<compile_context>
chip_gen: v6e
topology: v6e:2x2x1
jax: 0.10.0
libtpu: 0.0.40
codegen_flags: <defaults>
</compile_context>

<pallas_src>
import jax
import jax.numpy as jnp
from jax import lax
from jax.experimental import pallas as pl
from jax.experimental.pallas import tpu as pltpu


def _basic_block_kernel(x_ref, w1_ref, w2_ref, b1_ref, b2_ref, out_ref, pad_ref):
    """Fused BasicBlock2D forward for one batch element.

    x_ref  : [1, H, W, C]   unpadded NHWC input (f32)
    w1_ref : [9*C, C]       bf16 conv1 weights, BN1 scale folded, im2col layout
    w2_ref : [9*C, C]       bf16 conv2 weights, BN2 scale folded, im2col layout
    b1_ref : [1, C]  f32    folded BN1 bias
    b2_ref : [1, C]  f32    folded BN2 bias
    out_ref: [1, H, W, C]   output block
    pad_ref: [H+2, W+2, C]  bf16 VMEM scratch; the zero halo supplies padding=1 for
                            both convolutions (buffer reused between conv1 and conv2).
    """
    _, h, w, c = x_ref.shape

    # Zero only the 1-pixel halo (the interior is fully overwritten below).
    # Done unconditionally every grid step so it is safe under megacore sharding.
    zrow = jnp.zeros((1, w + 2, c), jnp.bfloat16)
    pad_ref[pl.ds(0, 1), :, :] = zrow
    pad_ref[pl.ds(h + 1, 1), :, :] = zrow
    zcol = jnp.zeros((h, 1, c), jnp.bfloat16)
    pad_ref[pl.ds(1, h), pl.ds(0, 1), :] = zcol
    pad_ref[pl.ds(1, h), pl.ds(w + 1, 1), :] = zcol

    def conv3x3(w_ref):
        # im2col: nine shifted [H, W, C] windows of the zero-bordered scratch are
        # concatenated once into a [H*W, 9*C] bf16 operand -> single MXU matmul
        # with f32 accumulation (K = 9*C fills the systolic depth).
        cols = []
        for k in range(9):
            ky, kx = divmod(k, 3)
            patch = pad_ref[pl.ds(ky, h), pl.ds(kx, w), :]      # [H, W, C] bf16
            cols.append(patch.reshape(h * w, c))
        patches = jnp.concatenate(cols, axis=1)                 # [H*W, 9*C] bf16
        return jnp.dot(patches, w_ref[...],
                       preferred_element_type=jnp.float32)      # [H*W, C]  f32

    x = x_ref[0]                                                # [H, W, C] f32

    # ---- conv1 (BN1 scale pre-folded) + bias + ReLU ----
    pad_ref[pl.ds(1, h), pl.ds(1, w), :] = x.astype(jnp.bfloat16)
    y1 = jnp.maximum(conv3x3(w1_ref) + b1_ref[...], 0.0)        # [H*W, C] f32

    # ---- conv2 (BN2 scale pre-folded) + bias ----
    # Reuse the same scratch: only the interior is overwritten, halo stays zero.
    pad_ref[pl.ds(1, h), pl.ds(1, w), :] = y1.reshape(h, w, c).astype(jnp.bfloat16)
    y2 = conv3x3(w2_ref) + b2_ref[...]                          # [H*W, C] f32

    # ---- identity residual (downsample is None) + ReLU ----
    out = jnp.maximum(y2 + x.reshape(h * w, c).astype(jnp.float32), 0.0)
    out_ref[0] = out.reshape(h, w, c).astype(out_ref.dtype)


class BasicBlock2D:
    """JAX/Pallas port of the PyTorch BasicBlock2D forward (inference mode)."""

    expansion = 1

    def __init__(self, inplanes, planes, stride=1, downsample=None, groups=1,
                 base_width=64, dilation=1, norm_layer=None, *,
                 eps=1e-5, key=None, dtype=jnp.float32):
        if groups != 1 or base_width != 64:
            raise ValueError('BasicBlock only supports groups=1 and base_width=64')
        if dilation > 1:
            raise NotImplementedError('Dilation > 1 not supported in BasicBlock')
        if stride != 1 or downsample is not None or inplanes != planes:
            # TODO(synk): stride>1 / downsample (1x1 conv + BN residual projection)
            # is not lowered; identity-residual configuration only.
            raise NotImplementedError(
                'Pallas BasicBlock2D implements stride=1, downsample=None only')

        self.inplanes, self.planes = inplanes, planes
        self.stride, self.eps, self.dtype = stride, eps, dtype

        if key is None:
            key = jax.random.PRNGKey(0)
        ks = jax.random.split(key, 10)
        w_std = (2.0 / (9 * inplanes)) ** 0.5
        # PyTorch Conv2d weight layout: [Cout, Cin, kH, kW]
        self.conv1_w = w_std * jax.random.normal(ks[0], (planes, inplanes, 3, 3), dtype)
        self.conv2_w = w_std * jax.random.normal(ks[1], (planes, planes, 3, 3), dtype)
        # BatchNorm2d parameters / running statistics (inference semantics).
        self.bn1_gamma = jax.random.uniform(ks[2], (planes,), dtype, 0.5, 1.5)
        self.bn1_beta = 0.1 * jax.random.normal(ks[3], (planes,), dtype)
        self.bn1_mean = 0.1 * jax.random.normal(ks[4], (planes,), dtype)
        self.bn1_var = jax.random.uniform(ks[5], (planes,), dtype, 0.5, 1.5)
        self.bn2_gamma = jax.random.uniform(ks[6], (planes,), dtype, 0.5, 1.5)
        self.bn2_beta = 0.1 * jax.random.normal(ks[7], (planes,), dtype)
        self.bn2_mean = 0.1 * jax.random.normal(ks[8], (planes,), dtype)
        self.bn2_var = jax.random.uniform(ks[9], (planes,), dtype, 0.5, 1.5)

        # ---- wrapper-side preprocessing (perf review) ----
        # Fold BN running stats: y = conv(x)*s + b with s = g/sqrt(var+eps),
        # b = beta - mean*s.  The per-channel scale is folded into the conv weights;
        # only the bias add stays in-kernel.  Weights are put in im2col layout
        # [9*Cin, Cout] and cast once to bf16 (native MXU operand dtype).
        s1 = self.bn1_gamma / jnp.sqrt(self.bn1_var + eps)
        s2 = self.bn2_gamma / jnp.sqrt(self.bn2_var + eps)
        self._b1 = (self.bn1_beta - self.bn1_mean * s1).reshape(1, planes).astype(jnp.float32)
        self._b2 = (self.bn2_beta - self.bn2_mean * s2).reshape(1, planes).astype(jnp.float32)

        def fold(conv_w, scale, cin):
            # [Cout, Cin, kH, kW] -> [kH, kW, Cin, Cout] -> [9*Cin, Cout], * BN scale
            w_t = jnp.transpose(conv_w, (2, 3, 1, 0)).reshape(9 * cin, planes)
            return (w_t * scale[None, :]).astype(jnp.bfloat16)

        self._w1_folded = fold(self.conv1_w, s1, inplanes)
        self._w2_folded = fold(self.conv2_w, s2, planes)

    def __call__(self, x):
        n, c, h, w = x.shape
        assert c == self.inplanes, (c, self.inplanes)
        cc = self.planes

        # NCHW -> NHWC so channels sit on the TPU lane axis.  No host-side padding:
        # the kernel stages each image into a zero-bordered VMEM scratch itself.
        x_nhwc = jnp.transpose(x, (0, 2, 3, 1))

        out_nhwc = pl.pallas_call(
            _basic_block_kernel,
            out_shape=jax.ShapeDtypeStruct((n, h, w, cc), x.dtype),
            grid_spec=pltpu.PrefetchScalarGridSpec(
                num_scalar_prefetch=0,
                grid=(n,),  # one image per step; parallel steps shard across cores
                in_specs=[
                    pl.BlockSpec((1, h, w, c), lambda i: (i, 0, 0, 0)),
                    pl.BlockSpec((9 * c, cc), lambda i: (0, 0)),
                    pl.BlockSpec((9 * cc, cc), lambda i: (0, 0)),
                    pl.BlockSpec((1, cc), lambda i: (0, 0)),
                    pl.BlockSpec((1, cc), lambda i: (0, 0)),
                ],
                out_specs=pl.BlockSpec((1, h, w, cc), lambda i: (i, 0, 0, 0)),
                scratch_shapes=[pltpu.VMEM((h + 2, w + 2, cc), jnp.bfloat16)],
            ),
            compiler_params=pltpu.CompilerParams(
                dimension_semantics=("parallel",),
            ),
        )(x_nhwc, self._w1_folded, self._w2_folded, self._b1, self._b2)

        return jnp.transpose(out_nhwc, (0, 3, 1, 2))  # back to NCHW


if __name__ == "__main__":
    key = jax.random.PRNGKey(0)
    k_x, k_blk = jax.random.split(key)

    # Channels = 128 so every store (scratch interior, output) is lane-dense.
    n, c, h, w = 2, 128, 16, 16
    x = jax.random.normal(k_x, (n, c, h, w), dtype=jnp.float32)

    block = BasicBlock2D(inplanes=c, planes=c, key=k_blk)
    out = jax.block_until_ready(block(x))
    assert out.shape == (n, c, h, w), out.shape

    def conv_nchw(xx, ww, precision=None):
        return lax.conv_general_dilated(
            xx, ww, window_strides=(1, 1), padding=((1, 1), (1, 1)),
            dimension_numbers=('NCHW', 'OIHW', 'NCHW'),
            precision=precision, preferred_element_type=jnp.float32)

    eps = block.eps
    s1 = block.bn1_gamma / jnp.sqrt(block.bn1_var + eps)
    b1 = block.bn1_beta - block.bn1_mean * s1
    s2 = block.bn2_gamma / jnp.sqrt(block.bn2_var + eps)
    b2 = block.bn2_beta - block.bn2_mean * s2

    # (1) Reference mirroring the kernel's arithmetic exactly (bf16 matmul operands,
    #     f32 accumulation, BN scale folded into weights); only accumulation order
    #     differs -> tight tolerance.
    w1e = (block.conv1_w * s1[:, None, None, None]).astype(jnp.bfloat16)
    w2e = (block.conv2_w * s2[:, None, None, None]).astype(jnp.bfloat16)
    r = jax.nn.relu(conv_nchw(x.astype(jnp.bfloat16), w1e) + b1[None, :, None, None])
    r = conv_nchw(r.astype(jnp.bfloat16), w2e) + b2[None, :, None, None]
    ref_bf16 = jax.nn.relu(r + x)
    err_bf16 = float(jnp.max(jnp.abs(out - ref_bf16)))
    assert err_bf16 < 5e-3, f"mismatch vs bf16-matched reference: max|diff|={err_bf16}"

    # (2) Full-f32 reference (PyTorch-equivalent semantics); looser tolerance since
    #     the kernel feeds the MXU bf16 operands (f32 accumulation).
    def bn(t, g, bt, m, v):
        sc = g / jnp.sqrt(v + eps)
        return t * sc[None, :, None, None] + (bt - m * sc)[None, :, None, None]

    r32 = jax.nn.relu(bn(conv_nchw(x, block.conv1_w, precision=lax.Precision.HIGHEST),
                         block.bn1_gamma, block.bn1_beta, block.bn1_mean, block.bn1_var))
    r32 = bn(conv_nchw(r32, block.conv2_w, precision=lax.Precision.HIGHEST),
             block.bn2_gamma, block.bn2_beta, block.bn2_mean, block.bn2_var)
    ref_f32 = jax.nn.relu(r32 + x)
    err_f32 = float(jnp.max(jnp.abs(out - ref_f32)))
    assert err_f32 < 1e-1, f"mismatch vs f32 reference: max|diff|={err_f32}"

    print("KERNEL_OK")
</pallas_src>

<mosaic_0001>
module attributes {stable_mosaic.version = 11 : i64} {
  func.func @_basic_block_kernel(%arg0: i32, %arg1: memref<1x16x16x128xf32, #tpu.memory_space<vmem>>, %arg2: memref<1152x128xbf16, #tpu.memory_space<vmem>>, %arg3: memref<1152x128xbf16, #tpu.memory_space<vmem>>, %arg4: memref<1x128xf32, #tpu.memory_space<vmem>>, %arg5: memref<1x128xf32, #tpu.memory_space<vmem>>, %arg6: memref<1x16x16x128xf32, #tpu.memory_space<vmem>>, %arg7: memref<18x18x128xbf16, #tpu.memory_space<vmem>>) attributes {dimension_semantics = [#tpu.dimension_semantics<parallel>], iteration_bounds = array<i64: 2>, scalar_prefetch = 0 : i64, scratch_operands = 1 : i64, tpu.core_type = #tpu.core_type<tc>, window_params = [{transform_indices = @transform_0, window_bounds = array<i64: 1, 16, 16, 128>}, {pipeline_mode = #tpu.pipeline_mode<synchronous>, transform_indices = @transform_1, window_bounds = array<i64: 1152, 128>}, {pipeline_mode = #tpu.pipeline_mode<synchronous>, transform_indices = @transform_2, window_bounds = array<i64: 1152, 128>}, {pipeline_mode = #tpu.pipeline_mode<synchronous>, transform_indices = @transform_3, window_bounds = array<i64: 1, 128>}, {pipeline_mode = #tpu.pipeline_mode<synchronous>, transform_indices = @transform_4, window_bounds = array<i64: 1, 128>}, {transform_indices = @transform_5, window_bounds = array<i64: 1, 16, 16, 128>}]} {
    %cst = arith.constant 0.000000e+00 : bf16
    %0 = vector.broadcast %cst : bf16 to vector<1x18x128xbf16>
    %c0 = arith.constant 0 : index
    %c0_0 = arith.constant 0 : index
    %c0_1 = arith.constant 0 : index
    %1 = vector.load %arg7[%c0, %c0_0, %c0_1] : memref<18x18x128xbf16, #tpu.memory_space<vmem>>, vector<1x18x128xbf16>
    tpu.vector_store %arg7[%c0, %c0_0, %c0_1], %0 {strides = array<i32>} : memref<18x18x128xbf16, #tpu.memory_space<vmem>>, vector<1x18x128xbf16>,
    %c17 = arith.constant 17 : index
    %c0_2 = arith.constant 0 : index
    %c0_3 = arith.constant 0 : index
    %2 = vector.load %arg7[%c17, %c0_2, %c0_3] : memref<18x18x128xbf16, #tpu.memory_space<vmem>>, vector<1x18x128xbf16>
    tpu.vector_store %arg7[%c17, %c0_2, %c0_3], %0 {strides = array<i32>} : memref<18x18x128xbf16, #tpu.memory_space<vmem>>, vector<1x18x128xbf16>,
    %cst_4 = arith.constant 0.000000e+00 : bf16
    %3 = vector.broadcast %cst_4 : bf16 to vector<16x1x128xbf16>
    %c1 = arith.constant 1 : index
    %c0_5 = arith.constant 0 : index
    %c0_6 = arith.constant 0 : index
    %4 = vector.load %arg7[%c1, %c0_5, %c0_6] : memref<18x18x128xbf16, #tpu.memory_space<vmem>>, vector<16x1x128xbf16>
    tpu.vector_store %arg7[%c1, %c0_5, %c0_6], %3 {strides = array<i32>} : memref<18x18x128xbf16, #tpu.memory_space<vmem>>, vector<16x1x128xbf16>,
    %c1_7 = arith.constant 1 : index
    %c17_8 = arith.constant 17 : index
    %c0_9 = arith.constant 0 : index
    %5 = vector.load %arg7[%c1_7, %c17_8, %c0_9] : memref<18x18x128xbf16, #tpu.memory_space<vmem>>, vector<16x1x128xbf16>
    tpu.vector_store %arg7[%c1_7, %c17_8, %c0_9], %3 {strides = array<i32>} : memref<18x18x128xbf16, #tpu.memory_space<vmem>>, vector<16x1x128xbf16>,
    %c0_10 = arith.constant 0 : index
    %c0_11 = arith.constant 0 : index
    %c0_12 = arith.constant 0 : index
    %c0_13 = arith.constant 0 : index
    %6 = vector.load %arg1[%c0_10, %c0_11, %c0_12, %c0_13] : memref<1x16x16x128xf32, #tpu.memory_space<vmem>>, vector<1x16x16x128xf32>
    %7 = vector.shape_cast %6 : vector<1x16x16x128xf32> to vector<16x16x128xf32>
    %8 = arith.truncf %7 : vector<16x16x128xf32> to vector<16x16x128xbf16>
    %c1_14 = arith.constant 1 : index
    %c1_15 = arith.constant 1 : index
    %c0_16 = arith.constant 0 : index
    %9 = vector.load %arg7[%c1_14, %c1_15, %c0_16] : memref<18x18x128xbf16, #tpu.memory_space<vmem>>, vector<16x16x128xbf16>
    tpu.vector_store %arg7[%c1_14, %c1_15, %c0_16], %8 {strides = array<i32>} : memref<18x18x128xbf16, #tpu.memory_space<vmem>>, vector<16x16x128xbf16>,
    %c0_17 = arith.constant 0 : index
    %c0_18 = arith.constant 0 : index
    %c0_19 = arith.constant 0 : index
    %10 = vector.load %arg7[%c0_17, %c0_18, %c0_19] : memref<18x18x128xbf16, #tpu.memory_space<vmem>>, vector<16x16x128xbf16>
    %11 = vector.shape_cast %10 : vector<16x16x128xbf16> to vector<256x128xbf16>
    %c0_20 = arith.constant 0 : index
    %c1_21 = arith.constant 1 : index
    %c0_22 = arith.constant 0 : index
    %12 = vector.load %arg7[%c0_20, %c1_21, %c0_22] : memref<18x18x128xbf16, #tpu.memory_space<vmem>>, vector<16x16x128xbf16>
    %13 = vector.shape_cast %12 : vector<16x16x128xbf16> to vector<256x128xbf16>
    %c0_23 = arith.constant 0 : index
    %c2 = arith.constant 2 : index
    %c0_24 = arith.constant 0 : index
    %14 = vector.load %arg7[%c0_23, %c2, %c0_24] : memref<18x18x128xbf16, #tpu.memory_space<vmem>>, vector<16x16x128xbf16>
    %15 = vector.shape_cast %14 : vector<16x16x128xbf16> to vector<256x128xbf16>
    %c1_25 = arith.constant 1 : index
    %c0_26 = arith.constant 0 : index
    %c0_27 = arith.constant 0 : index
    %16 = vector.load %arg7[%c1_25, %c0_26, %c0_27] : memref<18x18x128xbf16, #tpu.memory_space<vmem>>, vector<16x16x128xbf16>
    %17 = vector.shape_cast %16 : vector<16x16x128xbf16> to vector<256x128xbf16>
    %c1_28 = arith.constant 1 : index
    %c1_29 = arith.constant 1 : index
    %c0_30 = arith.constant 0 : index
    %18 = vector.load %arg7[%c1_28, %c1_29, %c0_30] : memref<18x18x128xbf16, #tpu.memory_space<vmem>>, vector<16x16x128xbf16>
    %19 = vector.shape_cast %18 : vector<16x16x128xbf16> to vector<256x128xbf16>
    %c1_31 = arith.constant 1 : index
    %c2_32 = arith.constant 2 : index
    %c0_33 = arith.constant 0 : index
    %20 = vector.load %arg7[%c1_31, %c2_32, %c0_33] : memref<18x18x128xbf16, #tpu.memory_space<vmem>>, vector<16x16x128xbf16>
    %21 = vector.shape_cast %20 : vector<16x16x128xbf16> to vector<256x128xbf16>
    %c2_34 = arith.constant 2 : index
    %c0_35 = arith.constant 0 : index
    %c0_36 = arith.constant 0 : index
    %22 = vector.load %arg7[%c2_34, %c0_35, %c0_36] : memref<18x18x128xbf16, #tpu.memory_space<vmem>>, vector<16x16x128xbf16>
    %23 = vector.shape_cast %22 : vector<16x16x128xbf16> to vector<256x128xbf16>
    %c2_37 = arith.constant 2 : index
    %c1_38 = arith.constant 1 : index
    %c0_39 = arith.constant 0 : index
    %24 = vector.load %arg7[%c2_37, %c1_38, %c0_39] : memref<18x18x128xbf16, #tpu.memory_space<vmem>>, vector<16x16x128xbf16>
    %25 = vector.shape_cast %24 : vector<16x16x128xbf16> to vector<256x128xbf16>
    %c2_40 = arith.constant 2 : index
    %c2_41 = arith.constant 2 : index
    %c0_42 = arith.constant 0 : index
    %26 = vector.load %arg7[%c2_40, %c2_41, %c0_42] : memref<18x18x128xbf16, #tpu.memory_space<vmem>>, vector<16x16x128xbf16>
    %27 = vector.shape_cast %26 : vector<16x16x128xbf16> to vector<256x128xbf16>
    %28 = tpu.concatenate %11, %13, %15, %17, %19, %21, %23, %25, %27 in 1 : vector<256x128xbf16>, vector<256x128xbf16>, vector<256x128xbf16>, vector<256x128xbf16>, vector<256x128xbf16>, vector<256x128xbf16>, vector<256x128xbf16>, vector<256x128xbf16>, vector<256x128xbf16> -> vector<256x1152xbf16>
    %c0_43 = arith.constant 0 : index
    %c0_44 = arith.constant 0 : index
    %29 = vector.load %arg2[%c0_43, %c0_44] : memref<1152x128xbf16, #tpu.memory_space<vmem>>, vector<1152x128xbf16>
    %cst_45 = arith.constant dense<0.000000e+00> : vector<256x128xf32>
    %30 = tpu.matmul %28, %29, %cst_45 {dimension_numbers = #tpu.dot_dimension_numbers<[1], [0], [0], [1], [0, 0, 1, 1], [], []>} : vector<256x1152xbf16>, vector<1152x128xbf16>, vector<256x128xf32> -> vector<256x128xf32>
    %c0_46 = arith.constant 0 : index
    %c0_47 = arith.constant 0 : index
    %31 = vector.load %arg4[%c0_46, %c0_47] : memref<1x128xf32, #tpu.memory_space<vmem>>, vector<1x128xf32>
    %32 = vector.broadcast %31 : vector<1x128xf32> to vector<256x128xf32>
    %33 = arith.addf %30, %32 : vector<256x128xf32>
    %cst_48 = arith.constant 0.000000e+00 : f32
    %34 = vector.broadcast %cst_48 : f32 to vector<256x128xf32>
    %35 = arith.maximumf %33, %34 : vector<256x128xf32>
    %36 = vector.shape_cast %35 : vector<256x128xf32> to vector<16x16x128xf32>
    %37 = arith.truncf %36 : vector<16x16x128xf32> to vector<16x16x128xbf16>
    %c1_49 = arith.constant 1 : index
    %c1_50 = arith.constant 1 : index
    %c0_51 = arith.constant 0 : index
    %38 = vector.load %arg7[%c1_49, %c1_50, %c0_51] : memref<18x18x128xbf16, #tpu.memory_space<vmem>>, vector<16x16x128xbf16>
    tpu.vector_store %arg7[%c1_49, %c1_50, %c0_51], %37 {strides = array<i32>} : memref<18x18x128xbf16, #tpu.memory_space<vmem>>, vector<16x16x128xbf16>,
    %c0_52 = arith.constant 0 : index
    %c0_53 = arith.constant 0 : index
    %c0_54 = arith.constant 0 : index
    %39 = vector.load %arg7[%c0_52, %c0_53, %c0_54] : memref<18x18x128xbf16, #tpu.memory_space<vmem>>, vector<16x16x128xbf16>
    %40 = vector.shape_cast %39 : vector<16x16x128xbf16> to vector<256x128xbf16>
    %c0_55 = arith.constant 0 : index
    %c1_56 = arith.constant 1 : index
    %c0_57 = arith.constant 0 : index
    %41 = vector.load %arg7[%c0_55, %c1_56, %c0_57] : memref<18x18x128xbf16, #tpu.memory_space<vmem>>, vector<16x16x128xbf16>
    %42 = vector.shape_cast %41 : vector<16x16x128xbf16> to vector<256x128xbf16>
    %c0_58 = arith.constant 0 : index
    %c2_59 = arith.constant 2 : index
    %c0_60 = arith.constant 0 : index
    %43 = vector.load %arg7[%c0_58, %c2_59, %c0_60] : memref<18x18x128xbf16, #tpu.memory_space<vmem>>, vector<16x16x128xbf16>
    %44 = vector.shape_cast %43 : vector<16x16x128xbf16> to vector<256x128xbf16>
    %c1_61 = arith.constant 1 : index
    %c0_62 = arith.constant 0 : index
    %c0_63 = arith.constant 0 : index
    %45 = vector.load %arg7[%c1_61, %c0_62, %c0_63] : memref<18x18x128xbf16, #tpu.memory_space<vmem>>, vector<16x16x128xbf16>
    %46 = vector.shape_cast %45 : vector<16x16x128xbf16> to vector<256x128xbf16>
    %c1_64 = arith.constant 1 : index
    %c1_65 = arith.constant 1 : index
    %c0_66 = arith.constant 0 : index
    %47 = vector.load %arg7[%c1_64, %c1_65, %c0_66] : memref<18x18x128xbf16, #tpu.memory_space<vmem>>, vector<16x16x128xbf16>
    %48 = vector.shape_cast %47 : vector<16x16x128xbf16> to vector<256x128xbf16>
    %c1_67 = arith.constant 1 : index
    %c2_68 = arith.constant 2 : index
    %c0_69 = arith.constant 0 : index
    %49 = vector.load %arg7[%c1_67, %c2_68, %c0_69] : memref<18x18x128xbf16, #tpu.memory_space<vmem>>, vector<16x16x128xbf16>
    %50 = vector.shape_cast %49 : vector<16x16x128xbf16> to vector<256x128xbf16>
    %c2_70 = arith.constant 2 : index
    %c0_71 = arith.constant 0 : index
    %c0_72 = arith.constant 0 : index
    %51 = vector.load %arg7[%c2_70, %c0_71, %c0_72] : memref<18x18x128xbf16, #tpu.memory_space<vmem>>, vector<16x16x128xbf16>
    %52 = vector.shape_cast %51 : vector<16x16x128xbf16> to vector<256x128xbf16>
    %c2_73 = arith.constant 2 : index
    %c1_74 = arith.constant 1 : index
    %c0_75 = arith.constant 0 : index
    %53 = vector.load %arg7[%c2_73, %c1_74, %c0_75] : memref<18x18x128xbf16, #tpu.memory_space<vmem>>, vector<16x16x128xbf16>
    %54 = vector.shape_cast %53 : vector<16x16x128xbf16> to vector<256x128xbf16>
    %c2_76 = arith.constant 2 : index
    %c2_77 = arith.constant 2 : index
    %c0_78 = arith.constant 0 : index
    %55 = vector.load %arg7[%c2_76, %c2_77, %c0_78] : memref<18x18x128xbf16, #tpu.memory_space<vmem>>, vector<16x16x128xbf16>
    %56 = vector.shape_cast %55 : vector<16x16x128xbf16> to vector<256x128xbf16>
    %57 = tpu.concatenate %40, %42, %44, %46, %48, %50, %52, %54, %56 in 1 : vector<256x128xbf16>, vector<256x128xbf16>, vector<256x128xbf16>, vector<256x128xbf16>, vector<256x128xbf16>, vector<256x128xbf16>, vector<256x128xbf16>, vector<256x128xbf16>, vector<256x128xbf16> -> vector<256x1152xbf16>
    %c0_79 = arith.constant 0 : index
    %c0_80 = arith.constant 0 : index
    %58 = vector.load %arg3[%c0_79, %c0_80] : memref<1152x128xbf16, #tpu.memory_space<vmem>>, vector<1152x128xbf16>
    %cst_81 = arith.constant dense<0.000000e+00> : vector<256x128xf32>
    %59 = tpu.matmul %57, %58, %cst_81 {dimension_numbers = #tpu.dot_dimension_numbers<[1], [0], [0], [1], [0, 0, 1, 1], [], []>} : vector<256x1152xbf16>, vector<1152x128xbf16>, vector<256x128xf32> -> vector<256x128xf32>
    %c0_82 = arith.constant 0 : index
    %c0_83 = arith.constant 0 : index
    %60 = vector.load %arg5[%c0_82, %c0_83] : memref<1x128xf32, #tpu.memory_space<vmem>>, vector<1x128xf32>
    %61 = vector.broadcast %60 : vector<1x128xf32> to vector<256x128xf32>
    %62 = arith.addf %59, %61 : vector<256x128xf32>
    %63 = vector.shape_cast %7 : vector<16x16x128xf32> to vector<256x128xf32>
    %64 = arith.addf %62, %63 : vector<256x128xf32>
    %cst_84 = arith.constant 0.000000e+00 : f32
    %65 = vector.broadcast %cst_84 : f32 to vector<256x128xf32>
    %66 = arith.maximumf %64, %65 : vector<256x128xf32>
    %67 = vector.shape_cast %66 : vector<256x128xf32> to vector<16x16x128xf32>
    %c0_85 = arith.constant 0 : index
    %c0_86 = arith.constant 0 : index
    %c0_87 = arith.constant 0 : index
    %c0_88 = arith.constant 0 : index
    %68 = vector.load %arg6[%c0_85, %c0_86, %c0_87, %c0_88] : memref<1x16x16x128xf32, #tpu.memory_space<vmem>>, vector<1x16x16x128xf32>
    %69 = vector.shape_cast %68 : vector<1x16x16x128xf32> to vector<16x16x128xf32>
    %70 = vector.shape_cast %67 : vector<16x16x128xf32> to vector<1x16x16x128xf32>
    tpu.vector_store %arg6[%c0_85, %c0_86, %c0_87, %c0_88], %70 {strides = array<i32>} : memref<1x16x16x128xf32, #tpu.memory_space<vmem>>, vector<1x16x16x128xf32>,
    return
  }
  func.func @transform_0(%arg0: i32) -> (i32, i32, i32, i32) {
    %c0_i32 = arith.constant 0 : i32
    %c0_i32_0 = arith.constant 0 : i32
    %c0_i32_1 = arith.constant 0 : i32
    %c0_i32_2 = arith.constant 0 : i32
    return %arg0, %c0_i32, %c0_i32_0, %c0_i32_1 : i32, i32, i32, i32
  }
  func.func @transform_1(%arg0: i32) -> (i32, i32) {
    %c0_i32 = arith.constant 0 : i32
    %c0_i32_0 = arith.constant 0 : i32
    %c0_i32_1 = arith.constant 0 : i32
    return %c0_i32, %c0_i32_0 : i32, i32
  }
  func.func @transform_2(%arg0: i32) -> (i32, i32) {
    %c0_i32 = arith.constant 0 : i32
    %c0_i32_0 = arith.constant 0 : i32
    %c0_i32_1 = arith.constant 0 : i32
    return %c0_i32, %c0_i32_0 : i32, i32
  }
  func.func @transform_3(%arg0: i32) -> (i32, i32) {
    %c0_i32 = arith.constant 0 : i32
    %c0_i32_0 = arith.constant 0 : i32
    %c0_i32_1 = arith.constant 0 : i32
    return %c0_i32, %c0_i32_0 : i32, i32
  }
  func.func @transform_4(%arg0: i32) -> (i32, i32) {
    %c0_i32 = arith.constant 0 : i32
    %c0_i32_0 = arith.constant 0 : i32
    %c0_i32_1 = arith.constant 0 : i32
    return %c0_i32, %c0_i32_0 : i32, i32
  }
  func.func @transform_5(%arg0: i32) -> (i32, i32, i32, i32) {
    %c0_i32 = arith.constant 0 : i32
    %c0_i32_0 = arith.constant 0 : i32
    %c0_i32_1 = arith.constant 0 : i32
    %c0_i32_2 = arith.constant 0 : i32
    return %arg0, %c0_i32, %c0_i32_0, %c0_i32_1 : i32, i32, i32, i32
  }
}

</mosaic_0001>

<bundles_post_ra>
// kernel: tpu_custom_call.1
= control target key start
LH: loop header
LB: loop body
LE: loop exit
PB: predicated region body
PF: predicated region fallthrough
CT: control target
= control target key end

     0   :  { %10 = vsyncpa [#allocation4], 0  ;;  %s16402_s0 = inlined_call_operand.hbm [shape: f32[2,16,16,128], index: 0, kind: input, shape index: {}]   ;;  %s16403_s1 = inlined_call_operand.hbm [shape: bf16[1152,128], index: 1, kind: input, shape index: {}]   ;;  %s16404_s2 = inlined_call_operand.hbm [shape: bf16[1152,128], index: 2, kind: input, shape index: {}]   ;;  %s16405_s3 = inlined_call_operand.vmem [shape: f32[1,128], index: 3, kind: input, shape index: {}]   ;;  %s16406_s4 = inlined_call_operand.vmem [shape: f32[1,128], index: 4, kind: input, shape index: {}]   ;;  %s16407_s5 = inlined_call_operand.hbm [shape: f32[2,16,16,128], index: 5, kind: output, shape index: {}]  }
   0x1   :  { %12 = vsyncpa [#allocation4 + $0x1], 0 }
   0x2   :  { %13 = vsyncpa [#allocation7], 0 }
   0x3   :  { %14 = vsyncpa [#allocation5], 0 }
   0x4   :  { %16 = vsyncpa [#allocation5 + $0x1], 0  ;;  %s11716_s18 = smov 0   ;;  %s11718_s19 = smov 0  }
   0x5   :  { %s11720_s20 = smov 0   ;;  %s11722_s21 = smov 0  }
   0x6 LB: > { %s11737_s22 = sadd.s32 4294967295, %s11673_s21   ;;  %s9386_s23 = sadd.s32 4294967294, %s11673_s21   ;;  %s11673_s21 = sphi %s11722_s21, %s16855_s21   ;;  %s11669_s20 = sphi %s11720_s20, %s16854_s20   ;;  %s11665_s19 = sphi %s11718_s19, %s16853_s19   ;;  %s11661_s18 = sphi %s11716_s18, %s16852_s18  }
   0x7   : > { %p42_p0 = scmp.ne.s32.totalorder %s11665_s19, %s11661_s18  ;;  %p16408_p1 = scmp.eq.s32.totalorder %s11737_s22, 0 }
   0x8   : > { %p156_p3 = scmp.eq.s32.totalorder %s9386_s23, 1  ;;  %p9387_p5 = scmp.ge.s32.totalorder %s11673_s21, 1 }
   0x9   : > { %p11746_p4 = por %p16408_p1, %p42_p0  ;;  %p163_p7 = scmp.lt.s32.totalorder %s11673_s21, 3 }
   0xa   : > { %p11751_p6 = por %p156_p3, %p42_p0  ;;  %s11675_s27 = smov [#allocation6]  }
   0xb   : > { %s16456_s24 = scalar_select %p11746_p4, 1, 0 }
   0xc   : > { %s16457_s25 = scalar_select %p11751_p6, 1, 0 }
   0xd   : > { %p11756_p8 = pnand %p9387_p5, %p163_p7  ;;  %s175_s28 = sshll.u32 %s11675_s27, 4  ;;  %s176_s28 = int_to_ptr.vmem [resolvable:$true] %s175_s28 }
   0xe   : > { %s11676_s30 = smov [#allocation8]   ;;  %s11536_s7 = scalar_lea.vmem %s176_s28, 9216 }
   0xf   : > { %s16458_s26 = scalar_select %p11756_p8, 1, 0 }
  0x10   : > { %p11116_p9 = pneg %p11756_p8  ;;  %s188_s6 = sshll.u32 %s11676_s30, 4  ;;  %s189_s6 = int_to_ptr.vmem [resolvable:$true] %s188_s6 }
  0x11   : > { %p11537_p13 = scmp.ne.s32.totalorder %s176_s28, %s11536_s7  ;;  %p11544_p5 = scmp.lt.s32.totalorder %s176_s28, %s176_s28 }
  0x12   : > { %p11765_p11 = pnand %p11116_p9, %p16408_p1  ;;  %p11545_p7 = scmp.lt.s32.totalorder %s11536_s7, %s11536_s7 }
  0x14   : > { %p11527_p12 = pneg %p11765_p11  ;;  %p11546_p10 = por %p11545_p7, %p11544_p5 }
  0x16   : > { %p11539_p0 = pnand %p11537_p13, %p11527_p12 }
  0x18   : > { %p11540_p3 = pneg %p11539_p0 }
  0x1a   : > { %p11547_p9 = pnand %p11546_p10, %p11540_p3 }
  0x1c   : > { %11550 = shalt.err (!%p11547_p9)
}
  0x1d   : > { %s11677_s8 = smov 64   ;;  %s11678_s9 = smov 4  }
  0x1e   : > { %11119 = dma.hbm_to_vmem [thread:$0]  (!%p11765_p11), %s16403_s1, 9216, %s176_s28, [#allocation7], %s11677_s8, %s11677_s8, %s11678_s9  }
  0x1f   : > { %s11562_s12 = scalar_lea.vmem %s189_s6, 9216  ;;  %p11570_p2 = scmp.lt.s32.totalorder %s189_s6, %s189_s6 }
  0x20   : > { %p11563_p1 = scmp.ne.s32.totalorder %s189_s6, %s11562_s12  ;;  %p11571_p6 = scmp.lt.s32.totalorder %s11562_s12, %s11562_s12 }
  0x22   : > { %p11565_p13 = pnand %p11563_p1, %p11527_p12  ;;  %p11572_p5 = por %p11571_p6, %p11570_p2 }
  0x24   : > { %p11566_p0 = pneg %p11565_p13 }
  0x26   : > { %p11573_p10 = pnand %p11572_p5, %p11566_p0 }
  0x28   : > { %11576 = shalt.err (!%p11573_p10)
}
  0x29   : > { %11122 = dma.hbm_to_vmem [thread:$0]  (!%p11765_p11), %s16404_s2, 9216, %s189_s6, [#allocation7], %s11677_s8, %s11677_s8, %s11678_s9  }
  0x2a   : > { %s11788_s15 = sadd.s32 1, %s11673_s21   ;;  %s29_s16 = sadd.s32 1, %s11669_s20 }
  0x2b   : > { %s26_s17 = ssub.s32 %s11673_s21, %s11788_s15  ;;  %p36_p1 = scmp.ne.s32.totalorder %s11669_s20, %s11665_s19 }
  0x2c   : > { %p27_p2 = scmp.eq.s32.totalorder %s26_s17, 0  ;;  %p37_p6 = scmp.eq.s32.totalorder %s11673_s21, 0 }
  0x2d   : > { %p16460_p12 = scmp.eq.s32.totalorder %s11737_s22, 1  ;;  %p11133_p7 = scmp.lt.s32.totalorder %s11673_s21, 2 }
  0x2e   : > { %s11804_s27 = scalar_select %p27_p2, %s11669_s20, %s29_s16  }
  0x2f   : > { %p11798_p3 = por %p16460_p12, %p36_p1  ;;  %p38_p9 = por %p37_p6, %p36_p1 }
  0x30   : > { %s208_s28 = sand.u32 1, %s11669_s20   ;;  %s9998_s30 = sshll.u32 %s11673_s21, 12 }
  0x31   : > { %s16461_s23 = scalar_select %p11798_p3, 1, 0 }
  0x32   : > { %s9391_s29 = sshll.u32 %s208_s28, 8  ;;  %s11811_s8 = scalar_lea.hbm %s16402_s0, %s9998_s30 }
  0x33   : > { %s212_s9 = scalar_lea.vmem [#allocation3], %s9391_s29  ;;  %p11815_p11 = pnand %p11133_p7, %p38_p9 }
  0x34   : > { %s219_s10 = sshll.u32 %s212_s9, 4  ;;  %s11819_s12 = scalar_lea.sflag [#allocation4], %s208_s28  ;;  %s11813_s10 = int_to_ptr.vmem [resolvable:$true] %s219_s10 }
  0x35   : > { %s11577_s13 = scalar_lea.hbm %s11811_s8, 4096  ;;  %p11579_p0 = pneg %p11815_p11 }
  0x36   : > { %p11578_p13 = scmp.ne.s32.totalorder %s11811_s8, %s11577_s13  ;;  %s11582_s17 = scalar_lea.hbm %s16402_s0, 8192 }
  0x37   : > { %p11583_p1 = scmp.lt.s32.totalorder %s11811_s8, %s16402_s0  ;;  %p11584_p2 = scmp.lt.s32.totalorder %s11582_s17, %s11577_s13 }
  0x38   : > { %p11580_p5 = pnand %p11579_p0, %p11578_p13 }
  0x39   : > { %p11585_p6 = por %p11584_p2, %p11583_p1 }
  0x3a   : > { %p11581_p10 = pneg %p11580_p5 }
  0x3c   : > { %p11586_p12 = pnand %p11585_p6, %p11581_p10 }
  0x3e   : > { %11589 = shalt.err (!%p11586_p12)
}
  0x3f   : > { %s11590_s28 = scalar_lea.vmem %s11813_s10, 4096  ;;  %s11679_s6 = smov [#allocation3]  }
  0x40   : > { %p11591_p7 = scmp.ne.s32.totalorder %s11813_s10, %s11590_s28  ;;  %s11595_s7 = sshll.u32 %s11679_s6, 4  ;;  %s11596_s7 = int_to_ptr.vmem [resolvable:$false] %s11595_s7 }
  0x41   : > { %s11597_s9 = scalar_lea.vmem %s11596_s7, 8192  ;;  %p11598_p5 = scmp.lt.s32.totalorder %s11813_s10, %s11596_s7 }
  0x42   : > { %p11593_p9 = pnand %p11591_p7, %p11579_p0  ;;  %p11599_p3 = scmp.lt.s32.totalorder %s11597_s9, %s11590_s28 }
  0x44   : > { %p11594_p13 = pneg %p11593_p9  ;;  %p11600_p4 = por %p11599_p3, %p11598_p5 }
  0x46   : > { %p11601_p8 = pnand %p11600_p4, %p11594_p13 }
  0x48   : > { %11604 = shalt.err (!%p11601_p8)
}
  0x49   : > { %s11680_s13 = smov 128   ;;  %s11681_s14 = smov 8  }
  0x4a   : > { %11126 = dma.hbm_to_vmem [thread:$0]  (!%p11815_p11), %s11811_s8, 4096, %s11813_s10, %s11819_s12, %s11680_s13, %s11680_s13, %s11681_s14  }
  0x4b   : > { %p16463_p0 = scmp.ne.s32.totalorder %s16458_s26, 0 }
  0x4d   : > { %231 = sbr.rel (%p16463_p0) target bundleno = 1328 (0x530), region = 40 }
  0x52   : > { %s11843_s16 = sand.u32 1, %s11665_s19   ;;  %p16464_p4 = scmp.ne.s32.totalorder %s16456_s24, 0 }
  0x53   : > { %s9395_s17 = sshll.u32 %s11843_s16, 8  ;;  %s234_s29 = scalar_lea.sflag [#allocation4], %s11843_s16 }
  0x54   : > { %s11849_s30 = scalar_lea.vmem [#allocation3], %s9395_s17 }
  0x55   : > { %11648 = dma.done.wait (%p16464_p4), %s234_s29, 4096  }
  0x56   : > { %11650 = vsyncadd (%p16464_p4), %s234_s29, 4294963200  ;;  %p16465_p8 = scmp.eq.s32.totalorder %s11737_s22, 0 }
  0x58   : > { %11652 = dma.done.wait (%p16465_p8), [#allocation7], 18432   ;;  %p16466_p3 = pmov %p16465_p8 }
  0x59   : > { %v11682_v0 = vmov 0   ;;  %v11178_v1 = vld [vmem:[#allocation6 + $0x78] sm:$0xff]   ;;  %v11182_v5 = vld [vmem:[#allocation6 + $0x70] sm:$0xff]   ;;  %v11186_v9 = vld [vmem:[#allocation6 + $0x68] sm:$0xff]   ;;  %vm282_vm0 = vsmask.f32 256 }
  0x5a   : > { %11654 = vsyncadd (%p16466_p3), [#allocation7], 4294948864  ;;  %273 = vst [vmem:[#allocation2] sm:$0xf] %v11682_v0  ;;  %v11179_v2 = vld [vmem:[#allocation6 + $0x38] sm:$0xff]   ;;  %10064 = vmatprep.subr.bf16.mxu0 %v11178_v1  ;;  %v11183_v6 = vld [vmem:[#allocation6 + $0x30] sm:$0xff]  }
  0x5b   : > { %274 = vst [vmem:[#allocation2 + $0x4] sm:$0xf] %v11682_v0  ;;  %275 = vst [vmem:[#allocation2 + $0x8] sm:$0x1] %v11682_v0  ;;  %v11180_v3 = vld [vmem:[#allocation6 + $0xf8] sm:$0xff]   ;;  %10065 = vmatpush3.bf16.msra.mxu0 %v11179_v2  ;;  %v11184_v7 = vld [vmem:[#allocation6 + $0xf0] sm:$0xff]  }
  0x5c   : > { %277 = vst [vmem:[#allocation2 + $0xcc] sm:$0xf] %v11682_v0  ;;  %278 = vst [vmem:[#allocation2 + $0xd0] sm:$0xf] %v11682_v0  ;;  %v11181_v4 = vld [vmem:[#allocation6 + $0xb8] sm:$0xff]   ;;  %10176 = vmatprep.subr.bf16.mxu1 %v11180_v3  ;;  %10066 = vmatprep.subr.bf16.mxu0 %v11182_v5  ;;  %v11185_v8 = vld [vmem:[#allocation6 + $0xb0] sm:$0xff]  }
  0x5d   : > { %279 = vst [vmem:[#allocation2 + $0xd4] sm:$0x1] %v11682_v0  ;;  %10177 = vmatpush3.bf16.msra.mxu1 %v11181_v4  ;;  %v11187_v10 = vld [vmem:[#allocation6 + $0x28] sm:$0xff]   ;;  %v11190_v13 = vld [vmem:[#allocation6 + $0x60] sm:$0xff]   ;;  %v11194_v17 = vld [vmem:[#allocation6 + $0x58] sm:$0xff]   ;;  %vm281_vm4 = vcmask 1040384  }
  0x5e   : > { %10178 = vmatprep.subr.bf16.mxu1 %v11184_v7  ;;  %v11188_v11 = vld [vmem:[#allocation6 + $0xe8] sm:$0xff]   ;;  %v11191_v14 = vld [vmem:[#allocation6 + $0x20] sm:$0xff]   ;;  %v11195_v18 = vld [vmem:[#allocation6 + $0x18] sm:$0xff]   ;;  %vm994_vm1 = vsmask.f32 3328  ;;  %vm832_vm6 = vcmask 1043456  }
  0x5f   : > { %10067 = vmatpush3.bf16.msra.mxu0 %v11183_v6  ;;  %v11189_v12 = vld [vmem:[#allocation6 + $0xa8] sm:$0xff]   ;;  %v11192_v15 = vld [vmem:[#allocation6 + $0xe0] sm:$0xff]   ;;  %v11196_v19 = vld [vmem:[#allocation6 + $0xd8] sm:$0xff]   ;;  %vm995_vm2 = vsmask.f32 7440  ;;  %vm1445_vm7 = vcmask 1042432  }
  0x60   : > { %10068 = vmatprep.subr.bf16.mxu0 %v11186_v9  ;;  %v11193_v16 = vld [vmem:[#allocation6 + $0xa0] sm:$0xff]   ;;  %v11197_v20 = vld [vmem:[#allocation6 + $0x98] sm:$0xff]   ;;  %v11198_v21 = vld [vmem:[#allocation6 + $0x50] sm:$0xff]   ;;  %vm332_vm3 = vsmask.f32 7938  ;;  %v16467_v39 = vmov 0 }
  0x61   : > { %10179 = vmatpush3.bf16.msra.mxu1 %v11185_v8  ;;  %v11199_v22 = vld [vmem:[#allocation6 + $0x10] sm:$0xff]   ;;  %v11202_v25 = vld [vmem:[#allocation6 + $0x48] sm:$0xff]   ;;  %v11206_v29 = vld [vmem:[#allocation6 + $0x40] sm:$0xff]   ;;  %vm510_vm5 = vsmask.f32 4368  ;;  %vm1446_vm9 = vcmask 1046532  }
  0x62   : > { %10180 = vmatprep.subr.bf16.mxu1 %v11188_v11  ;;  %v11200_v23 = vld [vmem:[#allocation6 + $0xd0] sm:$0xff]   ;;  %v11203_v26 = vld [vmem:[#allocation6 + $0x8] sm:$0xff]   ;;  %v11207_v30 = vld [vmem:[#allocation6] sm:$0xff]   ;;  %v16470_v43 = vmov 0  ;;  %v16473_v61 = vmov 0  ;;  %v16476_v3 = vmov 0 }
  0x63   : > { %10069 = vmatpush3.bf16.msra.mxu0 %v11187_v10  ;;  %v11201_v24 = vld [vmem:[#allocation6 + $0x90] sm:$0xff]   ;;  %v11204_v27 = vld [vmem:[#allocation6 + $0xc8] sm:$0xff]   ;;  %v11208_v31 = vld [vmem:[#allocation6 + $0xc0] sm:$0xff]   ;;  %v16479_v5 = vmov 0  ;;  %s16191_s28 = scalar_lea.vmem [#allocation9], %s9395_s17  ;;  %s10063_s6 = sshll.u32 %s11737_s22, 12 }
  0x64   : > { %10070 = vmatprep.subr.bf16.mxu0 %v11190_v13  ;;  %v11205_v28 = vld [vmem:[#allocation6 + $0x88] sm:$0xff]   ;;  %v11863_v34 = vld [vmem:[#allocation2 + $0x8] sm:$0x1]  ;;  %vm11871_vm8 = vmand %vm281_vm4, %vm282_vm0  ;;  %s9294_s7 = sshll.u32 %s16191_s28, 4  ;;  %s16355_s14 = scalar_lea.hbm %s16407_s5, %s10063_s6  ;;  %s16357_s7 = int_to_ptr.vmem [resolvable:$true] %s9294_s7 }
  0x65   : > { %10181 = vmatpush3.bf16.msra.mxu1 %v11189_v12  ;;  %v11859_v32 = vld [vmem:[#allocation2] sm:$0xf]  ;;  %v11861_v33 = vld [vmem:[#allocation2 + $0x4] sm:$0xf]  ;;  %v16468_v39 = vsel %vm11871_vm8, 4294967295, %v16467_v39  ;;  %v1017_v40 = vshll.u32 %v11863_v34, 16  ;;  %vm11878_vm10 = vmor %vm994_vm1, %vm995_vm2 }
  0x66   : > { %10182 = vmatprep.subr.bf16.mxu1 %v11192_v15  ;;  %v998_v35 = vshrl.u32 %v11859_v32, 16  ;;  %v1001_v36 = vshll.u32 %v11859_v32, 16  ;;  %v1007_v37 = vshll.u32 %v11861_v33, 16  ;;  %v1011_v38 = vshrl.u32 %v11861_v33, 16  ;;  %16469 = vst [vmem:[#allocation13_spill] sm:$0xff] %v16468_v39  ;;  %v11209_v41 = vld [vmem:[#allocation6 + $0x80] sm:$0xff]   ;;  %vm11892_vm11 = vmand %vm281_vm4, %vm332_vm3 }
  0x67   : > { %10071 = vmatpush3.bf16.msra.mxu0 %v11191_v14  ;;  %v11211_v42 = vld [vmem:[#allocation6 + $0x178] sm:$0xff]   ;;  %v16471_v43 = vsel %vm11878_vm10, 4294967295, %v16470_v43  ;;  %v1019_v48 = vrot.slane %v1017_v40, 5  ;;  %v284_v49 = vld [vmem:[#allocation2 + $0xc] sm:$0x1]  ;;  %v382_v50 = vld [vmem:[%s11849_s30] sm:$0xff]  ;;  %v9479_v57 = vcombine.low %v11859_v32, %v11861_v33 }
  0x68   : > { %10072 = vmatprep.subr.bf16.mxu0 %v11194_v17  ;;  %16472 = vst [vmem:[#allocation14_spill] sm:$0xff] %v16471_v43  ;;  %v1000_v44 = vrot.slane %v998_v35, 4  ;;  %v1003_v45 = vrot.slane %v1001_v36, 5  ;;  %v1009_v46 = vrot.slane %v1007_v37, 5  ;;  %v1013_v47 = vrot.slane %v1011_v38, 4  ;;  %v383_v54 = vld [vmem:[%s11849_s30 + $0x8] sm:$0xff]  ;;  %vm11898_vm12 = vmor %vm1445_vm7, %vm1446_vm9 }
  0x69   : > { %10183 = vmatpush3.bf16.msra.mxu1 %v11193_v16  ;;  %v285_v53 = vsel %vm11871_vm8, 0, %v284_v49  ;;  %v9999_v55 = vpack.c.bf16 %v382_v50, %v382_v50  ;;  %v1453_v56 = vrot.slane %v11863_v34, 5  ;;  %v10000_v58 = vpack.c.bf16 %v383_v54, %v383_v54  ;;  %v1381_v59 = vld [vmem:[#allocation2] sm:$0xe]  ;;  %v334_v62 = vld [vmem:[#allocation2 + $0x14] sm:$0x1]  ;;  %vm11904_vm13 = vmor %vm282_vm0, %vm510_vm5 }
  0x6a   : > { %10184 = vmatprep.subr.bf16.mxu1 %v11196_v19  ;;  %v1004_v51 = vor.u32 %v1003_v45, %v1000_v44  ;;  %v1014_v52 = vor.u32 %v1013_v47, %v1009_v46  ;;  %286 = vst [vmem:[#allocation2 + $0xc] sm:$0x1] %v285_v53  ;;  %v1450_v60 = vrot.slane %v11861_v33, 5  ;;  %v16474_v61 = vsel %vm11892_vm11, 4294967295, %v16473_v61  ;;  %v287_v4 = vld [vmem:[#allocation2 + $0x18] sm:$0x1]  ;;  %vm11916_vm14 = vmand %vm832_vm6, %vm332_vm3 }
  0x6b   : > { %10073 = vmatpush3.bf16.msra.mxu0 %v11195_v18  ;;  %16475 = vst [vmem:[#allocation15_spill] sm:$0xff] %v16474_v61  ;;  %v513_v1 = vshrl.u32 %v9999_v55, 16  ;;  %v516_v2 = vshll.u32 %v9999_v55, 16  ;;  %v16477_v3 = vsel %vm11898_vm12, 4294967295, %v16476_v3  ;;  %v16480_v5 = vsel %vm11904_vm13, 4294967295, %v16479_v5  ;;  %v11213_v8 = vld [vmem:[#allocation6 + $0x138] sm:$0xff]  }
  0x6c   : > { %10074 = vmatprep.subr.bf16.mxu0 %v11198_v21  ;;  %v1005_v63 = vrot.slane %v1004_v51, 4  ;;  %v1015_v0 = vrot.slane %v1014_v52, 4  ;;  %16478 = vst [vmem:[#allocation16_spill] sm:$0xff] %v16477_v3  ;;  %16481 = vst [vmem:[#allocation17_spill] sm:$0xff] %v16480_v5  ;;  %v521_v6 = vshrl.u32 %v10000_v58, 16  ;;  %v524_v7 = vshll.u32 %v10000_v58, 16 }
  0x6d   : > { %10185 = vmatpush3.bf16.msra.mxu1 %v11197_v20  ;;  %v9431_v9 = vrot.slane %v1381_v59, 9  ;;  %v1452_v10 = vrot.slane %v1450_v60, 4  ;;  %v384_v11 = vld [vmem:[%s11849_s30 + $0x10] sm:$0xff]  ;;  %v385_v12 = vld [vmem:[%s11849_s30 + $0x18] sm:$0xff]  ;;  %v515_v15 = vrot.slane %v513_v1, 7  ;;  %v16482_v16 = vmov 0 }
  0x6e   : > { %10186 = vmatprep.subr.bf16.mxu1 %v11200_v23  ;;  %v1010_v13 = vsel %vm11878_vm10, %v1005_v63, %v1009_v46  ;;  %v1020_v14 = vsel %vm11878_vm10, %v1015_v0, %v1019_v48  ;;  %v16483_v16 = vsel %vm11916_vm14, 4294967295, %v16482_v16  ;;  %v335_v17 = vsel %vm11892_vm11, 0, %v334_v62  ;;  %v337_v18 = vld [vmem:[#allocation2 + $0x20] sm:$0x1]  ;;  %v290_v23 = vld [vmem:[#allocation2 + $0x24] sm:$0x1] }
  0x6f   : > { %10075 = vmatpush3.bf16.msra.mxu0 %v11199_v22  ;;  %16484 = vst [vmem:[#allocation18_spill] sm:$0xff] %v16483_v16  ;;  %v9495_v19 = vcombine.low %v1010_v13, %v1020_v14  ;;  %v523_v20 = vrot.slane %v521_v6, 7  ;;  %v11924_v21 = vsel %vm11898_vm12, %v9431_v9, %v1450_v60  ;;  %336 = vst [vmem:[#allocation2 + $0x14] sm:$0x1] %v335_v17  ;;  %v11217_v22 = vld [vmem:[#allocation6 + $0x170] sm:$0xff]   ;;  %v338_v35 = vsel %vm11892_vm11, 0, %v337_v18 }
  0x70   : > { %10076 = vmatprep.subr.bf16.mxu0 %v11202_v25  ;;  %v519_v25 = vrot.slane %v515_v15, 4  ;;  %v10001_v32 = vpack.c.bf16 %v384_v11, %v384_v11  ;;  %v10002_v33 = vpack.c.bf16 %v385_v12, %v385_v12  ;;  %v291_v36 = vsel %vm11871_vm8, 0, %v290_v23  ;;  %v340_v40 = vld [vmem:[#allocation2 + $0x2c] sm:$0x1]  ;;  %339 = vst [vmem:[#allocation2 + $0x20] sm:$0x1] %v338_v35 }
  0x71   : > { %10187 = vmatpush3.bf16.msra.mxu1 %v11201_v24  ;;  %v518_v24 = vor.u32 %v516_v2, %v515_v15  ;;  %4016 = vmatprep.mubr.bf16.mxu0 %v9495_v19  ;;  %v834_v34 = vld [vmem:[#allocation2 + $0xc] sm:$0xf]  ;;  %292 = vst [vmem:[#allocation2 + $0x24] sm:$0x1] %v291_v36  ;;  %v293_v47 = vld [vmem:[#allocation2 + $0x30] sm:$0x1] }
  0x72   : > { %10188 = vmatprep.subr.bf16.mxu1 %v11204_v27  ;;  %v288_v27 = vsel %vm11871_vm8, 0, %v287_v4  ;;  %v530_v44 = vshrl.u32 %v10001_v32, 16  ;;  %v533_v45 = vshll.u32 %v10001_v32, 16  ;;  %v11219_v46 = vld [vmem:[#allocation6 + $0x130] sm:$0xff]   ;;  %v538_v49 = vshrl.u32 %v10002_v33, 16  ;;  %v11223_v63 = vld [vmem:[#allocation6 + $0x168] sm:$0xff]  }
  0x73   : > { %10077 = vmatpush3.bf16.msra.mxu0 %v11203_v26  ;;  %v11928_v26 = vsel %vm11898_vm12, %v1452_v10, %v1453_v56  ;;  %289 = vst [vmem:[#allocation2 + $0x18] sm:$0x1] %v288_v27  ;;  %v388_v48 = vld [vmem:[%s11849_s30 + $0x30] sm:$0xff]  ;;  %v541_v50 = vshll.u32 %v10002_v33, 16  ;;  %v341_v56 = vsel %vm11892_vm11, 0, %v340_v40  ;;  %v294_v60 = vsel %vm11871_vm8, 0, %v293_v47 }
  0x74   : > { %10078 = vmatprep.subr.bf16.mxu0 %v11206_v29  ;;  %v387_v29 = vld [vmem:[%s11849_s30 + $0x28] sm:$0xff]  ;;  %v532_v53 = vrot.slane %v530_v44, 7  ;;  %v540_v58 = vrot.slane %v538_v49, 7  ;;  %342 = vst [vmem:[#allocation2 + $0x2c] sm:$0x1] %v341_v56  ;;  %v11947_v62 = vpack.c.bf16 %v388_v48, %v388_v48  ;;  %v389_v6 = vld [vmem:[%s11849_s30 + $0x38] sm:$0xff]  ;;  %v9511_v13 = vcombine.low %v11924_v21, %v11928_v26 }
  0x75   : > { %10189 = vmatpush3.bf16.msra.mxu1 %v11205_v28  ;;  %v386_v28 = vld [vmem:[%s11849_s30 + $0x20] sm:$0xff]  ;;  %v10004_v38 = vpack.c.bf16 %v387_v29, %v387_v29  ;;  %295 = vst [vmem:[#allocation2 + $0x30] sm:$0x1] %v294_v60  ;;  %v11225_v18 = vld [vmem:[#allocation6 + $0x128] sm:$0xff]   ;;  %v11963_v23 = vpack.c.bf16 %v389_v6, %v389_v6  ;;  %s9281_s17 = scalar_lea.sflag [#allocation5], %s11843_s16  ;;  %s11605_s22 = scalar_lea.vmem %s16357_s7, 4096 }
  0x76   : > { %10190 = vmatprep.subr.bf16.mxu1 %v11208_v31  ;;  %v528_v31 = vrot.slane %v523_v20, 4  ;;  %v10003_v37 = vpack.c.bf16 %v386_v28, %v386_v28  ;;  %v535_v1 = vor.u32 %v533_v45, %v532_v53  ;;  %v536_v2 = vrot.slane %v532_v53, 4  ;;  %p11606_p11 = scmp.ne.s32.totalorder %s16357_s7, %s11605_s22  ;;  %p16849_p10 = scmp.ne.s32.totalorder %s16461_s23, 0 }
  0x77   : > { %10079 = vmatpush3.bf16.msra.mxu0 %v11207_v30  ;;  %v526_v30 = vor.u32 %v524_v7, %v523_v20  ;;  %v555_v54 = vshrl.u32 %v10004_v38, 16  ;;  %v558_v55 = vshll.u32 %v10004_v38, 16  ;;  %v390_v7 = vld [vmem:[%s11849_s30 + $0x40] sm:$0xff]  ;;  %v545_v9 = vrot.slane %v540_v58, 4  ;;  %v845_v20 = vld [vmem:[#allocation2 + $0x20] sm:$0x1] }
  0x78   : > { %10288 = vmatprep.subr.bf16.mxu0 %v11211_v42  ;;  %v835_v42 = vsel %vm11916_vm14, %v518_v24, %v834_v34  ;;  %v547_v51 = vshrl.u32 %v10003_v37, 16  ;;  %v550_v52 = vshll.u32 %v10003_v37, 16  ;;  %v564_v24 = vshrl.u32 %v11947_v62, 16  ;;  %p11607_p1 = pnand %p11606_p11, %p16849_p10  ;;  %s11683_s29 = smov [#allocation9]  }
  0x79   : > { %10191 = vmatpush3.bf16.msra.mxu1 %v11209_v41  ;;  %v527_v41 = vsel %vm11904_vm13, %v519_v25, %v526_v30  ;;  %836 = vst [vmem:[#allocation2 + $0xc] sm:$0xf] %v835_v42  ;;  %v11951_v4 = vrot.slane %v555_v54, 7  ;;  %v567_v21 = vshll.u32 %v11947_v62, 16  ;;  %v846_v28 = vsel %vm11871_vm8, %v545_v9, %v845_v20  ;;  %v391_v42 = vld [vmem:[%s11849_s30 + $0x48] sm:$0xff] }
  0x7a   : > { %4017 = vmatmul.mubr.bf16.vlgmr.msra.gmra.mxu0 %v9479_v57  ;;  %837 = vst [vmem:[#allocation2 + $0x10] sm:$0xf] %v527_v41  ;;  %v838_v57 = vld [vmem:[#allocation2 + $0x14] sm:$0x1]  ;;  %v549_v59 = vrot.slane %v547_v51, 7  ;;  %p11608_p2 = pneg %p11607_p1 }
  0x7b   : > { %10289 = vmatpush3.bf16.msra.mxu0 %v11213_v8  ;;  %v839_v0 = vsel %vm11871_vm8, %v528_v31, %v838_v57  ;;  %v543_v8 = vor.u32 %v541_v50, %v540_v58  ;;  %v841_v10 = vld [vmem:[#allocation2 + $0x18] sm:$0xf]  ;;  %v560_v15 = vor.u32 %v558_v55, %v11951_v4  ;;  %v562_v17 = vrot.slane %v11951_v4, 4  ;;  %847 = vst [vmem:[#allocation2 + $0x20] sm:$0x1] %v846_v28 }
  0x7c   : > { %10290 = vmatprep.subr.bf16.mxu0 %v11217_v22  ;;  %840 = vst [vmem:[#allocation2 + $0x14] sm:$0x1] %v839_v0  ;;  %v552_v11 = vor.u32 %v550_v52, %v549_v59  ;;  %v553_v12 = vrot.slane %v549_v59, 4  ;;  %v842_v14 = vsel %vm11916_vm14, %v535_v1, %v841_v10  ;;  %v848_v22 = vld [vmem:[#allocation2 + $0x24] sm:$0xf]  ;;  %v11975_v31 = vpack.c.bf16 %v390_v7, %v390_v7  ;;  %v11229_v1 = vld [vmem:[#allocation6 + $0x160] sm:$0xff]  }
  0x7d   : > { %v544_v19 = vsel %vm11904_vm13, %v536_v2, %v543_v8  ;;  %843 = vst [vmem:[#allocation2 + $0x18] sm:$0xf] %v842_v14  ;;  %v11987_v57 = vpack.c.bf16 %v391_v42, %v391_v42 }
  0x7e   : > { %844 = vst [vmem:[#allocation2 + $0x1c] sm:$0xf] %v544_v19  ;;  %v561_v29 = vsel %vm11904_vm13, %v553_v12, %v560_v15  ;;  %v849_v30 = vsel %vm11916_vm14, %v552_v11, %v848_v22 }
  0x7f   : > { %10291 = vmatpush3.bf16.msra.mxu0 %v11219_v46  ;;  %850 = vst [vmem:[#allocation2 + $0x24] sm:$0xf] %v849_v30  ;;  %851 = vst [vmem:[#allocation2 + $0x28] sm:$0xf] %v561_v29 }
  0x80   : > { %10292 = vmatprep.subr.bf16.mxu0 %v11223_v63  ;;  %v1560_v25 = vld [vmem:[#allocation2 + $0xc] sm:$0xf] }
  0x81   : > { %v1561_v26 = vld [vmem:[#allocation2 + $0x10] sm:$0xf]  ;;  %v11967_v27 = vld [vmem:[#allocation2 + $0xc] sm:$0xf]  ;;  %v1609_v32 = vshrl.u32 %v1560_v25, 16  ;;  %v1612_v33 = vshll.u32 %v1560_v25, 16 }
  0x82   : > { %v1618_v34 = vshll.u32 %v1561_v26, 16  ;;  %v1622_v35 = vshrl.u32 %v1561_v26, 16  ;;  %v11977_v36 = vld [vmem:[#allocation2 + $0x10] sm:$0xf]  ;;  %v9527_v37 = vcombine.low %v1560_v25, %v1561_v26  ;;  %v1022_v38 = vshrl.u32 %v11967_v27, 16 }
  0x83   : > { %10293 = vmatpush3.bf16.msra.mxu0 %v11225_v18  ;;  %v1025_v40 = vshll.u32 %v11967_v27, 16  ;;  %v1031_v41 = vshll.u32 %v11977_v36, 16  ;;  %v1611_v44 = vrot.slane %v1609_v32, 4  ;;  %v1614_v45 = vrot.slane %v1612_v33, 5  ;;  %v1382_v48 = vld [vmem:[#allocation2 + $0xc] sm:$0xe] }
  0x84   : > { %v11983_v46 = vrot.slane %v1618_v34, 5  ;;  %v1624_v47 = vrot.slane %v1622_v35, 4  ;;  %4177 = vmatprep.mubr.bf16.mxu1 %v9527_v37  ;;  %v979_v49 = vld [vmem:[#allocation2 + $0x14] sm:$0x1]  ;;  %v1024_v50 = vrot.slane %v1022_v38, 4  ;;  %v1035_v53 = vshrl.u32 %v11977_v36, 16  ;;  %10294 = vmatprep.subr.bf16.mxu0 %v11229_v1 }
  0x85   : > { %v1027_v51 = vrot.slane %v1025_v40, 5  ;;  %v1033_v52 = vrot.slane %v1031_v41, 5  ;;  %v1615_v54 = vor.u32 %v1614_v45, %v1611_v44  ;;  %4178 = vmatmul.mubr.bf16.vlgmr.msra.gmra.mxu1 %v9511_v13  ;;  %v1041_v56 = vshll.u32 %v979_v49, 16  ;;  %v11989_v60 = vld [vmem:[#allocation2 + $0x18] sm:$0xf] }
  0x86   : > { %v1625_v55 = vor.u32 %v1624_v47, %v11983_v46  ;;  %v1037_v59 = vrot.slane %v1035_v53, 4  ;;  %v9432_v63 = vrot.slane %v1382_v48, 9  ;;  %v1457_v0 = vrot.slane %v11977_v36, 5  ;;  %v1563_v9 = vld [vmem:[#allocation2 + $0x1c] sm:$0xf] }
  0x87   : > { %v1028_v58 = vor.u32 %v1027_v51, %v1024_v50  ;;  %v11992_v2 = vrot.slane %v1615_v54, 4  ;;  %v1043_v7 = vrot.slane %v1041_v56, 5  ;;  %v9480_v8 = vcombine.low %v11967_v27, %v11977_v36  ;;  %v12000_v14 = vld [vmem:[#allocation2 + $0x18] sm:$0xf]  ;;  %v12002_v15 = vld [vmem:[#allocation2 + $0x1c] sm:$0xf] }
  0x88   : > { %v11994_v6 = vrot.slane %v1625_v55, 4  ;;  %v1038_v11 = vor.u32 %v1037_v59, %v1033_v52  ;;  %v1633_v12 = vshrl.u32 %v11989_v60, 16  ;;  %v9528_v13 = vcombine.low %v11989_v60, %v1563_v9  ;;  %v980_v22 = vld [vmem:[#allocation2 + $0x20] sm:$0x1]  ;;  %v12011_v30 = vld [vmem:[#allocation2 + $0x24] sm:$0xf] }
  0x89   : > { %v1029_v10 = vrot.slane %v1028_v58, 4  ;;  %v1458_v18 = vsel %vm11898_vm12, %v9432_v63, %v1457_v0  ;;  %v1459_v19 = vrot.slane %v1457_v0, 4  ;;  %v1460_v20 = vrot.slane %v979_v49, 5  ;;  %v1565_v36 = vld [vmem:[#allocation2 + $0x28] sm:$0xf]  ;;  %v11231_v37 = vld [vmem:[#allocation6 + $0x120] sm:$0xff]  }
  0x8a   : > { %v1046_v25 = vshrl.u32 %v12000_v14, 16  ;;  %v1039_v27 = vrot.slane %v1038_v11, 4  ;;  %4185 = vmatprep.mubr.bf16.mxu1 %v9528_v13  ;;  %v1049_v28 = vshll.u32 %v12000_v14, 16  ;;  %v1055_v29 = vshll.u32 %v12002_v15, 16  ;;  %v1383_v44 = vld [vmem:[#allocation2 + $0x18] sm:$0xe]  ;;  %10295 = vmatpush3.bf16.msra.mxu0 %v11231_v37 }
  0x8b   : > { %v1034_v26 = vsel %vm11878_vm10, %v1029_v10, %v1033_v52  ;;  %v1461_v32 = vsel %vm11898_vm12, %v1459_v19, %v1460_v20  ;;  %v1059_v34 = vshrl.u32 %v12002_v15, 16  ;;  %v1065_v35 = vshll.u32 %v980_v22, 16  ;;  %v852_v45 = vld [vmem:[#allocation2 + $0x2c] sm:$0x1]  ;;  %v12019_v51 = vld [vmem:[#allocation2 + $0x24] sm:$0xf] }
  0x8c   : > { %v1048_v33 = vrot.slane %v1046_v25, 4  ;;  %v1044_v38 = vsel %vm11878_vm10, %v1039_v27, %v1043_v7  ;;  %v9512_v40 = vcombine.low %v1458_v18, %v1461_v32  ;;  %v1051_v41 = vrot.slane %v1049_v28, 5  ;;  %v12025_v56 = vld [vmem:[#allocation2 + $0x28] sm:$0xf]  ;;  %v12034_v11 = vld [vmem:[#allocation2 + $0x24] sm:$0xe] }
  0x8d   : > { %v1057_v42 = vrot.slane %v1055_v29, 5  ;;  %v9496_v47 = vcombine.low %v1034_v26, %v1044_v38  ;;  %v1636_v48 = vshll.u32 %v11989_v60, 16  ;;  %v1061_v49 = vrot.slane %v1059_v34, 4  ;;  %v11235_v18 = vld [vmem:[#allocation6 + $0x158] sm:$0xff]   ;;  %v343_v28 = vld [vmem:[#allocation2 + $0x38] sm:$0x1] }
  0x8e   : > { %v1067_v50 = vrot.slane %v1065_v35, 5  ;;  %4186 = vmatmul.mubr.bf16.gmra.mxu1 %v9512_v40  ;;  %v1052_v52 = vor.u32 %v1051_v41, %v1048_v33  ;;  %v9481_v53 = vcombine.low %v12000_v14, %v12002_v15  ;;  %v1657_v54 = vshrl.u32 %v12011_v30, 16  ;;  %10296 = vmatprep.subr.bf16.mxu0 %v11235_v18  ;;  %v296_v35 = vld [vmem:[#allocation2 + $0x3c] sm:$0x1] }
  0x8f   : > { %v9529_v55 = vcombine.low %v12011_v30, %v1565_v36  ;;  %4024 = vmatprep.mubr.bf16.mxu0 %v9496_v47  ;;  %v1062_v58 = vor.u32 %v1061_v49, %v1057_v42  ;;  %v9433_v59 = vrot.slane %v1383_v44, 9  ;;  %v1464_v63 = vrot.slane %v12002_v15, 5  ;;  %v11237_v36 = vld [vmem:[#allocation6 + $0x118] sm:$0xff]  }
  0x90   : > { %v1467_v0 = vrot.slane %v980_v22, 5  ;;  %4025 = vmatmul.mubr.bf16.gmra.mxu0 %v9480_v8  ;;  %v1053_v1 = vrot.slane %v1052_v52, 4  ;;  %v853_v7 = vsel %vm11871_vm8, %v562_v17, %v852_v45  ;;  %v1070_v9 = vshrl.u32 %v12019_v51, 16  ;;  %v855_v45 = vld [vmem:[#allocation2 + $0x30] sm:$0xf] }
  0x91   : > { %4193 = vmatprep.mubr.bf16.mxu1 %v9529_v55  ;;  %v1073_v10 = vshll.u32 %v12019_v51, 16  ;;  %v1063_v13 = vrot.slane %v1062_v58, 4  ;;  %v1465_v14 = vsel %vm11898_vm12, %v9433_v59, %v1464_v63  ;;  %v1466_v15 = vrot.slane %v1464_v63, 4  ;;  %854 = vst [vmem:[#allocation2 + $0x2c] sm:$0x1] %v853_v7  ;;  %10297 = vmatpush3.bf16.msra.mxu0 %v11237_v36 }
  0x92   : > { %v1079_v8 = vshll.u32 %v12025_v56, 16  ;;  %v1058_v4 = vsel %vm11878_vm10, %v1053_v1, %v1057_v42  ;;  %v1072_v19 = vrot.slane %v1070_v9, 4  ;;  %v1083_v20 = vshrl.u32 %v12025_v56, 16 }
  0x93   : > { %v1075_v17 = vrot.slane %v1073_v10, 5  ;;  %v1068_v22 = vsel %vm11878_vm10, %v1063_v13, %v1067_v50  ;;  %v1468_v26 = vsel %vm11898_vm12, %v1466_v15, %v1467_v0  ;;  %v566_v37 = vrot.slane %v564_v24, 7  ;;  %v346_v50 = vld [vmem:[#allocation2 + $0x44] sm:$0x1]  ;;  %v392_v15 = vld [vmem:[%s11849_s30 + $0x50] sm:$0xff] }
  0x94   : > { %v12047_v27 = vrot.slane %v1079_v8, 5  ;;  %v9497_v29 = vcombine.low %v1058_v4, %v1068_v22  ;;  %v9513_v32 = vcombine.low %v1465_v14, %v1468_v26  ;;  %v1085_v34 = vrot.slane %v1083_v20, 4  ;;  %v393_v8 = vld [vmem:[%s11849_s30 + $0x58] sm:$0xff] }
  0x95   : > { %v1076_v33 = vor.u32 %v1075_v17, %v1072_v19  ;;  %v572_v38 = vshrl.u32 %v11963_v23, 16  ;;  %v575_v40 = vshll.u32 %v11963_v23, 16  ;;  %v9434_v41 = vrot.slane %v12034_v11, 9  ;;  %v11241_v19 = vld [vmem:[#allocation6 + $0x150] sm:$0xff]  }
  0x96   : > { %4032 = vmatprep.mubr.bf16.mxu0 %v9497_v29  ;;  %4194 = vmatmul.mubr.bf16.gmra.mxu1 %v9513_v32  ;;  %v1086_v44 = vor.u32 %v1085_v34, %v12047_v27  ;;  %v1471_v47 = vrot.slane %v12025_v56, 5  ;;  %v344_v49 = vsel %vm11892_vm11, 0, %v343_v28  ;;  %v569_v24 = vor.u32 %v567_v21, %v566_v37  ;;  %v394_v29 = vld [vmem:[%s11849_s30 + $0x60] sm:$0xff]  ;;  %v395_v32 = vld [vmem:[%s11849_s30 + $0x68] sm:$0xff] }
  0x97   : > { %v1077_v42 = vrot.slane %v1076_v33, 4  ;;  %v570_v52 = vrot.slane %v566_v37, 4  ;;  %v574_v55 = vrot.slane %v572_v38, 7  ;;  %345 = vst [vmem:[#allocation2 + $0x38] sm:$0x1] %v344_v49  ;;  %v297_v23 = vsel %vm11871_vm8, 0, %v296_v35  ;;  %10298 = vmatprep.subr.bf16.mxu0 %v11241_v19 }
  0x98   : > { %4033 = vmatmul.mubr.bf16.gmra.mxu0 %v9481_v53  ;;  %v981_v58 = vld [vmem:[#allocation2 + $0x2c] sm:$0x1]  ;;  %v1087_v63 = vrot.slane %v1086_v44, 4  ;;  %v9482_v62 = vcombine.low %v12019_v51, %v12025_v56  ;;  %v1473_v21 = vrot.slane %v1471_v47, 4  ;;  %298 = vst [vmem:[#allocation2 + $0x3c] sm:$0x1] %v297_v23  ;;  %v856_v9 = vsel %vm11916_vm14, %v569_v24, %v855_v45 }
  0x99   : > { %v1082_v59 = vsel %vm11878_vm10, %v1077_v42, %v12047_v27  ;;  %v1089_v0 = vshll.u32 %v981_v58, 16  ;;  %v577_v1 = vor.u32 %v575_v40, %v574_v55  ;;  %v579_v7 = vrot.slane %v574_v55, 4  ;;  %v299_v53 = vld [vmem:[#allocation2 + $0x48] sm:$0x1]  ;;  %857 = vst [vmem:[#allocation2 + $0x30] sm:$0xf] %v856_v9 }
  0x9a   : > { %v1474_v10 = vrot.slane %v981_v58, 5  ;;  %v581_v11 = vshrl.u32 %v11975_v31, 16  ;;  %v584_v13 = vshll.u32 %v11975_v31, 16  ;;  %v589_v14 = vshrl.u32 %v11987_v57, 16  ;;  %v11243_v38 = vld [vmem:[#allocation6 + $0x110] sm:$0xff]   ;;  %v397_v55 = vld [vmem:[%s11849_s30 + $0x78] sm:$0xff] }
  0x9b   : > { %v1091_v51 = vrot.slane %v1089_v0, 5  ;;  %v578_v56 = vsel %vm11904_vm13, %v570_v52, %v577_v1  ;;  %v592_v18 = vshll.u32 %v11987_v57, 16  ;;  %v347_v4 = vsel %vm11892_vm11, 0, %v346_v50  ;;  %v396_v52 = vld [vmem:[%s11849_s30 + $0x70] sm:$0xff]  ;;  %v398_v23 = vld [vmem:[%s11849_s30 + $0x80] sm:$0xff]  ;;  %10299 = vmatpush3.bf16.msra.mxu0 %v11243_v38 }
  0x9c   : > { %858 = vst [vmem:[#allocation2 + $0x34] sm:$0xf] %v578_v56  ;;  %v12081_v31 = vsel %vm11898_vm12, %v9434_v41, %v1471_v47  ;;  %v583_v17 = vrot.slane %v581_v11, 7  ;;  %v12083_v20 = vrot.slane %v589_v14, 7  ;;  %348 = vst [vmem:[#allocation2 + $0x44] sm:$0x1] %v347_v4  ;;  %v12091_v57 = vsel %vm11898_vm12, %v1473_v21, %v1474_v10 }
  0x9d   : > { %v300_v22 = vsel %vm11871_vm8, 0, %v299_v53  ;;  %v1092_v26 = vsel %vm11878_vm10, %v1087_v63, %v1091_v51  ;;  %v12093_v27 = vpack.c.bf16 %v392_v15, %v392_v15  ;;  %v12095_v28 = vpack.c.bf16 %v393_v8, %v393_v8  ;;  %v399_v10 = vld [vmem:[%s11849_s30 + $0x88] sm:$0xff]  ;;  %v1992_v9 = vld [vmem:[#allocation2 + $0xc] sm:$0xe] }
  0x9e   : > { %301 = vst [vmem:[#allocation2 + $0x48] sm:$0x1] %v300_v22  ;;  %v9498_v33 = vcombine.low %v1082_v59, %v1092_v26  ;;  %v859_v34 = vld [vmem:[#allocation2 + $0x38] sm:$0x1]  ;;  %v586_v35 = vor.u32 %v584_v13, %v583_v17  ;;  %v587_v36 = vrot.slane %v583_v17, 4  ;;  %v594_v37 = vor.u32 %v592_v18, %v12083_v20  ;;  %v11247_v11 = vld [vmem:[#allocation6 + $0x148] sm:$0xff]  }
  0x9f   : > { %v860_v40 = vsel %vm11871_vm8, %v579_v7, %v859_v34  ;;  %v596_v41 = vrot.slane %v12083_v20, 4  ;;  %v862_v42 = vld [vmem:[#allocation2 + $0x3c] sm:$0xf]  ;;  %v598_v44 = vshrl.u32 %v12093_v27, 16  ;;  %v601_v45 = vshll.u32 %v12093_v27, 16  ;;  %10300 = vmatprep.subr.bf16.mxu0 %v11247_v11 }
  0xa0   : > { %4040 = vmatprep.mubr.bf16.mxu0 %v9498_v33  ;;  %861 = vst [vmem:[#allocation2 + $0x38] sm:$0x1] %v860_v40  ;;  %v595_v47 = vsel %vm11904_vm13, %v587_v36, %v594_v37  ;;  %v863_v49 = vsel %vm11916_vm14, %v586_v35, %v862_v42  ;;  %v606_v50 = vshrl.u32 %v12095_v28, 16  ;;  %v609_v24 = vshll.u32 %v12095_v28, 16  ;;  %v12114_v58 = vld [vmem:[#allocation2 + $0x30] sm:$0xf] }
  0xa1   : > { %4041 = vmatmul.mubr.bf16.gmra.mxu0 %v9482_v62  ;;  %v9514_v59 = vcombine.low %v12081_v31, %v12091_v57  ;;  %v12118_v63 = vld [vmem:[#allocation2 + $0x30] sm:$0xf]  ;;  %864 = vst [vmem:[#allocation2 + $0x3c] sm:$0xf] %v863_v49  ;;  %865 = vst [vmem:[#allocation2 + $0x40] sm:$0xf] %v595_v47  ;;  %v12120_v0 = vpack.c.bf16 %v394_v29, %v394_v29  ;;  %v12122_v1 = vpack.c.bf16 %v395_v32, %v395_v32 }
  0xa2   : > { %v1385_v21 = vld [vmem:[#allocation2 + $0x30] sm:$0xe]  ;;  %v1094_v62 = vshrl.u32 %v12118_v63, 16  ;;  %v1097_v53 = vshll.u32 %v12118_v63, 16  ;;  %v12131_v8 = vrot.slane %v598_v44, 7  ;;  %v12133_v51 = vpack.c.bf16 %v396_v52, %v396_v52 }
  0xa3   : > { %v1567_v13 = vld [vmem:[#allocation2 + $0x34] sm:$0xf]  ;;  %v9435_v15 = vrot.slane %v1385_v21, 9  ;;  %v12135_v56 = vpack.c.bf16 %v397_v55, %v397_v55  ;;  %v866_v17 = vld [vmem:[#allocation2 + $0x44] sm:$0x1]  ;;  %v12143_v27 = vpack.c.bf16 %v398_v23, %v398_v23  ;;  %v12146_v34 = vpack.c.bf16 %v399_v10, %v399_v10 }
  0xa4   : > { %v12129_v14 = vld [vmem:[#allocation2 + $0x34] sm:$0xf]  ;;  %v9530_v18 = vcombine.low %v12114_v58, %v1567_v13  ;;  %v1096_v4 = vrot.slane %v1094_v62, 4  ;;  %v1099_v19 = vrot.slane %v1097_v53, 5  ;;  %v867_v26 = vsel %vm11871_vm8, %v596_v41, %v866_v17  ;;  %v11249_v13 = vld [vmem:[#allocation6 + $0x108] sm:$0xff]  }
  0xa5   : > { %v1103_v31 = vshll.u32 %v12129_v14, 16  ;;  %v1107_v20 = vshrl.u32 %v12129_v14, 16  ;;  %v1478_v22 = vrot.slane %v12129_v14, 5  ;;  %v869_v57 = vld [vmem:[#allocation2 + $0x48] sm:$0xf]  ;;  %v603_v33 = vor.u32 %v601_v45, %v12131_v8  ;;  %10301 = vmatpush3.bf16.msra.mxu0 %v11249_v13 }
  0xa6   : > { %4201 = vmatprep.mubr.bf16.mxu1 %v9530_v18  ;;  %v1100_v29 = vor.u32 %v1099_v19, %v1096_v4  ;;  %868 = vst [vmem:[#allocation2 + $0x44] sm:$0x1] %v867_v26  ;;  %v604_v38 = vrot.slane %v12131_v8, 4  ;;  %v12149_v40 = vrot.slane %v606_v50, 7  ;;  %v9483_v44 = vcombine.low %v12118_v63, %v12129_v14  ;;  %v400_v63 = vld [vmem:[%s11849_s30 + $0x90] sm:$0xff]  ;;  %v11250_v26 = vld [vmem:[#allocation6 + $0x1f8] sm:$0xff]  }
  0xa7   : > { %v1105_v32 = vrot.slane %v1103_v31, 5  ;;  %4202 = vmatmul.mubr.bf16.gmra.mxu1 %v9514_v59  ;;  %v982_v35 = vld [vmem:[#allocation2 + $0x38] sm:$0x1]  ;;  %v1109_v36 = vrot.slane %v1107_v20, 4  ;;  %v1480_v37 = vrot.slane %v1478_v22, 4  ;;  %v870_v45 = vsel %vm11916_vm14, %v603_v33, %v869_v57  ;;  %10400 = vmatprep.subr.bf16.mxu1 %v11250_v26 }
  0xa8   : > { %v1101_v41 = vrot.slane %v1100_v29, 4  ;;  %v1113_v42 = vshll.u32 %v982_v35, 16  ;;  %v12153_v47 = vld [vmem:[#allocation2 + $0x3c] sm:$0xf]  ;;  %v1569_v49 = vld [vmem:[#allocation2 + $0x40] sm:$0xf]  ;;  %v1479_v50 = vsel %vm11898_vm12, %v9435_v15, %v1478_v22  ;;  %v611_v20 = vor.u32 %v609_v24, %v12149_v40 }
  0xa9   : > { %v1110_v52 = vor.u32 %v1109_v36, %v1105_v32  ;;  %v9531_v23 = vcombine.low %v12153_v47, %v1569_v49  ;;  %v12161_v59 = vld [vmem:[#allocation2 + $0x3c] sm:$0xf]  ;;  %v12163_v21 = vld [vmem:[#allocation2 + $0x40] sm:$0xf]  ;;  %871 = vst [vmem:[#allocation2 + $0x48] sm:$0xf] %v870_v45  ;;  %v12177_v22 = vpack.c.bf16 %v400_v63, %v400_v63 }
  0xaa   : > { %v1106_v62 = vsel %vm11878_vm10, %v1101_v41, %v1105_v32  ;;  %v1115_v53 = vrot.slane %v1113_v42, 5  ;;  %v1481_v10 = vrot.slane %v982_v35, 5  ;;  %v1118_v11 = vshrl.u32 %v12161_v59, 16  ;;  %v1386_v4 = vld [vmem:[#allocation2 + $0x3c] sm:$0xe] }
  0xab   : > { %v1111_v14 = vrot.slane %v1110_v52, 4  ;;  %4209 = vmatprep.mubr.bf16.mxu1 %v9531_v23  ;;  %v1121_v8 = vshll.u32 %v12161_v59, 16  ;;  %v1127_v15 = vshll.u32 %v12163_v21, 16  ;;  %v1131_v18 = vshrl.u32 %v12163_v21, 16  ;;  %v349_v19 = vld [vmem:[#allocation2 + $0x50] sm:$0x1] }
  0xac   : > { %v1482_v31 = vsel %vm11898_vm12, %v1480_v37, %v1481_v10  ;;  %v1120_v17 = vrot.slane %v1118_v11, 4  ;;  %v612_v37 = vsel %vm11904_vm13, %v604_v38, %v611_v20  ;;  %v302_v49 = vld [vmem:[#allocation2 + $0x54] sm:$0x1]  ;;  %v9436_v45 = vrot.slane %v1386_v4, 9  ;;  %v11252_v10 = vld [vmem:[#allocation6 + $0x1f0] sm:$0xff]  }
  0xad   : > { %v1116_v57 = vsel %vm11878_vm10, %v1111_v14, %v1115_v53  ;;  %v9515_v29 = vcombine.low %v1479_v50, %v1482_v31  ;;  %v983_v32 = vld [vmem:[#allocation2 + $0x44] sm:$0x1]  ;;  %v1123_v33 = vrot.slane %v1121_v8, 5  ;;  %v1129_v35 = vrot.slane %v1127_v15, 5  ;;  %872 = vst [vmem:[#allocation2 + $0x4c] sm:$0xf] %v612_v37 }
  0xae   : > { %v9499_v36 = vcombine.low %v1106_v62, %v1116_v57  ;;  %v1133_v41 = vrot.slane %v1131_v18, 4  ;;  %v1137_v42 = vshll.u32 %v983_v32, 16  ;;  %v1485_v52 = vrot.slane %v12163_v21, 5  ;;  %v11251_v23 = vld [vmem:[#allocation6 + $0x1b8] sm:$0xff]   ;;  %v11253_v18 = vld [vmem:[#allocation6 + $0x1b0] sm:$0xff]  }
  0xaf   : > { %4210 = vmatmul.mubr.bf16.gmra.mxu1 %v9515_v29  ;;  %v1124_v24 = vor.u32 %v1123_v33, %v1120_v17  ;;  %v1488_v53 = vrot.slane %v983_v32, 5  ;;  %v350_v38 = vsel %vm11892_vm11, 0, %v349_v19  ;;  %v613_v13 = vrot.slane %v12149_v40, 4 }
  0xb0   : > { %4048 = vmatprep.mubr.bf16.mxu0 %v9499_v36  ;;  %v1134_v50 = vor.u32 %v1133_v41, %v1129_v35  ;;  %v1139_v63 = vrot.slane %v1137_v42, 5  ;;  %v12185_v62 = vld [vmem:[#allocation2 + $0x48] sm:$0xf]  ;;  %v1486_v8 = vsel %vm11898_vm12, %v9436_v45, %v1485_v52  ;;  %351 = vst [vmem:[#allocation2 + $0x50] sm:$0x1] %v350_v38  ;;  %10401 = vmatpush3.bf16.msra.mxu1 %v11251_v23  ;;  %v1487_v31 = vrot.slane %v1485_v52, 4 }
  0xb1   : > { %4049 = vmatmul.mubr.bf16.gmra.mxu0 %v9483_v44  ;;  %v1125_v11 = vrot.slane %v1124_v24, 4  ;;  %v12193_v15 = vld [vmem:[#allocation2 + $0x48] sm:$0xf]  ;;  %10402 = vmatprep.subr.bf16.mxu1 %v11252_v10  ;;  %v303_v44 = vsel %vm11871_vm8, 0, %v302_v49  ;;  %v615_v20 = vshrl.u32 %v12120_v0, 16  ;;  %v618_v26 = vshll.u32 %v12120_v0, 16 }
  0xb2   : > { %v1135_v4 = vrot.slane %v1134_v50, 4  ;;  %v1142_v17 = vshrl.u32 %v12193_v15, 16  ;;  %v1145_v19 = vshll.u32 %v12193_v15, 16  ;;  %v1489_v29 = vsel %vm11898_vm12, %v1487_v31, %v1488_v53  ;;  %304 = vst [vmem:[#allocation2 + $0x54] sm:$0x1] %v303_v44  ;;  %v11256_v10 = vld [vmem:[#allocation6 + $0x1e8] sm:$0xff]  }
  0xb3   : > { %v1130_v40 = vsel %vm11878_vm10, %v1125_v11, %v1129_v35  ;;  %v12207_v36 = vld [vmem:[#allocation2 + $0x48] sm:$0xe]  ;;  %v9484_v35 = vcombine.low %v12161_v59, %v12163_v21  ;;  %v617_v42 = vrot.slane %v615_v20, 7  ;;  %v623_v37 = vshrl.u32 %v12122_v1, 16  ;;  %v352_v49 = vld [vmem:[#allocation2 + $0x5c] sm:$0x1] }
  0xb4   : > { %v1140_v57 = vsel %vm11878_vm10, %v1135_v4, %v1139_v63  ;;  %v1144_v32 = vrot.slane %v1142_v17, 4  ;;  %v1147_v33 = vrot.slane %v1145_v19, 5  ;;  %10403 = vmatpush3.bf16.msra.mxu1 %v11253_v18  ;;  %v1571_v0 = vld [vmem:[#allocation2 + $0x4c] sm:$0xf]  ;;  %v9516_v45 = vcombine.low %v1486_v8, %v1489_v29  ;;  %v305_v38 = vld [vmem:[#allocation2 + $0x60] sm:$0x1] }
  0xb5   : > { %v9500_v41 = vcombine.low %v1130_v40, %v1140_v57  ;;  %v12213_v52 = vld [vmem:[#allocation2 + $0x4c] sm:$0xf]  ;;  %v626_v50 = vshll.u32 %v12122_v1, 16  ;;  %v9532_v63 = vcombine.low %v12185_v62, %v1571_v0  ;;  %v9437_v21 = vrot.slane %v12207_v36, 9  ;;  %v355_v17 = vld [vmem:[#allocation2 + $0x68] sm:$0x1]  ;;  %10404 = vmatprep.subr.bf16.mxu1 %v11256_v10 }
  0xb6   : > { %v1148_v23 = vor.u32 %v1147_v33, %v1144_v32  ;;  %v1151_v53 = vshll.u32 %v12213_v52, 16  ;;  %v1155_v59 = vshrl.u32 %v12213_v52, 16  ;;  %v620_v8 = vor.u32 %v618_v26, %v617_v42  ;;  %v11257_v1 = vld [vmem:[#allocation6 + $0x1a8] sm:$0xff]   ;;  %v308_v57 = vld [vmem:[#allocation2 + $0x6c] sm:$0x1]  ;;  %v11258_v29 = vld [vmem:[#allocation6 + $0x1e0] sm:$0xff]  }
  0xb7   : > { %4056 = vmatprep.mubr.bf16.mxu0 %v9500_v41  ;;  %v873_v11 = vld [vmem:[#allocation2 + $0x50] sm:$0x1]  ;;  %v621_v4 = vrot.slane %v617_v42, 4  ;;  %v12222_v31 = vrot.slane %v623_v37, 7  ;;  %4217 = vmatprep.mubr.bf16.mxu1 %v9532_v63  ;;  %v1492_v20 = vrot.slane %v12213_v52, 5  ;;  %v353_v33 = vsel %vm11892_vm11, 0, %v352_v49 }
  0xb8   : > { %v12220_v18 = vrot.slane %v1148_v23, 4  ;;  %v874_v19 = vsel %vm11871_vm8, %v613_v13, %v873_v11  ;;  %v12226_v40 = vrot.slane %v1151_v53, 5  ;;  %v1157_v44 = vrot.slane %v1155_v59, 4  ;;  %4218 = vmatmul.mubr.bf16.gmra.mxu1 %v9516_v45  ;;  %v358_v13 = vld [vmem:[#allocation2 + $0x74] sm:$0x1] }
  0xb9   : > { %4057 = vmatmul.mubr.bf16.gmra.mxu0 %v9484_v35  ;;  %875 = vst [vmem:[#allocation2 + $0x50] sm:$0x1] %v874_v19  ;;  %v628_v26 = vor.u32 %v626_v50, %v12222_v31  ;;  %v630_v32 = vrot.slane %v12222_v31, 4  ;;  %v306_v41 = vsel %vm11871_vm8, 0, %v305_v38  ;;  %v11259_v35 = vld [vmem:[#allocation6 + $0x1a0] sm:$0xff]   ;;  %v9485_v0 = vcombine.low %v12193_v15, %v12213_v52  ;;  %10405 = vmatpush3.bf16.msra.mxu1 %v11257_v1 }
  0xba   : > { %v1154_v42 = vsel %vm11878_vm10, %v12220_v18, %v12226_v40  ;;  %v1158_v37 = vor.u32 %v1157_v44, %v12226_v40  ;;  %v876_v45 = vld [vmem:[#allocation2 + $0x54] sm:$0xf]  ;;  %v1494_v23 = vrot.slane %v1492_v20, 4  ;;  %354 = vst [vmem:[#allocation2 + $0x5c] sm:$0x1] %v353_v33  ;;  %v11261_v50 = vld [vmem:[#allocation6 + $0x140] sm:$0xff]   ;;  %10406 = vmatprep.subr.bf16.mxu1 %v11258_v29 }
  0xbb   : > { %307 = vst [vmem:[#allocation2 + $0x60] sm:$0x1] %v306_v41  ;;  %v311_v49 = vld [vmem:[#allocation2 + $0x78] sm:$0x1]  ;;  %v629_v63 = vsel %vm11904_vm13, %v621_v4, %v628_v26  ;;  %v877_v53 = vsel %vm11916_vm14, %v620_v8, %v876_v45  ;;  %v632_v59 = vshrl.u32 %v12133_v51, 16  ;;  %v635_v38 = vshll.u32 %v12133_v51, 16  ;;  %10302 = vmatprep.subr.bf16.mxu0 %v11261_v50 }
  0xbc   : > { %v12248_v10 = vrot.slane %v1158_v37, 4  ;;  %878 = vst [vmem:[#allocation2 + $0x54] sm:$0xf] %v877_v53  ;;  %879 = vst [vmem:[#allocation2 + $0x58] sm:$0xf] %v629_v63  ;;  %v640_v11 = vshrl.u32 %v12135_v56, 16 }
  0xbd   : > { %v643_v31 = vshll.u32 %v12135_v56, 16  ;;  %v356_v1 = vsel %vm11892_vm11, 0, %v355_v17  ;;  %v634_v4 = vrot.slane %v632_v59, 7  ;;  %v309_v8 = vsel %vm11871_vm8, 0, %v308_v57  ;;  %10407 = vmatpush3.bf16.msra.mxu1 %v11259_v35 }
  0xbe   : > { %357 = vst [vmem:[#allocation2 + $0x68] sm:$0x1] %v356_v1  ;;  %v649_v51 = vshrl.u32 %v12143_v27, 16  ;;  %v652_v19 = vshll.u32 %v12143_v27, 16  ;;  %v12258_v44 = vrot.slane %v640_v11, 7  ;;  %v657_v29 = vshrl.u32 %v12146_v34, 16 }
  0xbf   : > { %310 = vst [vmem:[#allocation2 + $0x6c] sm:$0x1] %v309_v8  ;;  %v660_v56 = vshll.u32 %v12146_v34, 16  ;;  %v359_v17 = vsel %vm11892_vm11, 0, %v358_v13  ;;  %v637_v26 = vor.u32 %v635_v38, %v634_v4  ;;  %v638_v33 = vrot.slane %v634_v4, 4  ;;  %v11263_v4 = vld [vmem:[#allocation6 + $0x100] sm:$0xff]  }
  0xc0   : > { %v651_v41 = vrot.slane %v649_v51, 7  ;;  %360 = vst [vmem:[#allocation2 + $0x74] sm:$0x1] %v359_v17  ;;  %v312_v57 = vsel %vm11871_vm8, 0, %v311_v49  ;;  %v984_v37 = vld [vmem:[#allocation2 + $0x50] sm:$0x1]  ;;  %v645_v27 = vor.u32 %v643_v31, %v12258_v44  ;;  %v1493_v13 = vsel %vm11898_vm12, %v9437_v21, %v1492_v20  ;;  %10303 = vmatpush3.bf16.msra.mxu0 %v11263_v4 }
  0xc1   : > { %v647_v45 = vrot.slane %v12258_v44, 4  ;;  %v12268_v50 = vrot.slane %v657_v29, 7  ;;  %313 = vst [vmem:[#allocation2 + $0x78] sm:$0x1] %v312_v57  ;;  %v666_v34 = vshrl.u32 %v12177_v22, 16  ;;  %v1161_v63 = vshll.u32 %v984_v37, 16 }
  0xc2   : > { %v1495_v35 = vrot.slane %v984_v37, 5  ;;  %v880_v53 = vld [vmem:[#allocation2 + $0x5c] sm:$0x1]  ;;  %v883_v59 = vld [vmem:[#allocation2 + $0x60] sm:$0xf]  ;;  %v654_v49 = vor.u32 %v652_v19, %v651_v41  ;;  %v646_v11 = vsel %vm11904_vm13, %v638_v33, %v645_v27  ;;  %v655_v1 = vrot.slane %v651_v41, 4 }
  0xc3   : > { %v881_v38 = vsel %vm11871_vm8, %v630_v32, %v880_v53  ;;  %v884_v31 = vsel %vm11916_vm14, %v637_v26, %v883_v59  ;;  %v1163_v8 = vrot.slane %v1161_v63, 5  ;;  %v12281_v36 = vld [vmem:[#allocation2 + $0x54] sm:$0xf]  ;;  %v1573_v51 = vld [vmem:[#allocation2 + $0x58] sm:$0xf]  ;;  %v662_v20 = vor.u32 %v660_v56, %v12268_v50 }
  0xc4   : > { %v1496_v21 = vsel %vm11898_vm12, %v1494_v23, %v1495_v35  ;;  %882 = vst [vmem:[#allocation2 + $0x5c] sm:$0x1] %v881_v38  ;;  %885 = vst [vmem:[#allocation2 + $0x60] sm:$0xf] %v884_v31  ;;  %v664_v32 = vrot.slane %v12268_v50, 4  ;;  %v9533_v29 = vcombine.low %v12281_v36, %v1573_v51  ;;  %v401_v27 = vld [vmem:[%s11849_s30 + $0x98] sm:$0xff] }
  0xc5   : > { %886 = vst [vmem:[#allocation2 + $0x64] sm:$0xf] %v646_v11  ;;  %v9517_v17 = vcombine.low %v1493_v13, %v1496_v21  ;;  %v12290_v26 = vld [vmem:[#allocation2 + $0x54] sm:$0xf]  ;;  %v12292_v33 = vld [vmem:[#allocation2 + $0x58] sm:$0xf]  ;;  %v1164_v23 = vsel %vm11878_vm10, %v12248_v10, %v1163_v8  ;;  %v663_v40 = vsel %vm11904_vm13, %v655_v1, %v662_v20  ;;  %v12324_v15 = vpack.c.bf16 %v401_v27, %v401_v27 }
  0xc6   : > { %v1166_v56 = vshrl.u32 %v12290_v26, 16  ;;  %v1169_v41 = vshll.u32 %v12290_v26, 16  ;;  %v1175_v57 = vshll.u32 %v12292_v33, 16  ;;  %v1388_v37 = vld [vmem:[#allocation2 + $0x54] sm:$0xe]  ;;  %v402_v50 = vld [vmem:[%s11849_s30 + $0xa0] sm:$0xff]  ;;  %v9501_v13 = vcombine.low %v1154_v42, %v1164_v23  ;;  %4225 = vmatprep.mubr.bf16.mxu1 %v9533_v29 }
  0xc7   : > { %v11264_v63 = vld [vmem:[#allocation6 + $0x1d8] sm:$0xff]   ;;  %v1179_v35 = vshrl.u32 %v12292_v33, 16  ;;  %v9438_v10 = vrot.slane %v1388_v37, 9  ;;  %v887_v53 = vld [vmem:[#allocation2 + $0x68] sm:$0x1]  ;;  %4226 = vmatmul.mubr.bf16.gmra.mxu1 %v9517_v17  ;;  %v1499_v4 = vrot.slane %v12292_v33, 5  ;;  %v12326_v52 = vpack.c.bf16 %v402_v50, %v402_v50 }
  0xc8   : > { %v890_v59 = vld [vmem:[#allocation2 + $0x6c] sm:$0xf]  ;;  %v1168_v38 = vrot.slane %v1166_v56, 4  ;;  %v1171_v11 = vrot.slane %v1169_v41, 5  ;;  %v1177_v31 = vrot.slane %v1175_v57, 5  ;;  %10408 = vmatprep.subr.bf16.mxu1 %v11264_v63  ;;  %4064 = vmatprep.mubr.bf16.mxu0 %v9501_v13  ;;  %v888_v18 = vsel %vm11871_vm8, %v647_v45, %v887_v53  ;;  %v11265_v21 = vld [vmem:[#allocation6 + $0x198] sm:$0xff]  }
  0xc9   : > { %v894_v8 = vld [vmem:[#allocation2 + $0x74] sm:$0x1]  ;;  %v1181_v51 = vrot.slane %v1179_v35, 4  ;;  %v891_v42 = vsel %vm11916_vm14, %v654_v49, %v890_v59  ;;  %4065 = vmatmul.mubr.bf16.gmra.mxu0 %v9485_v0  ;;  %v1501_v17 = vrot.slane %v1499_v4, 4  ;;  %889 = vst [vmem:[#allocation2 + $0x68] sm:$0x1] %v888_v18  ;;  %v9486_v49 = vcombine.low %v12290_v26, %v12292_v33  ;;  %10409 = vmatpush3.bf16.msra.mxu1 %v11265_v21 }
  0xca   : > { %v1172_v29 = vor.u32 %v1171_v11, %v1168_v38  ;;  %892 = vst [vmem:[#allocation2 + $0x6c] sm:$0xf] %v891_v42  ;;  %893 = vst [vmem:[#allocation2 + $0x70] sm:$0xf] %v663_v40  ;;  %v895_v23 = vsel %vm11871_vm8, %v664_v32, %v894_v8  ;;  %v11266_v45 = vld [vmem:[#allocation6 + $0x1d0] sm:$0xff]   ;;  %v1500_v37 = vsel %vm11898_vm12, %v9438_v10, %v1499_v4  ;;  %v403_v26 = vld [vmem:[%s11849_s30 + $0xa8] sm:$0xff] }
  0xcb   : > { %v985_v56 = vld [vmem:[#allocation2 + $0x5c] sm:$0x1]  ;;  %v1182_v1 = vor.u32 %v1181_v51, %v1177_v31  ;;  %v12322_v20 = vld [vmem:[#allocation2 + $0x60] sm:$0xf]  ;;  %896 = vst [vmem:[#allocation2 + $0x74] sm:$0x1] %v895_v23  ;;  %10410 = vmatprep.subr.bf16.mxu1 %v11266_v45  ;;  %v12346_v42 = vpack.c.bf16 %v403_v26, %v403_v26 }
  0xcc   : > { %v1575_v41 = vld [vmem:[#allocation2 + $0x64] sm:$0xf]  ;;  %v1173_v0 = vrot.slane %v1172_v29, 4  ;;  %v1185_v57 = vshll.u32 %v985_v56, 16  ;;  %v12331_v63 = vld [vmem:[#allocation2 + $0x60] sm:$0xf] }
  0xcd   : > { %v1183_v33 = vrot.slane %v1182_v1, 4  ;;  %v9534_v13 = vcombine.low %v12322_v20, %v1575_v41  ;;  %v1502_v27 = vrot.slane %v985_v56, 5  ;;  %v12335_v35 = vld [vmem:[#allocation2 + $0x64] sm:$0xf]  ;;  %v1190_v50 = vshrl.u32 %v12331_v63, 16  ;;  %v11267_v53 = vld [vmem:[#allocation6 + $0x190] sm:$0xff]  }
  0xce   : > { %v1178_v59 = vsel %vm11878_vm10, %v1173_v0, %v1177_v31  ;;  %v1187_v38 = vrot.slane %v1185_v57, 5  ;;  %v1193_v11 = vshll.u32 %v12331_v63, 16  ;;  %v1199_v10 = vshll.u32 %v12335_v35, 16  ;;  %v1389_v4 = vld [vmem:[#allocation2 + $0x60] sm:$0xe]  ;;  %v404_v8 = vld [vmem:[%s11849_s30 + $0xb0] sm:$0xff]  ;;  %10411 = vmatpush3.bf16.msra.mxu1 %v11267_v53 }
  0xcf   : > { %4233 = vmatprep.mubr.bf16.mxu1 %v9534_v13  ;;  %v1503_v51 = vsel %vm11898_vm12, %v1501_v17, %v1502_v27  ;;  %v1192_v18 = vrot.slane %v1190_v50, 4  ;;  %v1203_v40 = vshrl.u32 %v12335_v35, 16  ;;  %v9439_v0 = vrot.slane %v1389_v4, 9  ;;  %v11424_v16 = vld [vmem:[#allocation2 + $0x58] sm:$0xf] }
  0xd0   : > { %v1188_v31 = vsel %vm11878_vm10, %v1183_v33, %v1187_v38  ;;  %v9518_v21 = vcombine.low %v1500_v37, %v1503_v51  ;;  %v1195_v29 = vrot.slane %v1193_v11, 5  ;;  %v1201_v23 = vrot.slane %v1199_v10, 5  ;;  %v986_v56 = vld [vmem:[#allocation2 + $0x68] sm:$0x1] }
  0xd1   : > { %v9502_v45 = vcombine.low %v1178_v59, %v1188_v31  ;;  %v1205_v1 = vrot.slane %v1203_v40, 4  ;;  %v12350_v41 = vld [vmem:[#allocation2 + $0x6c] sm:$0xf]  ;;  %v12352_v57 = vpack.c.bf16 %v404_v8, %v404_v8  ;;  %v1209_v13 = vshll.u32 %v986_v56, 16  ;;  %v1577_v33 = vld [vmem:[#allocation2 + $0x70] sm:$0xf] }
  0xd2   : > { %4234 = vmatmul.mubr.bf16.gmra.mxu1 %v9518_v21  ;;  %v1196_v26 = vor.u32 %v1195_v29, %v1192_v18  ;;  %v9487_v27 = vcombine.low %v12331_v63, %v12335_v35  ;;  %v9535_v50 = vcombine.low %v12350_v41, %v1577_v33  ;;  %v1506_v53 = vrot.slane %v12335_v35, 5  ;;  %v12359_v38 = vld [vmem:[#allocation2 + $0x6c] sm:$0xf]  ;;  %v12361_v11 = vld [vmem:[#allocation2 + $0x70] sm:$0xf]  ;;  %v11270_v29 = vld [vmem:[#allocation6 + $0x1c8] sm:$0xff]  }
  0xd3   : > { %4072 = vmatprep.mubr.bf16.mxu0 %v9502_v45  ;;  %v1206_v37 = vor.u32 %v1205_v1, %v1201_v23  ;;  %v1509_v59 = vrot.slane %v986_v56, 5  ;;  %v1211_v4 = vrot.slane %v1209_v13, 5  ;;  %v12363_v8 = vld [vmem:[#allocation2 + $0x74] sm:$0x1]  ;;  %v1214_v63 = vshrl.u32 %v12359_v38, 16  ;;  %10412 = vmatprep.subr.bf16.mxu1 %v11270_v29 }
  0xd4   : > { %4073 = vmatmul.mubr.bf16.gmra.mxu0 %v9486_v49  ;;  %v1197_v10 = vrot.slane %v1196_v26, 4  ;;  %v1217_v51 = vshll.u32 %v12359_v38, 16  ;;  %4241 = vmatprep.mubr.bf16.mxu1 %v9535_v50  ;;  %v1507_v40 = vsel %vm11898_vm12, %v9439_v0, %v1506_v53  ;;  %v1508_v35 = vrot.slane %v1506_v53, 4  ;;  %v405_v21 = vld [vmem:[%s11849_s30 + $0xb8] sm:$0xff]  ;;  %v11271_v26 = vld [vmem:[#allocation6 + $0x188] sm:$0xff]  }
  0xd5   : > { %v1207_v18 = vrot.slane %v1206_v37, 4  ;;  %v1223_v31 = vshll.u32 %v12361_v11, 16  ;;  %v1216_v45 = vrot.slane %v1214_v63, 4  ;;  %v1227_v1 = vshrl.u32 %v12361_v11, 16  ;;  %10413 = vmatpush3.bf16.msra.mxu1 %v11271_v26  ;;  %v11272_v63 = vld [vmem:[#allocation6 + $0x1c0] sm:$0xff]  }
  0xd6   : > { %v1202_v49 = vsel %vm11878_vm10, %v1197_v10, %v1201_v23  ;;  %v1219_v56 = vrot.slane %v1217_v51, 5  ;;  %v1510_v33 = vsel %vm11898_vm12, %v1508_v35, %v1509_v59  ;;  %v1233_v37 = vshll.u32 %v12363_v8, 16  ;;  %v897_v23 = vld [vmem:[#allocation2 + $0x78] sm:$0xf]  ;;  %v361_v10 = vld [vmem:[#allocation2 + $0x80] sm:$0x1]  ;;  %10414 = vmatprep.subr.bf16.mxu1 %v11272_v63 }
  0xd7   : > { %v1212_v13 = vsel %vm11878_vm10, %v1207_v18, %v1211_v4  ;;  %v1225_v0 = vrot.slane %v1223_v31, 5  ;;  %v9519_v53 = vcombine.low %v1507_v40, %v1510_v33  ;;  %v1229_v32 = vrot.slane %v1227_v1, 4  ;;  %v1390_v18 = vld [vmem:[#allocation2 + $0x6c] sm:$0xe]  ;;  %v314_v59 = vld [vmem:[#allocation2 + $0x84] sm:$0x1] }
  0xd8   : > { %v9503_v50 = vcombine.low %v1202_v49, %v1212_v13  ;;  %v1220_v17 = vor.u32 %v1219_v56, %v1216_v45  ;;  %v1235_v51 = vrot.slane %v1233_v37, 5  ;;  %v668_v44 = vrot.slane %v666_v34, 7  ;;  %v11273_v31 = vld [vmem:[#allocation6 + $0x180] sm:$0xff]   ;;  %v12386_v56 = vld [vmem:[#allocation6 + $0x238] sm:$0xff]   ;;  %v364_v33 = vld [vmem:[#allocation2 + $0x8c] sm:$0x1] }
  0xd9   : > { %v669_v4 = vshll.u32 %v12177_v22, 16  ;;  %v12382_v35 = vpack.c.bf16 %v405_v21, %v405_v21  ;;  %v1230_v29 = vor.u32 %v1229_v32, %v1225_v0  ;;  %v674_v49 = vshrl.u32 %v12324_v15, 16  ;;  %v317_v37 = vld [vmem:[#allocation2 + $0x90] sm:$0x1]  ;;  %10415 = vmatpush3.bf16.msra.mxu1 %v11273_v31  ;;  %11008 = vmatprep.subr.bf16.mxu0 %v12386_v56 }
  0xda   : > { %4080 = vmatprep.mubr.bf16.mxu0 %v9503_v50  ;;  %4242 = vmatmul.mubr.bf16.gmra.mxu1 %v9519_v53  ;;  %v1221_v40 = vrot.slane %v1220_v17, 4  ;;  %v677_v45 = vshll.u32 %v12324_v15, 16  ;;  %v672_v26 = vrot.slane %v668_v44, 4  ;;  %v1513_v22 = vrot.slane %v12361_v11, 5 }
  0xdb   : > { %v671_v34 = vor.u32 %v669_v4, %v668_v44  ;;  %v1231_v13 = vrot.slane %v1230_v29, 4  ;;  %v12392_v17 = vrot.slane %v674_v49, 7  ;;  %v9440_v32 = vrot.slane %v1390_v18, 9  ;;  %v320_v18 = vld [vmem:[#allocation2 + $0x9c] sm:$0x1] }
  0xdc   : > { %4081 = vmatmul.mubr.bf16.gmra.mxu0 %v9487_v27  ;;  %v1226_v21 = vsel %vm11878_vm10, %v1221_v40, %v1225_v0  ;;  %v9488_v15 = vcombine.low %v12359_v38, %v12361_v11  ;;  %v1516_v50 = vrot.slane %v12363_v8, 5  ;;  %v362_v27 = vsel %vm11892_vm11, 0, %v361_v10  ;;  %v367_v11 = vld [vmem:[#allocation2 + $0x98] sm:$0x1] }
  0xdd   : > { %v898_v44 = vsel %vm11916_vm14, %v671_v34, %v897_v23  ;;  %v1236_v0 = vsel %vm11878_vm10, %v1231_v13, %v1235_v51  ;;  %v679_v53 = vor.u32 %v677_v45, %v12392_v17  ;;  %v1515_v63 = vrot.slane %v1513_v22, 4  ;;  %363 = vst [vmem:[#allocation2 + $0x80] sm:$0x1] %v362_v27 }
  0xde   : > { %899 = vst [vmem:[#allocation2 + $0x78] sm:$0xf] %v898_v44  ;;  %v315_v38 = vsel %vm11871_vm8, 0, %v314_v59  ;;  %v9504_v23 = vcombine.low %v1226_v21, %v1236_v0  ;;  %v681_v8 = vrot.slane %v12392_v17, 4  ;;  %v683_v10 = vshrl.u32 %v12326_v52, 16  ;;  %v406_v21 = vld [vmem:[%s11849_s30 + $0xc0] sm:$0xff] }
  0xdf   : > { %316 = vst [vmem:[#allocation2 + $0x84] sm:$0x1] %v315_v38  ;;  %v686_v4 = vshll.u32 %v12326_v52, 16  ;;  %v680_v51 = vsel %vm11904_vm13, %v672_v26, %v679_v53  ;;  %v12414_v31 = vsel %vm11898_vm12, %v9440_v32, %v1513_v22  ;;  %v691_v59 = vshrl.u32 %v12346_v42, 16  ;;  %v408_v0 = vld [vmem:[%s11849_s30 + $0xd0] sm:$0xff]  ;;  %v409_v53 = vld [vmem:[%s11849_s30 + $0xd8] sm:$0xff] }
  0xe0   : > { %v694_v40 = vshll.u32 %v12346_v42, 16  ;;  %4088 = vmatprep.mubr.bf16.mxu0 %v9504_v23  ;;  %900 = vst [vmem:[#allocation2 + $0x7c] sm:$0xf] %v680_v51  ;;  %v685_v29 = vrot.slane %v683_v10, 7  ;;  %v365_v52 = vsel %vm11892_vm11, 0, %v364_v33  ;;  %v318_v49 = vsel %vm11871_vm8, 0, %v317_v37 }
  0xe1   : > { %v700_v45 = vshrl.u32 %v12352_v57, 16  ;;  %v12425_v34 = vsel %vm11898_vm12, %v1515_v63, %v1516_v50  ;;  %v693_v26 = vrot.slane %v691_v59, 7  ;;  %366 = vst [vmem:[#allocation2 + $0x8c] sm:$0x1] %v365_v52  ;;  %319 = vst [vmem:[#allocation2 + $0x90] sm:$0x1] %v318_v49  ;;  %v12445_v10 = vpack.c.bf16 %v406_v21, %v406_v21 }
  0xe2   : > { %v703_v42 = vshll.u32 %v12352_v57, 16  ;;  %v708_v22 = vshrl.u32 %v12382_v35, 16  ;;  %v688_v13 = vor.u32 %v686_v4, %v685_v29  ;;  %v689_v17 = vrot.slane %v685_v29, 4  ;;  %v407_v37 = vld [vmem:[%s11849_s30 + $0xc8] sm:$0xff] }
  0xe3   : > { %v702_v32 = vrot.slane %v700_v45, 7  ;;  %v368_v33 = vsel %vm11892_vm11, 0, %v367_v11  ;;  %v696_v44 = vor.u32 %v694_v40, %v693_v26  ;;  %v711_v27 = vshll.u32 %v12382_v35, 16 }
  0xe4   : > { %4089 = vmatmul.mubr.bf16.gmra.mxu0 %v9488_v15  ;;  %v12433_v50 = vrot.slane %v708_v22, 7  ;;  %369 = vst [vmem:[#allocation2 + $0x98] sm:$0x1] %v368_v33  ;;  %v321_v57 = vsel %vm11871_vm8, 0, %v320_v18  ;;  %v9520_v38 = vcombine.low %v12414_v31, %v12425_v34  ;;  %v901_v23 = vld [vmem:[#allocation2 + $0x80] sm:$0x1]  ;;  %v12452_v40 = vpack.c.bf16 %v407_v37, %v407_v37 }
  0xe5   : > { %v12443_v11 = vld [vmem:[#allocation2 + $0x78] sm:$0xf]  ;;  %v698_v15 = vrot.slane %v693_v26, 4  ;;  %322 = vst [vmem:[#allocation2 + $0x9c] sm:$0x1] %v321_v57  ;;  %v902_v35 = vsel %vm11871_vm8, %v681_v8, %v901_v23  ;;  %v705_v59 = vor.u32 %v703_v42, %v702_v32  ;;  %v697_v29 = vsel %vm11904_vm13, %v689_v17, %v696_v44 }
  0xe6   : > { %v12447_v4 = vld [vmem:[#allocation2 + $0x78] sm:$0xf]  ;;  %v1238_v18 = vshrl.u32 %v12443_v11, 16  ;;  %v904_v51 = vld [vmem:[#allocation2 + $0x84] sm:$0xf]  ;;  %v1241_v31 = vshll.u32 %v12443_v11, 16  ;;  %v713_v42 = vor.u32 %v711_v27, %v12433_v50  ;;  %v12462_v22 = vpack.c.bf16 %v408_v0, %v408_v0 }
  0xe7   : > { %903 = vst [vmem:[#allocation2 + $0x80] sm:$0x1] %v902_v35  ;;  %v905_v52 = vsel %vm11916_vm14, %v688_v13, %v904_v51  ;;  %v1391_v49 = vld [vmem:[#allocation2 + $0x78] sm:$0xe]  ;;  %v706_v45 = vrot.slane %v702_v32, 4  ;;  %v12464_v21 = vpack.c.bf16 %v409_v53, %v409_v53  ;;  %v9447_v25 = vrot.slane %v1992_v9, 9 }
  0xe8   : > { %v1579_v34 = vld [vmem:[#allocation2 + $0x7c] sm:$0xf]  ;;  %v1240_v8 = vrot.slane %v1238_v18, 4  ;;  %906 = vst [vmem:[#allocation2 + $0x84] sm:$0xf] %v905_v52  ;;  %v1243_v33 = vrot.slane %v1241_v31, 5 }
  0xe9   : > { %v12459_v26 = vld [vmem:[#allocation2 + $0x7c] sm:$0xf]  ;;  %907 = vst [vmem:[#allocation2 + $0x88] sm:$0xf] %v697_v29  ;;  %v9536_v17 = vcombine.low %v12447_v4, %v1579_v34  ;;  %v908_v37 = vld [vmem:[#allocation2 + $0x8c] sm:$0x1]  ;;  %v714_v27 = vsel %vm11904_vm13, %v706_v45, %v713_v42 }
  0xea   : > { %v1247_v13 = vshll.u32 %v12459_v26, 16  ;;  %v1251_v32 = vshrl.u32 %v12459_v26, 16  ;;  %v370_v44 = vld [vmem:[#allocation2 + $0xa4] sm:$0x1]  ;;  %v9441_v57 = vrot.slane %v1391_v49, 9  ;;  %v1520_v23 = vrot.slane %v12459_v26, 5 }
  0xeb   : > { %v909_v35 = vsel %vm11871_vm8, %v698_v15, %v908_v37  ;;  %v911_v0 = vld [vmem:[#allocation2 + $0x90] sm:$0xf]  ;;  %v410_v53 = vld [vmem:[%s11849_s30 + $0xe0] sm:$0xff]  ;;  %4249 = vmatprep.mubr.bf16.mxu1 %v9536_v17  ;;  %v1244_v18 = vor.u32 %v1243_v33, %v1240_v8  ;;  %v715_v29 = vrot.slane %v12433_v50, 4  ;;  %914 = vst [vmem:[#allocation2 + $0x94] sm:$0xf] %v714_v27 }
  0xec   : > { %v1249_v51 = vrot.slane %v1247_v13, 5  ;;  %v1253_v31 = vrot.slane %v1251_v32, 4  ;;  %910 = vst [vmem:[#allocation2 + $0x8c] sm:$0x1] %v909_v35  ;;  %v915_v52 = vld [vmem:[#allocation2 + $0x98] sm:$0x1]  ;;  %4250 = vmatmul.mubr.bf16.gmra.mxu1 %v9520_v38  ;;  %v912_v15 = vsel %vm11916_vm14, %v705_v59, %v911_v0  ;;  %v12484_v50 = vpack.c.bf16 %v410_v53, %v410_v53 }
  0xed   : > { %v717_v45 = vshrl.u32 %v12445_v10, 16  ;;  %v1245_v42 = vrot.slane %v1244_v18, 4  ;;  %913 = vst [vmem:[#allocation2 + $0x90] sm:$0xf] %v912_v15  ;;  %v916_v17 = vsel %vm11871_vm8, %v715_v29, %v915_v52  ;;  %v411_v33 = vld [vmem:[%s11849_s30 + $0xe8] sm:$0xff]  ;;  %v1522_v32 = vrot.slane %v1520_v23, 4 }
  0xee   : > { %v1254_v8 = vor.u32 %v1253_v31, %v1249_v51  ;;  %v988_v13 = vld [vmem:[#allocation2 + $0x80] sm:$0x1]  ;;  %917 = vst [vmem:[#allocation2 + $0x98] sm:$0x1] %v916_v17  ;;  %v720_v38 = vshll.u32 %v12445_v10, 16  ;;  %v371_v59 = vsel %vm11892_vm11, 0, %v370_v44  ;;  %v9489_v0 = vcombine.low %v12443_v11, %v12459_v26 }
  0xef   : > { %v12486_v37 = vrot.slane %v717_v45, 7  ;;  %v1257_v27 = vshll.u32 %v988_v13, 16  ;;  %v12493_v18 = vld [vmem:[#allocation2 + $0x84] sm:$0xf]  ;;  %v1521_v53 = vsel %vm11898_vm12, %v9441_v57, %v1520_v23  ;;  %372 = vst [vmem:[#allocation2 + $0xa4] sm:$0x1] %v371_v59  ;;  %v1250_v45 = vsel %vm11878_vm10, %v1245_v42, %v1249_v51 }
  0xf0   : > { %v1255_v35 = vrot.slane %v1254_v8, 4  ;;  %v1581_v31 = vld [vmem:[#allocation2 + $0x88] sm:$0xf]  ;;  %v1523_v52 = vrot.slane %v988_v13, 5  ;;  %v12498_v15 = vld [vmem:[#allocation2 + $0x84] sm:$0xf]  ;;  %v12512_v34 = vpack.c.bf16 %v411_v33, %v411_v33 }
  0xf1   : > { %v9537_v29 = vcombine.low %v12493_v18, %v1581_v31  ;;  %v725_v10 = vshrl.u32 %v12452_v40, 16  ;;  %v728_v44 = vshll.u32 %v12452_v40, 16  ;;  %v1259_v11 = vrot.slane %v1257_v27, 5  ;;  %v12504_v26 = vld [vmem:[#allocation2 + $0x88] sm:$0xf] }
  0xf2   : > { %v1262_v8 = vshrl.u32 %v12498_v15, 16  ;;  %v1265_v57 = vshll.u32 %v12498_v15, 16  ;;  %v1524_v23 = vsel %vm11898_vm12, %v1522_v32, %v1523_v52  ;;  %v1271_v13 = vshll.u32 %v12504_v26, 16  ;;  %v1583_v31 = vld [vmem:[#allocation2 + $0x94] sm:$0xf] }
  0xf3   : > { %4257 = vmatprep.mubr.bf16.mxu1 %v9537_v29  ;;  %v989_v17 = vld [vmem:[#allocation2 + $0x8c] sm:$0x1]  ;;  %v1275_v59 = vshrl.u32 %v12504_v26, 16  ;;  %v1260_v51 = vsel %vm11878_vm10, %v1255_v35, %v1259_v11  ;;  %v9521_v42 = vcombine.low %v1521_v53, %v1524_v23  ;;  %v1392_v63 = vld [vmem:[#allocation2 + $0x84] sm:$0xe]  ;;  %v9490_v14 = vcombine.low %v12498_v15, %v12504_v26 }
  0xf4   : > { %v1264_v27 = vrot.slane %v1262_v8, 4  ;;  %v1267_v49 = vrot.slane %v1265_v57, 5  ;;  %v9505_v1 = vcombine.low %v1250_v45, %v1260_v51  ;;  %v1273_v29 = vrot.slane %v1271_v13, 5  ;;  %v12516_v32 = vld [vmem:[#allocation2 + $0x90] sm:$0xf] }
  0xf5   : > { %v1277_v19 = vrot.slane %v1275_v59, 4  ;;  %v1281_v24 = vshll.u32 %v989_v17, 16  ;;  %4258 = vmatmul.mubr.bf16.gmra.mxu1 %v9521_v42  ;;  %v9538_v33 = vcombine.low %v12516_v32, %v1583_v31  ;;  %v12521_v28 = vld [vmem:[#allocation2 + $0x90] sm:$0xf]  ;;  %v12523_v35 = vld [vmem:[#allocation2 + $0x94] sm:$0xf]  ;;  %v722_v53 = vor.u32 %v720_v38, %v12486_v37 }
  0xf6   : > { %v1268_v52 = vor.u32 %v1267_v49, %v1264_v27  ;;  %4096 = vmatprep.mubr.bf16.mxu0 %v9505_v1  ;;  %v9442_v8 = vrot.slane %v1392_v63, 9  ;;  %v1527_v57 = vrot.slane %v12504_v26, 5  ;;  %v1530_v49 = vrot.slane %v989_v17, 5  ;;  %v990_v13 = vld [vmem:[#allocation2 + $0x98] sm:$0x1] }
  0xf7   : > { %v1278_v45 = vor.u32 %v1277_v19, %v1273_v29  ;;  %v1283_v11 = vrot.slane %v1281_v24, 5  ;;  %4097 = vmatmul.mubr.bf16.gmra.mxu0 %v9489_v0  ;;  %4265 = vmatprep.mubr.bf16.mxu1 %v9538_v33  ;;  %v1286_v15 = vshrl.u32 %v12521_v28, 16  ;;  %v1289_v59 = vshll.u32 %v12521_v28, 16  ;;  %v918_v24 = vld [vmem:[#allocation2 + $0x9c] sm:$0xf] }
  0xf8   : > { %v1269_v23 = vrot.slane %v1268_v52, 4  ;;  %v1528_v51 = vsel %vm11898_vm12, %v9442_v8, %v1527_v57  ;;  %v1529_v38 = vrot.slane %v1527_v57, 4  ;;  %v1295_v19 = vshll.u32 %v12523_v35, 16  ;;  %v1393_v17 = vld [vmem:[#allocation2 + $0x90] sm:$0xe] }
  0xf9   : > { %v1279_v31 = vrot.slane %v1278_v45, 4  ;;  %v1288_v63 = vrot.slane %v1286_v15, 4  ;;  %v1291_v0 = vrot.slane %v1289_v59, 5  ;;  %v1299_v26 = vshrl.u32 %v12523_v35, 16  ;;  %v323_v59 = vld [vmem:[#allocation2 + $0xa8] sm:$0x1] }
  0xfa   : > { %v1274_v1 = vsel %vm11878_vm10, %v1269_v23, %v1273_v29  ;;  %v1531_v27 = vsel %vm11898_vm12, %v1529_v38, %v1530_v49  ;;  %v1297_v52 = vrot.slane %v1295_v19, 5  ;;  %v1305_v33 = vshll.u32 %v990_v13, 16 }
  0xfb   : > { %v1284_v42 = vsel %vm11878_vm10, %v1279_v31, %v1283_v11  ;;  %v9522_v8 = vcombine.low %v1528_v51, %v1531_v27  ;;  %v1292_v57 = vor.u32 %v1291_v0, %v1288_v63  ;;  %v1301_v55 = vrot.slane %v1299_v26, 4  ;;  %v922_v51 = vld [vmem:[#allocation2 + $0xa4] sm:$0x1] }
  0xfc   : > { %v9506_v45 = vcombine.low %v1274_v1, %v1284_v42  ;;  %v1307_v29 = vrot.slane %v1305_v33, 5  ;;  %v723_v23 = vrot.slane %v12486_v37, 4  ;;  %v727_v15 = vrot.slane %v725_v10, 7 }
  0xfd   : > { %4266 = vmatmul.mubr.bf16.gmra.mxu1 %v9522_v8  ;;  %v1293_v11 = vrot.slane %v1292_v57, 4  ;;  %v1302_v31 = vor.u32 %v1301_v55, %v1297_v52  ;;  %v919_v49 = vsel %vm11916_vm14, %v722_v53, %v918_v24  ;;  %v9443_v38 = vrot.slane %v1393_v17, 9  ;;  %v373_v24 = vld [vmem:[#allocation2 + $0xb0] sm:$0x1] }
  0xfe   : > { %4104 = vmatprep.mubr.bf16.mxu0 %v9506_v45  ;;  %v730_v19 = vor.u32 %v728_v44, %v727_v15  ;;  %v732_v1 = vrot.slane %v727_v15, 4  ;;  %920 = vst [vmem:[#allocation2 + $0x9c] sm:$0xf] %v919_v49  ;;  %v1534_v37 = vrot.slane %v12523_v35, 5  ;;  %v1537_v63 = vrot.slane %v990_v13, 5  ;;  %v412_v49 = vld [vmem:[%s11849_s30 + $0xf0] sm:$0xff] }
  0xff   : > { %4105 = vmatmul.mubr.bf16.gmra.mxu0 %v9490_v14  ;;  %v1298_v10 = vsel %vm11878_vm10, %v1293_v11, %v1297_v52  ;;  %v1303_v0 = vrot.slane %v1302_v31, 4  ;;  %v324_v55 = vsel %vm11871_vm8, 0, %v323_v59  ;;  %v734_v53 = vshrl.u32 %v12462_v22, 16  ;;  %v326_v52 = vld [vmem:[#allocation2 + $0xb4] sm:$0x1] }
 0x100   : > { %v731_v40 = vsel %vm11904_vm13, %v723_v23, %v730_v19  ;;  %v12557_v44 = vsel %vm11898_vm12, %v9443_v38, %v1534_v37  ;;  %v1536_v26 = vrot.slane %v1534_v37, 4  ;;  %v923_v14 = vsel %vm11871_vm8, %v732_v1, %v922_v51  ;;  %325 = vst [vmem:[#allocation2 + $0xa8] sm:$0x1] %v324_v55 }
 0x101   : > { %v1308_v13 = vsel %vm11878_vm10, %v1303_v0, %v1307_v29  ;;  %921 = vst [vmem:[#allocation2 + $0xa0] sm:$0xf] %v731_v40  ;;  %924 = vst [vmem:[#allocation2 + $0xa4] sm:$0x1] %v923_v14  ;;  %v736_v17 = vrot.slane %v734_v53, 7  ;;  %v737_v42 = vshll.u32 %v12462_v22, 16  ;;  %v9491_v23 = vcombine.low %v12521_v28, %v12523_v35 }
 0x102   : > { %v742_v27 = vshrl.u32 %v12464_v21, 16  ;;  %v9507_v33 = vcombine.low %v1298_v10, %v1308_v13  ;;  %v1538_v45 = vsel %vm11898_vm12, %v1536_v26, %v1537_v63  ;;  %v745_v8 = vshll.u32 %v12464_v21, 16 }
 0x103   : > { %v374_v57 = vsel %vm11892_vm11, 0, %v373_v24  ;;  %v740_v15 = vrot.slane %v736_v17, 4  ;;  %v739_v59 = vor.u32 %v737_v42, %v736_v17  ;;  %v327_v11 = vsel %vm11871_vm8, 0, %v326_v52 }
 0x104   : > { %v744_v22 = vrot.slane %v742_v27, 7  ;;  %375 = vst [vmem:[#allocation2 + $0xb0] sm:$0x1] %v374_v57  ;;  %4112 = vmatprep.mubr.bf16.mxu0 %v9507_v33  ;;  %v751_v31 = vshrl.u32 %v12484_v50, 16  ;;  %v759_v21 = vshrl.u32 %v12512_v34, 16  ;;  %v9523_v28 = vcombine.low %v12557_v44, %v1538_v45 }
 0x105   : > { %v1584_v19 = vld [vmem:[#allocation2 + $0x9c] sm:$0xf]  ;;  %328 = vst [vmem:[#allocation2 + $0xb4] sm:$0x1] %v327_v11  ;;  %v754_v55 = vshll.u32 %v12484_v50, 16  ;;  %v762_v44 = vshll.u32 %v12512_v34, 16  ;;  %v12595_v50 = vpack.c.bf16 %v412_v49, %v412_v49 }
 0x106   : > { %v12581_v35 = vld [vmem:[#allocation2 + $0x9c] sm:$0xf]  ;;  %v747_v1 = vor.u32 %v745_v8, %v744_v22  ;;  %v749_v10 = vrot.slane %v744_v22, 4  ;;  %v1897_v53 = vshrl.u32 %v1584_v19, 16  ;;  %v753_v42 = vrot.slane %v751_v31, 7 }
 0x107   : > { %v1310_v37 = vshrl.u32 %v12581_v35, 16  ;;  %v1313_v63 = vshll.u32 %v12581_v35, 16  ;;  %v1394_v0 = vld [vmem:[#allocation2 + $0x9c] sm:$0xe]  ;;  %4113 = vmatmul.mubr.bf16.gmra.mxu0 %v9491_v23  ;;  %v925_v40 = vld [vmem:[#allocation2 + $0xa8] sm:$0xf] }
 0x108   : > { %v748_v24 = vsel %vm11904_vm13, %v740_v15, %v747_v1  ;;  %v9444_v26 = vrot.slane %v1394_v0, 9  ;;  %v1585_v14 = vld [vmem:[#allocation2 + $0xa0] sm:$0xf]  ;;  %v926_v17 = vsel %vm11916_vm14, %v739_v59, %v925_v40  ;;  %v12593_v27 = vrot.slane %v759_v21, 7  ;;  %v991_v33 = vld [vmem:[#allocation2 + $0xa4] sm:$0x1] }
 0x109   : > { %v12589_v13 = vld [vmem:[#allocation2 + $0xa0] sm:$0xf]  ;;  %928 = vst [vmem:[#allocation2 + $0xac] sm:$0xf] %v748_v24  ;;  %v9539_v52 = vcombine.low %v1584_v19, %v1585_v14  ;;  %v1312_v45 = vrot.slane %v1310_v37, 4  ;;  %v1315_v8 = vrot.slane %v1313_v63, 5 }
 0x10a   : > { %v1319_v57 = vshll.u32 %v12589_v13, 16  ;;  %927 = vst [vmem:[#allocation2 + $0xa8] sm:$0xf] %v926_v17  ;;  %v1900_v34 = vshll.u32 %v1584_v19, 16  ;;  %v1323_v23 = vshrl.u32 %v12589_v13, 16  ;;  %v1329_v15 = vshll.u32 %v991_v33, 16 }
 0x10b   : > { %v1541_v22 = vrot.slane %v12589_v13, 5  ;;  %v929_v59 = vld [vmem:[#allocation2 + $0xb0] sm:$0x1]  ;;  %4273 = vmatprep.mubr.bf16.mxu1 %v9539_v52  ;;  %v1316_v11 = vor.u32 %v1315_v8, %v1312_v45  ;;  %v1544_v21 = vrot.slane %v991_v33, 5  ;;  %v376_v1 = vld [vmem:[#allocation2 + $0xbc] sm:$0x1]  ;;  %v756_v17 = vor.u32 %v754_v55, %v753_v42 }
 0x10c   : > { %v1321_v31 = vrot.slane %v1319_v57, 5  ;;  %v930_v49 = vsel %vm11871_vm8, %v749_v10, %v929_v59  ;;  %v12602_v37 = vrot.slane %v1897_v53, 4  ;;  %4274 = vmatmul.mubr.bf16.gmra.mxu1 %v9523_v28  ;;  %v1325_v63 = vrot.slane %v1323_v23, 4  ;;  %v932_v24 = vld [vmem:[#allocation2 + $0xb4] sm:$0xf] }
 0x10d   : > { %v1542_v19 = vsel %vm11898_vm12, %v9444_v26, %v1541_v22  ;;  %v1543_v0 = vrot.slane %v1541_v22, 4  ;;  %931 = vst [vmem:[#allocation2 + $0xb0] sm:$0x1] %v930_v49  ;;  %v413_v40 = vld [vmem:[%s11849_s30 + $0xf8] sm:$0xff]  ;;  %v1317_v14 = vrot.slane %v1316_v11, 4  ;;  %v757_v52 = vrot.slane %v753_v42, 4 }
 0x10e   : > { %16485 = vst [vmem:[#allocation19_spill] sm:$0xff] %v12602_v37  ;;  %v764_v33 = vor.u32 %v762_v44, %v12593_v27  ;;  %v1326_v45 = vor.u32 %v1325_v63, %v1321_v31  ;;  %v1331_v8 = vrot.slane %v1329_v15, 5  ;;  %v377_v28 = vsel %vm11892_vm11, 0, %v376_v1 }
 0x10f   : > { %v1545_v10 = vsel %vm11898_vm12, %v1543_v0, %v1544_v21  ;;  %v12612_v53 = vrot.slane %v1900_v34, 5  ;;  %v933_v55 = vsel %vm11916_vm14, %v756_v17, %v932_v24  ;;  %378 = vst [vmem:[#allocation2 + $0xbc] sm:$0x1] %v377_v28  ;;  %v12620_v44 = vpack.c.bf16 %v413_v40, %v413_v40  ;;  %v329_v24 = vld [vmem:[#allocation2 + $0xc0] sm:$0x1] }
 0x110   : > { %v1587_v26 = vld [vmem:[#allocation2 + $0xac] sm:$0xf]  ;;  %v765_v23 = vsel %vm11904_vm13, %v757_v52, %v764_v33  ;;  %v1322_v42 = vsel %vm11878_vm10, %v1317_v14, %v1321_v31  ;;  %v1327_v15 = vrot.slane %v1326_v45, 4  ;;  %v9524_v59 = vcombine.low %v1542_v19, %v1545_v10  ;;  %934 = vst [vmem:[#allocation2 + $0xb4] sm:$0xf] %v933_v55 }
 0x111   : > { %16486 = vst [vmem:[#allocation20_spill] sm:$0xff] %v12612_v53  ;;  %v12614_v57 = vld [vmem:[#allocation2 + $0xac] sm:$0xf]  ;;  %v1586_v22 = vld [vmem:[#allocation2 + $0xa8] sm:$0xf]  ;;  %v9492_v21 = vcombine.low %v12581_v35, %v12589_v13  ;;  %v766_v35 = vrot.slane %v12593_v27, 4 }
 0x112   : > { %v12624_v34 = vld [vmem:[#allocation2 + $0xa8] sm:$0xf]  ;;  %v1343_v11 = vshll.u32 %v12614_v57, 16  ;;  %935 = vst [vmem:[#allocation2 + $0xb8] sm:$0xf] %v765_v23  ;;  %v1921_v49 = vshrl.u32 %v1586_v22, 16  ;;  %v9540_v1 = vcombine.low %v1586_v22, %v1587_v26  ;;  %v1332_v31 = vsel %vm11878_vm10, %v1327_v15, %v1331_v8 }
 0x113   : > { %v1334_v63 = vshrl.u32 %v12624_v34, 16  ;;  %v1395_v0 = vld [vmem:[#allocation2 + $0xa8] sm:$0xe]  ;;  %v1337_v19 = vshll.u32 %v12624_v34, 16  ;;  %v1347_v14 = vshrl.u32 %v12614_v57, 16  ;;  %v9508_v17 = vcombine.low %v1322_v42, %v1332_v31 }
 0x114   : > { %v1345_v40 = vrot.slane %v1343_v11, 5  ;;  %v1924_v52 = vshll.u32 %v1586_v22, 16  ;;  %4281 = vmatprep.mubr.bf16.mxu1 %v9540_v1  ;;  %v992_v33 = vld [vmem:[#allocation2 + $0xb0] sm:$0x1]  ;;  %v1621_v8 = vsel %vm11878_vm10, %v11992_v2, %v11983_v46  ;;  %v9445_v26 = vrot.slane %v1395_v0, 9 }
 0x115   : > { %v1336_v45 = vrot.slane %v1334_v63, 4  ;;  %4282 = vmatmul.mubr.bf16.gmra.mxu1 %v9524_v59  ;;  %v1339_v13 = vrot.slane %v1337_v19, 5  ;;  %v1349_v10 = vrot.slane %v1347_v14, 4  ;;  %v1353_v28 = vshll.u32 %v992_v33, 16  ;;  %4120 = vmatprep.mubr.bf16.mxu0 %v9508_v17 }
 0x116   : > { %v1548_v23 = vrot.slane %v12614_v57, 5  ;;  %v1551_v55 = vrot.slane %v992_v33, 5  ;;  %v330_v42 = vsel %vm11871_vm8, 0, %v329_v24  ;;  %4121 = vmatmul.mubr.bf16.gmra.mxu0 %v9492_v21  ;;  %v12642_v15 = vrot.slane %v1921_v49, 4  ;;  %v936_v11 = vld [vmem:[#allocation2 + $0xbc] sm:$0x1] }
 0x117   : > { %v1340_v27 = vor.u32 %v1339_v13, %v1336_v45  ;;  %v1350_v22 = vor.u32 %v1349_v10, %v1345_v40  ;;  %v1355_v59 = vrot.slane %v1353_v28, 5  ;;  %331 = vst [vmem:[#allocation2 + $0xc0] sm:$0x1] %v330_v42  ;;  %v12644_v1 = vrot.slane %v1924_v52, 5  ;;  %v12648_v0 = vld [vmem:[#allocation2 + $0xb4] sm:$0xf] }
 0x118   : > { %16487 = vst [vmem:[#allocation21_spill] sm:$0xff] %v12642_v15  ;;  %v9493_v63 = vcombine.low %v12624_v34, %v12614_v57  ;;  %v1550_v19 = vrot.slane %v1548_v23, 4  ;;  %v937_v24 = vsel %vm11871_vm8, %v766_v35, %v936_v11  ;;  %v1549_v14 = vsel %vm11898_vm12, %v9445_v26, %v1548_v23  ;;  %v12654_v17 = vld [vmem:[#allocation2 + $0xb4] sm:$0xf]  ;;  %v12670_v11 = vld [vmem:[#allocation2 + $0x18] sm:$0xf] }
 0x119   : > { %16488 = vst [vmem:[#allocation22_spill] sm:$0xff] %v12644_v1  ;;  %v1589_v31 = vld [vmem:[#allocation2 + $0xb8] sm:$0xf]  ;;  %v1341_v21 = vrot.slane %v1340_v27, 4  ;;  %v1351_v49 = vrot.slane %v1350_v22, 4  ;;  %v768_v52 = vshrl.u32 %v12595_v50, 16 }
 0x11a   : > { %938 = vst [vmem:[#allocation2 + $0xbc] sm:$0x1] %v937_v24  ;;  %v9541_v33 = vcombine.low %v12648_v0, %v1589_v31  ;;  %v1552_v57 = vsel %vm11898_vm12, %v1550_v19, %v1551_v55  ;;  %v12660_v34 = vld [vmem:[#allocation2 + $0xb8] sm:$0xf]  ;;  %v1358_v45 = vshrl.u32 %v12654_v17, 16  ;;  %v1361_v35 = vshll.u32 %v12654_v17, 16 }
 0x11b   : > { %v1346_v13 = vsel %vm11878_vm10, %v1341_v21, %v1345_v40  ;;  %v1356_v10 = vsel %vm11878_vm10, %v1351_v49, %v1355_v59  ;;  %v1945_v28 = vshrl.u32 %v12648_v0, 16  ;;  %v771_v26 = vshll.u32 %v12595_v50, 16  ;;  %v1592_v22 = vld [vmem:[#allocation2 + $0x14] sm:$0x1]  ;;  %v12675_v59 = vld [vmem:[#allocation2 + $0x1c] sm:$0xf] }
 0x11c   : > { %v9509_v23 = vcombine.low %v1346_v13, %v1356_v10  ;;  %4289 = vmatprep.mubr.bf16.mxu1 %v9541_v33  ;;  %v9525_v42 = vcombine.low %v1549_v14, %v1552_v57  ;;  %v1360_v55 = vrot.slane %v1358_v45, 4  ;;  %v1363_v27 = vrot.slane %v1361_v35, 5  ;;  %v1396_v33 = vld [vmem:[#allocation2 + $0xb4] sm:$0xe] }
 0x11d   : > { %v1948_v31 = vshll.u32 %v12648_v0, 16  ;;  %v1367_v19 = vshll.u32 %v12660_v34, 16  ;;  %v1371_v40 = vshrl.u32 %v12660_v34, 16  ;;  %v770_v24 = vrot.slane %v768_v52, 7 }
 0x11e   : > { %4128 = vmatprep.mubr.bf16.mxu0 %v9509_v23  ;;  %4290 = vmatmul.mubr.bf16.gmra.mxu1 %v9525_v42  ;;  %v1364_v50 = vor.u32 %v1363_v27, %v1360_v55  ;;  %v776_v21 = vshrl.u32 %v12620_v44, 16  ;;  %v779_v49 = vshll.u32 %v12620_v44, 16  ;;  %v939_v14 = vld [vmem:[#allocation2 + $0xc0] sm:$0xf]  ;;  %v9575_v57 = vcombine.low %v12670_v11, %v12675_v59 }
 0x11f   : > { %4129 = vmatmul.mubr.bf16.gmra.mxu0 %v9493_v63  ;;  %v1369_v45 = vrot.slane %v1367_v19, 5  ;;  %v1373_v35 = vrot.slane %v1371_v40, 4  ;;  %v773_v13 = vor.u32 %v771_v26, %v770_v24  ;;  %v774_v10 = vrot.slane %v770_v24, 4 }
 0x120   : > { %v1365_v51 = vrot.slane %v1364_v50, 4  ;;  %v12681_v38 = vrot.slane %v776_v21, 7  ;;  %v1555_v23 = vrot.slane %v12660_v34, 5  ;;  %v1628_v42 = vshll.u32 %v1592_v22, 16 }
 0x121   : > { %v993_v52 = vld [vmem:[#allocation2 + $0xbc] sm:$0x1]  ;;  %v1374_v55 = vor.u32 %v1373_v35, %v1369_v45  ;;  %v940_v44 = vsel %vm11916_vm14, %v773_v13, %v939_v14  ;;  %v9446_v29 = vrot.slane %v1396_v33, 9  ;;  %v12686_v7 = vrot.slane %v1945_v28, 4  ;;  %v11418_v14 = vld [vmem:[#allocation2 + $0x10] sm:$0xf] }
 0x122   : > { %16489 = vst [vmem:[#allocation23_spill] sm:$0xff] %v12681_v38  ;;  %v1377_v27 = vshll.u32 %v993_v52, 16  ;;  %v1370_v63 = vsel %vm11878_vm10, %v1365_v51, %v1369_v45  ;;  %v781_v26 = vor.u32 %v779_v49, %v12681_v38  ;;  %941 = vst [vmem:[#allocation2 + $0xc0] sm:$0xf] %v940_v44  ;;  %v1558_v19 = vrot.slane %v993_v52, 5 }
 0x123   : > { %16490 = vst [vmem:[#allocation24_spill] sm:$0xff] %v12686_v7  ;;  %v1375_v40 = vrot.slane %v1374_v55, 4  ;;  %v1557_v50 = vrot.slane %v1555_v23, 4  ;;  %v1630_v21 = vrot.slane %v1628_v42, 5  ;;  %v2058_v33 = vrot.slane %v11418_v14, 5 }
 0x124   : > { %v1379_v24 = vrot.slane %v1377_v27, 5  ;;  %v782_v35 = vsel %vm11904_vm13, %v774_v10, %v781_v26  ;;  %v2061_v13 = vrot.slane %v1592_v22, 5  ;;  %v9494_v51 = vcombine.low %v12654_v17, %v12660_v34  ;;  %v2201_v45 = vld [vmem:[#allocation2 + $0x20] sm:$0x1]  ;;  %v1993_v42 = vld [vmem:[#allocation2 + $0x18] sm:$0xe] }
 0x125   : > { %942 = vst [vmem:[#allocation2 + $0xc4] sm:$0xf] %v782_v35  ;;  %v1556_v49 = vsel %vm11898_vm12, %v9446_v29, %v1555_v23  ;;  %v2218_v52 = vshrl.u32 %v12670_v11, 16  ;;  %v1559_v9 = vsel %vm11898_vm12, %v1557_v50, %v1558_v19  ;;  %v2059_v22 = vsel %vm11898_vm12, %v9447_v25, %v2058_v33  ;;  %v1593_v26 = vld [vmem:[#allocation2 + $0x20] sm:$0x1] }
 0x126   : > { %v1380_v28 = vsel %vm11878_vm10, %v1375_v40, %v1379_v24  ;;  %v2060_v10 = vrot.slane %v2058_v33, 4  ;;  %v1631_v17 = vsel %vm11878_vm10, %v11994_v6, %v1630_v21  ;;  %v2221_v27 = vshll.u32 %v12670_v11, 16  ;;  %v11419_v50 = vld [vmem:[#allocation2 + $0x1c] sm:$0xf] }
 0x127   : > { %v9510_v55 = vcombine.low %v1370_v63, %v1380_v28  ;;  %v2220_v34 = vrot.slane %v2218_v52, 4  ;;  %v2227_v29 = vshll.u32 %v12675_v59, 16  ;;  %v2231_v44 = vshrl.u32 %v12675_v59, 16 }
 0x128   : > { %v2062_v23 = vsel %vm11898_vm12, %v2060_v10, %v2061_v13  ;;  %v2237_v63 = vshll.u32 %v2201_v45, 16  ;;  %v9448_v19 = vrot.slane %v1993_v42, 9  ;;  %v2223_v40 = vrot.slane %v2221_v27, 5 }
 0x129   : > { %4136 = vmatprep.mubr.bf16.mxu0 %v9510_v55  ;;  %v9559_v25 = vcombine.low %v2059_v22, %v2062_v23  ;;  %v2229_v24 = vrot.slane %v2227_v29, 5  ;;  %v2065_v6 = vrot.slane %v11419_v50, 5  ;;  %v12714_v21 = vrot.slane %v1948_v31, 5  ;;  %v12717_v14 = vld [vmem:[#allocation2 + $0xc0] sm:$0xf] }
 0x12a   : > { %4137 = vmatmul.mubr.bf16.gmra.mxu0 %v9494_v51  ;;  %16492 = vst [vmem:[#allocation26_spill] sm:$0xff] %v12717_v14  ;;  %v9526_v33 = vcombine.low %v1556_v49, %v1559_v9  ;;  %v2233_v13 = vrot.slane %v2231_v44, 4  ;;  %v2224_v28 = vor.u32 %v2223_v40, %v2220_v34  ;;  %v2068_v52 = vrot.slane %v1593_v26, 5  ;;  %v12728_v9 = vld [vmem:[#allocation2 + $0x24] sm:$0xf] }
 0x12b   : > { %16491 = vst [vmem:[#allocation25_spill] sm:$0xff] %v12714_v21  ;;  %4338 = vmatprep.mubr.bf16.mxu0 %v9559_v25  ;;  %v2066_v51 = vsel %vm11898_vm12, %v9448_v19, %v2065_v6  ;;  %v2067_v45 = vrot.slane %v2065_v6, 4  ;;  %v9543_v0 = vcombine.low %v1621_v8, %v1631_v17  ;;  %v2239_v55 = vrot.slane %v2237_v63, 5  ;;  %v12737_v44 = vld [vmem:[#allocation2 + $0x28] sm:$0xf] }
 0x12c   : > { %v1591_v42 = vld [vmem:[#allocation2 + $0xc4] sm:$0xf]  ;;  %v2234_v31 = vor.u32 %v2233_v13, %v2229_v24  ;;  %v1635_v49 = vrot.slane %v1633_v12, 4  ;;  %v2225_v10 = vrot.slane %v2224_v28, 4  ;;  %v1638_v27 = vrot.slane %v1636_v48, 5  ;;  %v11277_v19 = vld [vmem:[#allocation6 + $0x230] sm:$0xff]  }
 0x12d   : > { %v9542_v22 = vcombine.low %v12717_v14, %v1591_v42  ;;  %v2069_v34 = vsel %vm11898_vm12, %v2067_v45, %v2068_v52  ;;  %v1642_v46 = vshll.u32 %v11419_v50, 16  ;;  %v1646_v2 = vshrl.u32 %v11419_v50, 16  ;;  %v2202_v40 = vld [vmem:[#allocation2 + $0x2c] sm:$0x1]  ;;  %v1994_v52 = vld [vmem:[#allocation2 + $0x24] sm:$0xe] }
 0x12e   : > { %v2235_v29 = vrot.slane %v2234_v31, 4  ;;  %v9560_v23 = vcombine.low %v2066_v51, %v2069_v34  ;;  %v2230_v8 = vsel %vm11878_vm10, %v2225_v10, %v2229_v24  ;;  %v1639_v12 = vor.u32 %v1638_v27, %v1635_v49  ;;  %v1594_v49 = vld [vmem:[#allocation2 + $0x2c] sm:$0x1]  ;;  %v1999_v14 = vld [vmem:[#allocation2 + $0x60] sm:$0xe] }
 0x12f   : > { %4297 = vmatprep.mubr.bf16.mxu1 %v9542_v22  ;;  %v1652_v17 = vshll.u32 %v1593_v26, 16  ;;  %v2242_v63 = vshrl.u32 %v12728_v9, 16  ;;  %v1644_v48 = vrot.slane %v1642_v46, 5  ;;  %v1648_v25 = vrot.slane %v1646_v2, 4  ;;  %v11420_v2 = vld [vmem:[#allocation2 + $0x28] sm:$0xf] }
 0x130   : > { %4298 = vmatmul.mubr.bf16.gmra.mxu1 %v9526_v33  ;;  %v2240_v60 = vsel %vm11878_vm10, %v2235_v29, %v2239_v55  ;;  %v2245_v50 = vshll.u32 %v12728_v9, 16  ;;  %v1640_v13 = vrot.slane %v1639_v12, 4  ;;  %v2251_v33 = vshll.u32 %v12737_v44, 16 }
 0x131   : > { %v9591_v6 = vcombine.low %v2230_v8, %v2240_v60  ;;  %v1654_v24 = vrot.slane %v1652_v17, 5  ;;  %v2244_v28 = vrot.slane %v2242_v63, 4  ;;  %v1649_v26 = vor.u32 %v1648_v25, %v1644_v48 }
 0x132   : > { %4339 = vmatmul.mubr.bf16.vlgmr.msra.gmra.mxu0 %v9543_v0  ;;  %v2247_v51 = vrot.slane %v2245_v50, 5  ;;  %v2255_v45 = vshrl.u32 %v12737_v44, 16  ;;  %v1645_v0 = vsel %vm11878_vm10, %v1640_v13, %v1644_v48  ;;  %v2261_v55 = vshll.u32 %v2202_v40, 16  ;;  %v12754_v48 = vld [vmem:[#allocation2 + $0x30] sm:$0xf] }
 0x133   : > { %11009 = vmatpush3.bf16.msra.mxu0 %v12386_v56  ;;  %4346 = vmatprep.mubr.bf16.mxu0 %v9560_v23  ;;  %v11280_v56 = vld [vmem:[#allocation6 + $0x228] sm:$0xff]   ;;  %v1650_v22 = vrot.slane %v1649_v26, 4  ;;  %v2253_v34 = vrot.slane %v2251_v33, 5  ;;  %v9576_v23 = vcombine.low %v12728_v9, %v12737_v44  ;;  %v9449_v46 = vrot.slane %v1994_v52, 9  ;;  %v11283_v44 = vld [vmem:[#allocation6 + $0x220] sm:$0xff]  }
 0x134   : > { %4499 = vmatprep.mubr.bf16.mxu1 %v9591_v6  ;;  %11010 = vmatprep.subr.bf16.mxu0 %v11277_v19  ;;  %v2248_v10 = vor.u32 %v2247_v51, %v2244_v28  ;;  %v2257_v27 = vrot.slane %v2255_v45, 4  ;;  %v2263_v29 = vrot.slane %v2261_v55, 5  ;;  %v2072_v8 = vrot.slane %v11420_v2, 5  ;;  %v12769_v33 = vld [vmem:[#allocation2 + $0x34] sm:$0xf] }
 0x135   : > { %v1655_v12 = vsel %vm11878_vm10, %v1650_v22, %v1654_v24  ;;  %v2075_v60 = vrot.slane %v1594_v49, 5  ;;  %v1659_v9 = vrot.slane %v1657_v54, 4  ;;  %v1666_v28 = vshll.u32 %v11420_v2, 16 }
 0x136   : > { %v2249_v17 = vrot.slane %v2248_v10, 4  ;;  %v2258_v63 = vor.u32 %v2257_v27, %v2253_v34  ;;  %v9544_v25 = vcombine.low %v1645_v0, %v1655_v12  ;;  %v2073_v40 = vsel %vm11898_vm12, %v9449_v46, %v2072_v8  ;;  %v2203_v0 = vld [vmem:[#allocation2 + $0x38] sm:$0x1]  ;;  %v11286_v27 = vld [vmem:[#allocation6 + $0x218] sm:$0xff]  }
 0x137   : > { %11011 = vmatpush3.bf16.msra.mxu0 %v11277_v19  ;;  %v2074_v50 = vrot.slane %v2072_v8, 4  ;;  %v16493_v19 = vshll.u32 %v12011_v30, 16  ;;  %v1670_v51 = vshrl.u32 %v11420_v2, 16  ;;  %v1676_v54 = vshll.u32 %v1594_v49, 16  ;;  %v1995_v30 = vld [vmem:[#allocation2 + $0x30] sm:$0xe] }
 0x138   : > { %11012 = vmatprep.subr.bf16.mxu0 %v11280_v56  ;;  %4500 = vmatmul.mubr.bf16.vlgmr.msra.gmra.mxu1 %v9575_v57  ;;  %v2254_v6 = vsel %vm11878_vm10, %v2249_v17, %v2253_v34  ;;  %v2259_v13 = vrot.slane %v2258_v63, 4  ;;  %v2266_v45 = vshrl.u32 %v12754_v48, 16  ;;  %v1668_v52 = vrot.slane %v1666_v28, 5  ;;  %v1595_v8 = vld [vmem:[#allocation2 + $0x38] sm:$0x1] }
 0x139   : > { %v1662_v24 = vrot.slane %v16493_v19, 5  ;;  %v2076_v26 = vsel %vm11898_vm12, %v2074_v50, %v2075_v60  ;;  %v1672_v22 = vrot.slane %v1670_v51, 4  ;;  %v1678_v10 = vrot.slane %v1676_v54, 5  ;;  %v11421_v19 = vld [vmem:[#allocation2 + $0x34] sm:$0xf] }
 0x13a   : > { %4347 = vmatmul.mubr.bf16.gmra.mxu0 %v9544_v25  ;;  %v2264_v11 = vsel %vm11878_vm10, %v2259_v13, %v2263_v29  ;;  %v9561_v59 = vcombine.low %v2073_v40, %v2076_v26  ;;  %v2268_v34 = vrot.slane %v2266_v45, 4  ;;  %v2269_v46 = vshll.u32 %v12754_v48, 16 }
 0x13b   : > { %v1663_v57 = vor.u32 %v1662_v24, %v1659_v9  ;;  %11013 = vmatpush3.bf16.msra.mxu0 %v11280_v56  ;;  %v9592_v55 = vcombine.low %v2254_v6, %v2264_v11  ;;  %v2275_v2 = vshll.u32 %v12769_v33, 16  ;;  %v2279_v29 = vshrl.u32 %v12769_v33, 16  ;;  %v11289_v9 = vld [vmem:[#allocation6 + $0x210] sm:$0xff]  }
 0x13c   : > { %11014 = vmatprep.subr.bf16.mxu0 %v11283_v44  ;;  %4354 = vmatprep.mubr.bf16.mxu0 %v9561_v59  ;;  %v1673_v12 = vor.u32 %v1672_v22, %v1668_v52  ;;  %v2285_v17 = vshll.u32 %v2203_v0, 16  ;;  %v9577_v56 = vcombine.low %v12754_v48, %v12769_v33  ;;  %v9450_v63 = vrot.slane %v1995_v30, 9 }
 0x13d   : > { %v1664_v49 = vrot.slane %v1663_v57, 4  ;;  %4507 = vmatprep.mubr.bf16.mxu1 %v9592_v55  ;;  %v2271_v25 = vrot.slane %v2269_v46, 5  ;;  %v2277_v40 = vrot.slane %v2275_v2, 5  ;;  %v2281_v50 = vrot.slane %v2279_v29, 4  ;;  %v12785_v57 = vld [vmem:[#allocation2 + $0x3c] sm:$0xf] }
 0x13e   : > { %v1674_v6 = vrot.slane %v1673_v12, 4  ;;  %v2287_v13 = vrot.slane %v2285_v17, 5  ;;  %v2079_v24 = vrot.slane %v11421_v19, 5  ;;  %v2082_v28 = vrot.slane %v1595_v8, 5  ;;  %v12791_v55 = vld [vmem:[#allocation2 + $0x40] sm:$0xf] }
 0x13f   : > { %v1669_v60 = vsel %vm11878_vm10, %v1664_v49, %v1668_v52  ;;  %11015 = vmatpush3.bf16.msra.mxu0 %v11283_v44  ;;  %v2272_v26 = vor.u32 %v2271_v25, %v2268_v34  ;;  %v2282_v51 = vor.u32 %v2281_v50, %v2277_v40  ;;  %v16494_v54 = vshrl.u32 %v12114_v58, 16  ;;  %v1996_v17 = vld [vmem:[#allocation2 + $0x3c] sm:$0xe] }
 0x140   : > { %11016 = vmatprep.subr.bf16.mxu0 %v11286_v27  ;;  %4508 = vmatmul.mubr.bf16.gmra.mxu1 %v9576_v23  ;;  %v16495_v11 = vshll.u32 %v12114_v58, 16  ;;  %v1679_v44 = vsel %vm11878_vm10, %v1674_v6, %v1678_v10  ;;  %v2080_v52 = vsel %vm11898_vm12, %v9450_v63, %v2079_v24  ;;  %v2081_v0 = vrot.slane %v2079_v24, 4  ;;  %v12793_v23 = vpop.f32.mrf.mxu0  ;;  %v2204_v58 = vld [vmem:[#allocation2 + $0x44] sm:$0x1] }
 0x141   : > { %v1683_v45 = vrot.slane %v16494_v54, 4  ;;  %v1690_v30 = vshll.u32 %v11421_v19, 16  ;;  %v9545_v22 = vcombine.low %v1669_v60, %v1679_v44  ;;  %v2273_v34 = vrot.slane %v2272_v26, 4  ;;  %v11292_v63 = vld [vmem:[#allocation6 + $0x208] sm:$0xff]  }
 0x142   : > { %v1686_v59 = vrot.slane %v16495_v11, 5  ;;  %v2283_v49 = vrot.slane %v2282_v51, 4  ;;  %v2083_v2 = vsel %vm11898_vm12, %v2081_v0, %v2082_v28  ;;  %v1694_v10 = vshrl.u32 %v11421_v19, 16  ;;  %v12801_v24 = vld [vmem:[#allocation2 + $0x44] sm:$0x1]  ;;  %v11295_v11 = vld [vmem:[#allocation6 + $0x200] sm:$0xff]  }
 0x143   : > { %11017 = vmatpush3.bf16.msra.mxu0 %v11286_v27  ;;  %v1692_v29 = vrot.slane %v1690_v30, 5  ;;  %v1700_v12 = vshll.u32 %v1595_v8, 16  ;;  %v2278_v25 = vsel %vm11878_vm10, %v2273_v34, %v2277_v40  ;;  %v9562_v50 = vcombine.low %v2080_v52, %v2083_v2  ;;  %v12804_v8 = vpop.f32.mrf.mxu0 }
 0x144   : > { %v1687_v46 = vor.u32 %v1686_v59, %v1683_v45  ;;  %11018 = vmatprep.subr.bf16.mxu0 %v11289_v9  ;;  %4355 = vmatmul.mubr.bf16.gmra.mxu0 %v9545_v22  ;;  %v2288_v60 = vsel %vm11878_vm10, %v2283_v49, %v2287_v13  ;;  %v1696_v26 = vrot.slane %v1694_v10, 4  ;;  %v2290_v19 = vshrl.u32 %v12785_v57, 16  ;;  %v11422_v10 = vld [vmem:[#allocation2 + $0x40] sm:$0xf] }
 0x145   : > { %v9593_v27 = vcombine.low %v2278_v25, %v2288_v60  ;;  %v1702_v28 = vrot.slane %v1700_v12, 5  ;;  %4362 = vmatprep.mubr.bf16.mxu0 %v9562_v50  ;;  %v2293_v40 = vshll.u32 %v12785_v57, 16  ;;  %v2299_v54 = vshll.u32 %v12791_v55, 16  ;;  %v12811_v45 = vpop.f32.mrf.mxu1  ;;  %v12821_v12 = vpop.f32.mrf.mxu0  ;;  %v12827_v60 = vld [vmem:[#allocation2 + $0x48] sm:$0xf] }
 0x146   : > { %v1688_v6 = vrot.slane %v1687_v46, 4  ;;  %v2303_v13 = vshrl.u32 %v12791_v55, 16  ;;  %v1697_v59 = vor.u32 %v1696_v26, %v1692_v29  ;;  %v2292_v44 = vrot.slane %v2290_v19, 4  ;;  %v12835_v19 = vld [vmem:[#allocation2 + $0x4c] sm:$0xf] }
 0x147   : > { %11019 = vmatpush3.bf16.msra.mxu0 %v11289_v9  ;;  %4515 = vmatprep.mubr.bf16.mxu1 %v9593_v27  ;;  %v2309_v52 = vshll.u32 %v2204_v58, 16  ;;  %v9578_v0 = vcombine.low %v12785_v57, %v12791_v55  ;;  %v2295_v30 = vrot.slane %v2293_v40, 5  ;;  %v2301_v22 = vrot.slane %v2299_v54, 5  ;;  %v12818_v46 = vpop.f32.mrf.mxu1 }
 0x148   : > { %v1693_v51 = vsel %vm11878_vm10, %v1688_v6, %v1692_v29  ;;  %11020 = vmatprep.subr.bf16.mxu0 %v11292_v63  ;;  %4516 = vmatmul.mubr.bf16.gmra.mxu1 %v9577_v56  ;;  %v2305_v34 = vrot.slane %v2303_v13, 4  ;;  %v9451_v49 = vrot.slane %v1996_v17, 9  ;;  %v1698_v9 = vrot.slane %v1697_v59, 4  ;;  %v2205_v59 = vld [vmem:[#allocation2 + $0x50] sm:$0x1] }
 0x149   : > { %v2311_v2 = vrot.slane %v2309_v52, 5  ;;  %v2086_v29 = vrot.slane %v11422_v10, 5  ;;  %v2089_v58 = vrot.slane %v12801_v24, 5  ;;  %v2296_v57 = vor.u32 %v2295_v30, %v2292_v44  ;;  %v12829_v17 = vpop.f32.mrf.mxu1 }
 0x14a   : > { %v2306_v55 = vor.u32 %v2305_v34, %v2301_v22  ;;  %v16496_v25 = vshrl.u32 %v12153_v47, 16  ;;  %v16497_v33 = vshll.u32 %v12153_v47, 16  ;;  %v1703_v50 = vsel %vm11878_vm10, %v1698_v9, %v1702_v28  ;;  %v1997_v34 = vld [vmem:[#allocation2 + $0x48] sm:$0xe] }
 0x14b   : > { %11021 = vmatpush3.bf16.msra.mxu0 %v11292_v63  ;;  %v2087_v6 = vsel %vm11898_vm12, %v9451_v49, %v2086_v29  ;;  %v2088_v27 = vrot.slane %v2086_v29, 4  ;;  %v1714_v26 = vshll.u32 %v11422_v10, 16  ;;  %v9546_v40 = vcombine.low %v1693_v51, %v1703_v50  ;;  %v12837_v44 = vpop.f32.mrf.mxu1  ;;  %v12842_v49 = vpop.f32.mrf.mxu0 }
 0x14c   : > { %v1707_v48 = vrot.slane %v16496_v25, 4  ;;  %v1710_v56 = vrot.slane %v16497_v33, 5  ;;  %11022 = vmatprep.subr.bf16.mxu0 %v11295_v11  ;;  %v2297_v54 = vrot.slane %v2296_v57, 4  ;;  %v2307_v47 = vrot.slane %v2306_v55, 4  ;;  %v12848_v55 = vld [vmem:[#allocation2 + $0x50] sm:$0x1] }
 0x14d   : > { %v2090_v63 = vsel %vm11898_vm12, %v2088_v27, %v2089_v58  ;;  %v1716_v52 = vrot.slane %v1714_v26, 5  ;;  %v1718_v28 = vshrl.u32 %v11422_v10, 16  ;;  %v1724_v30 = vshll.u32 %v12801_v24, 16  ;;  %4363 = vmatmul.mubr.bf16.gmra.mxu0 %v9546_v40 }
 0x14e   : > { %v1711_v13 = vor.u32 %v1710_v56, %v1707_v48  ;;  %v2302_v51 = vsel %vm11878_vm10, %v2297_v54, %v2301_v22  ;;  %v2312_v9 = vsel %vm11878_vm10, %v2307_v47, %v2311_v2  ;;  %v9563_v29 = vcombine.low %v2087_v6, %v2090_v63  ;;  %v12851_v24 = vpop.f32.mrf.mxu1 }
 0x14f   : > { %v9594_v25 = vcombine.low %v2302_v51, %v2312_v9  ;;  %v1720_v58 = vrot.slane %v1718_v28, 4  ;;  %v1726_v48 = vrot.slane %v1724_v30, 5  ;;  %v2314_v10 = vshrl.u32 %v12827_v60, 16  ;;  %11023 = vmatpush3.bf16.msra.mxu0 %v11295_v11  ;;  %v11423_v51 = vld [vmem:[#allocation2 + $0x4c] sm:$0xf] }
 0x150   : > { %v1712_v57 = vrot.slane %v1711_v13, 4  ;;  %4370 = vmatprep.mubr.bf16.mxu0 %v9563_v29  ;;  %v2317_v22 = vshll.u32 %v12827_v60, 16  ;;  %v2323_v2 = vshll.u32 %v12835_v19, 16  ;;  %v2327_v56 = vshrl.u32 %v12835_v19, 16  ;;  %v12860_v40 = vpop.f32.mrf.mxu0  ;;  %v12862_v11 = vpop.f32.mrf.mxu1 }
 0x151   : > { %4523 = vmatprep.mubr.bf16.mxu1 %v9594_v25  ;;  %v1721_v50 = vor.u32 %v1720_v58, %v1716_v52  ;;  %v2316_v6 = vrot.slane %v2314_v10, 4  ;;  %v2333_v27 = vshll.u32 %v2205_v59, 16  ;;  %v9579_v26 = vcombine.low %v12827_v60, %v12835_v19  ;;  %v12873_v10 = vld [vmem:[#allocation2 + $0x54] sm:$0xf] }
 0x152   : > { %v1717_v33 = vsel %vm11878_vm10, %v1712_v57, %v1716_v52  ;;  %4524 = vmatmul.mubr.bf16.gmra.mxu1 %v9578_v0  ;;  %v2319_v54 = vrot.slane %v2317_v22, 5  ;;  %v2325_v47 = vrot.slane %v2323_v2, 5  ;;  %v2329_v13 = vrot.slane %v2327_v56, 4  ;;  %v12865_v29 = vpop.f32.mrf.mxu0  ;;  %v12867_v59 = vpop.f32.mrf.mxu1 }
 0x153   : > { %v9452_v63 = vrot.slane %v1997_v34, 9  ;;  %v1722_v28 = vrot.slane %v1721_v50, 4  ;;  %v2335_v30 = vrot.slane %v2333_v27, 5  ;;  %v2093_v9 = vrot.slane %v11423_v51, 5  ;;  %v12879_v50 = vld [vmem:[#allocation2 + $0x58] sm:$0xf] }
 0x154   : > { %v2096_v52 = vrot.slane %v12848_v55, 5  ;;  %v2320_v60 = vor.u32 %v2319_v54, %v2316_v6  ;;  %v2330_v19 = vor.u32 %v2329_v13, %v2325_v47  ;;  %v16498_v57 = vshrl.u32 %v12185_v62, 16  ;;  %v12881_v6 = vpop.f32.mrf.mxu0  ;;  %v12883_v27 = vpop.f32.mrf.mxu1 }
 0x155   : > { %v16499_v0 = vshll.u32 %v12185_v62, 16  ;;  %v1727_v34 = vsel %vm11878_vm10, %v1722_v28, %v1726_v48  ;;  %v2094_v22 = vsel %vm11898_vm12, %v9452_v63, %v2093_v9  ;;  %v2095_v2 = vrot.slane %v2093_v9, 4  ;;  %v2206_v63 = vld [vmem:[#allocation2 + $0x5c] sm:$0x1] }
 0x156   : > { %v1731_v25 = vrot.slane %v16498_v57, 4  ;;  %v1738_v56 = vshll.u32 %v11423_v51, 16  ;;  %v9547_v54 = vcombine.low %v1717_v33, %v1727_v34  ;;  %v2321_v13 = vrot.slane %v2320_v60, 4  ;;  %v12888_v9 = vpop.f32.mrf.mxu0  ;;  %v12894_v34 = vpop.f32.mrf.mxu1 }
 0x157   : > { %v1734_v58 = vrot.slane %v16499_v0, 5  ;;  %v2331_v62 = vrot.slane %v2330_v19, 4  ;;  %v2097_v0 = vsel %vm11898_vm12, %v2095_v2, %v2096_v52  ;;  %v1742_v48 = vshrl.u32 %v11423_v51, 16 }
 0x158   : > { %v1740_v35 = vrot.slane %v1738_v56, 5  ;;  %v1748_v28 = vshll.u32 %v12848_v55, 16  ;;  %4371 = vmatmul.mubr.bf16.gmra.mxu0 %v9547_v54  ;;  %v2326_v31 = vsel %vm11878_vm10, %v2321_v13, %v2325_v47  ;;  %v9564_v60 = vcombine.low %v2094_v22, %v2097_v0  ;;  %v12897_v56 = vpop.f32.mrf.mxu0 }
 0x159   : > { %v1735_v57 = vor.u32 %v1734_v58, %v1731_v25  ;;  %v2336_v33 = vsel %vm11878_vm10, %v2331_v62, %v2335_v30  ;;  %v1598_v25 = vld [vmem:[#allocation2 + $0x5c] sm:$0x1]  ;;  %v1998_v58 = vld [vmem:[#allocation2 + $0x54] sm:$0xe]  ;;  %v1744_v51 = vrot.slane %v1742_v48, 4  ;;  %v2338_v55 = vshrl.u32 %v12873_v10, 16 }
 0x15a   : > { %v9595_v52 = vcombine.low %v2326_v31, %v2336_v33  ;;  %v1750_v2 = vrot.slane %v1748_v28, 5  ;;  %4378 = vmatprep.mubr.bf16.mxu0 %v9564_v60  ;;  %v2341_v54 = vshll.u32 %v12873_v10, 16  ;;  %v2347_v30 = vshll.u32 %v12879_v50, 16  ;;  %v12906_v0 = vpop.f32.mrf.mxu0 }
 0x15b   : > { %v1736_v19 = vrot.slane %v1735_v57, 4  ;;  %v2351_v22 = vshrl.u32 %v12879_v50, 16  ;;  %v1745_v13 = vor.u32 %v1744_v51, %v1740_v35  ;;  %v2340_v62 = vrot.slane %v2338_v55, 4 }
 0x15c   : > { %4531 = vmatprep.mubr.bf16.mxu1 %v9595_v52  ;;  %v2357_v31 = vshll.u32 %v2206_v63, 16  ;;  %v9580_v57 = vcombine.low %v12873_v10, %v12879_v50  ;;  %v2343_v48 = vrot.slane %v2341_v54, 5  ;;  %v2349_v28 = vrot.slane %v2347_v30, 5 }
 0x15d   : > { %v1741_v47 = vsel %vm11878_vm10, %v1736_v19, %v1740_v35  ;;  %4532 = vmatmul.mubr.bf16.gmra.mxu1 %v9579_v26  ;;  %v2353_v33 = vrot.slane %v2351_v22, 4  ;;  %v9453_v60 = vrot.slane %v1998_v58, 9  ;;  %v12908_v19 = vpop.f32.mrf.mxu1  ;;  %v1746_v42 = vrot.slane %v1745_v13, 4  ;;  %v12910_v35 = vpop.f32.mrf.mxu0  ;;  %v12920_v13 = vld [vmem:[#allocation2 + $0x60] sm:$0xf] }
 0x15e   : > { %v2359_v5 = vrot.slane %v2357_v31, 5  ;;  %v2100_v39 = vrot.slane %v11424_v16, 5  ;;  %v2103_v52 = vrot.slane %v1598_v25, 5  ;;  %v2344_v63 = vor.u32 %v2343_v48, %v2340_v62 }
 0x15f   : > { %v2354_v51 = vor.u32 %v2353_v33, %v2349_v28  ;;  %v16500_v10 = vshrl.u32 %v12281_v36, 16  ;;  %v16501_v26 = vshll.u32 %v12281_v36, 16  ;;  %v1751_v58 = vsel %vm11878_vm10, %v1746_v42, %v1750_v2  ;;  %v12922_v31 = vpop.f32.mrf.mxu0  ;;  %v2207_v36 = vld [vmem:[#allocation2 + $0x68] sm:$0x1] }
 0x160   : > { %v2101_v54 = vsel %vm11898_vm12, %v9453_v60, %v2100_v39  ;;  %v2102_v30 = vrot.slane %v2100_v39, 4  ;;  %v1762_v22 = vshll.u32 %v11424_v16, 16  ;;  %v9548_v62 = vcombine.low %v1741_v47, %v1751_v58 }
 0x161   : > { %v1755_v50 = vrot.slane %v16500_v10, 4  ;;  %v1758_v55 = vrot.slane %v16501_v26, 5  ;;  %v2345_v48 = vrot.slane %v2344_v63, 4  ;;  %v2355_v33 = vrot.slane %v2354_v51, 4  ;;  %v12924_v10 = vld [vmem:[#allocation2 + $0x64] sm:$0xf]  ;;  %v12926_v26 = vpop.f32.mrf.mxu1 }
 0x162   : > { %v2104_v42 = vsel %vm11898_vm12, %v2102_v30, %v2103_v52  ;;  %v1764_v2 = vrot.slane %v1762_v22, 5  ;;  %v1766_v60 = vshrl.u32 %v11424_v16, 16  ;;  %v1772_v39 = vshll.u32 %v1598_v25, 16  ;;  %4379 = vmatmul.mubr.bf16.gmra.mxu0 %v9548_v62 }
 0x163   : > { %v1759_v38 = vor.u32 %v1758_v55, %v1755_v50  ;;  %v2350_v61 = vsel %vm11878_vm10, %v2345_v48, %v2349_v28  ;;  %v2360_v47 = vsel %vm11878_vm10, %v2355_v33, %v2359_v5  ;;  %v9565_v63 = vcombine.low %v2101_v54, %v2104_v42  ;;  %v1599_v50 = vld [vmem:[#allocation2 + $0x68] sm:$0x1]  ;;  %v12934_v55 = vpop.f32.mrf.mxu0  ;;  %v12942_v54 = vpop.f32.mrf.mxu1 }
 0x164   : > { %v9596_v58 = vcombine.low %v2350_v61, %v2360_v47  ;;  %v1768_v21 = vrot.slane %v1766_v60, 4  ;;  %v1774_v7 = vrot.slane %v1772_v39, 5  ;;  %v2362_v52 = vshrl.u32 %v12920_v13, 16 }
 0x165   : > { %v1760_v51 = vrot.slane %v1759_v38, 4  ;;  %4386 = vmatprep.mubr.bf16.mxu0 %v9565_v63  ;;  %v2365_v25 = vshll.u32 %v12920_v13, 16  ;;  %v2371_v28 = vshll.u32 %v12924_v10, 16  ;;  %v2375_v5 = vshrl.u32 %v12924_v10, 16  ;;  %v12946_v60 = vpop.f32.mrf.mxu0  ;;  %v11425_v63 = vld [vmem:[#allocation2 + $0x64] sm:$0xf] }
 0x166   : > { %4539 = vmatprep.mubr.bf16.mxu1 %v9596_v58  ;;  %v1769_v38 = vor.u32 %v1768_v21, %v1764_v2  ;;  %v2364_v30 = vrot.slane %v2362_v52, 4  ;;  %v2381_v61 = vshll.u32 %v2207_v36, 16  ;;  %v9581_v22 = vcombine.low %v12920_v13, %v12924_v10 }
 0x167   : > { %v1765_v16 = vsel %vm11878_vm10, %v1760_v51, %v1764_v2  ;;  %4540 = vmatmul.mubr.bf16.gmra.mxu1 %v9580_v57  ;;  %v2367_v62 = vrot.slane %v2365_v25, 5  ;;  %v2373_v48 = vrot.slane %v2371_v28, 5  ;;  %v2377_v33 = vrot.slane %v2375_v5, 4  ;;  %v12952_v57 = vld [vmem:[#allocation2 + $0x6c] sm:$0xf]  ;;  %v12954_v10 = vpop.f32.mrf.mxu1 }
 0x168   : > { %v9454_v42 = vrot.slane %v1999_v14, 9  ;;  %v1770_v39 = vrot.slane %v1769_v38, 4  ;;  %v2383_v47 = vrot.slane %v2381_v61, 5  ;;  %v2107_v51 = vrot.slane %v11425_v63, 5  ;;  %v12960_v5 = vld [vmem:[#allocation2 + $0x70] sm:$0xf] }
 0x169   : > { %v2110_v1 = vrot.slane %v1599_v50, 5  ;;  %v2368_v15 = vor.u32 %v2367_v62, %v2364_v30  ;;  %v2378_v58 = vor.u32 %v2377_v33, %v2373_v48  ;;  %v16502_v21 = vshrl.u32 %v12322_v20, 16  ;;  %v12962_v33 = vpop.f32.mrf.mxu0 }
 0x16a   : > { %v16503_v2 = vshll.u32 %v12322_v20, 16  ;;  %v1775_v14 = vsel %vm11878_vm10, %v1770_v39, %v1774_v7  ;;  %v2108_v52 = vsel %vm11898_vm12, %v9454_v42, %v2107_v51  ;;  %v2109_v25 = vrot.slane %v2107_v51, 4  ;;  %v2208_v20 = vld [vmem:[#allocation2 + $0x74] sm:$0x1]  ;;  %16504 = vst [vmem:[#allocation27_spill] sm:$0xff] %v12962_v33 }
 0x16b   : > { %v1779_v36 = vrot.slane %v16502_v21, 4  ;;  %v1786_v28 = vshll.u32 %v11425_v63, 16  ;;  %v9549_v38 = vcombine.low %v1765_v16, %v1775_v14  ;;  %v2369_v30 = vrot.slane %v2368_v15, 4  ;;  %v12964_v21 = vpop.f32.mrf.mxu1  ;;  %v2000_v42 = vld [vmem:[#allocation2 + $0x6c] sm:$0xe] }
 0x16c   : > { %v1782_v13 = vrot.slane %v16503_v2, 5  ;;  %v2379_v61 = vrot.slane %v2378_v58, 4  ;;  %v2111_v2 = vsel %vm11898_vm12, %v2109_v25, %v2110_v1  ;;  %v1790_v39 = vshrl.u32 %v11425_v63, 16 }
 0x16d   : > { %v1788_v7 = vrot.slane %v1786_v28, 5  ;;  %v1796_v53 = vshll.u32 %v1599_v50, 16  ;;  %4387 = vmatmul.mubr.bf16.gmra.mxu0 %v9549_v38  ;;  %v2374_v51 = vsel %vm11878_vm10, %v2369_v30, %v2373_v48  ;;  %v9566_v16 = vcombine.low %v2108_v52, %v2111_v2  ;;  %v12980_v52 = vpop.f32.mrf.mxu0 }
 0x16e   : > { %v1783_v62 = vor.u32 %v1782_v13, %v1779_v36  ;;  %v2384_v15 = vsel %vm11878_vm10, %v2379_v61, %v2383_v47  ;;  %v1600_v36 = vld [vmem:[#allocation2 + $0x74] sm:$0x1]  ;;  %v12972_v13 = vpop.f32.mrf.mxu1  ;;  %v1792_v37 = vrot.slane %v1790_v39, 4  ;;  %v2386_v1 = vshrl.u32 %v12952_v57, 16  ;;  %16506 = vst [vmem:[#allocation29_spill] sm:$0xff] %v12980_v52 }
 0x16f   : > { %16505 = vst [vmem:[#allocation28_spill] sm:$0xff] %v12972_v13  ;;  %v9597_v14 = vcombine.low %v2374_v51, %v2384_v15  ;;  %v1798_v33 = vrot.slane %v1796_v53, 5  ;;  %4394 = vmatprep.mubr.bf16.mxu0 %v9566_v16  ;;  %v2389_v63 = vshll.u32 %v12952_v57, 16  ;;  %v2395_v48 = vshll.u32 %v12960_v5, 16 }
 0x170   : > { %v1784_v58 = vrot.slane %v1783_v62, 4  ;;  %v2399_v47 = vshrl.u32 %v12960_v5, 16  ;;  %v12982_v25 = vpop.f32.mrf.mxu1  ;;  %v1793_v28 = vor.u32 %v1792_v37, %v1788_v7  ;;  %v2388_v38 = vrot.slane %v2386_v1, 4 }
 0x171   : > { %16507 = vst [vmem:[#allocation30_spill] sm:$0xff] %v12982_v25  ;;  %4547 = vmatprep.mubr.bf16.mxu1 %v9597_v14  ;;  %v2405_v53 = vshll.u32 %v2208_v20, 16  ;;  %v9582_v30 = vcombine.low %v12952_v57, %v12960_v5  ;;  %v2391_v61 = vrot.slane %v2389_v63, 5  ;;  %v2397_v62 = vrot.slane %v2395_v48, 5  ;;  %v12994_v5 = vpop.f32.mrf.mxu0 }
 0x172   : > { %v1789_v50 = vsel %vm11878_vm10, %v1784_v58, %v1788_v7  ;;  %4548 = vmatmul.mubr.bf16.gmra.mxu1 %v9581_v22  ;;  %v2401_v2 = vrot.slane %v2399_v47, 4  ;;  %v9455_v39 = vrot.slane %v2000_v42, 9  ;;  %v12986_v51 = vpop.f32.mrf.mxu1  ;;  %v1794_v15 = vrot.slane %v1793_v28, 4  ;;  %v11426_v58 = vld [vmem:[#allocation2 + $0x70] sm:$0xf] }
 0x173   : > { %16508 = vst [vmem:[#allocation31_spill] sm:$0xff] %v12986_v51  ;;  %v2407_v16 = vrot.slane %v2405_v53, 5  ;;  %v2114_v13 = vrot.slane %v11426_v58, 5  ;;  %v2117_v52 = vrot.slane %v1600_v36, 5  ;;  %v2392_v25 = vor.u32 %v2391_v61, %v2388_v38  ;;  %v12992_v22 = vld [vmem:[#allocation2 + $0x78] sm:$0xf] }
 0x174   : > { %v2402_v14 = vor.u32 %v2401_v2, %v2397_v62  ;;  %v16509_v37 = vshrl.u32 %v12350_v41, 16  ;;  %v16510_v7 = vshll.u32 %v12350_v41, 16  ;;  %v12996_v42 = vpop.f32.mrf.mxu1  ;;  %v1799_v1 = vsel %vm11878_vm10, %v1794_v15, %v1798_v33  ;;  %v13002_v28 = vld [vmem:[#allocation2 + $0x7c] sm:$0xf]  ;;  %v2209_v2 = vld [vmem:[#allocation2 + $0x80] sm:$0x1] }
 0x175   : > { %16511 = vst [vmem:[#allocation32_spill] sm:$0xff] %v12996_v42  ;;  %v2115_v63 = vsel %vm11898_vm12, %v9455_v39, %v2114_v13  ;;  %v2116_v48 = vrot.slane %v2114_v13, 4  ;;  %v1810_v47 = vshll.u32 %v11426_v58, 16  ;;  %v9550_v38 = vcombine.low %v1789_v50, %v1799_v1 }
 0x176   : > { %v1803_v20 = vrot.slane %v16509_v37, 4  ;;  %v1806_v57 = vrot.slane %v16510_v7, 5  ;;  %v2393_v53 = vrot.slane %v2392_v25, 4  ;;  %v2403_v41 = vrot.slane %v2402_v14, 4  ;;  %v13004_v37 = vpop.f32.mrf.mxu0  ;;  %v13006_v7 = vpop.f32.mrf.mxu1 }
 0x177   : > { %16512 = vst [vmem:[#allocation33_spill] sm:$0xff] %v13006_v7  ;;  %v2118_v42 = vsel %vm11898_vm12, %v2116_v48, %v2117_v52  ;;  %v1812_v33 = vrot.slane %v1810_v47, 5  ;;  %v1814_v15 = vshrl.u32 %v11426_v58, 16  ;;  %v1820_v51 = vshll.u32 %v1600_v36, 16  ;;  %4395 = vmatmul.mubr.bf16.gmra.mxu0 %v9550_v38  ;;  %v13020_v36 = vld [vmem:[%s16405_s3] ss:$0 sm:$0xff] }
 0x178   : > { %v1807_v61 = vor.u32 %v1806_v57, %v1803_v20  ;;  %v2398_v13 = vsel %vm11878_vm10, %v2393_v53, %v2397_v62  ;;  %v2408_v50 = vsel %vm11878_vm10, %v2403_v41, %v2407_v16  ;;  %v9567_v25 = vcombine.low %v2115_v63, %v2118_v42  ;;  %v13014_v14 = vpop.f32.mrf.mxu0  ;;  %v13022_v52 = vpop.f32.mrf.mxu1  ;;  %v2001_v63 = vld [vmem:[#allocation2 + $0x78] sm:$0xe] }
 0x179   : > { %v9598_v20 = vcombine.low %v2398_v13, %v2408_v50  ;;  %v1816_v57 = vrot.slane %v1814_v15, 4  ;;  %v1822_v1 = vrot.slane %v1820_v51, 5  ;;  %v2410_v7 = vshrl.u32 %v12992_v22, 16  ;;  %16513 = vst [vmem:[#allocation34_spill] sm:$0xff] %v13022_v52  ;;  %v13029_v51 = vld [vmem:[#allocation2 + $0x80] sm:$0x1] }
 0x17a   : > { %v1808_v39 = vrot.slane %v1807_v61, 4  ;;  %4402 = vmatprep.mubr.bf16.mxu0 %v9567_v25  ;;  %v2413_v16 = vshll.u32 %v12992_v22, 16  ;;  %v2419_v58 = vshll.u32 %v13002_v28, 16  ;;  %v2423_v42 = vshrl.u32 %v13002_v28, 16  ;;  %v13031_v48 = vpop.f32.mrf.mxu0 }
 0x17b   : > { %4555 = vmatprep.mubr.bf16.mxu1 %v9598_v20  ;;  %v1817_v47 = vor.u32 %v1816_v57, %v1812_v33  ;;  %v2412_v38 = vrot.slane %v2410_v7, 4  ;;  %v2429_v53 = vshll.u32 %v2209_v2, 16  ;;  %v10082_v41 = vadd.f32 %v12804_v8, %v12793_v23  ;;  %v13042_v2 = vpop.f32.mrf.mxu1  ;;  %v11427_v57 = vld [vmem:[#allocation2 + $0x7c] sm:$0xf] }
 0x17c   : > { %v1813_v62 = vsel %vm11878_vm10, %v1808_v39, %v1812_v33  ;;  %4556 = vmatmul.mubr.bf16.gmra.mxu1 %v9582_v30  ;;  %v2415_v61 = vrot.slane %v2413_v16, 5  ;;  %v2421_v15 = vrot.slane %v2419_v58, 5  ;;  %v2425_v13 = vrot.slane %v2423_v42, 4  ;;  %v13040_v33 = vpop.f32.mrf.mxu0 }
 0x17d   : > { %v9583_v50 = vcombine.low %v12992_v22, %v13002_v28  ;;  %v1818_v25 = vrot.slane %v1817_v47, 4  ;;  %v2431_v39 = vrot.slane %v2429_v53, 5  ;;  %v4019_v52 = vadd.f32 %v10082_v41, %v13020_v36  ;;  %v13054_v53 = vld [vmem:[#allocation2 + $0x84] sm:$0xf]  ;;  %v13062_v41 = vld [vmem:[#allocation2 + $0x88] sm:$0xf] }
 0x17e   : > { %v10194_v20 = vadd.f32 %v12818_v46, %v12811_v45  ;;  %v2416_v7 = vor.u32 %v2415_v61, %v2412_v38  ;;  %v2426_v23 = vor.u32 %v2425_v13, %v2421_v15  ;;  %v10085_v8 = vadd.f32 %v12842_v49, %v12821_v12  ;;  %v13051_v45 = vpop.f32.mrf.mxu1  ;;  %v13064_v61 = vpop.f32.mrf.mxu0 }
 0x17f   : > { %v9456_v30 = vrot.slane %v2001_v63, 9  ;;  %v1823_v22 = vsel %vm11878_vm10, %v1818_v25, %v1822_v1  ;;  %v2121_v16 = vrot.slane %v11427_v57, 5  ;;  %v2124_v58 = vrot.slane %v13029_v51, 5 }
 0x180   : > { %v13048_v28 = vadd.f32 %v10194_v20, %v4019_v52  ;;  %v9551_v46 = vcombine.low %v1813_v62, %v1823_v22  ;;  %v2417_v42 = vrot.slane %v2416_v7, 4  ;;  %v2427_v47 = vrot.slane %v2426_v23, 4  ;;  %v2210_v23 = vld [vmem:[#allocation2 + $0x8c] sm:$0x1]  ;;  %v13076_v22 = vpop.f32.mrf.mxu1 }
 0x181   : > { %v4022_v38 = vadd.f32 %v10085_v8, %v13020_v36  ;;  %v2122_v12 = vsel %vm11898_vm12, %v9456_v30, %v2121_v16  ;;  %v2123_v49 = vrot.slane %v2121_v16, 4  ;;  %v10197_v1 = vadd.f32 %v12837_v44, %v12829_v17 }
 0x182   : > { %16514 = vst [vmem:[#allocation35_spill] sm:$0xff] %v13048_v28  ;;  %v16515_v52 = vshrl.u32 %v12447_v4, 16  ;;  %4403 = vmatmul.mubr.bf16.gmra.mxu0 %v9551_v46  ;;  %v2422_v62 = vsel %vm11878_vm10, %v2417_v42, %v2421_v15  ;;  %v2432_v13 = vsel %vm11878_vm10, %v2427_v47, %v2431_v39  ;;  %v16516_v25 = vshll.u32 %v12447_v4, 16 }
 0x183   : > { %v1834_v7 = vshll.u32 %v11427_v57, 16  ;;  %v9599_v17 = vcombine.low %v2422_v62, %v2432_v13  ;;  %v2125_v44 = vsel %vm11898_vm12, %v2123_v49, %v2124_v58  ;;  %v13074_v8 = vadd.f32 %v10197_v1, %v4022_v38  ;;  %v2002_v62 = vld [vmem:[#allocation2 + $0x84] sm:$0xe]  ;;  %v13082_v58 = vpop.f32.mrf.mxu0  ;;  %v13085_v1 = vld [vmem:[#allocation2 + $0x8c] sm:$0x1] }
 0x184   : > { %v1827_v63 = vrot.slane %v16515_v52, 4  ;;  %v1830_v20 = vrot.slane %v16516_v25, 5  ;;  %v1838_v30 = vshrl.u32 %v11427_v57, 16  ;;  %v9568_v16 = vcombine.low %v2122_v12, %v2125_v44 }
 0x185   : > { %16517 = vst [vmem:[#allocation36_spill] sm:$0xff] %v13074_v8  ;;  %v1836_v15 = vrot.slane %v1834_v7, 5  ;;  %v1844_v42 = vshll.u32 %v13029_v51, 16  ;;  %4563 = vmatprep.mubr.bf16.mxu1 %v9599_v17  ;;  %v2434_v4 = vshrl.u32 %v13054_v53, 16  ;;  %v2437_v47 = vshll.u32 %v13054_v53, 16 }
 0x186   : > { %v1831_v46 = vor.u32 %v1830_v20, %v1827_v63  ;;  %v1840_v39 = vrot.slane %v1838_v30, 4  ;;  %v2443_v52 = vshll.u32 %v13062_v41, 16  ;;  %4564 = vmatmul.mubr.bf16.gmra.mxu1 %v9583_v50  ;;  %4410 = vmatprep.mubr.bf16.mxu0 %v9568_v16  ;;  %v2447_v12 = vshrl.u32 %v13062_v41, 16  ;;  %v13087_v20 = vpop.f32.mrf.mxu1 }
 0x187   : > { %v1846_v38 = vrot.slane %v1844_v42, 5  ;;  %v2453_v49 = vshll.u32 %v2210_v23, 16  ;;  %v2436_v63 = vrot.slane %v2434_v4, 4  ;;  %v2439_v13 = vrot.slane %v2437_v47, 5  ;;  %v13097_v42 = vpop.f32.mrf.mxu0 }
 0x188   : > { %v1832_v57 = vrot.slane %v1831_v46, 4  ;;  %v1841_v51 = vor.u32 %v1840_v39, %v1836_v15  ;;  %v2445_v25 = vrot.slane %v2443_v52, 5  ;;  %v2449_v17 = vrot.slane %v2447_v12, 4  ;;  %v11428_v52 = vld [vmem:[#allocation2 + $0x88] sm:$0xf] }
 0x189   : > { %v2455_v44 = vrot.slane %v2453_v49, 5  ;;  %v10088_v50 = vadd.f32 %v12865_v29, %v12860_v40  ;;  %v2440_v16 = vor.u32 %v2439_v13, %v2436_v63  ;;  %v9584_v23 = vcombine.low %v13054_v53, %v13062_v41  ;;  %v13105_v41 = vpop.f32.mrf.mxu1  ;;  %v2211_v13 = vld [vmem:[#allocation2 + $0x98] sm:$0x1] }
 0x18a   : > { %v1837_v7 = vsel %vm11878_vm10, %v1832_v57, %v1836_v15  ;;  %v1842_v30 = vrot.slane %v1841_v51, 4  ;;  %v10200_v46 = vadd.f32 %v12862_v11, %v12851_v24  ;;  %v2450_v39 = vor.u32 %v2449_v17, %v2445_v25  ;;  %v13110_v51 = vld [vmem:[#allocation2 + $0x90] sm:$0xf] }
 0x18b   : > { %v4027_v4 = vadd.f32 %v10088_v50, %v13020_v36  ;;  %v10091_v15 = vadd.f32 %v12888_v9, %v12881_v6  ;;  %v9457_v47 = vrot.slane %v2002_v62, 9  ;;  %v2441_v29 = vrot.slane %v2440_v16, 4  ;;  %v13112_v6 = vld [vmem:[#allocation2 + $0x94] sm:$0xf]  ;;  %v13122_v17 = vpop.f32.mrf.mxu1 }
 0x18c   : > { %v1847_v40 = vsel %vm11878_vm10, %v1842_v30, %v1846_v38  ;;  %v2128_v57 = vrot.slane %v11428_v52, 5  ;;  %v2131_v53 = vrot.slane %v13085_v1, 5  ;;  %v2451_v11 = vrot.slane %v2450_v39, 4 }
 0x18d   : > { %v9552_v24 = vcombine.low %v1837_v7, %v1847_v40  ;;  %v13107_v12 = vadd.f32 %v10200_v46, %v4027_v4  ;;  %v4030_v49 = vadd.f32 %v10091_v15, %v13020_v36  ;;  %v2446_v9 = vsel %vm11878_vm10, %v2441_v29, %v2445_v25  ;;  %v13120_v7 = vpop.f32.mrf.mxu0  ;;  %v13136_v40 = vpop.f32.mrf.mxu1 }
 0x18e   : > { %v2129_v62 = vsel %vm11898_vm12, %v9457_v47, %v2128_v57  ;;  %v2130_v38 = vrot.slane %v2128_v57, 4  ;;  %v10203_v63 = vadd.f32 %v12883_v27, %v12867_v59  ;;  %v2456_v50 = vsel %vm11878_vm10, %v2451_v11, %v2455_v44 }
 0x18f   : > { %16518 = vst [vmem:[#allocation37_spill] sm:$0xff] %v13107_v12  ;;  %4411 = vmatmul.mubr.bf16.gmra.mxu0 %v9552_v24  ;;  %v16519_v30 = vshrl.u32 %v12493_v18, 16  ;;  %v16520_v25 = vshll.u32 %v12493_v18, 16  ;;  %v1858_v39 = vshll.u32 %v11428_v52, 16  ;;  %v9600_v4 = vcombine.low %v2446_v9, %v2456_v50  ;;  %v13134_v47 = vpop.f32.mrf.mxu0  ;;  %v16526_v12 = vld [vmem:[#allocation27_spill] sm:$0xff] }
 0x190   : > { %v2132_v59 = vsel %vm11898_vm12, %v2130_v38, %v2131_v53  ;;  %v13132_v27 = vadd.f32 %v10203_v63, %v4030_v49  ;;  %v1862_v15 = vshrl.u32 %v11428_v52, 16  ;;  %v1868_v24 = vshll.u32 %v13085_v1, 16  ;;  %v13144_v52 = vpop.f32.mrf.mxu1  ;;  %v13147_v1 = vld [vmem:[#allocation2 + $0x98] sm:$0x1] }
 0x191   : > { %v1851_v16 = vrot.slane %v16519_v30, 4  ;;  %v1854_v46 = vrot.slane %v16520_v25, 5  ;;  %v9569_v29 = vcombine.low %v2129_v62, %v2132_v59  ;;  %v1860_v57 = vrot.slane %v1858_v39, 5  ;;  %4571 = vmatprep.mubr.bf16.mxu1 %v9600_v4  ;;  %v13142_v49 = vpop.f32.mrf.mxu0  ;;  %v2003_v30 = vld [vmem:[#allocation2 + $0x90] sm:$0xe] }
 0x192   : > { %16521 = vst [vmem:[#allocation38_spill] sm:$0xff] %v13132_v27  ;;  %v1864_v18 = vrot.slane %v1862_v15, 4  ;;  %v2458_v11 = vshrl.u32 %v13110_v51, 16  ;;  %v2461_v9 = vshll.u32 %v13110_v51, 16  ;;  %v2467_v53 = vshll.u32 %v13112_v6, 16  ;;  %4572 = vmatmul.mubr.bf16.gmra.mxu1 %v9584_v23 }
 0x193   : > { %v1855_v44 = vor.u32 %v1854_v46, %v1851_v16  ;;  %4418 = vmatprep.mubr.bf16.mxu0 %v9569_v29  ;;  %v1870_v62 = vrot.slane %v1868_v24, 5  ;;  %v2471_v63 = vshrl.u32 %v13112_v6, 16  ;;  %v2477_v50 = vshll.u32 %v2211_v13, 16  ;;  %v13149_v4 = vpop.f32.mrf.mxu0 }
 0x194   : > { %v1865_v16 = vor.u32 %v1864_v18, %v1860_v57  ;;  %v2460_v25 = vrot.slane %v2458_v11, 4  ;;  %v2463_v46 = vrot.slane %v2461_v9, 5  ;;  %v2469_v39 = vrot.slane %v2467_v53, 5  ;;  %v13159_v11 = vpop.f32.mrf.mxu1 }
 0x195   : > { %v1856_v38 = vrot.slane %v1855_v44, 4  ;;  %v2473_v15 = vrot.slane %v2471_v63, 4  ;;  %v2479_v23 = vrot.slane %v2477_v50, 5  ;;  %v10094_v29 = vadd.f32 %v12906_v0, %v12897_v56  ;;  %v11429_v63 = vld [vmem:[#allocation2 + $0x94] sm:$0xf] }
 0x196   : > { %v1866_v44 = vrot.slane %v1865_v16, 4  ;;  %v2464_v24 = vor.u32 %v2463_v46, %v2460_v25  ;;  %v9585_v13 = vcombine.low %v13110_v51, %v13112_v6  ;;  %v10206_v18 = vadd.f32 %v12908_v19, %v12894_v34  ;;  %v13167_v6 = vpop.f32.mrf.mxu0  ;;  %v13169_v34 = vpop.f32.mrf.mxu1 }
 0x197   : > { %v1861_v59 = vsel %vm11878_vm10, %v1856_v38, %v1860_v57  ;;  %v2474_v9 = vor.u32 %v2473_v15, %v2469_v39  ;;  %v4035_v53 = vadd.f32 %v10094_v29, %v13020_v36  ;;  %v10097_v57 = vadd.f32 %v12922_v31, %v12910_v35  ;;  %v13174_v35 = vld [vmem:[#allocation2 + $0x9c] sm:$0xf]  ;;  %v13176_v31 = vld [vmem:[#allocation2 + $0xa0] sm:$0xf] }
 0x198   : > { %v9458_v38 = vrot.slane %v2003_v30, 9  ;;  %v1871_v56 = vsel %vm11878_vm10, %v1866_v44, %v1870_v62  ;;  %v2465_v0 = vrot.slane %v2464_v24, 4  ;;  %v2135_v50 = vrot.slane %v11429_v63, 5  ;;  %v13184_v44 = vpop.f32.mrf.mxu0  ;;  %v13186_v24 = vpop.f32.mrf.mxu1 }
 0x199   : > { %v2138_v51 = vrot.slane %v13147_v1, 5  ;;  %v9553_v19 = vcombine.low %v1861_v59, %v1871_v56  ;;  %v2475_v16 = vrot.slane %v2474_v9, 4  ;;  %v13171_v25 = vadd.f32 %v10206_v18, %v4035_v53  ;;  %v2212_v59 = vld [vmem:[#allocation2 + $0xa4] sm:$0x1] }
 0x19a   : > { %v4038_v46 = vadd.f32 %v10097_v57, %v13020_v36  ;;  %v2470_v62 = vsel %vm11878_vm10, %v2465_v0, %v2469_v39  ;;  %v2136_v30 = vsel %vm11898_vm12, %v9458_v38, %v2135_v50  ;;  %v2137_v15 = vrot.slane %v2135_v50, 4  ;;  %v13198_v50 = vpop.f32.mrf.mxu0 }
 0x19b   : > { %16522 = vst [vmem:[#allocation39_spill] sm:$0xff] %v13171_v25  ;;  %v10209_v29 = vadd.f32 %v12942_v54, %v12926_v26  ;;  %4419 = vmatmul.mubr.bf16.gmra.mxu0 %v9553_v19  ;;  %v2480_v18 = vsel %vm11878_vm10, %v2475_v16, %v2479_v23  ;;  %v16523_v9 = vshrl.u32 %v12516_v32, 16  ;;  %v16524_v39 = vshll.u32 %v12516_v32, 16  ;;  %v13200_v19 = vpop.f32.mrf.mxu1  ;;  %v11298_v25 = vld [vmem:[#allocation8 + $0x78] sm:$0xff]  }
 0x19c   : > { %v1882_v38 = vshll.u32 %v11429_v63, 16  ;;  %v9601_v56 = vcombine.low %v2470_v62, %v2480_v18  ;;  %v2139_v26 = vsel %vm11898_vm12, %v2137_v15, %v2138_v51  ;;  %v1886_v0 = vshrl.u32 %v11429_v63, 16  ;;  %v11299_v23 = vld [vmem:[#allocation8 + $0x38] sm:$0xff]   ;;  %v2004_v63 = vld [vmem:[#allocation2 + $0x9c] sm:$0xe]  ;;  %v13206_v15 = vpop.f32.mrf.mxu0  ;;  %10536 = vmatprep.subr.bf16.mxu1 %v11298_v25 }
 0x19d   : > { %v1875_v53 = vrot.slane %v16523_v9, 4  ;;  %v1878_v57 = vrot.slane %v16524_v39, 5  ;;  %v13196_v54 = vadd.f32 %v10209_v29, %v4038_v46  ;;  %v9570_v16 = vcombine.low %v2136_v30, %v2139_v26  ;;  %10537 = vmatpush3.bf16.msra.mxu1 %v11299_v23 }
 0x19e   : > { %v1884_v9 = vrot.slane %v1882_v38, 5  ;;  %v1892_v32 = vshll.u32 %v13147_v1, 16  ;;  %4579 = vmatprep.mubr.bf16.mxu1 %v9601_v56  ;;  %v1888_v39 = vrot.slane %v1886_v0, 4  ;;  %v2482_v62 = vshrl.u32 %v13174_v35, 16  ;;  %v1604_v1 = vld [vmem:[#allocation2 + $0xa4] sm:$0x1]  ;;  %v13209_v0 = vpop.f32.mrf.mxu0 }
 0x19f   : > { %16525 = vst [vmem:[#allocation40_spill] sm:$0xff] %v13196_v54  ;;  %v1879_v27 = vor.u32 %v1878_v57, %v1875_v53  ;;  %v2485_v51 = vshll.u32 %v13174_v35, 16  ;;  %v2491_v46 = vshll.u32 %v13176_v31, 16  ;;  %4580 = vmatmul.mubr.bf16.gmra.mxu1 %v9585_v13  ;;  %4426 = vmatprep.mubr.bf16.mxu0 %v9570_v16  ;;  %v2495_v18 = vshrl.u32 %v13176_v31, 16  ;;  %v13211_v54 = vpop.f32.mrf.mxu1 }
 0x1a0   : > { %v1894_v30 = vrot.slane %v1892_v32, 5  ;;  %v2501_v53 = vshll.u32 %v2212_v59, 16  ;;  %v1889_v57 = vor.u32 %v1888_v39, %v1884_v9  ;;  %v2484_v38 = vrot.slane %v2482_v62, 4 }
 0x1a1   : > { %v1880_v29 = vrot.slane %v1879_v27, 4  ;;  %v2487_v56 = vrot.slane %v2485_v51, 5  ;;  %v2493_v26 = vrot.slane %v2491_v46, 5  ;;  %v2497_v13 = vrot.slane %v2495_v18, 4  ;;  %v13221_v51 = vpop.f32.mrf.mxu0 }
 0x1a2   : > { %v2503_v16 = vrot.slane %v2501_v53, 5  ;;  %v10100_v27 = vadd.f32 %v12946_v60, %v12934_v55  ;;  %v1890_v32 = vrot.slane %v1889_v57, 4  ;;  %v9586_v39 = vcombine.low %v13174_v35, %v13176_v31  ;;  %v11430_v53 = vld [vmem:[#allocation2 + $0xa0] sm:$0xf]  ;;  %v13230_v31 = vpop.f32.mrf.mxu1 }
 0x1a3   : > { %v1885_v25 = vsel %vm11878_vm10, %v1880_v29, %v1884_v9  ;;  %v2488_v59 = vor.u32 %v2487_v56, %v2484_v38  ;;  %v10212_v62 = vadd.f32 %v12964_v21, %v12954_v10  ;;  %v2498_v46 = vor.u32 %v2497_v13, %v2493_v26  ;;  %v16527_v9 = vld [vmem:[#allocation29_spill] sm:$0xff]  ;;  %v13228_v35 = vpop.f32.mrf.mxu0 }
 0x1a4   : > { %v4043_v23 = vadd.f32 %v10100_v27, %v13020_v36  ;;  %v10103_v29 = vadd.f32 %v16527_v9, %v16526_v12  ;;  %v9459_v18 = vrot.slane %v2004_v63, 9  ;;  %v1895_v55 = vsel %vm11878_vm10, %v1890_v32, %v1894_v30  ;;  %16528 = vst [vmem:[#allocation27_spill] sm:$0xff] %v13228_v35  ;;  %v13235_v27 = vld [vmem:[#allocation2 + $0xa8] sm:$0xf]  ;;  %v13237_v12 = vld [vmem:[#allocation2 + $0xac] sm:$0xf] }
 0x1a5   : > { %v2489_v60 = vrot.slane %v2488_v59, 4  ;;  %v2142_v57 = vrot.slane %v11430_v53, 5  ;;  %v2145_v38 = vrot.slane %v1604_v1, 5  ;;  %v9554_v10 = vcombine.low %v1885_v25, %v1895_v55  ;;  %16530 = vst [vmem:[#allocation41_spill] sm:$0xff] %v13237_v12  ;;  %v16531_v59 = vld [vmem:[#allocation28_spill] sm:$0xff]  ;;  %v16532_v9 = vld [vmem:[#allocation30_spill] sm:$0xff]  ;;  %v13251_v28 = vpop.f32.mrf.mxu0 }
 0x1a6   : > { %v2499_v21 = vrot.slane %v2498_v46, 4  ;;  %v13232_v56 = vadd.f32 %v10212_v62, %v4043_v23  ;;  %v4046_v13 = vadd.f32 %v10103_v29, %v13020_v36  ;;  %v10215_v8 = vadd.f32 %v16532_v9, %v16531_v59  ;;  %v13245_v25 = vld [vmem:[#allocation2 + $0xb0] sm:$0x1]  ;;  %v16534_v46 = vld [vmem:[#allocation19_spill] sm:$0xff]  ;;  %v13257_v59 = vpop.f32.mrf.mxu1 }
 0x1a7   : > { %v2494_v63 = vsel %vm11878_vm10, %v2489_v60, %v2493_v26  ;;  %v2143_v30 = vsel %vm11898_vm12, %v9459_v18, %v2142_v57  ;;  %v2144_v32 = vrot.slane %v2142_v57, 4  ;;  %16533 = vst [vmem:[#allocation28_spill] sm:$0xff] %v13245_v25  ;;  %4427 = vmatmul.mubr.bf16.gmra.mxu0 %v9554_v10  ;;  %v16535_v23 = vld [vmem:[#allocation20_spill] sm:$0xff]  ;;  %v1906_v55 = vshll.u32 %v11430_v53, 16 }
 0x1a8   : > { %16529 = vst [vmem:[#allocation29_spill] sm:$0xff] %v13232_v56  ;;  %v2504_v62 = vsel %vm11878_vm10, %v2499_v21, %v2503_v16  ;;  %v1903_v29 = vor.u32 %v16535_v23, %v16534_v46  ;;  %v1910_v56 = vshrl.u32 %v11430_v53, 16  ;;  %v13255_v60 = vadd.f32 %v10215_v8, %v4046_v13 }
 0x1a9   : > { %v9602_v26 = vcombine.low %v2494_v63, %v2504_v62  ;;  %v2146_v18 = vsel %vm11898_vm12, %v2144_v32, %v2145_v38  ;;  %v1916_v57 = vshll.u32 %v1604_v1, 16  ;;  %v1908_v35 = vrot.slane %v1906_v55, 5  ;;  %v2005_v62 = vld [vmem:[#allocation2 + $0xa8] sm:$0xe]  ;;  %v13270_v55 = vpop.f32.mrf.mxu1 }
 0x1aa   : > { %16536 = vst [vmem:[#allocation30_spill] sm:$0xff] %v13255_v60  ;;  %v9571_v10 = vcombine.low %v2143_v30, %v2146_v18  ;;  %v1904_v9 = vrot.slane %v1903_v29, 4  ;;  %v1912_v16 = vrot.slane %v1910_v56, 4  ;;  %v2506_v46 = vshrl.u32 %v13235_v27, 16  ;;  %v13266_v56 = vpop.f32.mrf.mxu0 }
 0x1ab   : > { %4587 = vmatprep.mubr.bf16.mxu1 %v9602_v26  ;;  %v1918_v21 = vrot.slane %v1916_v57, 5  ;;  %v2509_v53 = vshll.u32 %v13235_v27, 16  ;;  %v2515_v63 = vshll.u32 %v13237_v12, 16  ;;  %v2519_v38 = vshrl.u32 %v13237_v12, 16 }
 0x1ac   : > { %4588 = vmatmul.mubr.bf16.gmra.mxu1 %v9586_v39  ;;  %4434 = vmatprep.mubr.bf16.mxu0 %v9571_v10  ;;  %v1909_v8 = vsel %vm11878_vm10, %v1904_v9, %v1908_v35  ;;  %v1913_v1 = vor.u32 %v1912_v16, %v1908_v35  ;;  %v2525_v13 = vshll.u32 %v13245_v25, 16  ;;  %v2508_v30 = vrot.slane %v2506_v46, 4  ;;  %v16537_v9 = vld [vmem:[#allocation31_spill] sm:$0xff]  ;;  %v16538_v16 = vld [vmem:[#allocation32_spill] sm:$0xff] }
 0x1ad   : > { %v2511_v32 = vrot.slane %v2509_v53, 5  ;;  %v2517_v23 = vrot.slane %v2515_v63, 5  ;;  %v10106_v29 = vadd.f32 %v13004_v37, %v12994_v5  ;;  %v2521_v26 = vrot.slane %v2519_v38, 4  ;;  %v1605_v53 = vld [vmem:[#allocation2 + $0xb0] sm:$0x1] }
 0x1ae   : > { %v1914_v39 = vrot.slane %v1913_v1, 4  ;;  %v2527_v18 = vrot.slane %v2525_v13, 5  ;;  %v9587_v35 = vcombine.low %v13235_v27, %v13237_v12  ;;  %v10218_v60 = vadd.f32 %v16538_v16, %v16537_v9  ;;  %v11431_v1 = vld [vmem:[#allocation2 + $0xac] sm:$0xf]  ;;  %v13281_v13 = vpop.f32.mrf.mxu0  ;;  %v13286_v9 = vpop.f32.mrf.mxu1  ;;  %v13296_v25 = vld [vmem:[#allocation2 + $0xb4] sm:$0xf] }
 0x1af   : > { %v2512_v57 = vor.u32 %v2511_v32, %v2508_v30  ;;  %v4051_v10 = vadd.f32 %v10106_v29, %v13020_v36  ;;  %v10109_v46 = vadd.f32 %v13031_v48, %v13014_v14  ;;  %v2522_v37 = vor.u32 %v2521_v26, %v2517_v23  ;;  %16540 = vst [vmem:[#allocation20_spill] sm:$0xff] %v13286_v9  ;;  %v11300_v16 = vld [vmem:[#allocation8 + $0x70] sm:$0xff]  }
 0x1b0   : > { %v1919_v5 = vsel %vm11878_vm10, %v1914_v39, %v1918_v21  ;;  %v9460_v63 = vrot.slane %v2005_v62, 9  ;;  %v2149_v38 = vrot.slane %v11431_v1, 5  ;;  %v11301_v14 = vld [vmem:[#allocation8 + $0x30] sm:$0xff]   ;;  %v2152_v62 = vrot.slane %v1605_v53, 5  ;;  %v13298_v12 = vpop.f32.mrf.mxu1  ;;  %10538 = vmatprep.subr.bf16.mxu1 %v11300_v16 }
 0x1b1   : > { %v9555_v27 = vcombine.low %v1909_v8, %v1919_v5  ;;  %v2513_v30 = vrot.slane %v2512_v57, 4  ;;  %v13283_v32 = vadd.f32 %v10218_v60, %v4051_v10  ;;  %v4054_v29 = vadd.f32 %v10109_v46, %v13020_v36  ;;  %v16541_v8 = vld [vmem:[#allocation33_spill] sm:$0xff]  ;;  %v16542_v57 = vld [vmem:[#allocation34_spill] sm:$0xff]  ;;  %16545 = vst [vmem:[#allocation31_spill] sm:$0xff] %v13298_v12  ;;  %10539 = vmatpush3.bf16.msra.mxu1 %v11301_v14 }
 0x1b2   : > { %v2523_v48 = vrot.slane %v2522_v37, 4  ;;  %v2150_v21 = vsel %vm11898_vm12, %v9460_v63, %v2149_v38  ;;  %v2151_v39 = vrot.slane %v2149_v38, 4  ;;  %v10221_v60 = vadd.f32 %v16542_v57, %v16541_v8  ;;  %v16543_v10 = vld [vmem:[#allocation21_spill] sm:$0xff]  ;;  %v16544_v5 = vld [vmem:[#allocation22_spill] sm:$0xff]  ;;  %v13308_v8 = vpop.f32.mrf.mxu0  ;;  %v13312_v12 = vpop.f32.mrf.mxu1 }
 0x1b3   : > { %16539 = vst [vmem:[#allocation19_spill] sm:$0xff] %v13283_v32  ;;  %4435 = vmatmul.mubr.bf16.gmra.mxu0 %v9555_v27  ;;  %v2518_v26 = vsel %vm11878_vm10, %v2513_v30, %v2517_v23  ;;  %v1927_v46 = vor.u32 %v16544_v5, %v16543_v10  ;;  %v1930_v32 = vshll.u32 %v11431_v1, 16  ;;  %v1934_v38 = vshrl.u32 %v11431_v1, 16  ;;  %v13304_v27 = vld [vmem:[#allocation2 + $0xb8] sm:$0xf] }
 0x1b4   : > { %v2528_v37 = vsel %vm11878_vm10, %v2523_v48, %v2527_v18  ;;  %v2153_v63 = vsel %vm11898_vm12, %v2151_v39, %v2152_v62  ;;  %v1940_v23 = vshll.u32 %v1605_v53, 16  ;;  %16546 = vst [vmem:[#allocation32_spill] sm:$0xff] %v13304_v27  ;;  %v13306_v30 = vld [vmem:[#allocation2 + $0xbc] sm:$0x1]  ;;  %v13310_v5 = vadd.f32 %v10221_v60, %v4054_v29  ;;  %v13319_v29 = vpop.f32.mrf.mxu1 }
 0x1b5   : > { %16547 = vst [vmem:[#allocation33_spill] sm:$0xff] %v13306_v30  ;;  %v9603_v57 = vcombine.low %v2518_v26, %v2528_v37  ;;  %v9572_v10 = vcombine.low %v2150_v21, %v2153_v63  ;;  %v1928_v16 = vrot.slane %v1927_v46, 4  ;;  %v1932_v18 = vrot.slane %v1930_v32, 5  ;;  %v2006_v46 = vld [vmem:[#allocation2 + $0xb4] sm:$0xe]  ;;  %v13325_v37 = vpop.f32.mrf.mxu0 }
 0x1b6   : > { %16548 = vst [vmem:[#allocation34_spill] sm:$0xff] %v13310_v5  ;;  %v1936_v48 = vrot.slane %v1934_v38, 4  ;;  %v1942_v9 = vrot.slane %v1940_v23, 5  ;;  %v2530_v1 = vshrl.u32 %v13296_v25, 16  ;;  %v2533_v53 = vshll.u32 %v13296_v25, 16 }
 0x1b7   : > { %4595 = vmatprep.mubr.bf16.mxu1 %v9603_v57  ;;  %4442 = vmatprep.mubr.bf16.mxu0 %v9572_v10  ;;  %v2539_v39 = vshll.u32 %v13304_v27, 16  ;;  %v2543_v14 = vshrl.u32 %v13304_v27, 16  ;;  %v2549_v21 = vshll.u32 %v13306_v30, 16  ;;  %v1933_v32 = vsel %vm11878_vm10, %v1928_v16, %v1932_v18  ;;  %v1606_v10 = vld [vmem:[#allocation2 + $0xbc] sm:$0x1] }
 0x1b8   : > { %4596 = vmatmul.mubr.bf16.gmra.mxu1 %v9587_v35  ;;  %v1937_v62 = vor.u32 %v1936_v48, %v1932_v18  ;;  %v2532_v26 = vrot.slane %v2530_v1, 4  ;;  %v10112_v60 = vadd.f32 %v13064_v61, %v13040_v33  ;;  %v2535_v63 = vrot.slane %v2533_v53, 5  ;;  %v13332_v18 = vpop.f32.mrf.mxu1 }
 0x1b9   : > { %v2541_v38 = vrot.slane %v2539_v39, 5  ;;  %v2545_v23 = vrot.slane %v2543_v14, 4  ;;  %v2551_v57 = vrot.slane %v2549_v21, 5  ;;  %v9588_v35 = vcombine.low %v13296_v25, %v13304_v27  ;;  %v11432_v14 = vld [vmem:[#allocation2 + $0xb8] sm:$0xf]  ;;  %v13340_v25 = vpop.f32.mrf.mxu0 }
 0x1ba   : > { %v1938_v5 = vrot.slane %v1937_v62, 4  ;;  %v4059_v30 = vadd.f32 %v10112_v60, %v13020_v36  ;;  %v10224_v16 = vadd.f32 %v13051_v45, %v13042_v2  ;;  %v2536_v33 = vor.u32 %v2535_v63, %v2532_v26  ;;  %v13342_v60 = vpop.f32.mrf.mxu1 }
 0x1bb   : > { %v2546_v61 = vor.u32 %v2545_v23, %v2541_v38  ;;  %v10115_v48 = vadd.f32 %v13097_v42, %v13082_v58  ;;  %v9461_v1 = vrot.slane %v2006_v46, 9  ;;  %v2156_v21 = vrot.slane %v11432_v14, 5  ;;  %v379_v23 = vld [vmem:[#allocation2 + $0xc8] sm:$0x1] }
 0x1bc   : > { %v1943_v53 = vsel %vm11878_vm10, %v1938_v5, %v1942_v9  ;;  %v13338_v39 = vadd.f32 %v10224_v16, %v4059_v30  ;;  %v2159_v62 = vrot.slane %v1606_v10, 5  ;;  %v2537_v45 = vrot.slane %v2536_v33, 4  ;;  %v16550_v30 = vld [vmem:[#allocation24_spill] sm:$0xff]  ;;  %v16551_v5 = vld [vmem:[#allocation25_spill] sm:$0xff]  ;;  %v13351_v16 = vpop.f32.mrf.mxu0 }
 0x1bd   : > { %v9556_v2 = vcombine.low %v1933_v32, %v1943_v53  ;;  %v2547_v26 = vrot.slane %v2546_v61, 4  ;;  %v4062_v63 = vadd.f32 %v10115_v48, %v13020_v36  ;;  %v2157_v58 = vsel %vm11898_vm12, %v9461_v1, %v2156_v21  ;;  %v13359_v1 = vld [vmem:[#allocation2 + $0xc0] sm:$0xf] }
 0x1be   : > { %16549 = vst [vmem:[#allocation21_spill] sm:$0xff] %v13338_v39  ;;  %v2158_v42 = vrot.slane %v2156_v21, 4  ;;  %v10227_v9 = vadd.f32 %v13087_v20, %v13076_v22  ;;  %v1951_v46 = vor.u32 %v16551_v5, %v16550_v30  ;;  %v13353_v39 = vpop.f32.mrf.mxu1  ;;  %v2542_v32 = vsel %vm11878_vm10, %v2537_v45, %v2541_v38  ;;  %v13361_v22 = vld [vmem:[#allocation2 + $0xc4] sm:$0xf] }
 0x1bf   : > { %4443 = vmatmul.mubr.bf16.gmra.mxu0 %v9556_v2  ;;  %v2552_v33 = vsel %vm11878_vm10, %v2547_v26, %v2551_v57  ;;  %v1954_v61 = vshll.u32 %v11432_v14, 16  ;;  %v1958_v48 = vshrl.u32 %v11432_v14, 16  ;;  %v13367_v2 = vpop.f32.mrf.mxu0  ;;  %v1964_v26 = vshll.u32 %v1606_v10, 16 }
 0x1c0   : > { %v9604_v20 = vcombine.low %v2542_v32, %v2552_v33  ;;  %v2160_v53 = vsel %vm11898_vm12, %v2158_v42, %v2159_v62  ;;  %v13365_v21 = vadd.f32 %v10227_v9, %v4062_v63  ;;  %v1952_v30 = vrot.slane %v1951_v46, 4  ;;  %v13369_v5 = vpop.f32.mrf.mxu1  ;;  %v16555_v9 = vld [vmem:[#allocation26_spill] sm:$0xff] }
 0x1c1   : > { %v9573_v38 = vcombine.low %v2157_v58, %v2160_v53  ;;  %v1956_v45 = vrot.slane %v1954_v61, 5  ;;  %v1960_v57 = vrot.slane %v1958_v48, 4  ;;  %v380_v27 = vsel %vm11892_vm11, 0, %v379_v23  ;;  %v13376_v63 = vpop.f32.mrf.mxu0 }
 0x1c2   : > { %16552 = vst [vmem:[#allocation22_spill] sm:$0xff] %v13365_v21  ;;  %4603 = vmatprep.mubr.bf16.mxu1 %v9604_v20  ;;  %v2554_v32 = vshrl.u32 %v13359_v1, 16  ;;  %v2557_v33 = vshll.u32 %v13359_v1, 16  ;;  %v2563_v62 = vshll.u32 %v13361_v22, 16  ;;  %v13378_v42 = vpop.f32.mrf.mxu1  ;;  %v16556_v46 = vshrl.u32 %v16555_v9, 16 }
 0x1c3   : > { %16554 = vst [vmem:[#allocation24_spill] sm:$0xff] %v13378_v42  ;;  %4604 = vmatmul.mubr.bf16.gmra.mxu1 %v9588_v35  ;;  %4450 = vmatprep.mubr.bf16.mxu0 %v9573_v38  ;;  %v1961_v10 = vor.u32 %v1960_v57, %v1956_v45  ;;  %v1966_v61 = vrot.slane %v1964_v26, 5  ;;  %381 = vst [vmem:[#allocation2 + $0xc8] sm:$0x1] %v380_v27  ;;  %v2567_v23 = vshrl.u32 %v13361_v22, 16  ;;  %v13389_v21 = vpop.f32.mrf.mxu0  ;;  %v11302_v57 = vld [vmem:[#allocation8 + $0x68] sm:$0xff]  }
 0x1c4   : > { %v13382_v58 = vrot.slane %v16556_v46, 4  ;;  %v2556_v48 = vrot.slane %v2554_v32, 4  ;;  %v2559_v20 = vrot.slane %v2557_v33, 5  ;;  %v13385_v53 = vrot.slane %v2563_v62, 5  ;;  %16557 = vst [vmem:[#allocation25_spill] sm:$0xff] %v13389_v21  ;;  %v13395_v27 = vpop.f32.mrf.mxu1  ;;  %v11303_v26 = vld [vmem:[#allocation8 + $0x28] sm:$0xff]   ;;  %10540 = vmatprep.subr.bf16.mxu1 %v11302_v57 }
 0x1c5   : > { %v10118_v14 = vadd.f32 %v13134_v47, %v13120_v7  ;;  %v1957_v46 = vsel %vm11878_vm10, %v1952_v30, %v1956_v45  ;;  %v1962_v42 = vrot.slane %v1961_v10, 4  ;;  %v2569_v35 = vrot.slane %v2567_v23, 4  ;;  %16558 = vst [vmem:[#allocation15_spill] sm:$0xff] %v13395_v27  ;;  %v2007_v21 = vld [vmem:[#allocation2 + $0xc0] sm:$0xe]  ;;  %v13402_v30 = vpop.f32.mrf.mxu0  ;;  %10541 = vmatpush3.bf16.msra.mxu1 %v11303_v26 }
 0x1c6   : > { %v10230_v38 = vadd.f32 %v13122_v17, %v13105_v41  ;;  %v16559_v32 = vshll.u32 %v16555_v9, 16  ;;  %v2560_v62 = vor.u32 %v2559_v20, %v2556_v48  ;;  %v10121_v47 = vadd.f32 %v13149_v4, %v13142_v49  ;;  %v13404_v45 = vld [vmem:[#allocation2 + $0x28] sm:$0xf]  ;;  %v13412_v23 = vld [vmem:[#allocation2 + $0x2c] sm:$0x1] }
 0x1c7   : > { %v4067_v7 = vadd.f32 %v10118_v14, %v13020_v36  ;;  %v1967_v17 = vsel %vm11878_vm10, %v1962_v42, %v1966_v61  ;;  %v2570_v10 = vor.u32 %v2569_v35, %v13385_v53  ;;  %v10233_v9 = vadd.f32 %v13144_v52, %v13136_v40  ;;  %v13418_v14 = vld [vmem:[#allocation2 + $0xcc] sm:$0xf]  ;;  %v13422_v42 = vpop.f32.mrf.mxu0  ;;  %v11435_v35 = vld [vmem:[#allocation2 + $0xc4] sm:$0xf] }
 0x1c8   : > { %v1974_v33 = vrot.slane %v16559_v32, 5  ;;  %v9557_v4 = vcombine.low %v1957_v46, %v1967_v17  ;;  %v4070_v20 = vadd.f32 %v10121_v47, %v13020_v36  ;;  %v13420_v32 = vld [vmem:[#allocation2 + $0xd0] sm:$0xf]  ;;  %16561 = vst [vmem:[#allocation42_spill] sm:$0xff] %v13422_v42  ;;  %v13424_v61 = vrot.slane %v2560_v62, 4  ;;  %v16566_v49 = vld [vmem:[#allocation23_spill] sm:$0xff] }
 0x1c9   : > { %v13415_v48 = vadd.f32 %v10230_v38, %v4067_v7  ;;  %v9462_v52 = vrot.slane %v2007_v21, 9  ;;  %v2163_v57 = vrot.slane %v11435_v35, 5  ;;  %v13428_v46 = vld [vmem:[#allocation2 + $0xd4] sm:$0x1]  ;;  %v13430_v38 = vpop.f32.mrf.mxu1  ;;  %v13432_v7 = vrot.slane %v2570_v10, 4  ;;  %v13436_v62 = vpop.f32.mrf.mxu0 }
 0x1ca   : > { %16562 = vst [vmem:[#allocation43_spill] sm:$0xff] %v13428_v46  ;;  %16563 = vst [vmem:[#allocation44_spill] sm:$0xff] %v13430_v38  ;;  %4451 = vmatmul.mubr.bf16.gmra.mxu0 %v9557_v4  ;;  %v943_v36 = vld [vmem:[#allocation2 + $0xc8] sm:$0x1]  ;;  %v13434_v47 = vadd.f32 %v10233_v9, %v4070_v20  ;;  %v1978_v17 = vshll.u32 %v11435_v35, 16  ;;  %v1982_v26 = vshrl.u32 %v11435_v35, 16  ;;  %v10236_v27 = vadd.f32 %v13169_v34, %v13159_v11 }
 0x1cb   : > { %16560 = vst [vmem:[#allocation26_spill] sm:$0xff] %v13415_v48  ;;  %16565 = vst [vmem:[#allocation46_spill] sm:$0xff] %v13436_v62  ;;  %v16567_v41 = vrot.slane %v16566_v49, 4  ;;  %v1975_v48 = vor.u32 %v1974_v33, %v13382_v58  ;;  %v2578_v42 = vshrl.u32 %v13418_v14, 16  ;;  %v2581_v4 = vshll.u32 %v13418_v14, 16 }
 0x1cc   : > { %16564 = vst [vmem:[#allocation45_spill] sm:$0xff] %v13434_v47  ;;  %v13445_v10 = vrot.slane %v1978_v17, 5  ;;  %v1984_v9 = vrot.slane %v1982_v26, 4  ;;  %v2587_v20 = vshll.u32 %v13420_v32, 16  ;;  %v2591_v35 = vshrl.u32 %v13420_v32, 16  ;;  %v13449_v47 = vpop.f32.mrf.mxu0 }
 0x1cd   : > { %v944_v21 = vsel %vm11871_vm8, %v16567_v41, %v943_v36  ;;  %16569 = vst [vmem:[#allocation23_spill] sm:$0xff] %v13449_v47  ;;  %v13453_v49 = vsel %vm11898_vm12, %v9462_v52, %v2163_v57  ;;  %v2580_v41 = vrot.slane %v2578_v42, 4  ;;  %v2583_v58 = vrot.slane %v2581_v4, 5  ;;  %v13456_v36 = vpop.f32.mrf.mxu1  ;;  %v2601_v38 = vld [vmem:[#allocation2 + $0x18] sm:$0xe] }
 0x1ce   : > { %945 = vst [vmem:[#allocation2 + $0xc8] sm:$0x1] %v944_v21  ;;  %v2597_v33 = vshll.u32 %v13428_v46, 16  ;;  %16570 = vst [vmem:[#allocation47_spill] sm:$0xff] %v13456_v36  ;;  %v2566_v17 = vsel %vm11878_vm10, %v13424_v61, %v13385_v53  ;;  %v2165_v26 = vrot.slane %v2163_v57, 4  ;;  %v2589_v21 = vrot.slane %v2587_v20, 5  ;;  %v13465_v4 = vpop.f32.mrf.mxu0 }
 0x1cf   : > { %v2593_v40 = vrot.slane %v2591_v35, 4  ;;  %v1976_v47 = vrot.slane %v1975_v48, 4  ;;  %v1985_v62 = vor.u32 %v1984_v9, %v13445_v10  ;;  %v2584_v52 = vor.u32 %v2583_v58, %v2580_v41  ;;  %v13474_v48 = vld [vmem:[%s16405_s3] ss:$0 sm:$0xff]  ;;  %v13477_v20 = vpop.f32.mrf.mxu1 }
 0x1d0   : > { %v10124_v42 = vadd.f32 %v13184_v44, %v13167_v6  ;;  %v2599_v36 = vrot.slane %v2597_v33, 5  ;;  %v10127_v53 = vadd.f32 %v13206_v15, %v13198_v50  ;;  %v9463_v9 = vrot.slane %v2601_v38, 9  ;;  %v11437_v6 = vld [vmem:[#allocation2 + $0x1c] sm:$0xf]  ;;  %16571 = vst [vmem:[#allocation48_spill] sm:$0xff] %v13477_v20 }
 0x1d1   : > { %v2594_v46 = vor.u32 %v2593_v40, %v2589_v21  ;;  %v2585_v61 = vrot.slane %v2584_v52, 4  ;;  %v2667_v44 = vrot.slane %v11437_v6, 5  ;;  %v11438_v11 = vld [vmem:[#allocation2 + $0x20] sm:$0x1]  ;;  %v10239_v50 = vadd.f32 %v13200_v19, %v13186_v24  ;;  %v2602_v15 = vld [vmem:[#allocation2 + $0x24] sm:$0xe] }
 0x1d2   : > { %v4075_v57 = vadd.f32 %v13474_v48, %v10124_v42  ;;  %v4078_v35 = vadd.f32 %v13474_v48, %v10127_v53  ;;  %v2670_v34 = vrot.slane %v11438_v11, 5  ;;  %v1981_v38 = vsel %vm11878_vm10, %v1976_v47, %v13445_v10  ;;  %v13491_v53 = vpop.f32.mrf.mxu1 }
 0x1d3   : > { %v2595_v40 = vrot.slane %v2594_v46, 4  ;;  %v1986_v33 = vrot.slane %v1985_v62, 4  ;;  %v2669_v42 = vrot.slane %v2667_v44, 4  ;;  %v13489_v46 = vpop.f32.mrf.mxu0  ;;  %v2668_v19 = vsel %vm11898_vm12, %v9463_v9, %v2667_v44 }
 0x1d4   : > { %v13487_v52 = vadd.f32 %v10236_v27, %v4075_v57  ;;  %v2590_v20 = vsel %vm11878_vm10, %v2585_v61, %v2589_v21  ;;  %v13502_v62 = vadd.f32 %v10239_v50, %v4078_v35  ;;  %v13504_v10 = vpop.f32.mrf.mxu1  ;;  %v16574_v21 = vrot.slane %v13404_v45, 5 }
 0x1d5   : > { %v13482_v41 = vld [vmem:[#allocation2 + $0xc8] sm:$0x1]  ;;  %v2600_v47 = vsel %vm11878_vm10, %v2595_v40, %v2599_v36  ;;  %v2671_v27 = vsel %vm11898_vm12, %v2669_v42, %v2670_v34  ;;  %v10130_v36 = vadd.f32 %v13221_v51, %v13209_v0  ;;  %v2603_v40 = vld [vmem:[#allocation2 + $0x30] sm:$0xe]  ;;  %v13513_v35 = vpop.f32.mrf.mxu0  ;;  %v10245_v45 = vadd.f32 %v13270_v55, %v13257_v59 }
 0x1d6   : > { %16572 = vst [vmem:[#allocation49_spill] sm:$0xff] %v13482_v41  ;;  %v1607_v58 = vld [vmem:[#allocation2 + $0xc8] sm:$0x1]  ;;  %16573 = vst [vmem:[#allocation50_spill] sm:$0xff] %v13487_v52  ;;  %v2573_v6 = vshll.u32 %v13482_v41, 16  ;;  %v9464_v41 = vrot.slane %v2602_v15, 9  ;;  %v9607_v44 = vcombine.low %v2668_v19, %v2671_v27  ;;  %v13515_v34 = vpop.f32.mrf.mxu1  ;;  %v9606_v51 = vcombine.low %v2590_v20, %v2600_v47 }
 0x1d7   : > { %v2166_v11 = vrot.slane %v1607_v58, 5  ;;  %v1988_v24 = vshll.u32 %v1607_v58, 16  ;;  %v2676_v61 = vrot.slane %v16574_v21, 4  ;;  %v16575_v15 = vld [vmem:[#allocation27_spill] sm:$0xff]  ;;  %v16576_v19 = vmov %v16574_v21  ;;  %v13542_v27 = vpop.f32.mrf.mxu0  ;;  %v11441_v21 = vld [vmem:[#allocation2 + $0x40] sm:$0xf] }
 0x1d8   : > { %v2575_v57 = vrot.slane %v2573_v6, 5  ;;  %v10133_v42 = vadd.f32 %v13251_v28, %v16575_v15  ;;  %v16577_v28 = vrot.slane %v13412_v23, 5  ;;  %v10136_v55 = vadd.f32 %v13281_v13, %v13266_v56  ;;  %v11442_v56 = vld [vmem:[#allocation2 + $0x44] sm:$0x1] }
 0x1d9   : > { %v2167_v58 = vsel %vm11898_vm12, %v2165_v26, %v2166_v11  ;;  %v1990_v52 = vrot.slane %v1988_v24, 5  ;;  %v4083_v11 = vadd.f32 %v13474_v48, %v10130_v36  ;;  %v13527_v24 = vpop.f32.mrf.mxu1  ;;  %v11304_v36 = vld [vmem:[#allocation8 + $0x60] sm:$0xff]   ;;  %v13559_v15 = vpop.f32.mrf.mxu0  ;;  %v2691_v13 = vrot.slane %v11442_v56, 5 }
 0x1da   : > { %v9574_v9 = vcombine.low %v13453_v49, %v2167_v58  ;;  %v2576_v26 = vsel %vm11878_vm10, %v13432_v7, %v2575_v57  ;;  %v10242_v49 = vadd.f32 %v13230_v31, %v13211_v54  ;;  %v2675_v7 = vsel %vm11898_vm12, %v9464_v41, %v16576_v19  ;;  %v11439_v54 = vld [vmem:[#allocation2 + $0x34] sm:$0xf]  ;;  %v2604_v41 = vld [vmem:[#allocation2 + $0x3c] sm:$0xe]  ;;  %10542 = vmatprep.subr.bf16.mxu1 %v11304_v36 }
 0x1db   : > { %v1991_v50 = vsel %vm11878_vm10, %v1986_v33, %v1990_v52  ;;  %v9605_v6 = vcombine.low %v2566_v17, %v2576_v26  ;;  %v4086_v33 = vadd.f32 %v13474_v48, %v10133_v42  ;;  %v9465_v52 = vrot.slane %v2603_v40, 9  ;;  %v13544_v57 = vpop.f32.mrf.mxu1  ;;  %v11305_v40 = vld [vmem:[#allocation8 + $0x20] sm:$0xff]   ;;  %v16579_v26 = vld [vmem:[#allocation20_spill] sm:$0xff] }
 0x1dc   : > { %4458 = vmatprep.mubr.bf16.mxu0 %v9574_v9  ;;  %v9558_v0 = vcombine.low %v1981_v38, %v1991_v50  ;;  %v2681_v31 = vrot.slane %v11439_v54, 5  ;;  %v2678_v17 = vsel %vm11898_vm12, %v2676_v61, %v16577_v28  ;;  %v13538_v20 = vadd.f32 %v10242_v49, %v4083_v11  ;;  %v11440_v38 = vld [vmem:[#allocation2 + $0x38] sm:$0x1]  ;;  %v16580_v50 = vld [vmem:[#allocation31_spill] sm:$0xff]  ;;  %10543 = vmatpush3.bf16.msra.mxu1 %v11305_v40 }
 0x1dd   : > { %4611 = vmatprep.mubr.bf16.mxu1 %v9605_v6  ;;  %v2684_v47 = vrot.slane %v11440_v38, 5  ;;  %v16578_v58 = vcombine.low %v13359_v1, %v13361_v22  ;;  %v2688_v61 = vrot.slane %v11441_v21, 5  ;;  %v13551_v59 = vadd.f32 %v10245_v45, %v4086_v33  ;;  %v13561_v42 = vpop.f32.mrf.mxu1  ;;  %v11445_v40 = vld [vmem:[#allocation2 + $0x58] sm:$0xf] }
 0x1de   : > { %4459 = vmatmul.mubr.bf16.gmra.mxu0 %v9558_v0  ;;  %v2682_v23 = vsel %vm11898_vm12, %v9465_v52, %v2681_v31  ;;  %v2683_v9 = vrot.slane %v2681_v31, 4  ;;  %v10248_v49 = vadd.f32 %v16580_v50, %v16579_v26  ;;  %v10139_v1 = vadd.f32 %v13325_v37, %v13308_v8  ;;  %v11443_v37 = vld [vmem:[#allocation2 + $0x4c] sm:$0xf]  ;;  %v13569_v52 = vpop.f32.mrf.mxu0 }
 0x1df   : > { %4612 = vmatmul.mubr.bf16.gmra.mxu1 %v16578_v58  ;;  %11024 = vmatprep.mubr.bf16.mxu0 %v9607_v44  ;;  %v2605_v44 = vld [vmem:[#allocation2 + $0x48] sm:$0xe]  ;;  %v9590_v6 = vcombine.low %v13418_v14, %v13420_v32  ;;  %v9608_v0 = vcombine.low %v2675_v7, %v2678_v17  ;;  %v9466_v11 = vrot.slane %v2604_v41, 9  ;;  %v4091_v19 = vadd.f32 %v13474_v48, %v10136_v55  ;;  %v13573_v28 = vpop.f32.mrf.mxu1 }
 0x1e0   : > { %4619 = vmatprep.mubr.bf16.mxu1 %v9606_v51  ;;  %v2685_v51 = vsel %vm11898_vm12, %v2683_v9, %v2684_v47  ;;  %v4094_v8 = vadd.f32 %v13474_v48, %v10139_v1  ;;  %v2695_v33 = vrot.slane %v11443_v37, 5  ;;  %v2690_v31 = vrot.slane %v2688_v61, 4  ;;  %v11444_v47 = vld [vmem:[#allocation2 + $0x50] sm:$0x1]  ;;  %v13577_v41 = vpop.f32.mrf.mxu0 }
 0x1e1   : > { %v9609_v54 = vcombine.low %v2682_v23, %v2685_v51  ;;  %v9467_v14 = vrot.slane %v2605_v44, 9  ;;  %v10251_v7 = vadd.f32 %v13319_v29, %v13312_v12  ;;  %v13575_v17 = vadd.f32 %v10248_v49, %v4091_v19  ;;  %v13596_v26 = vpop.f32.mrf.mxu1  ;;  %v11447_v51 = vld [vmem:[#allocation2 + $0x5c] sm:$0x1] }
 0x1e2   : > { %v2697_v38 = vrot.slane %v2695_v33, 4  ;;  %v2698_v45 = vrot.slane %v11444_v47, 5  ;;  %v10142_v9 = vadd.f32 %v13351_v16, %v13340_v25  ;;  %v2689_v23 = vsel %vm11898_vm12, %v9466_v11, %v2688_v61  ;;  %v13589_v21 = vpop.f32.mrf.mxu0  ;;  %v2606_v16 = vld [vmem:[#allocation2 + $0x54] sm:$0xe]  ;;  %v16583_v47 = vld [vmem:[#allocation15_spill] sm:$0xff] }
 0x1e3   : > { %v13579_v58 = vadd.f32 %v10251_v7, %v4094_v8  ;;  %v10254_v12 = vadd.f32 %v13342_v60, %v13332_v18  ;;  %v10145_v29 = vadd.f32 %v13376_v63, %v13367_v2  ;;  %v2692_v36 = vsel %vm11898_vm12, %v2690_v31, %v2691_v13  ;;  %v2607_v2 = vld [vmem:[#allocation2 + $0x60] sm:$0xe]  ;;  %v11446_v63 = vld [vmem:[#allocation2 + $0x64] sm:$0xf]  ;;  %v13613_v31 = vpop.f32.mrf.mxu1  ;;  %v2608_v7 = vld [vmem:[#allocation2 + $0x6c] sm:$0xe] }
 0x1e4   : > { %v2696_v25 = vsel %vm11898_vm12, %v9467_v14, %v2695_v33  ;;  %v2702_v55 = vrot.slane %v11445_v40, 5  ;;  %v4099_v61 = vadd.f32 %v13474_v48, %v10142_v9  ;;  %v2699_v18 = vsel %vm11898_vm12, %v2697_v38, %v2698_v45  ;;  %v13603_v1 = vpop.f32.mrf.mxu0  ;;  %v16581_v33 = vld [vmem:[#allocation25_spill] sm:$0xff]  ;;  %v16582_v38 = vld [vmem:[#allocation24_spill] sm:$0xff]  ;;  %v16584_v9 = vld [vmem:[#allocation42_spill] sm:$0xff] }
 0x1e5   : > { %v4102_v60 = vadd.f32 %v13474_v48, %v10145_v29  ;;  %v2709_v50 = vrot.slane %v11446_v63, 5  ;;  %v10257_v49 = vadd.f32 %v13369_v5, %v13353_v39  ;;  %v2705_v11 = vrot.slane %v11447_v51, 5  ;;  %v11448_v5 = vld [vmem:[#allocation2 + $0x68] sm:$0x1] }
 0x1e6   : > { %11025 = vmatmul.mubr.bf16.vlgmr.msra.gmra.mxu0 %v9608_v0  ;;  %v13605_v44 = vadd.f32 %v10254_v12, %v4099_v61  ;;  %v9468_v0 = vrot.slane %v2606_v16, 9  ;;  %v13609_v13 = vpop.f32.mrf.mxu0  ;;  %v9611_v19 = vcombine.low %v2696_v25, %v2699_v18  ;;  %v2704_v8 = vrot.slane %v2702_v55, 4  ;;  %v16586_v61 = vld [vmem:[#allocation44_spill] sm:$0xff]  ;;  %v16587_v18 = vld [vmem:[#allocation47_spill] sm:$0xff] }
 0x1e7   : > { %4620 = vmatmul.mubr.bf16.gmra.mxu1 %v9590_v6  ;;  %11028 = vmatprep.mubr.bf16.mxu0 %v9609_v54  ;;  %v9610_v6 = vcombine.low %v2689_v23, %v2692_v36  ;;  %v13607_v56 = vadd.f32 %v10257_v49, %v4102_v60  ;;  %v9469_v37 = vrot.slane %v2607_v2, 9  ;;  %v10148_v54 = vadd.f32 %v13402_v30, %v16581_v33  ;;  %v16585_v23 = vld [vmem:[#allocation46_spill] sm:$0xff]  ;;  %v11449_v36 = vld [vmem:[#allocation2 + $0x70] sm:$0xf]  ;;  %v13633_v33 = vpop.f32.mrf.mxu1 }
 0x1e8   : > { %v2711_v39 = vrot.slane %v2709_v50, 4  ;;  %v2712_v14 = vrot.slane %v11448_v5, 5  ;;  %v10260_v45 = vadd.f32 %v16583_v47, %v16582_v38  ;;  %v10151_v12 = vadd.f32 %v16585_v23, %v16584_v9  ;;  %v13619_v29 = vpop.f32.mrf.mxu0  ;;  %v16588_v5 = vld [vmem:[#allocation23_spill] sm:$0xff] }
 0x1e9   : > { %v2716_v25 = vrot.slane %v11449_v36, 5  ;;  %v4107_v16 = vadd.f32 %v13474_v48, %v10148_v54  ;;  %v2703_v30 = vsel %vm11898_vm12, %v9468_v0, %v2702_v55  ;;  %v10263_v60 = vadd.f32 %v16587_v18, %v16586_v61  ;;  %v11452_v9 = vld [vmem:[#allocation2 + $0x88] sm:$0xf]  ;;  %v13653_v61 = vpop.f32.mrf.mxu1 }
 0x1ea   : > { %v4110_v40 = vadd.f32 %v13474_v48, %v10151_v12  ;;  %v2706_v2 = vsel %vm11898_vm12, %v2704_v8, %v2705_v11  ;;  %v2710_v63 = vsel %vm11898_vm12, %v9469_v37, %v2709_v50  ;;  %v9470_v49 = vrot.slane %v2608_v7, 9  ;;  %v13641_v38 = vpop.f32.mrf.mxu0  ;;  %v11451_v8 = vld [vmem:[#allocation2 + $0x74] sm:$0x1]  ;;  %v2609_v37 = vld [vmem:[#allocation2 + $0x78] sm:$0xe] }
 0x1eb   : > { %v13631_v51 = vadd.f32 %v10260_v45, %v4107_v16  ;;  %v2713_v55 = vsel %vm11898_vm12, %v2711_v39, %v2712_v14  ;;  %v2718_v11 = vrot.slane %v2716_v25, 4  ;;  %v2719_v50 = vrot.slane %v11451_v8, 5  ;;  %v16589_v7 = vld [vmem:[#allocation48_spill] sm:$0xff]  ;;  %v2610_v14 = vld [vmem:[#allocation2 + $0x84] sm:$0xe] }
 0x1ec   : > { %v13637_v54 = vadd.f32 %v10263_v60, %v4110_v40  ;;  %v10266_v47 = vadd.f32 %v13491_v53, %v16589_v7  ;;  %v10157_v45 = vadd.f32 %v13513_v35, %v13489_v46  ;;  %v9612_v39 = vcombine.low %v2703_v30, %v2706_v2  ;;  %v13648_v36 = vpop.f32.mrf.mxu0  ;;  %v11453_v60 = vld [vmem:[#allocation2 + $0x80] sm:$0x1]  ;;  %v11455_v8 = vld [vmem:[#allocation2 + $0x94] sm:$0xf] }
 0x1ed   : > { %v2730_v23 = vrot.slane %v11452_v9, 5  ;;  %v10269_v40 = vadd.f32 %v13515_v34, %v13504_v10  ;;  %v9471_v53 = vrot.slane %v2609_v37, 9  ;;  %v2726_v46 = vrot.slane %v11453_v60, 5  ;;  %v11454_v34 = vld [vmem:[#allocation2 + $0x8c] sm:$0x1] }
 0x1ee   : > { %11029 = vmatmul.mubr.bf16.gmra.mxu0 %v9610_v6  ;;  %v11450_v6 = vld [vmem:[#allocation2 + $0x7c] sm:$0xf]  ;;  %v4118_v16 = vadd.f32 %v13474_v48, %v10157_v45  ;;  %v13657_v30 = vpop.f32.mrf.mxu0  ;;  %v2717_v2 = vsel %vm11898_vm12, %v9470_v49, %v2716_v25  ;;  %v2737_v37 = vrot.slane %v11455_v8, 5  ;;  %v10160_v7 = vadd.f32 %v13559_v15, %v13542_v27  ;;  %v11306_v45 = vld [vmem:[#allocation8 + $0x58] sm:$0xff]  }
 0x1ef   : > { %11032 = vmatprep.mubr.bf16.mxu0 %v9611_v19  ;;  %v2723_v0 = vrot.slane %v11450_v6, 5  ;;  %v10154_v19 = vadd.f32 %v13465_v4, %v16588_v5  ;;  %v9613_v4 = vcombine.low %v2710_v63, %v2713_v55  ;;  %v2720_v63 = vsel %vm11898_vm12, %v2718_v11, %v2719_v50  ;;  %v2611_v6 = vld [vmem:[#allocation2 + $0x90] sm:$0xe]  ;;  %10544 = vmatprep.subr.bf16.mxu1 %v11306_v45 }
 0x1f0   : > { %v9472_v55 = vrot.slane %v2610_v14, 9  ;;  %v13663_v5 = vadd.f32 %v10269_v40, %v4118_v16  ;;  %v2732_v10 = vrot.slane %v2730_v23, 4  ;;  %v11307_v25 = vld [vmem:[#allocation8 + $0x18] sm:$0xff]   ;;  %v10272_v49 = vadd.f32 %v13544_v57, %v13527_v24  ;;  %v10282_v50 = vpop.f32.mrf.mxu1  ;;  %v11456_v16 = vld [vmem:[#allocation2 + $0x98] sm:$0x1] }
 0x1f1   : > { %v4115_v12 = vadd.f32 %v13474_v48, %v10154_v19  ;;  %v2725_v18 = vrot.slane %v2723_v0, 4  ;;  %v2733_v19 = vrot.slane %v11454_v34, 5  ;;  %v10163_v11 = vadd.f32 %v13577_v41, %v13569_v52  ;;  %10545 = vmatpush3.bf16.msra.mxu1 %v11307_v25  ;;  %v2613_v25 = vld [vmem:[#allocation2 + $0xa8] sm:$0xe] }
 0x1f2   : > { %v2724_v14 = vsel %vm11898_vm12, %v9471_v53, %v2723_v0  ;;  %v4123_v27 = vadd.f32 %v13474_v48, %v10160_v7  ;;  %v9473_v24 = vrot.slane %v2611_v6, 9  ;;  %v10275_v52 = vadd.f32 %v13573_v28, %v13561_v42  ;;  %v10283_v41 = vpop.f32.mrf.mxu1  ;;  %v13689_v53 = vld [vmem:[#allocation2 + $0x9c] sm:$0xe] }
 0x1f3   : > { %v13655_v35 = vadd.f32 %v10266_v47, %v4115_v12  ;;  %v13667_v47 = vpop.f32.mrf.mxu0  ;;  %v2727_v9 = vsel %vm11898_vm12, %v2725_v18, %v2726_v46  ;;  %v13680_v12 = vsel %vm11898_vm12, %v9472_v55, %v2730_v23  ;;  %v4126_v57 = vadd.f32 %v13474_v48, %v10163_v11  ;;  %v16591_v11 = vld [vmem:[#allocation41_spill] sm:$0xff] }
 0x1f4   : > { %v13687_v0 = vsel %vm11898_vm12, %v2732_v10, %v2733_v19  ;;  %v2740_v40 = vrot.slane %v11456_v16, 5  ;;  %v13691_v18 = vadd.f32 %v10272_v49, %v4123_v27  ;;  %v9615_v60 = vcombine.low %v2724_v14, %v2727_v9  ;;  %v10285_v28 = vpop.f32.mrf.mxu1  ;;  %v2616_v10 = vld [vmem:[#allocation2 + $0xcc] sm:$0xe] }
 0x1f5   : > { %v10304_v15 = vpop.f32.mrf.mxu0  ;;  %v13693_v46 = vadd.f32 %v10275_v52, %v4126_v57  ;;  %v10166_v42 = vadd.f32 %v13603_v1, %v13589_v21  ;;  %v10278_v55 = vadd.f32 %v13613_v31, %v13596_v26  ;;  %v10169_v6 = vadd.f32 %v13619_v29, %v13609_v13  ;;  %v16590_v19 = vld [vmem:[#allocation43_spill] sm:$0xff] }
 0x1f6   : > { %11033 = vmatmul.mubr.bf16.gmra.mxu0 %v9612_v39  ;;  %v9614_v39 = vcombine.low %v2717_v2, %v2720_v63  ;;  %v11457_v2 = vld [vmem:[#allocation2 + $0xa0] sm:$0xf]  ;;  %v2775_v8 = vrot.slane %v16590_v19, 5  ;;  %v9616_v7 = vcombine.low %v13680_v12, %v13687_v0  ;;  %v9474_v45 = vrot.slane %v13689_v53, 9  ;;  %v10286_v1 = vpop.f32.mrf.mxu1 }
 0x1f7   : > { %11036 = vmatprep.mubr.bf16.mxu0 %v9613_v4  ;;  %v2739_v4 = vrot.slane %v2737_v37, 4  ;;  %v10305_v23 = vpop.f32.mrf.mxu0  ;;  %v2744_v63 = vrot.slane %v11457_v2, 5  ;;  %v4131_v21 = vadd.f32 %v13474_v48, %v10166_v42  ;;  %v2738_v26 = vsel %vm11898_vm12, %v9473_v24, %v2737_v37  ;;  %v11458_v24 = vld [vmem:[#allocation2 + $0xa4] sm:$0x1] }
 0x1f8   : > { %v4134_v31 = vadd.f32 %v13474_v48, %v10169_v6  ;;  %v10281_v29 = vadd.f32 %v13653_v61, %v13633_v33  ;;  %v2751_v14 = vrot.slane %v16591_v11, 5  ;;  %v9478_v27 = vrot.slane %v2616_v10, 9  ;;  %v13717_v12 = vpop.f32.mrf.mxu1  ;;  %v16592_v10 = vld [vmem:[#allocation28_spill] sm:$0xff]  ;;  %v16597_v11 = vld [vmem:[#allocation37_spill] sm:$0xff] }
 0x1f9   : > { %v10307_v34 = vpop.f32.mrf.mxu0  ;;  %v2741_v13 = vsel %vm11898_vm12, %v2739_v4, %v2740_v40  ;;  %v13714_v9 = vadd.f32 %v10278_v55, %v4131_v21  ;;  %v2746_v37 = vrot.slane %v2744_v63, 4  ;;  %v2747_v57 = vrot.slane %v11458_v24, 5  ;;  %v2614_v24 = vld [vmem:[#allocation2 + $0xb4] sm:$0xe] }
 0x1fa   : > { %v9475_v52 = vrot.slane %v2613_v25, 9  ;;  %v13719_v0 = vadd.f32 %v10281_v29, %v4134_v31  ;;  %v10172_v16 = vadd.f32 %v13648_v36, %v13641_v38  ;;  %v10284_v40 = vadd.f32 %v10283_v41, %v10282_v50  ;;  %v13727_v53 = vpop.f32.mrf.mxu1  ;;  %v16596_v29 = vld [vmem:[#allocation32_spill] sm:$0xff] }
 0x1fb   : > { %v10308_v49 = vpop.f32.mrf.mxu0  ;;  %v10287_v42 = vadd.f32 %v10286_v1, %v10285_v28  ;;  %v10306_v2 = vadd.f32 %v10305_v23, %v10304_v15  ;;  %v2753_v6 = vrot.slane %v2751_v14, 4  ;;  %v2754_v19 = vrot.slane %v16592_v10, 5 }
 0x1fc   : > { %v4139_v21 = vadd.f32 %v13474_v48, %v10172_v16  ;;  %v13737_v38 = vpop.f32.mrf.mxu1  ;;  %v10309_v15 = vadd.f32 %v10308_v49, %v10307_v34  ;;  %v2745_v1 = vsel %vm11898_vm12, %v9474_v45, %v2744_v63  ;;  %v2748_v34 = vsel %vm11898_vm12, %v2746_v37, %v2747_v57  ;;  %v16599_v37 = vld [vmem:[#allocation38_spill] sm:$0xff] }
 0x1fd   : > { %v10310_v4 = vpop.f32.mrf.mxu0  ;;  %v2758_v49 = vrot.slane %v16596_v29, 5  ;;  %v2752_v63 = vsel %vm11898_vm12, %v9475_v52, %v2751_v14  ;;  %v2755_v45 = vsel %vm11898_vm12, %v2753_v6, %v2754_v19  ;;  %v16602_v19 = vld [vmem:[#allocation49_spill] sm:$0xff] }
 0x1fe   : > { %11037 = vmatmul.mubr.bf16.gmra.mxu0 %v9614_v39  ;;  %v2772_v39 = vrot.slane %v13420_v32, 5  ;;  %v9617_v32 = vcombine.low %v2738_v26, %v2741_v13  ;;  %v13745_v23 = vadd.f32 %v10284_v40, %v4139_v21  ;;  %v13747_v28 = vpop.f32.mrf.mxu1  ;;  %v16595_v13 = vld [vmem:[#allocation36_spill] sm:$0xff]  ;;  %v9618_v40 = vcombine.low %v2745_v1, %v2748_v34 }
 0x1ff   : > { %11040 = vmatprep.mubr.bf16.mxu0 %v9615_v60  ;;  %v10175_v60 = vadd.f32 %v13667_v47, %v13657_v30  ;;  %v10311_v55 = vpop.f32.mrf.mxu0  ;;  %v16593_v30 = vld [vmem:[#allocation35_spill] sm:$0xff]  ;;  %v13754_v31 = vadd.f32 %v10309_v15, %v16595_v13  ;;  %v2768_v21 = vrot.slane %v16602_v19, 5 }
 0x200   : > { %v13723_v33 = vsel %vm11898_vm12, %v9478_v27, %v2772_v39  ;;  %v2774_v61 = vrot.slane %v2772_v39, 4  ;;  %v13743_v47 = vadd.f32 %v10306_v2, %v16593_v30  ;;  %v13762_v39 = vpop.f32.mrf.mxu1  ;;  %v16601_v2 = vld [vmem:[#allocation33_spill] sm:$0xff]  ;;  %v11308_v30 = vld [vmem:[#allocation8 + $0x50] sm:$0xff]  }
 0x201   : > { %v4142_v50 = vadd.f32 %v13474_v48, %v10175_v60  ;;  %v10313_v41 = vpop.f32.mrf.mxu0  ;;  %v9476_v60 = vrot.slane %v2614_v24, 9  ;;  %v11309_v15 = vld [vmem:[#allocation8 + $0x10] sm:$0xff]   ;;  %10546 = vmatprep.subr.bf16.mxu1 %v11308_v30  ;;  %v16609_v30 = vld [vmem:[#allocation30_spill] sm:$0xff] }
 0x202   : > { %v13734_v25 = vsel %vm11898_vm12, %v2774_v61, %v2775_v8  ;;  %v10312_v8 = vadd.f32 %v10311_v55, %v10310_v4  ;;  %v2765_v4 = vrot.slane %v13361_v22, 5  ;;  %v2615_v61 = vld [vmem:[#allocation2 + $0xc0] sm:$0xe]  ;;  %v13769_v16 = vpop.f32.mrf.mxu1  ;;  %v2761_v55 = vrot.slane %v16601_v2, 5  ;;  %10547 = vmatpush3.bf16.msra.mxu1 %v11309_v15 }
 0x203   : > { %v9622_v36 = vcombine.low %v13723_v33, %v13734_v25  ;;  %v13751_v26 = vadd.f32 %v10287_v42, %v4142_v50  ;;  %v10314_v48 = vpop.f32.mrf.mxu0  ;;  %v2760_v42 = vrot.slane %v2758_v49, 4  ;;  %v9477_v52 = vrot.slane %v2615_v61, 9  ;;  %v16613_v33 = vld [vmem:[#allocation34_spill] sm:$0xff] }
 0x204   : > { %v13760_v27 = vadd.f32 %v10312_v8, %v16597_v11  ;;  %v13775_v10 = vpop.f32.mrf.mxu1  ;;  %v2767_v6 = vrot.slane %v2765_v4, 4  ;;  %v2759_v8 = vsel %vm11898_vm12, %v9476_v60, %v2758_v49  ;;  %v16603_v11 = vld [vmem:[#allocation39_spill] sm:$0xff] }
 0x205   : > { %16594 = vst [vmem:[#allocation27_spill] sm:$0xff] %v13751_v26  ;;  %v10316_v14 = vpop.f32.mrf.mxu0  ;;  %v2762_v1 = vsel %vm11898_vm12, %v2760_v42, %v2761_v55  ;;  %v2766_v34 = vsel %vm11898_vm12, %v9477_v52, %v2765_v4  ;;  %v16607_v52 = vld [vmem:[#allocation29_spill] sm:$0xff] }
 0x206   : > { %11041 = vmatmul.mubr.bf16.gmra.mxu0 %v9616_v7  ;;  %16598 = vst [vmem:[#allocation20_spill] sm:$0xff] %v13760_v27  ;;  %v10315_v7 = vadd.f32 %v10314_v48, %v10313_v41  ;;  %v13778_v22 = vpop.f32.mrf.mxu1  ;;  %v2769_v29 = vsel %vm11898_vm12, %v2767_v6, %v2768_v21 }
 0x207   : > { %11044 = vmatprep.mubr.bf16.mxu0 %v9617_v32  ;;  %v9619_v32 = vcombine.low %v2752_v63, %v2755_v45  ;;  %v10317_v50 = vpop.f32.mrf.mxu0  ;;  %v9620_v45 = vcombine.low %v2759_v8, %v2762_v1  ;;  %v9621_v61 = vcombine.low %v2766_v34, %v2769_v29 }
 0x208   : > { %v13772_v57 = vadd.f32 %v10315_v7, %v16599_v37  ;;  %v10318_v41 = vadd.f32 %v10317_v50, %v10316_v14  ;;  %v13784_v13 = vpop.f32.mrf.mxu1 }
 0x209   : > { %v10319_v48 = vpop.f32.mrf.mxu0 }
 0x20a   : > { %16600 = vst [vmem:[#allocation31_spill] sm:$0xff] %v13772_v57  ;;  %v13791_v7 = vadd.f32 %v10318_v41, %v16603_v11  ;;  %v13793_v63 = vpop.f32.mrf.mxu1  ;;  %v16611_v11 = vld [vmem:[#allocation19_spill] sm:$0xff]  ;;  %v11323_v57 = vld [vmem:[#allocation8] sm:$0xff]  }
 0x20b   : > { %v10320_v49 = vpop.f32.mrf.mxu0 }
 0x20c   : > { %16604 = vst [vmem:[#allocation25_spill] sm:$0xff] %v13791_v7  ;;  %v10321_v24 = vadd.f32 %v10320_v49, %v10319_v48  ;;  %v13795_v37 = vpop.f32.mrf.mxu1 }
 0x20d   : > { %v10322_v60 = vpop.f32.mrf.mxu0 }
 0x20e   : > { %11045 = vmatmul.mubr.bf16.gmra.mxu0 %v9618_v40  ;;  %v16605_v40 = vld [vmem:[#allocation40_spill] sm:$0xff]  ;;  %v13800_v4 = vpop.f32.mrf.mxu1 }
 0x20f   : > { %11048 = vmatprep.mubr.bf16.mxu0 %v9619_v32  ;;  %v13798_v32 = vadd.f32 %v10321_v24, %v16605_v40  ;;  %v10323_v42 = vpop.f32.mrf.mxu0 }
 0x210   : > { %v10324_v2 = vadd.f32 %v10323_v42, %v10322_v60  ;;  %v11310_v60 = vld [vmem:[#allocation8 + $0xf8] sm:$0xff]  }
 0x211   : > { %16606 = vst [vmem:[#allocation24_spill] sm:$0xff] %v13798_v32  ;;  %v10325_v14 = vpop.f32.mrf.mxu0  ;;  %10648 = vmatprep.subr.bf16.mxu0 %v11310_v60  ;;  %v11317_v60 = vld [vmem:[#allocation8 + $0xa8] sm:$0xff]   ;;  %v11325_v32 = vld [vmem:[#allocation8 + $0x90] sm:$0xff]  }
 0x212   : > { %v13802_v55 = vpop.f32.mrf.mxu1  ;;  %v13805_v6 = vadd.f32 %v10324_v2, %v16607_v52  ;;  %v11312_v2 = vld [vmem:[#allocation8 + $0xb8] sm:$0xff]  }
 0x213   : > { %v10326_v21 = vpop.f32.mrf.mxu0  ;;  %10649 = vmatpush3.bf16.msra.mxu0 %v11312_v2  ;;  %v11313_v2 = vld [vmem:[#allocation8 + $0x8] sm:$0xff]  }
 0x214   : > { %16608 = vst [vmem:[#allocation15_spill] sm:$0xff] %v13805_v6  ;;  %v13807_v19 = vpop.f32.mrf.mxu1  ;;  %v10327_v50 = vadd.f32 %v10326_v21, %v10325_v14  ;;  %v11321_v6 = vld [vmem:[#allocation8 + $0x40] sm:$0xff]  }
 0x216   : > { %11049 = vmatmul.mubr.bf16.gmra.mxu0 %v9620_v45  ;;  %v13813_v15 = vadd.f32 %v10327_v50, %v16609_v30  ;;  %v13815_v41 = vpop.f32.mrf.mxu1  ;;  %v16617_v50 = vld [vmem:[#allocation21_spill] sm:$0xff] }
 0x217   : > { %11052 = vmatprep.mubr.bf16.mxu0 %v9621_v61 }
 0x218   : > { %16610 = vst [vmem:[#allocation42_spill] sm:$0xff] %v13813_v15  ;;  %v10328_v8 = vpop.f32.mrf.mxu0  ;;  %v13817_v48 = vpop.f32.mrf.mxu1  ;;  %v11322_v15 = vld [vmem:[#allocation8 + $0x98] sm:$0xff]  }
 0x21a   : > { %v10329_v1 = vpop.f32.mrf.mxu0 }
 0x21b   : > { %v10330_v34 = vadd.f32 %v10329_v1, %v10328_v8  ;;  %v11314_v8 = vld [vmem:[#allocation8 + $0xf0] sm:$0xff]  }
 0x21c   : > { %v10331_v29 = vpop.f32.mrf.mxu0  ;;  %10650 = vmatprep.subr.bf16.mxu0 %v11314_v8 }
 0x21d   : > { %v13820_v49 = vadd.f32 %v10330_v34, %v16611_v11  ;;  %v13822_v24 = vpop.f32.mrf.mxu1  ;;  %v11315_v34 = vld [vmem:[#allocation8 + $0xb0] sm:$0xff]  }
 0x21e   : > { %11053 = vmatmul.mubr.bf16.gmra.mxu0 %v9622_v36  ;;  %v10332_v45 = vpop.f32.mrf.mxu0 }
 0x21f   : > { %16612 = vst [vmem:[#allocation46_spill] sm:$0xff] %v13820_v49  ;;  %v10333_v61 = vadd.f32 %v10332_v45, %v10331_v29  ;;  %v13827_v40 = vpop.f32.mrf.mxu1  ;;  %10651 = vmatpush3.bf16.msra.mxu0 %v11315_v34  ;;  %v16620_v45 = vld [vmem:[#allocation22_spill] sm:$0xff] }
 0x220   : > { %16615 = vst [vmem:[#allocation47_spill] sm:$0xff] %v13827_v40  ;;  %v16623_v34 = vld [vmem:[#allocation26_spill] sm:$0xff] }
 0x221   : > { %v13825_v25 = vadd.f32 %v10333_v61, %v16613_v33  ;;  %v13829_v21 = vpop.f32.mrf.mxu1  ;;  %v11316_v33 = vld [vmem:[#allocation8 + $0xe8] sm:$0xff]  }
 0x222   : > { %v10334_v36 = vpop.f32.mrf.mxu0  ;;  %16616 = vst [vmem:[#allocation23_spill] sm:$0xff] %v13829_v21  ;;  %10652 = vmatprep.subr.bf16.mxu0 %v11316_v33  ;;  %v11320_v33 = vld [vmem:[#allocation8 + $0xd8] sm:$0xff]   ;;  %v5348_v49 = vld [vmem:[#allocation2] sm:$0xf] }
 0x223   : > { %16614 = vst [vmem:[#allocation44_spill] sm:$0xff] %v13825_v25  ;;  %v13834_v11 = vpop.f32.mrf.mxu1  ;;  %10653 = vmatpush3.bf16.msra.mxu0 %v11317_v60  ;;  %v13846_v60 = vld [vmem:[#allocation2 + $0x4] sm:$0xf] }
 0x224   : > { %v10335_v42 = vpop.f32.mrf.mxu0  ;;  %16619 = vst [vmem:[#allocation43_spill] sm:$0xff] %v13834_v11  ;;  %v16629_v21 = vld [vmem:[#allocation50_spill] sm:$0xff] }
 0x225   : > { %v10336_v14 = vadd.f32 %v10335_v42, %v10334_v36  ;;  %v11311_v42 = vld [vmem:[#allocation8 + $0x48] sm:$0xff]  }
 0x226   : > { %v10337_v52 = vpop.f32.mrf.mxu0  ;;  %10548 = vmatprep.subr.bf16.mxu1 %v11311_v42 }
 0x227   : > { %v13832_v30 = vadd.f32 %v10336_v14, %v16617_v50  ;;  %v13839_v14 = vpop.f32.mrf.mxu1  ;;  %10549 = vmatpush3.bf16.msra.mxu1 %v11313_v2  ;;  %v5400_v2 = vshll.u32 %v5348_v49, 16 }
 0x228   : > { %v10338_v1 = vpop.f32.mrf.mxu0  ;;  %16622 = vst [vmem:[#allocation28_spill] sm:$0xff] %v13839_v14  ;;  %10550 = vmatprep.subr.bf16.mxu1 %v11321_v6 }
 0x229   : > { %16618 = vst [vmem:[#allocation48_spill] sm:$0xff] %v13832_v30  ;;  %v10339_v29 = vadd.f32 %v10338_v1, %v10337_v52  ;;  %v11318_v52 = vld [vmem:[#allocation8 + $0xe0] sm:$0xff]   ;;  %v5402_v26 = vrot.slane %v5400_v2, 5  ;;  %v11326_v2 = vld [vmem:[#allocation8 + $0xc8] sm:$0xff]  }
 0x22a   : > { %v11319_v1 = vld [vmem:[#allocation8 + $0xa0] sm:$0xff]   ;;  %10654 = vmatprep.subr.bf16.mxu0 %v11318_v52 }
 0x22b   : > { %v13837_v61 = vadd.f32 %v10339_v29, %v16620_v45  ;;  %10655 = vmatpush3.bf16.msra.mxu0 %v11319_v1  ;;  %v13844_v45 = vpop.f32.mrf.mxu1  ;;  %v5410_v1 = vshrl.u32 %v13846_v60, 16  ;;  %10551 = vmatpush3.bf16.msra.mxu1 %v11323_v57 }
 0x22c   : > { %16625 = vst [vmem:[#allocation36_spill] sm:$0xff] %v13844_v45  ;;  %10656 = vmatprep.subr.bf16.mxu0 %v11320_v33 }
 0x22d   : > { %16621 = vst [vmem:[#allocation41_spill] sm:$0xff] %v13837_v61  ;;  %v10340_v36 = vpop.f32.mrf.mxu0  ;;  %v5412_v7 = vrot.slane %v5410_v1, 4  ;;  %v11327_v1 = vld [vmem:[#allocation8 + $0x88] sm:$0xff]  }
 0x22f   : > { %v10341_v25 = vpop.f32.mrf.mxu0  ;;  %10657 = vmatpush3.bf16.msra.mxu0 %v11322_v15 }
 0x230   : > { %v10342_v50 = vadd.f32 %v10341_v25, %v10340_v36  ;;  %v5397_v25 = vshrl.u32 %v5348_v49, 16  ;;  %v16626_v36 = vld [vmem:[#allocation45_spill] sm:$0xff] }
 0x231   : > { %v10343_v8 = vpop.f32.mrf.mxu0 }
 0x232   : > { %v13842_v30 = vadd.f32 %v10342_v50, %v16623_v34  ;;  %v5406_v50 = vshll.u32 %v13846_v60, 16  ;;  %v5399_v52 = vrot.slane %v5397_v25, 4 }
 0x233   : > { %v10344_v29 = vpop.f32.mrf.mxu0 }
 0x234   : > { %16624 = vst [vmem:[#allocation35_spill] sm:$0xff] %v13842_v30  ;;  %v10345_v61 = vadd.f32 %v10344_v29, %v10343_v8  ;;  %v13853_v30 = vpop.f32.mrf.mxu1  ;;  %v11324_v8 = vld [vmem:[#allocation8 + $0xd0] sm:$0xff]   ;;  %v5408_v45 = vrot.slane %v5406_v50, 5  ;;  %v5403_v33 = vor.u32 %v5402_v26, %v5399_v52 }
 0x235   : > { %16628 = vst [vmem:[#allocation37_spill] sm:$0xff] %v13853_v30  ;;  %v5380_v29 = vld [vmem:[#allocation2 + $0x8] sm:$0x1]  ;;  %10658 = vmatprep.subr.bf16.mxu0 %v11324_v8 }
 0x236   : > { %v13849_v42 = vadd.f32 %v10345_v61, %v16626_v36  ;;  %v5416_v61 = vshll.u32 %v5380_v29, 16  ;;  %10659 = vmatpush3.bf16.msra.mxu0 %v11325_v32  ;;  %v5413_v15 = vor.u32 %v5412_v7, %v5408_v45  ;;  %v13855_v11 = vpop.f32.mrf.mxu1  ;;  %v5404_v50 = vrot.slane %v5403_v33, 4 }
 0x237   : > { %v10346_v34 = vpop.f32.mrf.mxu0  ;;  %10660 = vmatprep.subr.bf16.mxu0 %v11326_v2  ;;  %v5846_v32 = vrot.slane %v13846_v60, 5  ;;  %v5849_v8 = vrot.slane %v5380_v29, 5  ;;  %v5780_v2 = vld [vmem:[#allocation2] sm:$0xe] }
 0x238   : > { %16627 = vst [vmem:[#allocation32_spill] sm:$0xff] %v13849_v42  ;;  %v5418_v25 = vrot.slane %v5416_v61, 5  ;;  %v5414_v40 = vrot.slane %v5413_v15, 4  ;;  %v5409_v26 = vsel %vm11878_vm10, %v5404_v50, %v5408_v45  ;;  %v11330_v61 = vld [vmem:[#allocation8 + $0x80] sm:$0xff]   ;;  %v9728_v50 = vrot.slane %v5780_v2, 9 }
 0x239   : > { %v10347_v14 = vpop.f32.mrf.mxu0 }
 0x23a   : > { %v10348_v36 = vadd.f32 %v10347_v14, %v10346_v34  ;;  %10661 = vmatpush3.bf16.msra.mxu0 %v11327_v1  ;;  %v5419_v7 = vsel %vm11878_vm10, %v5414_v40, %v5418_v25  ;;  %v13866_v34 = vpop.f32.mrf.mxu1 }
 0x23b   : > { %v10349_v42 = vpop.f32.mrf.mxu0  ;;  %v9792_v52 = vcombine.low %v5409_v26, %v5419_v7  ;;  %v13889_v26 = vsel %vm11898_vm12, %v9728_v50, %v5846_v32 }
 0x23c   : > { %v13858_v30 = vadd.f32 %v10348_v36, %v16629_v21  ;;  %v9776_v21 = vcombine.low %v5348_v49, %v13846_v60  ;;  %v13875_v49 = vpop.f32.mrf.mxu1  ;;  %16631 = vst [vmem:[#allocation33_spill] sm:$0xff] %v13889_v26 }
 0x23d   : > { %v10350_v27 = vpop.f32.mrf.mxu0  ;;  %8411 = vmatprep.mubr.bf16.mxu1 %v9792_v52 }
 0x23e   : > { %v10351_v14 = vadd.f32 %v10350_v27, %v10349_v42  ;;  %v11329_v27 = vld [vmem:[#allocation8 + $0xc0] sm:$0xff]   ;;  %v5848_v42 = vrot.slane %v5846_v32, 4  ;;  %8412 = vmatmul.mubr.bf16.vlgmr.msra.gmra.mxu1 %v9776_v21  ;;  %v13880_v15 = vpop.f32.mrf.mxu1 }
 0x23f   : > { %10662 = vmatprep.subr.bf16.mxu0 %v11329_v27 }
 0x240   : > { %v13869_v6 = vadd.f32 %v10351_v14, %v13502_v62  ;;  %v13873_v40 = vsel %vm11898_vm12, %v5848_v42, %v5849_v8  ;;  %10663 = vmatpush3.bf16.msra.mxu0 %v11330_v61  ;;  %v13885_v1 = vpop.f32.mrf.mxu1 }
 0x241   : > { %16630 = vst [vmem:[#allocation38_spill] sm:$0xff] %v13873_v40 }
 0x242   : > { %v10352_v57 = vpop.f32.mrf.mxu0  ;;  %v13893_v21 = vpop.f32.mrf.mxu1 }
 0x244   : > { %v10353_v45 = vpop.f32.mrf.mxu0  ;;  %v13898_v42 = vpop.f32.mrf.mxu1 }
 0x245   : > { %v10354_v60 = vadd.f32 %v10353_v45, %v10352_v57 }
 0x246   : > { %v10355_v62 = vpop.f32.mrf.mxu0  ;;  %v13903_v32 = vpop.f32.mrf.mxu1 }
 0x247   : > { %v13878_v36 = vadd.f32 %v10354_v60, %v13538_v20 }
 0x248   : > { %v10356_v33 = vpop.f32.mrf.mxu0 }
 0x249   : > { %v10357_v29 = vadd.f32 %v10356_v33, %v10355_v62  ;;  %v11333_v62 = vld [vmem:[#allocation8 + $0x178] sm:$0xff]  }
 0x24a   : > { %v11334_v33 = vld [vmem:[#allocation8 + $0x138] sm:$0xff]   ;;  %10760 = vmatprep.subr.bf16.mxu1 %v11333_v62 }
 0x24b   : > { %v13883_v25 = vadd.f32 %v10357_v29, %v13551_v59  ;;  %v13905_v29 = vpop.f32.mrf.mxu1  ;;  %10761 = vmatpush3.bf16.msra.mxu1 %v11334_v33 }
 0x24f   : > { %v10358_v14 = vpop.f32.mrf.mxu0 }
 0x251   : > { %v10359_v7 = vpop.f32.mrf.mxu0 }
 0x252   : > { %v10360_v52 = vadd.f32 %v10359_v7, %v10358_v14  ;;  %v13910_v7 = vpop.f32.mrf.mxu1 }
 0x253   : > { %v10361_v27 = vpop.f32.mrf.mxu0 }
 0x254   : > { %v13896_v59 = vadd.f32 %v10360_v52, %v13575_v17 }
 0x255   : > { %v10362_v57 = vpop.f32.mrf.mxu0 }
 0x256   : > { %v10363_v8 = vadd.f32 %v10362_v57, %v10361_v27  ;;  %v13915_v27 = vpop.f32.mrf.mxu1 }
 0x258   : > { %v13901_v61 = vadd.f32 %v10363_v8, %v13579_v58  ;;  %v13917_v20 = vpop.f32.mrf.mxu1 }
 0x25a   : > { %v13922_v33 = vpop.f32.mrf.mxu1 }
 0x25b   : > { %v10364_v45 = vpop.f32.mrf.mxu0 }
 0x25d   : > { %v10365_v60 = vpop.f32.mrf.mxu0 }
 0x25e   : > { %v10366_v2 = vadd.f32 %v10365_v60, %v10364_v45 }
 0x25f   : > { %v10367_v50 = vpop.f32.mrf.mxu0 }
 0x260   : > { %v13908_v17 = vadd.f32 %v10366_v2, %v13605_v44 }
 0x261   : > { %v10368_v14 = vpop.f32.mrf.mxu0 }
 0x262   : > { %v10369_v58 = vadd.f32 %v10368_v14, %v10367_v50 }
 0x264   : > { %v13913_v52 = vadd.f32 %v10369_v58, %v13607_v56  ;;  %v13927_v56 = vpop.f32.mrf.mxu1 }
 0x266   : > { %v13929_v43 = vpop.f32.mrf.mxu1 }
 0x267   : > { %v10370_v57 = vpop.f32.mrf.mxu0 }
 0x269   : > { %v10371_v8 = vpop.f32.mrf.mxu0 }
 0x26a   : > { %v10372_v45 = vadd.f32 %v10371_v8, %v10370_v57 }
 0x26b   : > { %v10373_v60 = vpop.f32.mrf.mxu0 }
 0x26c   : > { %v13920_v62 = vadd.f32 %v10372_v45, %v13631_v51  ;;  %v13934_v45 = vpop.f32.mrf.mxu1 }
 0x26d   : > { %v10374_v44 = vpop.f32.mrf.mxu0 }
 0x26e   : > { %16632 = vst [vmem:[#allocation49_spill] sm:$0xff] %v13920_v62  ;;  %v10375_v2 = vadd.f32 %v10374_v44, %v10373_v60 }
 0x270   : > { %v13925_v50 = vadd.f32 %v10375_v2, %v13637_v54  ;;  %v13939_v54 = vpop.f32.mrf.mxu1  ;;  %v11339_v2 = vld [vmem:[#allocation8 + $0x170] sm:$0xff]  }
 0x271   : > { %10762 = vmatprep.subr.bf16.mxu1 %v11339_v2 }
 0x272   : > { %16633 = vst [vmem:[#allocation39_spill] sm:$0xff] %v13925_v50 }
 0x273   : > { %v10376_v14 = vpop.f32.mrf.mxu0 }
 0x275   : > { %v10377_v58 = vpop.f32.mrf.mxu0 }
 0x276   : > { %v10378_v3 = vadd.f32 %v10377_v58, %v10376_v14  ;;  %v13941_v14 = vpop.f32.mrf.mxu1 }
 0x277   : > { %v10379_v40 = vpop.f32.mrf.mxu0 }
 0x278   : > { %v13932_v57 = vadd.f32 %v10378_v3, %v13655_v35 }
 0x279   : > { %v10380_v51 = vpop.f32.mrf.mxu0 }
 0x27a   : > { %16634 = vst [vmem:[#allocation40_spill] sm:$0xff] %v13932_v57  ;;  %v10381_v8 = vadd.f32 %v10380_v51, %v10379_v40  ;;  %v13946_v51 = vpop.f32.mrf.mxu1 }
 0x27c   : > { %v13937_v60 = vadd.f32 %v10381_v8, %v13663_v5  ;;  %v11340_v8 = vld [vmem:[#allocation8 + $0x130] sm:$0xff]   ;;  %v13951_v57 = vpop.f32.mrf.mxu1 }
 0x27d   : > { %10763 = vmatpush3.bf16.msra.mxu1 %v11340_v8 }
 0x27e   : > { %16635 = vst [vmem:[#allocation29_spill] sm:$0xff] %v13937_v60  ;;  %v13953_v26 = vpop.f32.mrf.mxu1 }
 0x27f   : > { %v10382_v44 = vpop.f32.mrf.mxu0 }
 0x281   : > { %v10383_v50 = vpop.f32.mrf.mxu0 }
 0x282   : > { %v10384_v62 = vadd.f32 %v10383_v50, %v10382_v44 }
 0x283   : > { %v10385_v58 = vpop.f32.mrf.mxu0 }
 0x284   : > { %v13944_v3 = vadd.f32 %v10384_v62, %v13691_v18 }
 0x285   : > { %v10386_v35 = vpop.f32.mrf.mxu0 }
 0x286   : > { %v10387_v40 = vadd.f32 %v10386_v35, %v10385_v58  ;;  %v13958_v35 = vpop.f32.mrf.mxu1 }
 0x288   : > { %v13949_v5 = vadd.f32 %v10387_v40, %v13693_v46  ;;  %v13963_v40 = vpop.f32.mrf.mxu1 }
 0x28a   : > { %16636 = vst [vmem:[#allocation30_spill] sm:$0xff] %v13949_v5  ;;  %v10388_v60 = vpop.f32.mrf.mxu0  ;;  %v13965_v5 = vpop.f32.mrf.mxu1 }
 0x28c   : > { %v10389_v50 = vpop.f32.mrf.mxu0 }
 0x28d   : > { %v10390_v44 = vadd.f32 %v10389_v50, %v10388_v60  ;;  %v10418_v60 = vadd.f32 %v13727_v53, %v13717_v12  ;;  %v10421_v50 = vadd.f32 %v13747_v28, %v13737_v38  ;;  %v10436_v12 = vadd.f32 %v13807_v19, %v13802_v55  ;;  %v13981_v53 = vpop.f32.mrf.mxu1  ;;  %v16641_v55 = vld [vmem:[#allocation20_spill] sm:$0xff] }
 0x28e   : > { %v10391_v2 = vpop.f32.mrf.mxu0  ;;  %v10439_v28 = vadd.f32 %v13817_v48, %v13815_v41 }
 0x28f   : > { %v13956_v18 = vadd.f32 %v10390_v44, %v13714_v9  ;;  %v10424_v44 = vadd.f32 %v13769_v16, %v13762_v39  ;;  %v13996_v48 = vpop.f32.mrf.mxu1 }
 0x290   : > { %v10392_v62 = vpop.f32.mrf.mxu0 }
 0x291   : > { %16637 = vst [vmem:[#allocation19_spill] sm:$0xff] %v13956_v18  ;;  %v10393_v58 = vadd.f32 %v10392_v62, %v10391_v2  ;;  %v10427_v2 = vadd.f32 %v13778_v22, %v13775_v10  ;;  %v10430_v62 = vadd.f32 %v13793_v63, %v13784_v13  ;;  %v4502_v10 = vadd.f32 %v10418_v60, %v13743_v47  ;;  %v11345_v13 = vld [vmem:[#allocation8 + $0x168] sm:$0xff]   ;;  %v16640_v63 = vld [vmem:[#allocation47_spill] sm:$0xff]  ;;  %v16646_v47 = vld [vmem:[#allocation25_spill] sm:$0xff] }
 0x292   : > { %v4505_v22 = vadd.f32 %v10421_v50, %v13754_v31  ;;  %v4510_v19 = vadd.f32 %v10424_v44, %v16641_v55  ;;  %v16644_v18 = vld [vmem:[#allocation43_spill] sm:$0xff]  ;;  %v16647_v31 = vld [vmem:[#allocation24_spill] sm:$0xff]  ;;  %10764 = vmatprep.subr.bf16.mxu1 %v11345_v13  ;;  %v16651_v55 = vld [vmem:[#allocation42_spill] sm:$0xff] }
 0x293   : > { %v13961_v46 = vadd.f32 %v10393_v58, %v13719_v0  ;;  %v10433_v58 = vadd.f32 %v13800_v4, %v13795_v37  ;;  %v10442_v37 = vadd.f32 %v16640_v63, %v13822_v24  ;;  %v4518_v60 = vadd.f32 %v10430_v62, %v16646_v47  ;;  %v16648_v24 = vld [vmem:[#allocation28_spill] sm:$0xff]  ;;  %v16650_v44 = vld [vmem:[#allocation27_spill] sm:$0xff] }
 0x294   : > { %v10454_v62 = vadd.f32 %v13875_v49, %v13866_v34  ;;  %v10469_v34 = vadd.f32 %v13922_v33, %v13917_v20  ;;  %v10472_v49 = vadd.f32 %v13929_v43, %v13927_v56  ;;  %v16657_v43 = vld [vmem:[#allocation35_spill] sm:$0xff]  ;;  %v16658_v56 = vld [vmem:[#allocation32_spill] sm:$0xff] }
 0x295   : > { %16638 = vst [vmem:[#allocation34_spill] sm:$0xff] %v13961_v46  ;;  %v16643_v46 = vld [vmem:[#allocation23_spill] sm:$0xff]  ;;  %v14001_v50 = vadd.f32 %v10433_v58, %v16647_v31  ;;  %v10457_v58 = vadd.f32 %v13885_v1, %v13880_v15  ;;  %v14030_v15 = vpop.f32.mrf.mxu1 }
 0x296   : > { %v10445_v41 = vadd.f32 %v16644_v18, %v16643_v46  ;;  %v14009_v18 = vadd.f32 %v10439_v28, %v16651_v55  ;;  %v16652_v46 = vld [vmem:[#allocation37_spill] sm:$0xff]  ;;  %v16653_v28 = vld [vmem:[#allocation46_spill] sm:$0xff]  ;;  %v14045_v33 = vadd.f32 %v10454_v62, %v16657_v43 }
 0x297   : > { %v11346_v62 = vld [vmem:[#allocation8 + $0x128] sm:$0xff]  }
 0x298   : > { %10765 = vmatpush3.bf16.msra.mxu1 %v11346_v62 }
 0x29e   : > { %v10394_v8 = vpop.f32.mrf.mxu0 }
 0x2a0   : > { %v10395_v9 = vpop.f32.mrf.mxu0 }
 0x2a1   : > { %v10396_v0 = vadd.f32 %v10395_v9, %v10394_v8  ;;  %v16642_v8 = vld [vmem:[#allocation31_spill] sm:$0xff] }
 0x2a2   : > { %v10397_v38 = vpop.f32.mrf.mxu0  ;;  %v4513_v9 = vadd.f32 %v10427_v2, %v16642_v8  ;;  %v10451_v8 = vadd.f32 %v13855_v11, %v16652_v46  ;;  %v10466_v11 = vadd.f32 %v13915_v27, %v13910_v7  ;;  %v16656_v7 = vld [vmem:[#allocation41_spill] sm:$0xff]  ;;  %v14056_v46 = vadd.f32 %v10472_v49, %v13896_v59 }
 0x2a3   : > { %v13986_v39 = vadd.f32 %v10396_v0, %v13745_v23  ;;  %v16645_v0 = vld [vmem:[#allocation15_spill] sm:$0xff] }
 0x2a4   : > { %v10398_v16 = vpop.f32.mrf.mxu0  ;;  %v14039_v27 = vadd.f32 %v10451_v8, %v16656_v7  ;;  %v14062_v8 = vadd.f32 %v10469_v34, %v13883_v25 }
 0x2a5   : > { %16639 = vst [vmem:[#allocation21_spill] sm:$0xff] %v13986_v39  ;;  %v10399_v4 = vadd.f32 %v10398_v16, %v10397_v38  ;;  %v4526_v39 = vadd.f32 %v10436_v12, %v16645_v0  ;;  %v16649_v38 = vld [vmem:[#allocation36_spill] sm:$0xff]  ;;  %v10460_v12 = vadd.f32 %v13898_v42, %v13893_v21  ;;  %v14022_v0 = vadd.f32 %v10442_v37, %v16653_v28 }
 0x2a6   : > { %v11026_v23 = vpop.f32.mrf.mxu0  ;;  %v10448_v16 = vadd.f32 %v16649_v38, %v16648_v24  ;;  %v16654_v21 = vld [vmem:[#allocation44_spill] sm:$0xff]  ;;  %v14048_v24 = vadd.f32 %v10457_v58, %v16658_v56 }
 0x2a7   : > { %v14006_v63 = vadd.f32 %v10399_v4, %v16650_v44  ;;  %v4671_v2 = vadd.f32 %v11026_v23, %v4510_v19  ;;  %v10463_v4 = vadd.f32 %v13905_v29, %v13903_v32  ;;  %v14033_v42 = vadd.f32 %v10445_v41, %v16654_v21  ;;  %v16655_v37 = vld [vmem:[#allocation48_spill] sm:$0xff] }
 0x2a8   : > { %v4662_v13 = vpop.f32.mrf.mxu0  ;;  %v14036_v47 = vadd.f32 %v10448_v16, %v16655_v37  ;;  %v14042_v20 = vadd.f32 %v10460_v12, %v13858_v30  ;;  %v14053_v16 = vpop.f32.mrf.mxu1  ;;  %v14059_v30 = vadd.f32 %v10466_v11, %v13878_v36 }
 0x2a9   : > { %v4791_v19 = vmax.f32 %v4671_v2, 0.0  ;;  %v4663_v23 = vadd.f32 %v4662_v13, %v4502_v10 }
 0x2aa   : > { %v11027_v1 = vpop.f32.mrf.mxu0  ;;  %v14068_v34 = vpop.f32.mrf.mxu1 }
 0x2ab   : > { %v10033_v32 = vpack.c.bf16 %v4791_v19, %v4791_v19  ;;  %v4789_v29 = vmax.f32 %v4663_v23, 0.0  ;;  %v4674_v10 = vadd.f32 %v11027_v1, %v4513_v9  ;;  %v14051_v9 = vadd.f32 %v10463_v4, %v13869_v6 }
 0x2ac   : > { %v4665_v31 = vpop.f32.mrf.mxu0  ;;  %v14066_v6 = vadd.f32 %v13939_v54, %v13934_v45 }
 0x2ad   : > { %v4935_v41 = vshrl.u32 %v10033_v32, 16  ;;  %v10031_v38 = vpack.c.bf16 %v4789_v29, %v4789_v29  ;;  %v4792_v44 = vmax.f32 %v4674_v10, 0.0  ;;  %v4666_v2 = vadd.f32 %v4665_v31, %v4505_v22  ;;  %v5243_v22 = vld [vmem:[#allocation2 + $0x18] sm:$0xf] }
 0x2ae   : > { %v11030_v55 = vpop.f32.mrf.mxu0  ;;  %v4938_v12 = vshll.u32 %v10033_v32, 16 }
 0x2af   : > { %v4937_v58 = vrot.slane %v4935_v41, 7  ;;  %v4918_v13 = vshrl.u32 %v10031_v38, 16  ;;  %v10034_v19 = vpack.c.bf16 %v4792_v44, %v4792_v44  ;;  %v4921_v4 = vshll.u32 %v10031_v38, 16 }
 0x2b0   : > { %v4790_v23 = vmax.f32 %v4666_v2, 0.0  ;;  %v4687_v59 = vadd.f32 %v11030_v55, %v4526_v39  ;;  %v4678_v28 = vpop.f32.mrf.mxu0  ;;  %v5247_v39 = vld [vmem:[#allocation2 + $0x20] sm:$0x1]  ;;  %v11459_v2 = vld [vmem:[#allocation2 + $0xc] sm:$0xf] }
 0x2b1   : > { %v4940_v36 = vor.u32 %v4938_v12, %v4937_v58  ;;  %v4941_v11 = vrot.slane %v4937_v58, 4  ;;  %v4920_v49 = vrot.slane %v4918_v13, 7  ;;  %v4943_v25 = vshrl.u32 %v10034_v19, 16  ;;  %v14075_v12 = vpop.f32.mrf.mxu1 }
 0x2b2   : > { %v4946_v1 = vshll.u32 %v10034_v19, 16  ;;  %v10032_v21 = vpack.c.bf16 %v4790_v23, %v4790_v23  ;;  %v4795_v32 = vmax.f32 %v4687_v59, 0.0  ;;  %v4679_v29 = vadd.f32 %v4678_v28, %v4518_v60  ;;  %v11031_v10 = vpop.f32.mrf.mxu0 }
 0x2b3   : > { %v5244_v45 = vsel %vm11916_vm14, %v4940_v36, %v5243_v22  ;;  %v4923_v54 = vor.u32 %v4921_v4, %v4920_v49  ;;  %v4924_v31 = vrot.slane %v4920_v49, 4  ;;  %v4945_v7 = vrot.slane %v4943_v25, 7  ;;  %v5240_v25 = vld [vmem:[#allocation2 + $0x14] sm:$0x1] }
 0x2b4   : > { %5245 = vst [vmem:[#allocation2 + $0x18] sm:$0xf] %v5244_v45  ;;  %v4926_v43 = vshrl.u32 %v10032_v21, 16  ;;  %v4929_v56 = vshll.u32 %v10032_v21, 16  ;;  %v10037_v41 = vpack.c.bf16 %v4795_v32, %v4795_v32  ;;  %v4793_v38 = vmax.f32 %v4679_v29, 0.0  ;;  %v4681_v44 = vpop.f32.mrf.mxu0 }
 0x2b5   : > { %v5237_v55 = vsel %vm11916_vm14, %v4923_v54, %v11459_v2  ;;  %v4948_v62 = vor.u32 %v4946_v1, %v4945_v7  ;;  %v4950_v60 = vrot.slane %v4945_v7, 4  ;;  %v4690_v58 = vadd.f32 %v11031_v10, %v14009_v18  ;;  %v11351_v54 = vld [vmem:[#allocation8 + $0x160] sm:$0xff]  }
 0x2b6   : > { %5238 = vst [vmem:[#allocation2 + $0xc] sm:$0xf] %v5237_v55  ;;  %v4928_v13 = vrot.slane %v4926_v43, 7  ;;  %v4969_v19 = vshrl.u32 %v10037_v41, 16  ;;  %v4972_v22 = vshll.u32 %v10037_v41, 16  ;;  %v10035_v4 = vpack.c.bf16 %v4793_v38, %v4793_v38  ;;  %v11034_v23 = vpop.f32.mrf.mxu0  ;;  %v14087_v38 = vpop.f32.mrf.mxu1  ;;  %10766 = vmatprep.subr.bf16.mxu1 %v11351_v54 }
 0x2b7   : > { %v4949_v28 = vsel %vm11904_vm13, %v4941_v11, %v4948_v62  ;;  %v5248_v49 = vsel %vm11871_vm8, %v4950_v60, %v5247_v39  ;;  %v4796_v21 = vmax.f32 %v4690_v58, 0.0  ;;  %v4682_v1 = vadd.f32 %v4681_v44, %v14001_v50  ;;  %v5257_v11 = vld [vmem:[#allocation2 + $0x30] sm:$0xf]  ;;  %v5250_v58 = vld [vmem:[#allocation2 + $0x24] sm:$0xf] }
 0x2b8   : > { %5246 = vst [vmem:[#allocation2 + $0x1c] sm:$0xf] %v4949_v28  ;;  %5249 = vst [vmem:[#allocation2 + $0x20] sm:$0x1] %v5248_v49  ;;  %v4931_v18 = vor.u32 %v4929_v56, %v4928_v13  ;;  %v4933_v32 = vrot.slane %v4928_v13, 4  ;;  %v4971_v29 = vrot.slane %v4969_v19, 7  ;;  %v4694_v45 = vpop.f32.mrf.mxu0  ;;  %v14084_v7 = vadd.f32 %v13946_v51, %v13941_v14 }
 0x2b9   : > { %v4952_v10 = vshrl.u32 %v10035_v4, 16  ;;  %v10038_v43 = vpack.c.bf16 %v4796_v21, %v4796_v21  ;;  %v4794_v41 = vmax.f32 %v4682_v1, 0.0  ;;  %v4703_v39 = vadd.f32 %v11034_v23, %v14036_v47  ;;  %v5261_v21 = vld [vmem:[#allocation2 + $0x38] sm:$0x1] }
 0x2ba   : > { %v4932_v50 = vsel %vm11904_vm13, %v4924_v31, %v4931_v18  ;;  %v5241_v56 = vsel %vm11871_vm8, %v4933_v32, %v5240_v25  ;;  %v4974_v44 = vor.u32 %v4972_v22, %v4971_v29  ;;  %v4955_v2 = vshll.u32 %v10035_v4, 16  ;;  %v11035_v55 = vpop.f32.mrf.mxu0  ;;  %v14097_v25 = vpop.f32.mrf.mxu1 }
 0x2bb   : > { %5239 = vst [vmem:[#allocation2 + $0x10] sm:$0xf] %v4932_v50  ;;  %5242 = vst [vmem:[#allocation2 + $0x14] sm:$0x1] %v5241_v56  ;;  %v4975_v14 = vrot.slane %v4971_v29, 4  ;;  %v4954_v51 = vrot.slane %v4952_v10, 7  ;;  %v10036_v60 = vpack.c.bf16 %v4794_v41, %v4794_v41  ;;  %v4695_v31 = vadd.f32 %v4694_v45, %v14022_v0 }
 0x2bc   : > { %v4977_v62 = vshrl.u32 %v10038_v43, 16  ;;  %v5258_v47 = vsel %vm11916_vm14, %v4974_v44, %v5257_v11  ;;  %v4799_v13 = vmax.f32 %v4703_v39, 0.0  ;;  %v4706_v19 = vadd.f32 %v11035_v55, %v14039_v27  ;;  %v4697_v23 = vpop.f32.mrf.mxu0  ;;  %v5254_v41 = vld [vmem:[#allocation2 + $0x2c] sm:$0x1] }
 0x2bd   : > { %5259 = vst [vmem:[#allocation2 + $0x30] sm:$0xf] %v5258_v47  ;;  %v4957_v22 = vor.u32 %v4955_v2, %v4954_v51  ;;  %v4980_v28 = vshll.u32 %v10038_v43, 16  ;;  %v4960_v49 = vshrl.u32 %v10036_v60, 16  ;;  %v4963_v1 = vshll.u32 %v10036_v60, 16  ;;  %v11352_v60 = vld [vmem:[#allocation8 + $0x120] sm:$0xff]   ;;  %v14105_v47 = vpop.f32.mrf.mxu1 }
 0x2be   : > { %v4979_v4 = vrot.slane %v4977_v62, 7  ;;  %v10041_v18 = vpack.c.bf16 %v4799_v13, %v4799_v13  ;;  %v4797_v32 = vmax.f32 %v4695_v31, 0.0  ;;  %v4800_v29 = vmax.f32 %v4706_v19, 0.0  ;;  %v11038_v10 = vpop.f32.mrf.mxu0  ;;  %10767 = vmatpush3.bf16.msra.mxu1 %v11352_v60 }
 0x2bf   : > { %v5251_v54 = vsel %vm11916_vm14, %v4957_v22, %v5250_v58  ;;  %v4962_v27 = vrot.slane %v4960_v49, 7  ;;  %v4958_v11 = vrot.slane %v4954_v51, 4  ;;  %v4698_v49 = vadd.f32 %v4697_v23, %v14033_v42 }
 0x2c0   : > { %v4982_v0 = vor.u32 %v4980_v28, %v4979_v4  ;;  %v4984_v45 = vrot.slane %v4979_v4, 4  ;;  %5252 = vst [vmem:[#allocation2 + $0x24] sm:$0xf] %v5251_v54  ;;  %v5003_v39 = vshrl.u32 %v10041_v18, 16  ;;  %v10039_v43 = vpack.c.bf16 %v4797_v32, %v4797_v32  ;;  %v4710_v56 = vpop.f32.mrf.mxu0  ;;  %v5271_v4 = vld [vmem:[#allocation2 + $0x48] sm:$0xf] }
 0x2c1   : > { %v10042_v50 = vpack.c.bf16 %v4800_v29, %v4800_v29  ;;  %v4965_v55 = vor.u32 %v4963_v1, %v4962_v27  ;;  %v4967_v62 = vrot.slane %v4962_v27, 4  ;;  %v5006_v58 = vshll.u32 %v10041_v18, 16  ;;  %v5264_v29 = vld [vmem:[#allocation2 + $0x3c] sm:$0xf] }
 0x2c2   : > { %v4983_v44 = vsel %vm11904_vm13, %v4975_v14, %v4982_v0  ;;  %v5262_v2 = vsel %vm11871_vm8, %v4984_v45, %v5261_v21  ;;  %v5005_v51 = vrot.slane %v5003_v39, 7  ;;  %v4986_v13 = vshrl.u32 %v10039_v43, 16  ;;  %v11039_v19 = vpop.f32.mrf.mxu0 }
 0x2c3   : > { %5260 = vst [vmem:[#allocation2 + $0x34] sm:$0xf] %v4983_v44  ;;  %5263 = vst [vmem:[#allocation2 + $0x38] sm:$0x1] %v5262_v2  ;;  %v5011_v31 = vshrl.u32 %v10042_v50, 16  ;;  %v4966_v22 = vsel %vm11904_vm13, %v4958_v11, %v4965_v55  ;;  %v5255_v14 = vsel %vm11871_vm8, %v4967_v62, %v5254_v41  ;;  %v4989_v28 = vshll.u32 %v10039_v43, 16  ;;  %v14117_v41 = vpop.f32.mrf.mxu1 }
 0x2c4   : > { %5253 = vst [vmem:[#allocation2 + $0x28] sm:$0xf] %v4966_v22  ;;  %5256 = vst [vmem:[#allocation2 + $0x2c] sm:$0x1] %v5255_v14  ;;  %v5008_v21 = vor.u32 %v5006_v58, %v5005_v51  ;;  %v14112_v1 = vrot.slane %v4986_v13, 7  ;;  %v5014_v32 = vshll.u32 %v10042_v50, 16  ;;  %v4719_v0 = vadd.f32 %v11038_v10, %v14042_v20  ;;  %v4713_v11 = vpop.f32.mrf.mxu0 }
 0x2c5   : > { %v5013_v18 = vrot.slane %v5011_v31, 7  ;;  %v4798_v54 = vmax.f32 %v4698_v49, 0.0  ;;  %v4711_v45 = vadd.f32 %v4710_v56, %v14045_v33  ;;  %v4722_v27 = vadd.f32 %v11039_v19, %v14051_v9  ;;  %v5275_v44 = vld [vmem:[#allocation2 + $0x50] sm:$0x1]  ;;  %v14133_v13 = vpop.f32.mrf.mxu1 }
 0x2c6   : > { %v5009_v42 = vrot.slane %v5005_v51, 4  ;;  %v5272_v23 = vsel %vm11916_vm14, %v5008_v21, %v5271_v4  ;;  %v4991_v39 = vor.u32 %v4989_v28, %v14112_v1  ;;  %v4803_v55 = vmax.f32 %v4719_v0, 0.0  ;;  %v14135_v14 = vpop.f32.mrf.mxu0  ;;  %v11355_v4 = vld [vmem:[#allocation8 + $0x1f8] sm:$0xff]  }
 0x2c7   : > { %v5016_v43 = vor.u32 %v5014_v32, %v5013_v18  ;;  %5273 = vst [vmem:[#allocation2 + $0x48] sm:$0xf] %v5272_v23  ;;  %v5018_v50 = vrot.slane %v5013_v18, 4  ;;  %v10040_v2 = vpack.c.bf16 %v4798_v54, %v4798_v54  ;;  %v4801_v20 = vmax.f32 %v4711_v45, 0.0  ;;  %v5268_v18 = vld [vmem:[#allocation2 + $0x44] sm:$0x1]  ;;  %10872 = vmatprep.subr.bf16.mxu0 %v11355_v4 }
 0x2c8   : > { %v5265_v33 = vsel %vm11916_vm14, %v4991_v39, %v5264_v29  ;;  %v4804_v10 = vmax.f32 %v4722_v27, 0.0  ;;  %v4714_v56 = vadd.f32 %v4713_v11, %v14048_v24  ;;  %v10045_v51 = vpack.c.bf16 %v4803_v55, %v4803_v55  ;;  %v5278_v55 = vld [vmem:[#allocation2 + $0x54] sm:$0xf] }
 0x2c9   : > { %v5017_v9 = vsel %vm11904_vm13, %v5009_v42, %v5016_v43  ;;  %5266 = vst [vmem:[#allocation2 + $0x3c] sm:$0xf] %v5265_v33  ;;  %v5276_v62 = vsel %vm11871_vm8, %v5018_v50, %v5275_v44  ;;  %v4994_v60 = vshrl.u32 %v10040_v2, 16  ;;  %v14131_v58 = vadd.f32 %v14066_v6, %v13901_v61  ;;  %v5285_v42 = vld [vmem:[#allocation2 + $0x60] sm:$0xf]  ;;  %v14144_v43 = vpop.f32.mrf.mxu0 }
 0x2ca   : > { %5274 = vst [vmem:[#allocation2 + $0x4c] sm:$0xf] %v5017_v9  ;;  %5277 = vst [vmem:[#allocation2 + $0x50] sm:$0x1] %v5276_v62  ;;  %v10043_v31 = vpack.c.bf16 %v4801_v20, %v4801_v20  ;;  %v10046_v19 = vpack.c.bf16 %v4804_v10, %v4804_v10  ;;  %v4802_v22 = vmax.f32 %v4714_v56, 0.0  ;;  %v14139_v24 = vadd.f32 %v14084_v7, %v13908_v17  ;;  %v11359_v17 = vld [vmem:[#allocation8 + $0x158] sm:$0xff]   ;;  %v10503_v7 = vpop.f32.mrf.mxu1 }
 0x2cb   : > { %v10481_v28 = vadd.f32 %v13953_v26, %v13951_v57  ;;  %v4996_v49 = vrot.slane %v4994_v60, 7  ;;  %v4997_v21 = vshll.u32 %v10040_v2, 16  ;;  %v5037_v61 = vshrl.u32 %v10045_v51, 16  ;;  %v5289_v20 = vld [vmem:[#allocation2 + $0x68] sm:$0x1]  ;;  %10768 = vmatprep.subr.bf16.mxu1 %v11359_v17  ;;  %v16665_v17 = vld [vmem:[#allocation49_spill] sm:$0xff] }
 0x2cc   : > { %v4992_v6 = vrot.slane %v14112_v1, 4  ;;  %v5040_v32 = vshll.u32 %v10045_v51, 16  ;;  %v5020_v29 = vshrl.u32 %v10043_v31, 16  ;;  %v5045_v54 = vshrl.u32 %v10046_v19, 16  ;;  %v14152_v62 = vld [vmem:[#allocation2 + $0x10] sm:$0xf] }
 0x2cd   : > { %v4999_v0 = vor.u32 %v4997_v21, %v4996_v49  ;;  %v5001_v45 = vrot.slane %v4996_v49, 4  ;;  %v5039_v27 = vrot.slane %v5037_v61, 7  ;;  %v10044_v11 = vpack.c.bf16 %v4802_v22, %v4802_v22  ;;  %v11356_v61 = vld [vmem:[#allocation8 + $0x1b8] sm:$0xff]  }
 0x2ce   : > { %v5022_v23 = vrot.slane %v5020_v29, 7  ;;  %v5023_v39 = vshll.u32 %v10043_v31, 16  ;;  %v5047_v26 = vrot.slane %v5045_v54, 7  ;;  %v5048_v57 = vshll.u32 %v10046_v19, 16  ;;  %v10504_v19 = vpop.f32.mrf.mxu1 }
 0x2cf   : > { %v10484_v1 = vadd.f32 %v13963_v40, %v13958_v35  ;;  %v5000_v44 = vsel %vm11904_vm13, %v4992_v6, %v4999_v0  ;;  %v5269_v50 = vsel %vm11871_vm8, %v5001_v45, %v5268_v18  ;;  %v5042_v2 = vor.u32 %v5040_v32, %v5039_v27  ;;  %v5282_v32 = vld [vmem:[#allocation2 + $0x5c] sm:$0x1] }
 0x2d0   : > { %5267 = vst [vmem:[#allocation2 + $0x40] sm:$0xf] %v5000_v44  ;;  %5270 = vst [vmem:[#allocation2 + $0x44] sm:$0x1] %v5269_v50  ;;  %v5043_v33 = vrot.slane %v5039_v27, 4  ;;  %v5025_v9 = vor.u32 %v5023_v39, %v5022_v23  ;;  %v5050_v10 = vor.u32 %v5048_v57, %v5047_v26  ;;  %v5052_v56 = vrot.slane %v5047_v26, 4 }
 0x2d1   : > { %v10487_v35 = vadd.f32 %v13981_v53, %v13965_v5  ;;  %v10490_v40 = vadd.f32 %v14030_v15, %v13996_v48  ;;  %v5286_v60 = vsel %vm11916_vm14, %v5042_v2, %v5285_v42  ;;  %v5028_v51 = vshrl.u32 %v10044_v11, 16  ;;  %v14168_v53 = vld [vmem:[#allocation2 + $0xc] sm:$0xf]  ;;  %v11043_v48 = vpop.f32.mrf.mxu0  ;;  %v11360_v15 = vld [vmem:[#allocation8 + $0x118] sm:$0xff]   ;;  %v14183_v27 = vld [vmem:[#allocation2 + $0x1c] sm:$0xf] }
 0x2d2   : > { %v10493_v31 = vadd.f32 %v14068_v34, %v14053_v16  ;;  %5287 = vst [vmem:[#allocation2 + $0x60] sm:$0xf] %v5286_v60  ;;  %v5279_v22 = vsel %vm11916_vm14, %v5025_v9, %v5278_v55  ;;  %v5051_v4 = vsel %vm11904_vm13, %v5043_v33, %v5050_v10  ;;  %v5290_v5 = vsel %vm11871_vm8, %v5052_v56, %v5289_v20  ;;  %v14201_v39 = vld [vmem:[#allocation2 + $0x18] sm:$0xf]  ;;  %v14211_v2 = vld [vmem:[#allocation2 + $0xc] sm:$0xf] }
 0x2d3   : > { %v10496_v49 = vadd.f32 %v14087_v38, %v14075_v12  ;;  %5280 = vst [vmem:[#allocation2 + $0x54] sm:$0xf] %v5279_v22  ;;  %5288 = vst [vmem:[#allocation2 + $0x64] sm:$0xf] %v5051_v4  ;;  %v5030_v16 = vrot.slane %v5028_v51, 7  ;;  %v5031_v34 = vshll.u32 %v10044_v11, 16  ;;  %v9824_v21 = vcombine.low %v14168_v53, %v14152_v62  ;;  %10769 = vmatpush3.bf16.msra.mxu1 %v11360_v15  ;;  %v14228_v51 = vpop.f32.mrf.mxu1 }
 0x2d4   : > { %5291 = vst [vmem:[#allocation2 + $0x68] sm:$0x1] %v5290_v5  ;;  %v10499_v6 = vadd.f32 %v14105_v47, %v14097_v25  ;;  %v10502_v18 = vadd.f32 %v14133_v13, %v14117_v41  ;;  %v4735_v29 = vadd.f32 %v14135_v14, %v14056_v46  ;;  %v14181_v12 = vadd.f32 %v10481_v28, %v13913_v52  ;;  %v16662_v11 = vld [vmem:[#allocation33_spill] sm:$0xff]  ;;  %v16663_v25 = vld [vmem:[#allocation38_spill] sm:$0xff]  ;;  %v4729_v13 = vpop.f32.mrf.mxu0  ;;  %v16666_v46 = vld [vmem:[#allocation39_spill] sm:$0xff] }
 0x2d5   : > { %v10505_v38 = vadd.f32 %v10504_v19, %v10503_v7  ;;  %v5026_v54 = vrot.slane %v5022_v23, 4  ;;  %v5033_v0 = vor.u32 %v5031_v34, %v5030_v16  ;;  %v5035_v45 = vrot.slane %v5030_v16, 4  ;;  %8572 = vmatprep.mubr.bf16.mxu0 %v9824_v21  ;;  %v16667_v14 = vld [vmem:[#allocation40_spill] sm:$0xff]  ;;  %v16668_v57 = vld [vmem:[#allocation29_spill] sm:$0xff]  ;;  %v16669_v55 = vld [vmem:[#allocation30_spill] sm:$0xff] }
 0x2d6   : > { %v16664_v47 = vcombine.low %v16662_v11, %v16663_v25  ;;  %v4807_v41 = vmax.f32 %v4735_v29, 0.0  ;;  %v14189_v42 = vadd.f32 %v10484_v1, %v16665_v17  ;;  %v14192_v52 = vadd.f32 %v10487_v35, %v16666_v46  ;;  %v16670_v33 = vld [vmem:[#allocation19_spill] sm:$0xff]  ;;  %v14223_v35 = vld [vmem:[#allocation2 + $0x10] sm:$0xf]  ;;  %v5299_v16 = vld [vmem:[#allocation2 + $0x78] sm:$0xf] }
 0x2d7   : > { %v14195_v28 = vadd.f32 %v10490_v40, %v16667_v14  ;;  %v5034_v7 = vsel %vm11904_vm13, %v5026_v54, %v5033_v0  ;;  %v5283_v23 = vsel %vm11871_vm8, %v5035_v45, %v5282_v32  ;;  %v14204_v26 = vadd.f32 %v10496_v49, %v13944_v3  ;;  %v16671_v40 = vld [vmem:[#allocation34_spill] sm:$0xff]  ;;  %v14240_v54 = vld [vmem:[#allocation2 + $0x14] sm:$0x1]  ;;  %v11364_v45 = vld [vmem:[#allocation8 + $0x1b0] sm:$0xff]  }
 0x2d8   : > { %8573 = vmatmul.mubr.bf16.vlgmr.msra.gmra.mxu0 %v16664_v47  ;;  %v14207_v1 = vadd.f32 %v10493_v31, %v16668_v57  ;;  %5281 = vst [vmem:[#allocation2 + $0x58] sm:$0xf] %v5034_v7  ;;  %5284 = vst [vmem:[#allocation2 + $0x5c] sm:$0x1] %v5283_v23  ;;  %v10049_v44 = vpack.c.bf16 %v4807_v41, %v4807_v41  ;;  %v9825_v50 = vcombine.low %v14201_v39, %v14183_v27  ;;  %v5292_v23 = vld [vmem:[#allocation2 + $0x6c] sm:$0xf] }
 0x2d9   : > { %10873 = vmatpush3.bf16.msra.mxu0 %v11356_v61  ;;  %v14214_v20 = vadd.f32 %v10499_v6, %v16669_v55  ;;  %v14217_v9 = vadd.f32 %v10502_v18, %v16670_v33  ;;  %v4727_v3 = vadd.f32 %v14144_v43, %v14059_v30  ;;  %v4738_v10 = vadd.f32 %v11043_v48, %v14131_v58  ;;  %v11363_v6 = vld [vmem:[#allocation8 + $0x1f0] sm:$0xff]   ;;  %v10507_v18 = vpop.f32.mrf.mxu1  ;;  %v11046_v55 = vpop.f32.mrf.mxu0 }
 0x2da   : > { %v4730_v56 = vadd.f32 %v4729_v13, %v14062_v8  ;;  %v14226_v60 = vadd.f32 %v10505_v38, %v16671_v40  ;;  %v6005_v31 = vshrl.u32 %v14168_v53, 16  ;;  %v6008_v19 = vshll.u32 %v14168_v53, 16  ;;  %8580 = vmatprep.mubr.bf16.mxu0 %v9825_v50  ;;  %10874 = vmatprep.subr.bf16.mxu0 %v11363_v6 }
 0x2db   : > { %v5071_v22 = vshrl.u32 %v10049_v44, 16  ;;  %v5074_v4 = vshll.u32 %v10049_v44, 16  ;;  %v4805_v5 = vmax.f32 %v4727_v3, 0.0  ;;  %v4808_v30 = vmax.f32 %v4738_v10, 0.0  ;;  %v10509_v33 = vpop.f32.mrf.mxu1  ;;  %v4742_v6 = vpop.f32.mrf.mxu0 }
 0x2dc   : > { %v4806_v43 = vmax.f32 %v4730_v56, 0.0  ;;  %v5421_v58 = vshrl.u32 %v14211_v2, 16  ;;  %v5424_v48 = vshll.u32 %v14211_v2, 16  ;;  %v5430_v15 = vshll.u32 %v14223_v35, 16  ;;  %v5303_v56 = vld [vmem:[#allocation2 + $0x80] sm:$0x1] }
 0x2dd   : > { %v5073_v8 = vrot.slane %v5071_v22, 7  ;;  %v5434_v49 = vshrl.u32 %v14223_v35, 16  ;;  %v10047_v34 = vpack.c.bf16 %v4805_v5, %v4805_v5  ;;  %v10050_v21 = vpack.c.bf16 %v4808_v30, %v4808_v30  ;;  %10875 = vmatpush3.bf16.msra.mxu0 %v11364_v45  ;;  %v5296_v30 = vld [vmem:[#allocation2 + $0x74] sm:$0x1] }
 0x2de   : > { %v10048_v61 = vpack.c.bf16 %v4806_v43, %v4806_v43  ;;  %v5423_v53 = vrot.slane %v5421_v58, 4  ;;  %v14236_v32 = vrot.slane %v6005_v31, 4  ;;  %v14238_v29 = vrot.slane %v6008_v19, 5  ;;  %v11367_v19 = vld [vmem:[#allocation8 + $0x150] sm:$0xff]  }
 0x2df   : > { %v5076_v38 = vor.u32 %v5074_v4, %v5073_v8  ;;  %v5426_v0 = vrot.slane %v5424_v48, 5  ;;  %v5054_v11 = vshrl.u32 %v10047_v34, 16  ;;  %v5057_v25 = vshll.u32 %v10047_v34, 16  ;;  %10770 = vmatprep.subr.bf16.mxu1 %v11367_v19 }
 0x2e0   : > { %v5079_v47 = vshrl.u32 %v10050_v21, 16  ;;  %v5432_v41 = vrot.slane %v5430_v15, 5  ;;  %v5082_v17 = vshll.u32 %v10050_v21, 16  ;;  %v5062_v46 = vshrl.u32 %v10048_v61, 16 }
 0x2e1   : > { %v5300_v13 = vsel %vm11916_vm14, %v5076_v38, %v5299_v16  ;;  %v5427_v14 = vor.u32 %v5426_v0, %v5423_v53  ;;  %v5056_v7 = vrot.slane %v5054_v11, 7  ;;  %v5436_v44 = vrot.slane %v5434_v49, 4  ;;  %v11368_v16 = vld [vmem:[#allocation8 + $0x110] sm:$0xff]  }
 0x2e2   : > { %5301 = vst [vmem:[#allocation2 + $0x78] sm:$0xf] %v5300_v13  ;;  %v5081_v57 = vrot.slane %v5079_v47, 7  ;;  %v5440_v50 = vshll.u32 %v14240_v54, 16  ;;  %v6011_v3 = vor.u32 %v14238_v29, %v14236_v32  ;;  %v5077_v10 = vrot.slane %v5073_v8, 4  ;;  %v10510_v32 = vpop.f32.mrf.mxu1  ;;  %10771 = vmatpush3.bf16.msra.mxu1 %v11368_v16 }
 0x2e3   : > { %v5064_v40 = vrot.slane %v5062_v46, 7  ;;  %v5065_v31 = vshll.u32 %v10048_v61, 16  ;;  %v5059_v22 = vor.u32 %v5057_v25, %v5056_v7  ;;  %v5428_v43 = vrot.slane %v5427_v14, 4  ;;  %v5781_v53 = vld [vmem:[#allocation2 + $0xc] sm:$0xe] }
 0x2e4   : > { %v5084_v4 = vor.u32 %v5082_v17, %v5081_v57  ;;  %v5086_v5 = vrot.slane %v5081_v57, 4  ;;  %v5060_v58 = vrot.slane %v5056_v7, 4  ;;  %v5437_v49 = vor.u32 %v5436_v44, %v5432_v41  ;;  %v14268_v57 = vld [vmem:[#allocation2 + $0x18] sm:$0xf] }
 0x2e5   : > { %v5067_v48 = vor.u32 %v5065_v31, %v5064_v40  ;;  %v5069_v15 = vrot.slane %v5064_v40, 4  ;;  %v5293_v34 = vsel %vm11916_vm14, %v5059_v22, %v5292_v23  ;;  %v5442_v61 = vrot.slane %v5440_v50, 5  ;;  %v14287_v22 = vld [vmem:[#allocation2 + $0x24] sm:$0xf] }
 0x2e6   : > { %v5085_v8 = vsel %vm11904_vm13, %v5077_v10, %v5084_v4  ;;  %v5304_v21 = vsel %vm11871_vm8, %v5086_v5, %v5303_v56  ;;  %5294 = vst [vmem:[#allocation2 + $0x6c] sm:$0xf] %v5293_v34  ;;  %v5438_v0 = vrot.slane %v5437_v49, 4  ;;  %v5853_v45 = vrot.slane %v14223_v35, 5  ;;  %v14274_v10 = vld [vmem:[#allocation2 + $0x28] sm:$0xf] }
 0x2e7   : > { %5302 = vst [vmem:[#allocation2 + $0x7c] sm:$0xf] %v5085_v8  ;;  %5305 = vst [vmem:[#allocation2 + $0x80] sm:$0x1] %v5304_v21  ;;  %v5068_v29 = vsel %vm11904_vm13, %v5060_v58, %v5067_v48  ;;  %v5297_v38 = vsel %vm11871_vm8, %v5069_v15, %v5296_v30  ;;  %v14259_v11 = vadd.f32 %v10507_v18, %v14228_v51  ;;  %v6014_v25 = vshll.u32 %v14152_v62, 16 }
 0x2e8   : > { %5295 = vst [vmem:[#allocation2 + $0x70] sm:$0xf] %v5068_v29  ;;  %5298 = vst [vmem:[#allocation2 + $0x74] sm:$0x1] %v5297_v38  ;;  %v5856_v47 = vrot.slane %v14240_v54, 5  ;;  %v4751_v13 = vadd.f32 %v11046_v55, %v14189_v42  ;;  %v5433_v46 = vsel %vm11878_vm10, %v5428_v43, %v5432_v41  ;;  %v5443_v14 = vsel %vm11878_vm10, %v5438_v0, %v5442_v61  ;;  %v11047_v42 = vpop.f32.mrf.mxu0 }
 0x2e9   : > { %v9729_v7 = vrot.slane %v5781_v53, 9  ;;  %v5855_v23 = vrot.slane %v5853_v45, 4  ;;  %v14270_v51 = vadd.f32 %v10510_v32, %v10509_v33  ;;  %v14272_v18 = vrot.slane %v6011_v3, 4  ;;  %v14276_v54 = vld [vmem:[#allocation2 + $0x1c] sm:$0xf] }
 0x2ea   : > { %v9793_v44 = vcombine.low %v5433_v46, %v5443_v14  ;;  %v4811_v50 = vmax.f32 %v4751_v13, 0.0  ;;  %v6018_v41 = vshrl.u32 %v14152_v62, 16  ;;  %v9777_v33 = vcombine.low %v14211_v2, %v14223_v35  ;;  %v14289_v4 = vld [vmem:[#allocation2 + $0x20] sm:$0x1]  ;;  %v4745_v49 = vpop.f32.mrf.mxu0  ;;  %v5313_v0 = vld [vmem:[#allocation2 + $0x90] sm:$0xf] }
 0x2eb   : > { %v5854_v56 = vsel %vm11898_vm12, %v9729_v7, %v5853_v45  ;;  %v5857_v40 = vsel %vm11898_vm12, %v5855_v23, %v5856_v47  ;;  %v14285_v3 = vrot.slane %v6014_v25, 5  ;;  %v5445_v62 = vshrl.u32 %v14268_v57, 16  ;;  %v11371_v13 = vld [vmem:[#allocation8 + $0x1e8] sm:$0xff]  }
 0x2ec   : > { %8419 = vmatprep.mubr.bf16.mxu1 %v9793_v44  ;;  %v9809_v31 = vcombine.low %v5854_v56, %v5857_v40  ;;  %v10053_v19 = vpack.c.bf16 %v4811_v50, %v4811_v50  ;;  %v9826_v5 = vcombine.low %v14287_v22, %v14274_v10  ;;  %v5448_v30 = vshll.u32 %v14268_v57, 16  ;;  %v11050_v44 = vpop.f32.mrf.mxu0  ;;  %v11372_v50 = vld [vmem:[#allocation8 + $0x1a8] sm:$0xff]   ;;  %10876 = vmatprep.subr.bf16.mxu0 %v11371_v13 }
 0x2ed   : > { %8420 = vmatmul.mubr.bf16.gmra.mxu1 %v9777_v33  ;;  %v5454_v43 = vshll.u32 %v14276_v54, 16  ;;  %v5458_v2 = vshrl.u32 %v14276_v54, 16  ;;  %v6029_v35 = vshrl.u32 %v14201_v39, 16  ;;  %v6032_v58 = vshll.u32 %v14201_v39, 16  ;;  %10877 = vmatpush3.bf16.msra.mxu0 %v11372_v50  ;;  %v5310_v50 = vld [vmem:[#allocation2 + $0x8c] sm:$0x1] }
 0x2ee   : > { %8581 = vmatmul.mubr.bf16.gmra.mxu0 %v9809_v31  ;;  %v5105_v48 = vshrl.u32 %v10053_v19, 16  ;;  %v5447_v15 = vrot.slane %v5445_v62, 4  ;;  %v5450_v16 = vrot.slane %v5448_v30, 5  ;;  %v5464_v21 = vshll.u32 %v14289_v4, 16  ;;  %v11375_v31 = vld [vmem:[#allocation8 + $0x148] sm:$0xff]  }
 0x2ef   : > { %8588 = vmatprep.mubr.bf16.mxu0 %v9826_v5  ;;  %v5456_v34 = vrot.slane %v5454_v43, 5  ;;  %v5460_v8 = vrot.slane %v5458_v2, 4  ;;  %v5108_v53 = vshll.u32 %v10053_v19, 16  ;;  %v4743_v32 = vadd.f32 %v4742_v6, %v14139_v24  ;;  %10772 = vmatprep.subr.bf16.mxu1 %v11375_v31 }
 0x2f0   : > { %v14300_v61 = vrot.slane %v5105_v48, 7  ;;  %v4754_v29 = vadd.f32 %v11047_v42, %v14192_v52  ;;  %v14304_v38 = vrot.slane %v6018_v41, 4  ;;  %v5451_v45 = vor.u32 %v5450_v16, %v5447_v15 }
 0x2f1   : > { %v5461_v25 = vor.u32 %v5460_v8, %v5456_v34  ;;  %v4746_v47 = vadd.f32 %v4745_v49, %v14181_v12  ;;  %v5863_v14 = vrot.slane %v14289_v4, 5  ;;  %v4809_v7 = vmax.f32 %v4743_v32, 0.0  ;;  %v5782_v12 = vld [vmem:[#allocation2 + $0x18] sm:$0xe] }
 0x2f2   : > { %v5110_v46 = vor.u32 %v5108_v53, %v14300_v61  ;;  %v4812_v23 = vmax.f32 %v4754_v29, 0.0  ;;  %v5452_v56 = vrot.slane %v5451_v45, 4  ;;  %v5466_v6 = vrot.slane %v5464_v21, 5  ;;  %v14318_v21 = vpop.f32.mrf.mxu0  ;;  %v11376_v53 = vld [vmem:[#allocation8 + $0x108] sm:$0xff]  }
 0x2f3   : > { %v5462_v24 = vrot.slane %v5461_v25, 4  ;;  %v4810_v52 = vmax.f32 %v4746_v47, 0.0  ;;  %v10051_v41 = vpack.c.bf16 %v4809_v7, %v4809_v7  ;;  %v5860_v33 = vrot.slane %v14276_v54, 5  ;;  %v5306_v45 = vld [vmem:[#allocation2 + $0x84] sm:$0xf]  ;;  %10773 = vmatpush3.bf16.msra.mxu1 %v11376_v53 }
 0x2f4   : > { %v5314_v42 = vsel %vm11916_vm14, %v5110_v46, %v5313_v0  ;;  %v10054_v40 = vpack.c.bf16 %v4812_v23, %v4812_v23  ;;  %v5457_v19 = vsel %vm11878_vm10, %v5452_v56, %v5456_v34  ;;  %v4767_v5 = vadd.f32 %v11050_v44, %v14204_v26  ;;  %v5317_v26 = vld [vmem:[#allocation2 + $0x98] sm:$0x1] }
 0x2f5   : > { %5315 = vst [vmem:[#allocation2 + $0x90] sm:$0xf] %v5314_v42  ;;  %v5467_v4 = vsel %vm11878_vm10, %v5462_v24, %v5466_v6  ;;  %v10052_v62 = vpack.c.bf16 %v4810_v52, %v4810_v52  ;;  %v5111_v30 = vrot.slane %v14300_v61, 4  ;;  %v5088_v2 = vshrl.u32 %v10051_v41, 16  ;;  %v11051_v42 = vpop.f32.mrf.mxu0 }
 0x2f6   : > { %v9794_v43 = vcombine.low %v5457_v19, %v5467_v4  ;;  %v5113_v48 = vshrl.u32 %v10054_v40, 16  ;;  %v5091_v15 = vshll.u32 %v10051_v41, 16  ;;  %v5116_v49 = vshll.u32 %v10054_v40, 16 }
 0x2f7   : > { %v5096_v16 = vshrl.u32 %v10052_v62, 16  ;;  %v9730_v8 = vrot.slane %v5782_v12, 9  ;;  %v5090_v34 = vrot.slane %v5088_v2, 7  ;;  %v5862_v29 = vrot.slane %v5860_v33, 4  ;;  %v14332_v12 = vld [vmem:[#allocation2 + $0x34] sm:$0xf]  ;;  %v4761_v53 = vpop.f32.mrf.mxu0 }
 0x2f8   : > { %8427 = vmatprep.mubr.bf16.mxu1 %v9794_v43  ;;  %v5115_v32 = vrot.slane %v5113_v48, 7  ;;  %v4815_v0 = vmax.f32 %v4767_v5, 0.0  ;;  %v5099_v61 = vshll.u32 %v10052_v62, 16  ;;  %v9778_v13 = vcombine.low %v14268_v57, %v14276_v54  ;;  %v14341_v62 = vld [vmem:[#allocation2 + $0x28] sm:$0xf] }
 0x2f9   : > { %v5098_v25 = vrot.slane %v5096_v16, 7  ;;  %v5861_v47 = vsel %vm11898_vm12, %v9730_v8, %v5860_v33  ;;  %v5093_v46 = vor.u32 %v5091_v15, %v5090_v34  ;;  %v5094_v7 = vrot.slane %v5090_v34, 4  ;;  %v14334_v33 = vld [vmem:[#allocation2 + $0x24] sm:$0xf]  ;;  %v5327_v2 = vld [vmem:[#allocation2 + $0xa8] sm:$0xf] }
 0x2fa   : > { %v5118_v23 = vor.u32 %v5116_v49, %v5115_v32  ;;  %v5120_v44 = vrot.slane %v5115_v32, 4  ;;  %v5864_v6 = vsel %vm11898_vm12, %v5862_v29, %v5863_v14  ;;  %v10057_v52 = vpack.c.bf16 %v4815_v0, %v4815_v0  ;;  %8428 = vmatmul.mubr.bf16.gmra.mxu1 %v9778_v13  ;;  %v14351_v48 = vld [vmem:[#allocation2 + $0x30] sm:$0xf]  ;;  %v16674_v15 = vld [vmem:[#allocation21_spill] sm:$0xff]  ;;  %v5383_v8 = vld [vmem:[#allocation2 + $0x2c] sm:$0x1] }
 0x2fb   : > { %v5101_v56 = vor.u32 %v5099_v61, %v5098_v25  ;;  %v5103_v24 = vrot.slane %v5098_v25, 4  ;;  %v5307_v41 = vsel %vm11916_vm14, %v5093_v46, %v5306_v45  ;;  %v9810_v40 = vcombine.low %v5861_v47, %v5864_v6  ;;  %v11379_v0 = vld [vmem:[#allocation8 + $0x1e0] sm:$0xff]   ;;  %v11054_v6 = vpop.f32.mrf.mxu0 }
 0x2fc   : > { %v5119_v57 = vsel %vm11904_vm13, %v5111_v30, %v5118_v23  ;;  %v5318_v54 = vsel %vm11871_vm8, %v5120_v44, %v5317_v26  ;;  %v6038_v31 = vshll.u32 %v14183_v27, 16  ;;  %5308 = vst [vmem:[#allocation2 + $0x84] sm:$0xf] %v5307_v41  ;;  %v5139_v4 = vshrl.u32 %v10057_v52, 16  ;;  %v11380_v45 = vld [vmem:[#allocation8 + $0x1a0] sm:$0xff]   ;;  %v11381_v26 = vld [vmem:[#allocation8 + $0x1d8] sm:$0xff]   ;;  %10878 = vmatprep.subr.bf16.mxu0 %v11379_v0 }
 0x2fd   : > { %5316 = vst [vmem:[#allocation2 + $0x94] sm:$0xf] %v5119_v57  ;;  %5319 = vst [vmem:[#allocation2 + $0x98] sm:$0x1] %v5318_v54  ;;  %v5102_v14 = vsel %vm11904_vm13, %v5094_v7, %v5101_v56  ;;  %v5311_v19 = vsel %vm11871_vm8, %v5103_v24, %v5310_v50  ;;  %v14345_v5 = vrot.slane %v6029_v35, 4  ;;  %v14349_v30 = vrot.slane %v6032_v58, 5  ;;  %8589 = vmatmul.mubr.bf16.gmra.mxu0 %v9810_v40 }
 0x2fe   : > { %5309 = vst [vmem:[#allocation2 + $0x88] sm:$0xf] %v5102_v14  ;;  %5312 = vst [vmem:[#allocation2 + $0x8c] sm:$0x1] %v5311_v19  ;;  %v5142_v43 = vshll.u32 %v10057_v52, 16  ;;  %v4622_v49 = vadd.f32 %v14259_v11, %v16674_v15  ;;  %v14355_v16 = vrot.slane %v5139_v4, 7  ;;  %v9827_v35 = vcombine.low %v14351_v48, %v14332_v12  ;;  %10879 = vmatpush3.bf16.msra.mxu0 %v11380_v45 }
 0x2ff   : > { %v5469_v39 = vshrl.u32 %v14334_v33, 16  ;;  %v5472_v58 = vshll.u32 %v14334_v33, 16  ;;  %v6021_v32 = vor.u32 %v14304_v38, %v14285_v3  ;;  %v5478_v11 = vshll.u32 %v14341_v62, 16  ;;  %v11384_v46 = vld [vmem:[#allocation8 + $0x140] sm:$0xff]   ;;  %v11385_v52 = vld [vmem:[#allocation8 + $0x198] sm:$0xff]   ;;  %10880 = vmatprep.subr.bf16.mxu0 %v11381_v26 }
 0x300   : > { %v14370_v29 = vadd.f32 %v14270_v51, %v14006_v63  ;;  %v14372_v25 = vrot.slane %v6038_v31, 5  ;;  %v5144_v61 = vor.u32 %v5142_v43, %v14355_v16  ;;  %8596 = vmatprep.mubr.bf16.mxu0 %v9827_v35  ;;  %v6035_v7 = vor.u32 %v14349_v30, %v14345_v5  ;;  %10774 = vmatprep.subr.bf16.mxu1 %v11384_v46  ;;  %v5783_v31 = vld [vmem:[#allocation2 + $0x24] sm:$0xe] }
 0x301   : > { %v5471_v47 = vrot.slane %v5469_v39, 4  ;;  %v5474_v13 = vrot.slane %v5472_v58, 5  ;;  %v5480_v23 = vrot.slane %v5478_v11, 5  ;;  %v5482_v44 = vshrl.u32 %v14341_v62, 16 }
 0x302   : > { %v5488_v50 = vshll.u32 %v5383_v8, 16  ;;  %v6042_v63 = vshrl.u32 %v14183_v27, 16  ;;  %v5328_v51 = vsel %vm11916_vm14, %v5144_v61, %v5327_v2  ;;  %v4759_v24 = vadd.f32 %v14318_v21, %v14195_v28  ;;  %10881 = vmatpush3.bf16.msra.mxu0 %v11385_v52  ;;  %v11387_v61 = vld [vmem:[#allocation8 + $0x1d0] sm:$0xff]  }
 0x303   : > { %v5475_v56 = vor.u32 %v5474_v13, %v5471_v47  ;;  %5329 = vst [vmem:[#allocation2 + $0xa8] sm:$0xf] %v5328_v51  ;;  %v5484_v41 = vrot.slane %v5482_v44, 4  ;;  %v5870_v57 = vrot.slane %v5383_v8, 5  ;;  %v4770_v54 = vadd.f32 %v11051_v42, %v14214_v20  ;;  %v11388_v47 = vld [vmem:[#allocation8 + $0x190] sm:$0xff]   ;;  %10882 = vmatprep.subr.bf16.mxu0 %v11387_v61 }
 0x304   : > { %v4762_v40 = vadd.f32 %v4761_v53, %v14207_v1  ;;  %v5490_v19 = vrot.slane %v5488_v50, 5  ;;  %v4813_v4 = vmax.f32 %v4759_v24, 0.0  ;;  %v5867_v43 = vrot.slane %v14341_v62, 5  ;;  %v11389_v50 = vld [vmem:[#allocation8 + $0x1c8] sm:$0xff]   ;;  %v5320_v24 = vld [vmem:[#allocation2 + $0x9c] sm:$0xf] }
 0x305   : > { %v5476_v14 = vrot.slane %v5475_v56, 4  ;;  %v5485_v2 = vor.u32 %v5484_v41, %v5480_v23  ;;  %v4816_v28 = vmax.f32 %v4770_v54, 0.0  ;;  %v4783_v15 = vadd.f32 %v11054_v6, %v4622_v49  ;;  %v11386_v49 = vld [vmem:[#allocation8 + $0x100] sm:$0xff]  }
 0x306   : > { %v4814_v21 = vmax.f32 %v4762_v40, 0.0  ;;  %v10055_v39 = vpack.c.bf16 %v4813_v4, %v4813_v4  ;;  %v9731_v8 = vrot.slane %v5783_v31, 9  ;;  %v5869_v58 = vrot.slane %v5867_v43, 4  ;;  %10775 = vmatpush3.bf16.msra.mxu1 %v11386_v49  ;;  %10883 = vmatpush3.bf16.msra.mxu0 %v11388_v47 }
 0x307   : > { %v5481_v35 = vsel %vm11878_vm10, %v5476_v14, %v5480_v23  ;;  %v5486_v20 = vrot.slane %v5485_v2, 4  ;;  %v10058_v1 = vpack.c.bf16 %v4816_v28, %v4816_v28  ;;  %v4819_v53 = vmax.f32 %v4783_v15, 0.0  ;;  %v14396_v14 = vpop.f32.mrf.mxu0  ;;  %v5324_v2 = vld [vmem:[#allocation2 + $0xa4] sm:$0x1]  ;;  %10884 = vmatprep.subr.bf16.mxu0 %v11389_v50 }
 0x308   : > { %v10056_v42 = vpack.c.bf16 %v4814_v21, %v4814_v21  ;;  %v5122_v11 = vshrl.u32 %v10055_v39, 16  ;;  %v5125_v0 = vshll.u32 %v10055_v39, 16  ;;  %v5868_v45 = vsel %vm11898_vm12, %v9731_v8, %v5867_v43  ;;  %v14404_v39 = vld [vmem:[#allocation2 + $0x30] sm:$0xf]  ;;  %v14406_v8 = vld [vmem:[#allocation2 + $0x34] sm:$0xf] }
 0x309   : > { %v5871_v26 = vsel %vm11898_vm12, %v5869_v58, %v5870_v57  ;;  %v5491_v13 = vsel %vm11878_vm10, %v5486_v20, %v5490_v19  ;;  %v5147_v46 = vshrl.u32 %v10058_v1, 16  ;;  %v9779_v44 = vcombine.low %v14334_v33, %v14341_v62  ;;  %v5331_v57 = vld [vmem:[#allocation2 + $0xb0] sm:$0x1]  ;;  %v11391_v19 = vld [vmem:[#allocation8 + $0x188] sm:$0xff]  }
 0x30a   : > { %v5130_v23 = vshrl.u32 %v10056_v42, 16  ;;  %v9795_v51 = vcombine.low %v5481_v35, %v5491_v13  ;;  %v5124_v56 = vrot.slane %v5122_v11, 7  ;;  %v5150_v6 = vshll.u32 %v10058_v1, 16  ;;  %v14412_v20 = vld [vmem:[#allocation2 + $0x40] sm:$0xf]  ;;  %v11393_v1 = vld [vmem:[#allocation8 + $0x1c0] sm:$0xff]   ;;  %10885 = vmatpush3.bf16.msra.mxu0 %v11391_v19 }
 0x30b   : > { %v9811_v52 = vcombine.low %v5868_v45, %v5871_v26  ;;  %v5149_v41 = vrot.slane %v5147_v46, 7  ;;  %v5133_v40 = vshll.u32 %v10056_v42, 16  ;;  %v10061_v31 = vpack.c.bf16 %v4819_v53, %v4819_v53  ;;  %v11055_v45 = vpop.f32.mrf.mxu0  ;;  %v11394_v26 = vld [vmem:[#allocation8 + $0x180] sm:$0xff]   ;;  %10886 = vmatprep.subr.bf16.mxu0 %v11393_v1 }
 0x30c   : > { %v5132_v54 = vrot.slane %v5130_v23, 7  ;;  %v14401_v33 = vrot.slane %v6021_v32, 4  ;;  %v5145_v62 = vrot.slane %v14355_v16, 4  ;;  %8435 = vmatprep.mubr.bf16.mxu1 %v9795_v51  ;;  %v5127_v4 = vor.u32 %v5125_v0, %v5124_v56  ;;  %v5341_v0 = vld [vmem:[#allocation2 + $0xc0] sm:$0xf] }
 0x30d   : > { %v5128_v43 = vrot.slane %v5124_v56, 4  ;;  %8597 = vmatmul.mubr.bf16.gmra.mxu0 %v9811_v52  ;;  %v5152_v28 = vor.u32 %v5150_v6, %v5149_v41  ;;  %v5154_v21 = vrot.slane %v5149_v41, 4  ;;  %8436 = vmatmul.mubr.bf16.gmra.mxu1 %v9779_v44  ;;  %v6053_v38 = vshrl.u32 %v14287_v22, 16  ;;  %v14430_v46 = vld [vmem:[#allocation2 + $0x3c] sm:$0xf] }
 0x30e   : > { %v5135_v15 = vor.u32 %v5133_v40, %v5132_v54  ;;  %v5137_v35 = vrot.slane %v5132_v54, 4  ;;  %v6056_v32 = vshll.u32 %v14287_v22, 16  ;;  %v5321_v16 = vsel %vm11916_vm14, %v5127_v4, %v5320_v24  ;;  %v5384_v44 = vld [vmem:[#allocation2 + $0x38] sm:$0x1]  ;;  %v4777_v54 = vpop.f32.mrf.mxu0  ;;  %10887 = vmatpush3.bf16.msra.mxu0 %v11394_v26 }
 0x30f   : > { %v5173_v58 = vshrl.u32 %v10061_v31, 16  ;;  %5322 = vst [vmem:[#allocation2 + $0x9c] sm:$0xf] %v5321_v16  ;;  %v5153_v42 = vsel %vm11904_vm13, %v5145_v62, %v5152_v28  ;;  %v5332_v53 = vsel %vm11871_vm8, %v5154_v21, %v5331_v57  ;;  %v14425_v49 = vrot.slane %v6035_v7, 4 }
 0x310   : > { %v5136_v11 = vsel %vm11904_vm13, %v5128_v43, %v5135_v15  ;;  %v5325_v22 = vsel %vm11871_vm8, %v5137_v35, %v5324_v2  ;;  %v6062_v61 = vshll.u32 %v14274_v10, 16  ;;  %5330 = vst [vmem:[#allocation2 + $0xac] sm:$0xf] %v5153_v42  ;;  %5333 = vst [vmem:[#allocation2 + $0xb0] sm:$0x1] %v5332_v53  ;;  %v5176_v13 = vshll.u32 %v10061_v31, 16 }
 0x311   : > { %5323 = vst [vmem:[#allocation2 + $0xa0] sm:$0xf] %v5136_v11  ;;  %5326 = vst [vmem:[#allocation2 + $0xa4] sm:$0x1] %v5325_v22  ;;  %v14428_v47 = vrot.slane %v5173_v58, 7  ;;  %v9828_v23 = vcombine.low %v14430_v46, %v14412_v20  ;;  %v5493_v5 = vshrl.u32 %v14404_v39, 16  ;;  %v4775_v4 = vadd.f32 %v14396_v14, %v14217_v9 }
 0x312   : > { %v5496_v30 = vshll.u32 %v14404_v39, 16  ;;  %v5502_v7 = vshll.u32 %v14406_v8, 16  ;;  %v14439_v50 = vrot.slane %v6042_v63, 4  ;;  %v6055_v51 = vrot.slane %v6053_v38, 4  ;;  %v5784_v2 = vld [vmem:[#allocation2 + $0x30] sm:$0xe] }
 0x313   : > { %v6058_v56 = vrot.slane %v6056_v32, 5  ;;  %v5178_v24 = vor.u32 %v5176_v13, %v14428_v47  ;;  %8604 = vmatprep.mubr.bf16.mxu0 %v9828_v23  ;;  %v5495_v6 = vrot.slane %v5493_v5, 4  ;;  %v5506_v57 = vshrl.u32 %v14406_v8, 16  ;;  %v11395_v35 = vld [vmem:[#allocation8 + $0x238] sm:$0xff]  }
 0x314   : > { %v5498_v52 = vrot.slane %v5496_v30, 5  ;;  %v5504_v41 = vrot.slane %v5502_v7, 5  ;;  %v14443_v40 = vrot.slane %v6062_v61, 5  ;;  %v6066_v31 = vshrl.u32 %v14274_v10, 16  ;;  %11056 = vmatprep.subr.bf16.mxu1 %v11395_v35  ;;  %v5334_v7 = vld [vmem:[#allocation2 + $0xb4] sm:$0xf] }
 0x315   : > { %v5342_v27 = vsel %vm11916_vm14, %v5178_v24, %v5341_v0  ;;  %v5512_v63 = vshll.u32 %v5384_v44, 16  ;;  %v5508_v62 = vrot.slane %v5506_v57, 4  ;;  %v4786_v43 = vadd.f32 %v11055_v45, %v14370_v29  ;;  %v14476_v35 = vld [vmem:[#allocation2 + $0x40] sm:$0xf] }
 0x316   : > { %5343 = vst [vmem:[#allocation2 + $0xc0] sm:$0xf] %v5342_v27  ;;  %v5499_v19 = vor.u32 %v5498_v52, %v5495_v6  ;;  %v6059_v28 = vor.u32 %v6058_v56, %v6055_v51  ;;  %v6077_v21 = vshrl.u32 %v14351_v48, 16  ;;  %v4778_v15 = vadd.f32 %v4777_v54, %v14226_v60  ;;  %v5345_v52 = vld [vmem:[#allocation2 + $0xc8] sm:$0x1] }
 0x317   : > { %v5874_v10 = vrot.slane %v14406_v8, 5  ;;  %v5509_v32 = vor.u32 %v5508_v62, %v5504_v41  ;;  %v4817_v16 = vmax.f32 %v4775_v4, 0.0  ;;  %v4820_v58 = vmax.f32 %v4786_v43, 0.0 }
 0x318   : > { %v5500_v38 = vrot.slane %v5499_v19, 4  ;;  %v5877_v1 = vrot.slane %v5384_v44, 5  ;;  %v4818_v42 = vmax.f32 %v4778_v15, 0.0  ;;  %v9732_v53 = vrot.slane %v5784_v2, 9  ;;  %v5338_v19 = vld [vmem:[#allocation2 + $0xbc] sm:$0x1] }
 0x319   : > { %v5876_v11 = vrot.slane %v5874_v10, 4  ;;  %v5510_v9 = vrot.slane %v5509_v32, 4  ;;  %v5514_v29 = vrot.slane %v5512_v63, 5  ;;  %v10059_v14 = vpack.c.bf16 %v4817_v16, %v4817_v16 }
 0x31a   : > { %v10062_v22 = vpack.c.bf16 %v4820_v58, %v4820_v58  ;;  %v6080_v0 = vshll.u32 %v14351_v48, 16  ;;  %v10060_v45 = vpack.c.bf16 %v4818_v42, %v4818_v42  ;;  %v5875_v60 = vsel %vm11898_vm12, %v9732_v53, %v5874_v10  ;;  %v14486_v58 = vld [vmem:[#allocation2 + $0x48] sm:$0xf] }
 0x31b   : > { %v5878_v26 = vsel %vm11898_vm12, %v5876_v11, %v5877_v1  ;;  %v5505_v61 = vsel %vm11878_vm10, %v5500_v38, %v5504_v41  ;;  %v5515_v13 = vsel %vm11878_vm10, %v5510_v9, %v5514_v29  ;;  %v5156_v23 = vshrl.u32 %v10059_v14, 16 }
 0x31c   : > { %v5181_v44 = vshrl.u32 %v10062_v22, 16  ;;  %v9796_v5 = vcombine.low %v5505_v61, %v5515_v13  ;;  %v5159_v30 = vshll.u32 %v10059_v14, 16  ;;  %v5164_v51 = vshrl.u32 %v10060_v45, 16 }
 0x31d   : > { %v9780_v48 = vcombine.low %v14404_v39, %v14406_v8  ;;  %v5158_v56 = vrot.slane %v5156_v23, 7  ;;  %v5184_v6 = vshll.u32 %v10062_v22, 16  ;;  %v9812_v57 = vcombine.low %v5875_v60, %v5878_v26  ;;  %v14470_v39 = vld [vmem:[#allocation2 + $0x4c] sm:$0xf]  ;;  %v14472_v8 = vld [vmem:[#allocation2 + $0x3c] sm:$0xf] }
 0x31e   : > { %v5183_v24 = vrot.slane %v5181_v44, 7  ;;  %v14465_v54 = vrot.slane %v6059_v28, 4  ;;  %v14467_v41 = vrot.slane %v6066_v31, 4  ;;  %8443 = vmatprep.mubr.bf16.mxu1 %v9796_v5  ;;  %v5166_v27 = vrot.slane %v5164_v51, 7  ;;  %v5785_v22 = vld [vmem:[#allocation2 + $0x3c] sm:$0xe] }
 0x31f   : > { %v5167_v63 = vshll.u32 %v10060_v45, 16  ;;  %v5179_v62 = vrot.slane %v14428_v47, 4  ;;  %v5161_v4 = vor.u32 %v5159_v30, %v5158_v56  ;;  %8605 = vmatmul.mubr.bf16.gmra.mxu0 %v9812_v57  ;;  %8444 = vmatmul.mubr.bf16.gmra.mxu1 %v9780_v48  ;;  %v14474_v15 = vrot.slane %v6077_v21, 4  ;;  %v5385_v21 = vld [vmem:[#allocation2 + $0x44] sm:$0x1] }
 0x320   : > { %v5186_v43 = vor.u32 %v5184_v6, %v5183_v24  ;;  %v5188_v2 = vrot.slane %v5183_v24, 4  ;;  %v5162_v28 = vrot.slane %v5158_v56, 4  ;;  %v5171_v10 = vrot.slane %v5166_v27, 4  ;;  %v14507_v56 = vld [vmem:[#allocation2 + $0x58] sm:$0xf] }
 0x321   : > { %v5169_v31 = vor.u32 %v5167_v63, %v5166_v27  ;;  %v14478_v38 = vrot.slane %v6080_v0, 5  ;;  %v5335_v47 = vsel %vm11916_vm14, %v5161_v4, %v5334_v7  ;;  %v6086_v1 = vshll.u32 %v14332_v12, 16  ;;  %v14509_v24 = vld [vmem:[#allocation2 + $0x48] sm:$0xf]  ;;  %v14515_v27 = vld [vmem:[#allocation2 + $0x4c] sm:$0xf] }
 0x322   : > { %v5187_v32 = vsel %vm11904_vm13, %v5179_v62, %v5186_v43  ;;  %v5346_v16 = vsel %vm11871_vm8, %v5188_v2, %v5345_v52  ;;  %5336 = vst [vmem:[#allocation2 + $0xb4] sm:$0xf] %v5335_v47  ;;  %v5339_v37 = vsel %vm11871_vm8, %v5171_v10, %v5338_v19  ;;  %v9829_v53 = vcombine.low %v14486_v58, %v14470_v39  ;;  %v14517_v43 = vld [vmem:[#allocation2 + $0x54] sm:$0xf]  ;;  %v5386_v47 = vld [vmem:[#allocation2 + $0x50] sm:$0x1] }
 0x323   : > { %5344 = vst [vmem:[#allocation2 + $0xc4] sm:$0xf] %v5187_v32  ;;  %5347 = vst [vmem:[#allocation2 + $0xc8] sm:$0x1] %v5346_v16  ;;  %v5170_v42 = vsel %vm11904_vm13, %v5162_v28, %v5169_v31  ;;  %v5517_v11 = vshrl.u32 %v14472_v8, 16  ;;  %v5520_v9 = vshll.u32 %v14472_v8, 16  ;;  %v6083_v7 = vor.u32 %v14478_v38, %v14474_v15 }
 0x324   : > { %5337 = vst [vmem:[#allocation2 + $0xb8] sm:$0xf] %v5170_v42  ;;  %5340 = vst [vmem:[#allocation2 + $0xbc] sm:$0x1] %v5339_v37  ;;  %v5526_v29 = vshll.u32 %v14476_v35, 16  ;;  %v5530_v14 = vshrl.u32 %v14476_v35, 16  ;;  %8612 = vmatprep.mubr.bf16.mxu0 %v9829_v53  ;;  %v9830_v28 = vcombine.low %v14517_v43, %v14507_v56  ;;  %v9781_v53 = vcombine.low %v14472_v8, %v14476_v35 }
 0x325   : > { %v6101_v59 = vshrl.u32 %v14430_v46, 16  ;;  %v6104_v0 = vshll.u32 %v14430_v46, 16  ;;  %v5536_v36 = vshll.u32 %v5385_v21, 16  ;;  %v5881_v45 = vrot.slane %v14476_v35, 5 }
 0x326   : > { %v5519_v60 = vrot.slane %v5517_v11, 4  ;;  %v5522_v26 = vrot.slane %v5520_v9, 5  ;;  %v5528_v61 = vrot.slane %v5526_v29, 5  ;;  %v5532_v13 = vrot.slane %v5530_v14, 4  ;;  %v5786_v29 = vld [vmem:[#allocation2 + $0x48] sm:$0xe] }
 0x327   : > { %v6090_v23 = vshrl.u32 %v14332_v12, 16  ;;  %v5884_v44 = vrot.slane %v5385_v21, 5  ;;  %v9733_v5 = vrot.slane %v5785_v22, 9  ;;  %v5883_v30 = vrot.slane %v5881_v45, 4 }
 0x328   : > { %v14505_v51 = vrot.slane %v6086_v1, 5  ;;  %v5523_v48 = vor.u32 %v5522_v26, %v5519_v60  ;;  %v5533_v46 = vor.u32 %v5532_v13, %v5528_v61  ;;  %v6103_v6 = vrot.slane %v6101_v59, 4 }
 0x329   : > { %v6106_v52 = vrot.slane %v6104_v0, 5  ;;  %v5882_v57 = vsel %vm11898_vm12, %v9733_v5, %v5881_v45  ;;  %v5885_v12 = vsel %vm11898_vm12, %v5883_v30, %v5884_v44  ;;  %v5538_v62 = vrot.slane %v5536_v36, 5  ;;  %v14542_v44 = vld [vmem:[#allocation2 + $0x64] sm:$0xf] }
 0x32a   : > { %v5524_v63 = vrot.slane %v5523_v48, 4  ;;  %v5534_v19 = vrot.slane %v5533_v46, 4  ;;  %v9813_v4 = vcombine.low %v5882_v57, %v5885_v12  ;;  %v6110_v2 = vshll.u32 %v14412_v20, 16  ;;  %v14550_v48 = vld [vmem:[#allocation2 + $0x54] sm:$0xf] }
 0x32b   : > { %v6114_v15 = vshrl.u32 %v14412_v20, 16  ;;  %v5541_v31 = vshrl.u32 %v14509_v24, 16  ;;  %v5544_v32 = vshll.u32 %v14509_v24, 16  ;;  %v5550_v16 = vshll.u32 %v14515_v27, 16  ;;  %v14556_v57 = vld [vmem:[#allocation2 + $0x60] sm:$0xf] }
 0x32c   : > { %v5529_v10 = vsel %vm11878_vm10, %v5524_v63, %v5528_v61  ;;  %v5539_v38 = vsel %vm11878_vm10, %v5534_v19, %v5538_v62  ;;  %8613 = vmatmul.mubr.bf16.gmra.mxu0 %v9813_v4  ;;  %v6107_v21 = vor.u32 %v6106_v52, %v6103_v6  ;;  %v5554_v42 = vshrl.u32 %v14515_v27, 16  ;;  %v14558_v12 = vld [vmem:[#allocation2 + $0x58] sm:$0xf] }
 0x32d   : > { %v9797_v1 = vcombine.low %v5529_v10, %v5539_v38  ;;  %8620 = vmatprep.mubr.bf16.mxu0 %v9830_v28  ;;  %v5543_v20 = vrot.slane %v5541_v31, 4  ;;  %v6125_v37 = vshrl.u32 %v14486_v58, 16  ;;  %v5546_v11 = vrot.slane %v5544_v32, 5  ;;  %v5387_v28 = vld [vmem:[#allocation2 + $0x5c] sm:$0x1] }
 0x32e   : > { %v5552_v9 = vrot.slane %v5550_v16, 5  ;;  %v14534_v14 = vrot.slane %v6090_v23, 4  ;;  %v5556_v22 = vrot.slane %v5554_v42, 4  ;;  %v5560_v59 = vshll.u32 %v5386_v47, 16 }
 0x32f   : > { %8451 = vmatprep.mubr.bf16.mxu1 %v9797_v1  ;;  %v5888_v0 = vrot.slane %v14515_v27, 5  ;;  %v14537_v36 = vrot.slane %v6083_v7, 4  ;;  %v14539_v45 = vrot.slane %v6110_v2, 5  ;;  %v6128_v60 = vshll.u32 %v14486_v58, 16 }
 0x330   : > { %8452 = vmatmul.mubr.bf16.gmra.mxu1 %v9781_v53  ;;  %v5547_v26 = vor.u32 %v5546_v11, %v5543_v20  ;;  %v5557_v61 = vor.u32 %v5556_v22, %v5552_v9  ;;  %v5891_v8 = vrot.slane %v5386_v47, 5  ;;  %v9734_v35 = vrot.slane %v5786_v29, 9 }
 0x331   : > { %v5890_v13 = vrot.slane %v5888_v0, 4  ;;  %v14544_v23 = vrot.slane %v6107_v21, 4  ;;  %v14546_v5 = vrot.slane %v6114_v15, 4  ;;  %v14548_v30 = vrot.slane %v6125_v37, 4 }
 0x332   : > { %v5548_v7 = vrot.slane %v5547_v26, 4  ;;  %v5558_v46 = vrot.slane %v5557_v61, 4  ;;  %v5562_v6 = vrot.slane %v5560_v59, 5  ;;  %v5889_v58 = vsel %vm11898_vm12, %v9734_v35, %v5888_v0  ;;  %v14587_v26 = vld [vmem:[#allocation2 + $0x60] sm:$0xf] }
 0x333   : > { %v5892_v52 = vsel %vm11898_vm12, %v5890_v13, %v5891_v8  ;;  %v14560_v63 = vrot.slane %v6128_v60, 5  ;;  %v6134_v19 = vshll.u32 %v14470_v39, 16  ;;  %v9831_v4 = vcombine.low %v14556_v57, %v14542_v44 }
 0x334   : > { %v9814_v62 = vcombine.low %v5889_v58, %v5892_v52  ;;  %v5553_v2 = vsel %vm11878_vm10, %v5548_v7, %v5552_v9  ;;  %v5563_v15 = vsel %vm11878_vm10, %v5558_v46, %v5562_v6  ;;  %v5565_v31 = vshrl.u32 %v14550_v48, 16  ;;  %v5787_v9 = vld [vmem:[#allocation2 + $0x54] sm:$0xe]  ;;  %v14591_v52 = vld [vmem:[#allocation2 + $0x64] sm:$0xf] }
 0x335   : > { %v5568_v10 = vshll.u32 %v14550_v48, 16  ;;  %v6138_v38 = vshrl.u32 %v14470_v39, 16  ;;  %v9798_v47 = vcombine.low %v5553_v2, %v5563_v15  ;;  %v5574_v32 = vshll.u32 %v14558_v12, 16 }
 0x336   : > { %8621 = vmatmul.mubr.bf16.gmra.mxu0 %v9814_v62  ;;  %v5578_v16 = vshrl.u32 %v14558_v12, 16  ;;  %v6149_v21 = vshrl.u32 %v14517_v43, 16  ;;  %v9782_v1 = vcombine.low %v14509_v24, %v14515_v27  ;;  %v5567_v20 = vrot.slane %v5565_v31, 4  ;;  %v14599_v62 = vld [vmem:[#allocation2 + $0x6c] sm:$0xf] }
 0x337   : > { %8628 = vmatprep.mubr.bf16.mxu0 %v9831_v4  ;;  %v5570_v42 = vrot.slane %v5568_v10, 5  ;;  %v6152_v37 = vshll.u32 %v14517_v43, 16  ;;  %8459 = vmatprep.mubr.bf16.mxu1 %v9798_v47  ;;  %v5576_v53 = vrot.slane %v5574_v32, 5  ;;  %v5584_v39 = vshll.u32 %v5387_v28, 16  ;;  %v5388_v31 = vld [vmem:[#allocation2 + $0x68] sm:$0x1] }
 0x338   : > { %v5580_v11 = vrot.slane %v5578_v16, 4  ;;  %v6131_v29 = vor.u32 %v14560_v63, %v14548_v30  ;;  %v14580_v22 = vrot.slane %v6134_v19, 5  ;;  %8460 = vmatmul.mubr.bf16.gmra.mxu1 %v9782_v1  ;;  %v5895_v0 = vrot.slane %v14558_v12, 5  ;;  %v14589_v30 = vld [vmem:[#allocation2 + $0x70] sm:$0xf] }
 0x339   : > { %v5571_v59 = vor.u32 %v5570_v42, %v5567_v20  ;;  %v14583_v24 = vrot.slane %v6138_v38, 4  ;;  %v6158_v27 = vshll.u32 %v14507_v56, 16  ;;  %v6162_v43 = vshrl.u32 %v14507_v56, 16 }
 0x33a   : > { %v5581_v60 = vor.u32 %v5580_v11, %v5576_v53  ;;  %v5898_v8 = vrot.slane %v5387_v28, 5  ;;  %v9735_v35 = vrot.slane %v5787_v9, 9  ;;  %v5897_v13 = vrot.slane %v5895_v0, 4 }
 0x33b   : > { %v5572_v61 = vrot.slane %v5571_v59, 4  ;;  %v6151_v7 = vrot.slane %v6149_v21, 4  ;;  %v6154_v46 = vrot.slane %v6152_v37, 5  ;;  %v5586_v58 = vrot.slane %v5584_v39, 5  ;;  %v5788_v37 = vld [vmem:[#allocation2 + $0x60] sm:$0xe] }
 0x33c   : > { %v5582_v6 = vrot.slane %v5581_v60, 4  ;;  %v5896_v56 = vsel %vm11898_vm12, %v9735_v35, %v5895_v0  ;;  %v5899_v19 = vsel %vm11898_vm12, %v5897_v13, %v5898_v8  ;;  %v5589_v4 = vshrl.u32 %v14587_v26, 16  ;;  %v14619_v13 = vld [vmem:[#allocation2 + $0x7c] sm:$0xf] }
 0x33d   : > { %v5577_v63 = vsel %vm11878_vm10, %v5572_v61, %v5576_v53  ;;  %v9815_v15 = vcombine.low %v5896_v56, %v5899_v19  ;;  %v9832_v28 = vcombine.low %v14599_v62, %v14589_v30  ;;  %v5592_v10 = vshll.u32 %v14587_v26, 16  ;;  %v14632_v19 = vld [vmem:[#allocation2 + $0x78] sm:$0xf] }
 0x33e   : > { %v5587_v2 = vsel %vm11878_vm10, %v5582_v6, %v5586_v58  ;;  %v5591_v47 = vrot.slane %v5589_v4, 4  ;;  %v5598_v32 = vshll.u32 %v14591_v52, 16  ;;  %v5602_v16 = vshrl.u32 %v14591_v52, 16  ;;  %v14626_v58 = vld [vmem:[#allocation2 + $0x6c] sm:$0xf] }
 0x33f   : > { %v9799_v38 = vcombine.low %v5577_v63, %v5587_v2  ;;  %v6155_v21 = vor.u32 %v6154_v46, %v6151_v7  ;;  %v6173_v1 = vshrl.u32 %v14556_v57, 16  ;;  %8629 = vmatmul.mubr.bf16.gmra.mxu0 %v9815_v15  ;;  %v9783_v20 = vcombine.low %v14550_v48, %v14558_v12  ;;  %v14634_v4 = vld [vmem:[#allocation2 + $0x70] sm:$0xf] }
 0x340   : > { %v5594_v42 = vrot.slane %v5592_v10, 5  ;;  %8636 = vmatprep.mubr.bf16.mxu0 %v9832_v28  ;;  %v5600_v53 = vrot.slane %v5598_v32, 5  ;;  %v5604_v11 = vrot.slane %v5602_v16, 4  ;;  %v5608_v39 = vshll.u32 %v5388_v31, 16 }
 0x341   : > { %8467 = vmatprep.mubr.bf16.mxu1 %v9799_v38  ;;  %v5902_v9 = vrot.slane %v14591_v52, 5  ;;  %v14613_v59 = vrot.slane %v6131_v29, 4  ;;  %v14615_v0 = vrot.slane %v6158_v27, 5  ;;  %v14617_v60 = vrot.slane %v6162_v43, 4  ;;  %v5389_v38 = vld [vmem:[#allocation2 + $0x74] sm:$0x1] }
 0x342   : > { %8468 = vmatmul.mubr.bf16.gmra.mxu1 %v9783_v20  ;;  %v5595_v61 = vor.u32 %v5594_v42, %v5591_v47  ;;  %v5605_v8 = vor.u32 %v5604_v11, %v5600_v53  ;;  %v5905_v35 = vrot.slane %v5388_v31, 5  ;;  %v9736_v48 = vrot.slane %v5788_v37, 9 }
 0x343   : > { %v5904_v12 = vrot.slane %v5902_v9, 4  ;;  %v14621_v7 = vrot.slane %v6155_v21, 4  ;;  %v14623_v46 = vrot.slane %v6173_v1, 4  ;;  %v6176_v6 = vshll.u32 %v14556_v57, 16 }
 0x344   : > { %v5596_v29 = vrot.slane %v5595_v61, 4  ;;  %v5606_v27 = vrot.slane %v5605_v8, 4  ;;  %v5610_v43 = vrot.slane %v5608_v39, 5  ;;  %v5903_v63 = vsel %vm11898_vm12, %v9736_v48, %v5902_v9  ;;  %v5789_v8 = vld [vmem:[#allocation2 + $0x6c] sm:$0xe] }
 0x345   : > { %v5906_v56 = vsel %vm11898_vm12, %v5904_v12, %v5905_v35  ;;  %v6182_v2 = vshll.u32 %v14542_v44, 16  ;;  %v6186_v15 = vshrl.u32 %v14542_v44, 16  ;;  %v9833_v28 = vcombine.low %v14632_v19, %v14619_v13 }
 0x346   : > { %v9816_v57 = vcombine.low %v5903_v63, %v5906_v56  ;;  %v5601_v31 = vsel %vm11878_vm10, %v5596_v29, %v5600_v53  ;;  %v5611_v10 = vsel %vm11878_vm10, %v5606_v27, %v5610_v43  ;;  %v5613_v47 = vshrl.u32 %v14626_v58, 16  ;;  %v14660_v27 = vld [vmem:[#allocation2 + $0x78] sm:$0xf] }
 0x347   : > { %v5616_v32 = vshll.u32 %v14626_v58, 16  ;;  %v6178_v16 = vrot.slane %v6176_v6, 5  ;;  %v9800_v21 = vcombine.low %v5601_v31, %v5611_v10  ;;  %v5622_v44 = vshll.u32 %v14634_v4, 16 }
 0x348   : > { %8637 = vmatmul.mubr.bf16.gmra.mxu0 %v9816_v57  ;;  %v5626_v1 = vshrl.u32 %v14634_v4, 16  ;;  %v6197_v20 = vshrl.u32 %v14599_v62, 16  ;;  %v9784_v42 = vcombine.low %v14587_v26, %v14591_v52  ;;  %v5615_v37 = vrot.slane %v5613_v47, 4  ;;  %v14662_v57 = vld [vmem:[#allocation2 + $0x88] sm:$0xf] }
 0x349   : > { %8644 = vmatprep.mubr.bf16.mxu0 %v9833_v28  ;;  %v5618_v53 = vrot.slane %v5616_v32, 5  ;;  %v6200_v11 = vshll.u32 %v14599_v62, 16  ;;  %8475 = vmatprep.mubr.bf16.mxu1 %v9800_v21  ;;  %v5624_v39 = vrot.slane %v5622_v44, 5  ;;  %v5632_v61 = vshll.u32 %v5389_v38, 16  ;;  %v14664_v47 = vld [vmem:[#allocation2 + $0x7c] sm:$0xf] }
 0x34a   : > { %v5628_v9 = vrot.slane %v5626_v1, 4  ;;  %v14652_v35 = vrot.slane %v6182_v2, 5  ;;  %v14654_v48 = vrot.slane %v6186_v15, 4  ;;  %8476 = vmatmul.mubr.bf16.gmra.mxu1 %v9784_v42  ;;  %v5909_v6 = vrot.slane %v14634_v4, 5 }
 0x34b   : > { %v5619_v12 = vor.u32 %v5618_v53, %v5615_v37  ;;  %v6179_v26 = vor.u32 %v6178_v16, %v14623_v46  ;;  %v6206_v52 = vshll.u32 %v14589_v30, 16  ;;  %v6210_v29 = vshrl.u32 %v14589_v30, 16 }
 0x34c   : > { %v5629_v62 = vor.u32 %v5628_v9, %v5624_v39  ;;  %v5912_v63 = vrot.slane %v5389_v38, 5  ;;  %v9737_v56 = vrot.slane %v5789_v8, 9  ;;  %v5911_v2 = vrot.slane %v5909_v6, 4  ;;  %v14672_v38 = vld [vmem:[#allocation2 + $0x84] sm:$0xf] }
 0x34d   : > { %v5620_v43 = vrot.slane %v5619_v12, 4  ;;  %v6199_v15 = vrot.slane %v6197_v20, 4  ;;  %v6202_v28 = vrot.slane %v6200_v11, 5  ;;  %v5634_v10 = vrot.slane %v5632_v61, 5  ;;  %v5390_v20 = vld [vmem:[#allocation2 + $0x80] sm:$0x1] }
 0x34e   : > { %v5630_v31 = vrot.slane %v5629_v62, 4  ;;  %v5910_v30 = vsel %vm11898_vm12, %v9737_v56, %v5909_v6  ;;  %v5913_v32 = vsel %vm11898_vm12, %v5911_v2, %v5912_v63  ;;  %v5637_v16 = vshrl.u32 %v14660_v27, 16  ;;  %v5790_v6 = vld [vmem:[#allocation2 + $0x78] sm:$0xe] }
 0x34f   : > { %v5625_v46 = vsel %vm11878_vm10, %v5620_v43, %v5624_v39  ;;  %v9817_v44 = vcombine.low %v5910_v30, %v5913_v32  ;;  %v9834_v1 = vcombine.low %v14672_v38, %v14662_v57  ;;  %v5640_v42 = vshll.u32 %v14660_v27, 16  ;;  %v14692_v30 = vld [vmem:[#allocation2 + $0x94] sm:$0xf] }
 0x350   : > { %v5635_v21 = vsel %vm11878_vm10, %v5630_v31, %v5634_v10  ;;  %v5639_v53 = vrot.slane %v5637_v16, 4  ;;  %v5646_v11 = vshll.u32 %v14664_v47, 16  ;;  %v5650_v39 = vshrl.u32 %v14664_v47, 16 }
 0x351   : > { %v9801_v37 = vcombine.low %v5625_v46, %v5635_v21  ;;  %v6203_v9 = vor.u32 %v6202_v28, %v6199_v15  ;;  %v6221_v61 = vshrl.u32 %v14632_v19, 16  ;;  %8645 = vmatmul.mubr.bf16.gmra.mxu0 %v9817_v44  ;;  %v9785_v8 = vcombine.low %v14626_v58, %v14634_v4  ;;  %v14699_v44 = vld [vmem:[#allocation2 + $0x84] sm:$0xf] }
 0x352   : > { %v5642_v12 = vrot.slane %v5640_v42, 5  ;;  %8652 = vmatprep.mubr.bf16.mxu0 %v9834_v1  ;;  %v5648_v62 = vrot.slane %v5646_v11, 5  ;;  %v5652_v43 = vrot.slane %v5650_v39, 4  ;;  %v5656_v63 = vshll.u32 %v5390_v20, 16  ;;  %v14705_v42 = vld [vmem:[#allocation2 + $0x90] sm:$0xf] }
 0x353   : > { %8483 = vmatprep.mubr.bf16.mxu1 %v9801_v37  ;;  %v5916_v56 = vrot.slane %v14664_v47, 5  ;;  %v14686_v2 = vrot.slane %v6179_v26, 4  ;;  %v14688_v31 = vrot.slane %v6206_v52, 5  ;;  %v14690_v15 = vrot.slane %v6210_v29, 4  ;;  %v14707_v37 = vld [vmem:[#allocation2 + $0x88] sm:$0xf] }
 0x354   : > { %8484 = vmatmul.mubr.bf16.gmra.mxu1 %v9785_v8  ;;  %v5643_v28 = vor.u32 %v5642_v12, %v5639_v53  ;;  %v5653_v10 = vor.u32 %v5652_v43, %v5648_v62  ;;  %v5919_v46 = vrot.slane %v5390_v20, 5  ;;  %v9738_v58 = vrot.slane %v5790_v6, 9  ;;  %v5391_v8 = vld [vmem:[#allocation2 + $0x8c] sm:$0x1] }
 0x355   : > { %v5918_v4 = vrot.slane %v5916_v56, 4  ;;  %v14694_v32 = vrot.slane %v6203_v9, 4  ;;  %v14696_v16 = vrot.slane %v6221_v61, 4  ;;  %v6224_v21 = vshll.u32 %v14632_v19, 16 }
 0x356   : > { %v5644_v26 = vrot.slane %v5643_v28, 4  ;;  %v5654_v52 = vrot.slane %v5653_v10, 4  ;;  %v5658_v29 = vrot.slane %v5656_v63, 5  ;;  %v5917_v1 = vsel %vm11898_vm12, %v9738_v58, %v5916_v56 }
 0x357   : > { %v5920_v20 = vsel %vm11898_vm12, %v5918_v4, %v5919_v46  ;;  %v6230_v53 = vshll.u32 %v14619_v13, 16  ;;  %v6234_v11 = vshrl.u32 %v14619_v13, 16  ;;  %v9835_v39 = vcombine.low %v14705_v42, %v14692_v30 }
 0x358   : > { %v9818_v19 = vcombine.low %v5917_v1, %v5920_v20  ;;  %v5649_v9 = vsel %vm11878_vm10, %v5644_v26, %v5648_v62  ;;  %v5659_v61 = vsel %vm11878_vm10, %v5654_v52, %v5658_v29  ;;  %v5661_v12 = vshrl.u32 %v14699_v44, 16  ;;  %v5791_v52 = vld [vmem:[#allocation2 + $0x84] sm:$0xe] }
 0x359   : > { %v5664_v6 = vshll.u32 %v14699_v44, 16  ;;  %v6226_v43 = vrot.slane %v6224_v21, 5  ;;  %v9802_v63 = vcombine.low %v5649_v9, %v5659_v61  ;;  %v5670_v13 = vshll.u32 %v14707_v37, 16  ;;  %v14733_v9 = vld [vmem:[#allocation2 + $0x90] sm:$0xf] }
 0x35a   : > { %8653 = vmatmul.mubr.bf16.gmra.mxu0 %v9818_v19  ;;  %v5674_v56 = vshrl.u32 %v14707_v37, 16  ;;  %v6245_v28 = vshrl.u32 %v14672_v38, 16  ;;  %v9786_v62 = vcombine.low %v14660_v27, %v14664_v47  ;;  %v5663_v10 = vrot.slane %v5661_v12, 4 }
 0x35b   : > { %8660 = vmatprep.mubr.bf16.mxu0 %v9835_v39  ;;  %v5666_v46 = vrot.slane %v5664_v6, 5  ;;  %v6248_v58 = vshll.u32 %v14672_v38, 16  ;;  %8491 = vmatprep.mubr.bf16.mxu1 %v9802_v63  ;;  %v5672_v4 = vrot.slane %v5670_v13, 5  ;;  %v5680_v21 = vshll.u32 %v5391_v8, 16  ;;  %v14735_v63 = vld [vmem:[#allocation2 + $0xa0] sm:$0xf] }
 0x35c   : > { %v5676_v26 = vrot.slane %v5674_v56, 4  ;;  %v14725_v29 = vrot.slane %v6230_v53, 5  ;;  %v14727_v1 = vrot.slane %v6234_v11, 4  ;;  %8492 = vmatmul.mubr.bf16.gmra.mxu1 %v9786_v62  ;;  %v5923_v19 = vrot.slane %v14707_v37, 5 }
 0x35d   : > { %v5667_v20 = vor.u32 %v5666_v46, %v5663_v10  ;;  %v6227_v27 = vor.u32 %v6226_v43, %v14696_v16  ;;  %v6254_v47 = vshll.u32 %v14662_v57, 16  ;;  %v6258_v39 = vshrl.u32 %v14662_v57, 16  ;;  %v14737_v10 = vld [vmem:[#allocation2 + $0x94] sm:$0xf] }
 0x35e   : > { %16675 = vst [vmem:[#allocation22_spill] sm:$0xff] %v14725_v29  ;;  %16676 = vst [vmem:[#allocation26_spill] sm:$0xff] %v14727_v1  ;;  %v5677_v38 = vor.u32 %v5676_v26, %v5672_v4  ;;  %v5926_v12 = vrot.slane %v5391_v8, 5  ;;  %v9739_v6 = vrot.slane %v5791_v52, 9  ;;  %v5925_v53 = vrot.slane %v5923_v19, 4 }
 0x35f   : > { %v5668_v61 = vrot.slane %v5667_v20, 4  ;;  %v6247_v11 = vrot.slane %v6245_v28, 4  ;;  %v6250_v13 = vrot.slane %v6248_v58, 5  ;;  %v5682_v62 = vrot.slane %v5680_v21, 5  ;;  %v14745_v8 = vld [vmem:[#allocation2 + $0x9c] sm:$0xf] }
 0x360   : > { %v5678_v56 = vrot.slane %v5677_v38, 4  ;;  %v5924_v57 = vsel %vm11898_vm12, %v9739_v6, %v5923_v19  ;;  %v5927_v43 = vsel %vm11898_vm12, %v5925_v53, %v5926_v12  ;;  %v5685_v46 = vshrl.u32 %v14733_v9, 16  ;;  %v5392_v21 = vld [vmem:[#allocation2 + $0x98] sm:$0x1]  ;;  %v6388_v1 = vld [vmem:[#allocation2 + $0xc] sm:$0xe] }
 0x361   : > { %v5673_v16 = vsel %vm11878_vm10, %v5668_v61, %v5672_v4  ;;  %v9819_v58 = vcombine.low %v5924_v57, %v5927_v43  ;;  %v9836_v26 = vcombine.low %v14745_v8, %v14735_v63  ;;  %v5688_v4 = vshll.u32 %v14733_v9, 16 }
 0x362   : > { %v5683_v28 = vsel %vm11878_vm10, %v5678_v56, %v5682_v62  ;;  %v5687_v20 = vrot.slane %v5685_v46, 4  ;;  %v5694_v19 = vshll.u32 %v14737_v10, 16  ;;  %v5698_v38 = vshrl.u32 %v14737_v10, 16  ;;  %v5792_v56 = vld [vmem:[#allocation2 + $0x90] sm:$0xe] }
 0x363   : > { %v9803_v52 = vcombine.low %v5673_v16, %v5683_v28  ;;  %v6251_v61 = vor.u32 %v6250_v13, %v6247_v11  ;;  %v6269_v12 = vshrl.u32 %v14705_v42, 16  ;;  %8661 = vmatmul.mubr.bf16.gmra.mxu0 %v9819_v58  ;;  %v9787_v6 = vcombine.low %v14699_v44, %v14707_v37 }
 0x364   : > { %v5690_v53 = vrot.slane %v5688_v4, 5  ;;  %8668 = vmatprep.mubr.bf16.mxu0 %v9836_v26  ;;  %v5696_v62 = vrot.slane %v5694_v19, 5  ;;  %v5700_v57 = vrot.slane %v5698_v38, 4  ;;  %v5704_v43 = vshll.u32 %v5392_v21, 16  ;;  %v14765_v4 = vld [vmem:[#allocation2 + $0xac] sm:$0xf] }
 0x365   : > { %8499 = vmatprep.mubr.bf16.mxu1 %v9803_v52  ;;  %v5930_v16 = vrot.slane %v14737_v10, 5  ;;  %v14759_v46 = vrot.slane %v6227_v27, 4  ;;  %v14761_v28 = vrot.slane %v6254_v47, 5  ;;  %v14763_v11 = vrot.slane %v6258_v39, 4  ;;  %v14772_v38 = vld [vmem:[#allocation2 + $0x9c] sm:$0xf] }
 0x366   : > { %8500 = vmatmul.mubr.bf16.gmra.mxu1 %v9787_v6  ;;  %v5691_v13 = vor.u32 %v5690_v53, %v5687_v20  ;;  %v5701_v58 = vor.u32 %v5700_v57, %v5696_v62  ;;  %v5933_v34 = vrot.slane %v5392_v21, 5  ;;  %v9740_v44 = vrot.slane %v5792_v56, 9  ;;  %v14778_v6 = vld [vmem:[#allocation2 + $0xa8] sm:$0xf]  ;;  %v14780_v53 = vld [vmem:[#allocation2 + $0xa0] sm:$0xf] }
 0x367   : > { %16677 = vst [vmem:[#allocation45_spill] sm:$0xff] %v14759_v46  ;;  %16678 = vst [vmem:[#allocation50_spill] sm:$0xff] %v14761_v28  ;;  %v5932_v37 = vrot.slane %v5930_v16, 4  ;;  %v14767_v26 = vrot.slane %v6251_v61, 4  ;;  %v14769_v52 = vrot.slane %v6269_v12, 4  ;;  %v6272_v19 = vshll.u32 %v14705_v42, 16 }
 0x368   : > { %16679 = vst [vmem:[#allocation47_spill] sm:$0xff] %v14763_v11  ;;  %v5692_v27 = vrot.slane %v5691_v13, 4  ;;  %v5702_v47 = vrot.slane %v5701_v58, 4  ;;  %v5706_v39 = vrot.slane %v5704_v43, 5  ;;  %v5931_v20 = vsel %vm11898_vm12, %v9740_v44, %v5930_v16  ;;  %v5393_v16 = vld [vmem:[#allocation2 + $0xa4] sm:$0x1] }
 0x369   : > { %16680 = vst [vmem:[#allocation20_spill] sm:$0xff] %v14767_v26  ;;  %v5934_v21 = vsel %vm11898_vm12, %v5932_v37, %v5933_v34  ;;  %v6278_v61 = vshll.u32 %v14692_v30, 16  ;;  %v6282_v12 = vshrl.u32 %v14692_v30, 16  ;;  %v9837_v56 = vcombine.low %v14778_v6, %v14765_v4 }
 0x36a   : > { %v9820_v42 = vcombine.low %v5931_v20, %v5934_v21  ;;  %v5697_v57 = vsel %vm11878_vm10, %v5692_v27, %v5696_v62  ;;  %v5707_v43 = vsel %vm11878_vm10, %v5702_v47, %v5706_v39  ;;  %v5709_v34 = vshrl.u32 %v14772_v38, 16 }
 0x36b   : > { %v5712_v13 = vshll.u32 %v14772_v38, 16  ;;  %v6274_v58 = vrot.slane %v6272_v19, 5  ;;  %v9804_v44 = vcombine.low %v5697_v57, %v5707_v43  ;;  %v5718_v30 = vshll.u32 %v14780_v53, 16  ;;  %v5793_v57 = vld [vmem:[#allocation2 + $0x9c] sm:$0xe] }
 0x36c   : > { %8669 = vmatmul.mubr.bf16.gmra.mxu0 %v9820_v42  ;;  %v5722_v37 = vshrl.u32 %v14780_v53, 16  ;;  %v6293_v20 = vshrl.u32 %v14745_v8, 16  ;;  %v9788_v62 = vcombine.low %v14733_v9, %v14737_v10  ;;  %v5711_v27 = vrot.slane %v5709_v34, 4  ;;  %v14806_v34 = vld [vmem:[#allocation2 + $0xa8] sm:$0xf] }
 0x36d   : > { %8676 = vmatprep.mubr.bf16.mxu0 %v9837_v56  ;;  %v5714_v47 = vrot.slane %v5712_v13, 5  ;;  %v6296_v39 = vshll.u32 %v14745_v8, 16  ;;  %8507 = vmatprep.mubr.bf16.mxu1 %v9804_v44  ;;  %v5720_v21 = vrot.slane %v5718_v30, 5  ;;  %v5728_v19 = vshll.u32 %v5393_v16, 16 }
 0x36e   : > { %v5724_v26 = vrot.slane %v5722_v37, 4  ;;  %v14798_v42 = vrot.slane %v6278_v61, 5  ;;  %v14800_v43 = vrot.slane %v6282_v12, 4  ;;  %8508 = vmatmul.mubr.bf16.gmra.mxu1 %v9788_v62  ;;  %v5937_v28 = vrot.slane %v14780_v53, 5  ;;  %v5985_v37 = vld [vmem:[#allocation2 + $0xb8] sm:$0xf] }
 0x36f   : > { %v5715_v11 = vor.u32 %v5714_v47, %v5711_v27  ;;  %v6275_v9 = vor.u32 %v6274_v58, %v14769_v52  ;;  %v6302_v10 = vshll.u32 %v14735_v63, 16  ;;  %v6306_v56 = vshrl.u32 %v14735_v63, 16  ;;  %v14808_v47 = vld [vmem:[#allocation2 + $0xac] sm:$0xf] }
 0x370   : > { %16681 = vst [vmem:[#allocation31_spill] sm:$0xff] %v14798_v42  ;;  %16682 = vst [vmem:[#allocation23_spill] sm:$0xff] %v14800_v43  ;;  %v5725_v8 = vor.u32 %v5724_v26, %v5720_v21  ;;  %v5940_v44 = vrot.slane %v5393_v16, 5  ;;  %v9741_v30 = vrot.slane %v5793_v57, 9  ;;  %v5939_v61 = vrot.slane %v5937_v28, 4 }
 0x371   : > { %v5716_v13 = vrot.slane %v5715_v11, 4  ;;  %v6295_v12 = vrot.slane %v6293_v20, 4  ;;  %v6298_v43 = vrot.slane %v6296_v39, 5  ;;  %v5730_v27 = vrot.slane %v5728_v19, 5  ;;  %v14816_v11 = vld [vmem:[#allocation2 + $0xb4] sm:$0xf] }
 0x372   : > { %v5726_v62 = vrot.slane %v5725_v8, 4  ;;  %v5938_v63 = vsel %vm11898_vm12, %v9741_v30, %v5937_v28  ;;  %v5941_v26 = vsel %vm11898_vm12, %v5939_v61, %v5940_v44  ;;  %v5733_v16 = vshrl.u32 %v14806_v34, 16  ;;  %v5394_v19 = vld [vmem:[#allocation2 + $0xb0] sm:$0x1] }
 0x373   : > { %v5721_v52 = vsel %vm11878_vm10, %v5716_v13, %v5720_v21  ;;  %v9821_v20 = vcombine.low %v5938_v63, %v5941_v26  ;;  %v9838_v39 = vcombine.low %v14816_v11, %v5985_v37  ;;  %v5736_v57 = vshll.u32 %v14806_v34, 16 }
 0x374   : > { %v5731_v58 = vsel %vm11878_vm10, %v5726_v62, %v5730_v27  ;;  %v5735_v8 = vrot.slane %v5733_v16, 4  ;;  %v5742_v28 = vshll.u32 %v14808_v47, 16  ;;  %v5746_v13 = vshrl.u32 %v14808_v47, 16  ;;  %v5794_v27 = vld [vmem:[#allocation2 + $0xa8] sm:$0xe] }
 0x375   : > { %v9805_v21 = vcombine.low %v5721_v52, %v5731_v58  ;;  %v6299_v44 = vor.u32 %v6298_v43, %v6295_v12  ;;  %v6317_v30 = vshrl.u32 %v14778_v6, 16  ;;  %8677 = vmatmul.mubr.bf16.gmra.mxu0 %v9821_v20  ;;  %v9789_v61 = vcombine.low %v14772_v38, %v14780_v53 }
 0x376   : > { %v5738_v62 = vrot.slane %v5736_v57, 5  ;;  %8684 = vmatprep.mubr.bf16.mxu0 %v9838_v39  ;;  %v5744_v37 = vrot.slane %v5742_v28, 5  ;;  %v5748_v63 = vrot.slane %v5746_v13, 4  ;;  %v5752_v26 = vshll.u32 %v5394_v19, 16  ;;  %v5986_v57 = vld [vmem:[#allocation2 + $0xc0] sm:$0xf] }
 0x377   : > { %8515 = vmatprep.mubr.bf16.mxu1 %v9805_v21  ;;  %v5944_v52 = vrot.slane %v14808_v47, 5  ;;  %v14829_v16 = vrot.slane %v6275_v9, 4  ;;  %v14831_v58 = vrot.slane %v6302_v10, 5  ;;  %v14833_v43 = vrot.slane %v6306_v56, 4  ;;  %v5987_v21 = vld [vmem:[#allocation2 + $0xc4] sm:$0xf] }
 0x378   : > { %8516 = vmatmul.mubr.bf16.gmra.mxu1 %v9789_v61  ;;  %v5739_v12 = vor.u32 %v5738_v62, %v5735_v8  ;;  %v5749_v20 = vor.u32 %v5748_v63, %v5744_v37  ;;  %v5947_v42 = vrot.slane %v5394_v19, 5  ;;  %v9742_v38 = vrot.slane %v5794_v27, 9  ;;  %v14846_v61 = vld [vmem:[#allocation2 + $0xb8] sm:$0xf]  ;;  %v5395_v62 = vld [vmem:[#allocation2 + $0xbc] sm:$0x1] }
 0x379   : > { %16683 = vst [vmem:[#allocation43_spill] sm:$0xff] %v14829_v16  ;;  %16684 = vst [vmem:[#allocation15_spill] sm:$0xff] %v14831_v58  ;;  %v5946_v53 = vrot.slane %v5944_v52, 4  ;;  %v14835_v39 = vrot.slane %v6299_v44, 4  ;;  %v14837_v28 = vrot.slane %v6317_v30, 4  ;;  %v6320_v13 = vshll.u32 %v14778_v6, 16 }
 0x37a   : > { %16685 = vst [vmem:[#allocation25_spill] sm:$0xff] %v14833_v43  ;;  %v5740_v9 = vrot.slane %v5739_v12, 4  ;;  %v14840_v16 = vld [vmem:[#allocation2 + $0xb4] sm:$0xf]  ;;  %v5750_v10 = vrot.slane %v5749_v20, 4  ;;  %v5754_v56 = vrot.slane %v5752_v26, 5  ;;  %v5945_v8 = vsel %vm11898_vm12, %v9742_v38, %v5944_v52 }
 0x37b   : > { %16686 = vst [vmem:[#allocation24_spill] sm:$0xff] %v14835_v39  ;;  %v5948_v19 = vsel %vm11898_vm12, %v5946_v53, %v5947_v42  ;;  %v6326_v44 = vshll.u32 %v14765_v4, 16  ;;  %v9839_v6 = vcombine.low %v5986_v57, %v5987_v21  ;;  %v5757_v52 = vshrl.u32 %v14840_v16, 16  ;;  %v14858_v30 = vld [vmem:[#allocation2 + $0x18] sm:$0xf] }
 0x37c   : > { %v9822_v27 = vcombine.low %v5945_v8, %v5948_v19  ;;  %v5745_v63 = vsel %vm11878_vm10, %v5740_v9, %v5744_v37  ;;  %v5755_v26 = vsel %vm11878_vm10, %v5750_v10, %v5754_v56  ;;  %v5760_v12 = vshll.u32 %v14840_v16, 16  ;;  %v14864_v10 = vld [vmem:[#allocation2 + $0x1c] sm:$0xf] }
 0x37d   : > { %v9806_v42 = vcombine.low %v5745_v63, %v5755_v26  ;;  %v5766_v20 = vshll.u32 %v14846_v61, 16  ;;  %v5770_v38 = vshrl.u32 %v14846_v61, 16  ;;  %v5776_v53 = vshll.u32 %v5395_v62, 16  ;;  %v5795_v63 = vld [vmem:[#allocation2 + $0xb4] sm:$0xe] }
 0x37e   : > { %8685 = vmatmul.mubr.bf16.gmra.mxu0 %v9822_v27  ;;  %v14860_v57 = vrot.slane %v6320_v13, 5  ;;  %v9790_v37 = vcombine.low %v14806_v34, %v14808_v47  ;;  %v5759_v21 = vrot.slane %v5757_v52, 4  ;;  %v5762_v9 = vrot.slane %v5760_v12, 5  ;;  %v6596_v47 = vld [vmem:[#allocation2 + $0x20] sm:$0x1] }
 0x37f   : > { %8692 = vmatprep.mubr.bf16.mxu0 %v9839_v6  ;;  %v14866_v56 = vrot.slane %v6326_v44, 5  ;;  %8523 = vmatprep.mubr.bf16.mxu1 %v9806_v42  ;;  %v5768_v8 = vrot.slane %v5766_v20, 5  ;;  %v5772_v19 = vrot.slane %v5770_v38, 4  ;;  %v5954_v27 = vrot.slane %v5395_v62, 5 }
 0x380   : > { %8524 = vmatmul.mubr.bf16.gmra.mxu1 %v9790_v37  ;;  %v5763_v26 = vor.u32 %v5762_v9, %v5759_v21  ;;  %v5778_v39 = vrot.slane %v5776_v53, 5  ;;  %v5951_v13 = vrot.slane %v14846_v61, 5  ;;  %v6613_v43 = vshrl.u32 %v14858_v30, 16  ;;  %v5988_v9 = vld [vmem:[#allocation2 + $0x14] sm:$0x1] }
 0x381   : > { %16687 = vst [vmem:[#allocation28_spill] sm:$0xff] %v14866_v56  ;;  %v5773_v34 = vor.u32 %v5772_v19, %v5768_v8  ;;  %v6616_v6 = vshll.u32 %v14858_v30, 16  ;;  %v6622_v52 = vshll.u32 %v14864_v10, 16  ;;  %v6626_v44 = vshrl.u32 %v14864_v10, 16 }
 0x382   : > { %v5764_v12 = vrot.slane %v5763_v26, 4  ;;  %v9743_v42 = vrot.slane %v5795_v63, 9  ;;  %v5953_v20 = vrot.slane %v5951_v13, 4  ;;  %v6615_v62 = vrot.slane %v6613_v43, 4 }
 0x383   : > { %v5774_v38 = vrot.slane %v5773_v34, 4  ;;  %v6618_v37 = vrot.slane %v6616_v6, 5  ;;  %v6624_v21 = vrot.slane %v6622_v52, 5  ;;  %v6628_v53 = vrot.slane %v6626_v44, 4  ;;  %v14881_v6 = vld [vmem:[#allocation2 + $0x24] sm:$0xf] }
 0x384   : > { %v5769_v56 = vsel %vm11878_vm10, %v5764_v12, %v5768_v8  ;;  %v5952_v19 = vsel %vm11898_vm12, %v9743_v42, %v5951_v13  ;;  %v5955_v58 = vsel %vm11898_vm12, %v5953_v20, %v5954_v27  ;;  %v6632_v46 = vshll.u32 %v6596_v47, 16  ;;  %v14883_v52 = vld [vmem:[#allocation2 + $0x28] sm:$0xf]  ;;  %v11460_v20 = vld [vmem:[#allocation2 + $0x10] sm:$0xf] }
 0x385   : > { %v5779_v63 = vsel %vm11878_vm10, %v5774_v38, %v5778_v39  ;;  %v9823_v43 = vcombine.low %v5952_v19, %v5955_v58  ;;  %v6619_v26 = vor.u32 %v6618_v37, %v6615_v62  ;;  %v6629_v34 = vor.u32 %v6628_v53, %v6624_v21 }
 0x386   : > { %v9807_v44 = vcombine.low %v5769_v56, %v5779_v63  ;;  %v9791_v8 = vcombine.low %v14840_v16, %v14846_v61  ;;  %v6634_v13 = vrot.slane %v6632_v46, 5  ;;  %v6024_v12 = vshll.u32 %v5988_v9, 16 }
 0x387   : > { %8693 = vmatmul.mubr.bf16.gmra.mxu0 %v9823_v43  ;;  %v6620_v27 = vrot.slane %v6619_v26, 4  ;;  %v6630_v47 = vrot.slane %v6629_v34, 4  ;;  %v9744_v42 = vrot.slane %v6388_v1, 9  ;;  %v6454_v29 = vrot.slane %v11460_v20, 5  ;;  %v6597_v1 = vld [vmem:[#allocation2 + $0x2c] sm:$0x1] }
 0x388   : > { %8531 = vmatprep.mubr.bf16.mxu1 %v9807_v44  ;;  %v6026_v58 = vrot.slane %v6024_v12, 5  ;;  %v6637_v39 = vshrl.u32 %v14881_v6, 16  ;;  %v6640_v62 = vshll.u32 %v14881_v6, 16  ;;  %v6646_v38 = vshll.u32 %v14883_v52, 16  ;;  %v5989_v43 = vld [vmem:[#allocation2 + $0x20] sm:$0x1] }
 0x389   : > { %8532 = vmatmul.mubr.bf16.gmra.mxu1 %v9791_v8  ;;  %v6625_v16 = vsel %vm11878_vm10, %v6620_v27, %v6624_v21  ;;  %v6635_v46 = vsel %vm11878_vm10, %v6630_v47, %v6634_v13  ;;  %v6456_v61 = vrot.slane %v6454_v29, 4  ;;  %v6457_v56 = vrot.slane %v5988_v9, 5  ;;  %v6389_v27 = vld [vmem:[#allocation2 + $0x18] sm:$0xe] }
 0x38a   : > { %v9888_v37 = vcombine.low %v6625_v16, %v6635_v46  ;;  %v6027_v53 = vsel %vm11878_vm10, %v14401_v33, %v6026_v58  ;;  %v6639_v19 = vrot.slane %v6637_v39, 4  ;;  %v6642_v63 = vrot.slane %v6640_v62, 5  ;;  %v14912_v46 = vld [vmem:[#allocation2 + $0x30] sm:$0xf] }
 0x38b   : > { %v6455_v26 = vsel %vm11898_vm12, %v9744_v42, %v6454_v29  ;;  %v6458_v21 = vsel %vm11898_vm12, %v6456_v61, %v6457_v56  ;;  %v6648_v34 = vrot.slane %v6646_v38, 5  ;;  %v6650_v44 = vshrl.u32 %v14883_v52, 16  ;;  %v11461_v38 = vld [vmem:[#allocation2 + $0x1c] sm:$0xf] }
 0x38c   : > { %8894 = vmatprep.mubr.bf16.mxu0 %v9888_v37  ;;  %v9856_v9 = vcombine.low %v6455_v26, %v6458_v21  ;;  %v6643_v8 = vor.u32 %v6642_v63, %v6639_v19  ;;  %v6656_v13 = vshll.u32 %v6597_v1, 16  ;;  %v16439_v12 = vrot.slane %v14883_v52, 5  ;;  %v14914_v37 = vld [vmem:[#allocation2 + $0x34] sm:$0xf] }
 0x38d   : > { %v9872_v33 = vcombine.low %v14858_v30, %v14864_v10  ;;  %v16688_v29 = vsel %vm11878_vm10, %v14272_v18, %v14285_v3  ;;  %v6652_v42 = vrot.slane %v6650_v44, 4  ;;  %v6048_v20 = vshll.u32 %v5989_v43, 16  ;;  %v11398_v18 = vld [vmem:[#allocation8 + $0x230] sm:$0xff]   ;;  %v6598_v44 = vld [vmem:[#allocation2 + $0x38] sm:$0x1] }
 0x38e   : > { %v9840_v47 = vcombine.low %v16688_v29, %v6027_v53  ;;  %8733 = vmatprep.mubr.bf16.mxu1 %v9856_v9  ;;  %v6644_v58 = vrot.slane %v6643_v8, 4  ;;  %v7071_v39 = vrot.slane %v16439_v12, 4  ;;  %v7072_v62 = vrot.slane %v6597_v1, 5  ;;  %v11462_v8 = vld [vmem:[#allocation8 + $0x238] sm:$0xff]  }
 0x38f   : > { %v6461_v16 = vrot.slane %v11461_v38, 5  ;;  %8895 = vmatmul.mubr.bf16.vlgmr.msra.gmra.mxu0 %v9872_v33  ;;  %v6653_v30 = vor.u32 %v6652_v42, %v6648_v34  ;;  %v6658_v10 = vrot.slane %v6656_v13, 5  ;;  %v6050_v61 = vrot.slane %v6048_v20, 5  ;;  %v5990_v33 = vld [vmem:[#allocation2 + $0x2c] sm:$0x1]  ;;  %v11401_v20 = vld [vmem:[#allocation8 + $0x228] sm:$0xff]  }
 0x390   : > { %v9745_v56 = vrot.slane %v6389_v27, 9  ;;  %v6649_v3 = vsel %vm11878_vm10, %v6644_v58, %v6648_v34  ;;  %v14920_v53 = vsel %vm11898_vm12, %v7071_v39, %v7072_v62  ;;  %v6464_v19 = vrot.slane %v5989_v43, 5 }
 0x391   : > { %16689 = vst [vmem:[#allocation36_spill] sm:$0xff] %v14920_v53  ;;  %v6463_v1 = vrot.slane %v6461_v16, 4  ;;  %8734 = vmatmul.mubr.bf16.vlgmr.msra.gmra.mxu1 %v9840_v47  ;;  %v6654_v63 = vrot.slane %v6653_v30, 4  ;;  %v6045_v21 = vor.u32 %v14439_v50, %v14372_v25  ;;  %v6661_v9 = vshrl.u32 %v14912_v46, 16 }
 0x392   : > { %v6462_v26 = vsel %vm11898_vm12, %v9745_v56, %v6461_v16  ;;  %11057 = vmatpush3.bf16.msra.mxu1 %v11462_v8  ;;  %v6664_v13 = vshll.u32 %v14912_v46, 16  ;;  %v6670_v43 = vshll.u32 %v14914_v37, 16  ;;  %v6674_v27 = vshrl.u32 %v14914_v37, 16  ;;  %v6390_v16 = vld [vmem:[#allocation2 + $0x24] sm:$0xe] }
 0x393   : > { %v6465_v34 = vsel %vm11898_vm12, %v6463_v1, %v6464_v19  ;;  %v6659_v29 = vsel %vm11878_vm10, %v6654_v63, %v6658_v10  ;;  %v6046_v50 = vrot.slane %v6045_v21, 4  ;;  %v6663_v42 = vrot.slane %v6661_v9, 4  ;;  %11058 = vmatprep.subr.bf16.mxu1 %v11398_v18  ;;  %v14942_v9 = vld [vmem:[#allocation2 + $0x3c] sm:$0xf] }
 0x394   : > { %v9857_v47 = vcombine.low %v6462_v26, %v6465_v34  ;;  %v9889_v58 = vcombine.low %v6649_v3, %v6659_v29  ;;  %v6666_v39 = vrot.slane %v6664_v13, 5  ;;  %v6672_v62 = vrot.slane %v6670_v43, 5  ;;  %v11463_v26 = vld [vmem:[#allocation2 + $0x28] sm:$0xf]  ;;  %v11404_v13 = vld [vmem:[#allocation8 + $0x220] sm:$0xff]  }
 0x395   : > { %v6676_v38 = vrot.slane %v6674_v27, 4  ;;  %v9873_v30 = vcombine.low %v14881_v6, %v14883_v52  ;;  %v6051_v56 = vsel %vm11878_vm10, %v6046_v50, %v6050_v61  ;;  %v6680_v1 = vshll.u32 %v6598_v44, 16  ;;  %v14944_v44 = vld [vmem:[#allocation2 + $0x40] sm:$0xf] }
 0x396   : > { %8741 = vmatprep.mubr.bf16.mxu1 %v9857_v47  ;;  %v6072_v19 = vshll.u32 %v5990_v33, 16  ;;  %8902 = vmatprep.mubr.bf16.mxu0 %v9889_v58  ;;  %v6041_v10 = vsel %vm11878_vm10, %v14425_v49, %v14372_v25  ;;  %v6667_v3 = vor.u32 %v6666_v39, %v6663_v42  ;;  %v6468_v21 = vrot.slane %v11463_v26, 5  ;;  %v6599_v47 = vld [vmem:[#allocation2 + $0x44] sm:$0x1] }
 0x397   : > { %v6677_v63 = vor.u32 %v6676_v38, %v6672_v62  ;;  %11059 = vmatpush3.bf16.msra.mxu1 %v11398_v18  ;;  %8903 = vmatmul.mubr.bf16.gmra.mxu0 %v9873_v30  ;;  %v9841_v6 = vcombine.low %v6041_v10, %v6051_v56  ;;  %v6682_v34 = vrot.slane %v6680_v1, 5  ;;  %v9746_v61 = vrot.slane %v6390_v16, 9  ;;  %v5991_v16 = vld [vmem:[#allocation2 + $0x38] sm:$0x1]  ;;  %v11407_v10 = vld [vmem:[#allocation8 + $0x218] sm:$0xff]  }
 0x398   : > { %v6074_v8 = vrot.slane %v6072_v19, 5  ;;  %11060 = vmatprep.subr.bf16.mxu1 %v11401_v20  ;;  %v6668_v43 = vrot.slane %v6667_v3, 4  ;;  %v6470_v29 = vrot.slane %v6468_v21, 4  ;;  %v6471_v25 = vrot.slane %v5990_v33, 5  ;;  %v6391_v19 = vld [vmem:[#allocation2 + $0x30] sm:$0xe] }
 0x399   : > { %v6678_v27 = vrot.slane %v6677_v63, 4  ;;  %8742 = vmatmul.mubr.bf16.gmra.mxu1 %v9841_v6  ;;  %v6469_v49 = vsel %vm11898_vm12, %v9746_v61, %v6468_v21  ;;  %v6069_v18 = vor.u32 %v14467_v41, %v14443_v40  ;;  %v6685_v50 = vshrl.u32 %v14942_v9, 16 }
 0x39a   : > { %v6688_v42 = vshll.u32 %v14942_v9, 16  ;;  %v6673_v58 = vsel %vm11878_vm10, %v6668_v43, %v6672_v62  ;;  %v6472_v33 = vsel %vm11898_vm12, %v6470_v29, %v6471_v25  ;;  %v6694_v38 = vshll.u32 %v14944_v44, 16  ;;  %v14970_v25 = vld [vmem:[#allocation2 + $0x48] sm:$0xf] }
 0x39b   : > { %v6683_v39 = vsel %vm11878_vm10, %v6678_v27, %v6682_v34  ;;  %11061 = vmatpush3.bf16.msra.mxu1 %v11401_v20  ;;  %v9858_v41 = vcombine.low %v6469_v49, %v6472_v33  ;;  %v6070_v56 = vrot.slane %v6069_v18, 4  ;;  %v6687_v1 = vrot.slane %v6685_v50, 4  ;;  %v14972_v50 = vld [vmem:[#allocation2 + $0x4c] sm:$0xf] }
 0x39c   : > { %v9890_v30 = vcombine.low %v6673_v58, %v6683_v39  ;;  %11062 = vmatprep.subr.bf16.mxu1 %v11404_v13  ;;  %v6690_v3 = vrot.slane %v6688_v42, 5  ;;  %v6696_v63 = vrot.slane %v6694_v38, 5  ;;  %v6698_v62 = vshrl.u32 %v14944_v44, 16  ;;  %v11410_v42 = vld [vmem:[#allocation8 + $0x210] sm:$0xff]  }
 0x39d   : > { %v6704_v26 = vshll.u32 %v6599_v47, 16  ;;  %8749 = vmatprep.mubr.bf16.mxu1 %v9858_v41  ;;  %v9874_v20 = vcombine.low %v14912_v46, %v14914_v37  ;;  %v6075_v6 = vsel %vm11878_vm10, %v6070_v56, %v6074_v8  ;;  %v6096_v34 = vshll.u32 %v5991_v16, 16  ;;  %v11464_v46 = vld [vmem:[#allocation2 + $0x34] sm:$0xf]  ;;  %v14974_v8 = vpop.f32.mrf.mxu0  ;;  %v14982_v41 = vpop.f32.mrf.mxu1 }
 0x39e   : > { %8910 = vmatprep.mubr.bf16.mxu0 %v9890_v30  ;;  %v6065_v61 = vsel %vm11878_vm10, %v14465_v54, %v14443_v40  ;;  %v6691_v43 = vor.u32 %v6690_v3, %v6687_v1  ;;  %v6700_v27 = vrot.slane %v6698_v62, 4  ;;  %v9747_v29 = vrot.slane %v6391_v19, 9  ;;  %16690 = vst [vmem:[#allocation27_spill] sm:$0xff] %v14982_v41 }
 0x39f   : > { %11063 = vmatpush3.bf16.msra.mxu1 %v11404_v13  ;;  %8911 = vmatmul.mubr.bf16.gmra.mxu0 %v9874_v20  ;;  %v9842_v49 = vcombine.low %v6065_v61, %v6075_v6  ;;  %v6706_v18 = vrot.slane %v6704_v26, 5  ;;  %v6098_v47 = vrot.slane %v6096_v34, 5  ;;  %v6475_v37 = vrot.slane %v11464_v46, 5  ;;  %v5992_v6 = vld [vmem:[#allocation2 + $0x44] sm:$0x1]  ;;  %v14990_v34 = vpop.f32.mrf.mxu0 }
 0x3a0   : > { %11064 = vmatprep.subr.bf16.mxu1 %v11407_v10  ;;  %v6692_v58 = vrot.slane %v6691_v43, 4  ;;  %v6701_v40 = vor.u32 %v6700_v27, %v6696_v63  ;;  %v6478_v54 = vrot.slane %v5991_v16, 5  ;;  %v6093_v39 = vor.u32 %v14534_v14, %v14505_v51  ;;  %v6600_v16 = vld [vmem:[#allocation2 + $0x50] sm:$0x1]  ;;  %v11413_v61 = vld [vmem:[#allocation8 + $0x208] sm:$0xff]  }
 0x3a1   : > { %8750 = vmatmul.mubr.bf16.gmra.mxu1 %v9842_v49  ;;  %v6476_v13 = vsel %vm11898_vm12, %v9747_v29, %v6475_v37  ;;  %v6477_v33 = vrot.slane %v6475_v37, 4  ;;  %v6709_v38 = vshrl.u32 %v14970_v25, 16  ;;  %v6712_v30 = vshll.u32 %v14970_v25, 16  ;;  %v6392_v29 = vld [vmem:[#allocation2 + $0x3c] sm:$0xe] }
 0x3a2   : > { %v6697_v56 = vsel %vm11878_vm10, %v6692_v58, %v6696_v63  ;;  %v6702_v1 = vrot.slane %v6701_v40, 4  ;;  %v6094_v19 = vrot.slane %v6093_v39, 4  ;;  %v6718_v3 = vshll.u32 %v14972_v50, 16  ;;  %v14998_v40 = vpop.f32.mrf.mxu1 }
 0x3a3   : > { %11065 = vmatpush3.bf16.msra.mxu1 %v11407_v10  ;;  %v6479_v14 = vsel %vm11898_vm12, %v6477_v33, %v6478_v54  ;;  %v6711_v62 = vrot.slane %v6709_v38, 4  ;;  %v6714_v26 = vrot.slane %v6712_v30, 5  ;;  %v6722_v20 = vshrl.u32 %v14972_v50, 16  ;;  %16691 = vst [vmem:[#allocation42_spill] sm:$0xff] %v14998_v40  ;;  %v15004_v33 = vld [vmem:[#allocation2 + $0x54] sm:$0xf] }
 0x3a4   : > { %11066 = vmatprep.subr.bf16.mxu1 %v11410_v42  ;;  %v6707_v63 = vsel %vm11878_vm10, %v6702_v1, %v6706_v18  ;;  %v9859_v43 = vcombine.low %v6476_v13, %v6479_v14  ;;  %v6099_v27 = vsel %vm11878_vm10, %v6094_v19, %v6098_v47  ;;  %v6720_v10 = vrot.slane %v6718_v3, 5  ;;  %v11465_v13 = vld [vmem:[#allocation2 + $0x40] sm:$0xf]  ;;  %v15008_v1 = vpop.f32.mrf.mxu0  ;;  %v11416_v19 = vld [vmem:[#allocation8 + $0x200] sm:$0xff]  }
 0x3a5   : > { %v9891_v49 = vcombine.low %v6697_v56, %v6707_v63  ;;  %v9875_v46 = vcombine.low %v14942_v9, %v14944_v44  ;;  %v6715_v37 = vor.u32 %v6714_v26, %v6711_v62  ;;  %v6724_v58 = vrot.slane %v6722_v20, 4  ;;  %v15006_v56 = vld [vmem:[#allocation2 + $0x58] sm:$0xf]  ;;  %16692 = vst [vmem:[#allocation37_spill] sm:$0xff] %v15008_v1  ;;  %v15016_v20 = vpop.f32.mrf.mxu1 }
 0x3a6   : > { %8757 = vmatprep.mubr.bf16.mxu1 %v9859_v43  ;;  %v6089_v18 = vsel %vm11878_vm10, %v14537_v36, %v14505_v51  ;;  %v6728_v54 = vshll.u32 %v6600_v16, 16  ;;  %v6120_v39 = vshll.u32 %v5992_v6, 16  ;;  %v6482_v47 = vrot.slane %v11465_v13, 5  ;;  %16693 = vst [vmem:[#allocation46_spill] sm:$0xff] %v15016_v20  ;;  %v15020_v43 = vld [vmem:[#allocation2 + $0x5c] sm:$0x1] }
 0x3a7   : > { %11067 = vmatpush3.bf16.msra.mxu1 %v11410_v42  ;;  %8918 = vmatprep.mubr.bf16.mxu0 %v9891_v49  ;;  %v9843_v38 = vcombine.low %v6089_v18, %v6099_v27  ;;  %v6716_v9 = vrot.slane %v6715_v37, 4  ;;  %v6725_v44 = vor.u32 %v6724_v58, %v6720_v10  ;;  %v9748_v30 = vrot.slane %v6392_v29, 9  ;;  %v5993_v37 = vld [vmem:[#allocation2 + $0x50] sm:$0x1]  ;;  %v15028_v58 = vpop.f32.mrf.mxu0  ;;  %v6607_v20 = vld [vmem:[#allocation2 + $0xa4] sm:$0x1] }
 0x3a8   : > { %11068 = vmatprep.subr.bf16.mxu1 %v11413_v61  ;;  %8919 = vmatmul.mubr.bf16.gmra.mxu0 %v9875_v46  ;;  %v6730_v51 = vrot.slane %v6728_v54, 5  ;;  %v6122_v36 = vrot.slane %v6120_v39, 5  ;;  %v6484_v16 = vrot.slane %v6482_v47, 4  ;;  %v6485_v3 = vrot.slane %v5992_v6, 5  ;;  %16694 = vst [vmem:[#allocation44_spill] sm:$0xff] %v15028_v58 }
 0x3a9   : > { %8758 = vmatmul.mubr.bf16.gmra.mxu1 %v9843_v38  ;;  %v6721_v42 = vsel %vm11878_vm10, %v6716_v9, %v6720_v10  ;;  %v6726_v14 = vrot.slane %v6725_v44, 4  ;;  %v6483_v62 = vsel %vm11898_vm12, %v9748_v30, %v6482_v47  ;;  %v6117_v26 = vor.u32 %v14546_v5, %v14539_v45  ;;  %v6393_v47 = vld [vmem:[#allocation2 + $0x48] sm:$0xe]  ;;  %v15034_v30 = vpop.f32.mrf.mxu1 }
 0x3aa   : > { %v6486_v63 = vsel %vm11898_vm12, %v6484_v16, %v6485_v3  ;;  %v6733_v6 = vshrl.u32 %v15004_v33, 16  ;;  %v6736_v27 = vshll.u32 %v15004_v33, 16  ;;  %v6742_v10 = vshll.u32 %v15006_v56, 16  ;;  %16695 = vst [vmem:[#allocation48_spill] sm:$0xff] %v15034_v30 }
 0x3ab   : > { %11069 = vmatpush3.bf16.msra.mxu1 %v11413_v61  ;;  %v6731_v29 = vsel %vm11878_vm10, %v6726_v14, %v6730_v51  ;;  %v9860_v49 = vcombine.low %v6483_v62, %v6486_v63  ;;  %v6118_v46 = vrot.slane %v6117_v26, 4  ;;  %v6746_v5 = vshrl.u32 %v15006_v56, 16  ;;  %v11466_v26 = vld [vmem:[#allocation2 + $0x4c] sm:$0xf] }
 0x3ac   : > { %11070 = vmatprep.subr.bf16.mxu1 %v11416_v19  ;;  %v9892_v18 = vcombine.low %v6721_v42, %v6731_v29  ;;  %v6735_v54 = vrot.slane %v6733_v6, 4  ;;  %v6738_v39 = vrot.slane %v6736_v27, 5  ;;  %v6744_v13 = vrot.slane %v6742_v10, 5  ;;  %v15042_v6 = vld [vmem:[#allocation2 + $0x60] sm:$0xf] }
 0x3ad   : > { %v6341_v38 = vshrl.u32 %v14816_v11, 16  ;;  %8765 = vmatprep.mubr.bf16.mxu1 %v9860_v49  ;;  %v6123_v61 = vsel %vm11878_vm10, %v6118_v46, %v6122_v36  ;;  %v6748_v9 = vrot.slane %v6746_v5, 4  ;;  %v6752_v44 = vshll.u32 %v15020_v43, 16  ;;  %v15044_v27 = vld [vmem:[#allocation2 + $0x64] sm:$0xf] }
 0x3ae   : > { %8926 = vmatprep.mubr.bf16.mxu0 %v9892_v18  ;;  %v9876_v51 = vcombine.low %v14970_v25, %v14972_v50  ;;  %v6113_v16 = vsel %vm11878_vm10, %v14544_v23, %v14539_v45  ;;  %v6739_v3 = vor.u32 %v6738_v39, %v6735_v54  ;;  %v6144_v42 = vshll.u32 %v5993_v37, 16  ;;  %v15046_v10 = vpop.f32.mrf.mxu0  ;;  %v15048_v25 = vpop.f32.mrf.mxu1  ;;  %v6602_v54 = vld [vmem:[#allocation2 + $0x68] sm:$0x1]  ;;  %v16784_v55 = vld [vmem:[#allocation46_spill] sm:$0xff] }
 0x3af   : > { %11071 = vmatpush3.bf16.msra.mxu1 %v11416_v19  ;;  %v9844_v14 = vcombine.low %v6113_v16, %v6123_v61  ;;  %v6749_v62 = vor.u32 %v6748_v9, %v6744_v13  ;;  %v9749_v36 = vrot.slane %v6393_v47, 9  ;;  %v6489_v63 = vrot.slane %v11466_v26, 5 }
 0x3b0   : > { %8927 = vmatmul.mubr.bf16.gmra.mxu0 %v9876_v51  ;;  %v6740_v50 = vrot.slane %v6739_v3, 4  ;;  %v6754_v29 = vrot.slane %v6752_v44, 5  ;;  %v6146_v45 = vrot.slane %v6144_v42, 5  ;;  %v6492_v23 = vrot.slane %v5993_v37, 5  ;;  %v15064_v16 = vpop.f32.mrf.mxu0 }
 0x3b1   : > { %8766 = vmatmul.mubr.bf16.gmra.mxu1 %v9844_v14  ;;  %v6750_v19 = vrot.slane %v6749_v62, 4  ;;  %v6490_v49 = vsel %vm11898_vm12, %v9749_v36, %v6489_v63  ;;  %v6491_v46 = vrot.slane %v6489_v63, 4  ;;  %v6141_v5 = vor.u32 %v14583_v24, %v14580_v22  ;;  %v5994_v24 = vld [vmem:[#allocation2 + $0x5c] sm:$0x1]  ;;  %v6394_v36 = vld [vmem:[#allocation2 + $0x54] sm:$0xe] }
 0x3b2   : > { %v6745_v18 = vsel %vm11878_vm10, %v6740_v50, %v6744_v13  ;;  %v6757_v39 = vshrl.u32 %v15042_v6, 16  ;;  %v6760_v47 = vshll.u32 %v15042_v6, 16  ;;  %v6766_v61 = vshll.u32 %v15044_v27, 16  ;;  %v15066_v13 = vpop.f32.mrf.mxu1 }
 0x3b3   : > { %v6755_v37 = vsel %vm11878_vm10, %v6750_v19, %v6754_v29  ;;  %v6493_v9 = vsel %vm11898_vm12, %v6491_v46, %v6492_v23  ;;  %v6142_v44 = vrot.slane %v6141_v5, 4  ;;  %v6770_v51 = vshrl.u32 %v15044_v27, 16 }
 0x3b4   : > { %v9893_v3 = vcombine.low %v6745_v18, %v6755_v37  ;;  %v9861_v42 = vcombine.low %v6490_v49, %v6493_v9  ;;  %v6759_v14 = vrot.slane %v6757_v39, 4  ;;  %v6762_v62 = vrot.slane %v6760_v47, 5  ;;  %v11467_v47 = vld [vmem:[#allocation2 + $0x58] sm:$0xf]  ;;  %v15080_v37 = vpop.f32.mrf.mxu0  ;;  %v15082_v9 = vpop.f32.mrf.mxu1 }
 0x3b5   : > { %v6147_v26 = vsel %vm11878_vm10, %v6142_v44, %v6146_v45  ;;  %v6768_v63 = vrot.slane %v6766_v61, 5  ;;  %v6772_v50 = vrot.slane %v6770_v51, 4  ;;  %v6776_v29 = vshll.u32 %v6602_v54, 16  ;;  %v15076_v61 = vld [vmem:[#allocation2 + $0x6c] sm:$0xf] }
 0x3b6   : > { %8934 = vmatprep.mubr.bf16.mxu0 %v9893_v3  ;;  %8773 = vmatprep.mubr.bf16.mxu1 %v9861_v42  ;;  %v9877_v23 = vcombine.low %v15004_v33, %v15006_v56  ;;  %v6137_v19 = vsel %vm11878_vm10, %v14613_v59, %v14580_v22  ;;  %v6763_v49 = vor.u32 %v6762_v62, %v6759_v14  ;;  %v6168_v46 = vshll.u32 %v5994_v24, 16  ;;  %v15078_v54 = vld [vmem:[#allocation2 + $0x70] sm:$0xf]  ;;  %v15090_v62 = vld [vmem:[#allocation2 + $0x74] sm:$0x1] }
 0x3b7   : > { %v9845_v5 = vcombine.low %v6137_v19, %v6147_v26  ;;  %v6773_v18 = vor.u32 %v6772_v50, %v6768_v63  ;;  %v9750_v39 = vrot.slane %v6394_v36, 9  ;;  %v6496_v45 = vrot.slane %v11467_v47, 5  ;;  %v5995_v19 = vld [vmem:[#allocation2 + $0x68] sm:$0x1]  ;;  %v6395_v47 = vld [vmem:[#allocation2 + $0x60] sm:$0xe] }
 0x3b8   : > { %8935 = vmatmul.mubr.bf16.gmra.mxu0 %v9877_v23  ;;  %v6764_v33 = vrot.slane %v6763_v49, 4  ;;  %v6778_v56 = vrot.slane %v6776_v29, 5  ;;  %v6170_v44 = vrot.slane %v6168_v46, 5  ;;  %v6499_v22 = vrot.slane %v5994_v24, 5  ;;  %v15100_v49 = vpop.f32.mrf.mxu0 }
 0x3b9   : > { %8774 = vmatmul.mubr.bf16.gmra.mxu1 %v9845_v5  ;;  %v6774_v59 = vrot.slane %v6773_v18, 4  ;;  %v6497_v51 = vsel %vm11898_vm12, %v9750_v39, %v6496_v45  ;;  %v6498_v3 = vrot.slane %v6496_v45, 4  ;;  %v6165_v42 = vor.u32 %v14617_v60, %v14615_v0 }
 0x3ba   : > { %v6769_v14 = vsel %vm11878_vm10, %v6764_v33, %v6768_v63  ;;  %v6781_v36 = vshrl.u32 %v15076_v61, 16  ;;  %v6784_v26 = vshll.u32 %v15076_v61, 16  ;;  %v6790_v24 = vshll.u32 %v15078_v54, 16  ;;  %v15102_v63 = vpop.f32.mrf.mxu1 }
 0x3bb   : > { %v6779_v50 = vsel %vm11878_vm10, %v6774_v59, %v6778_v56  ;;  %v6500_v29 = vsel %vm11898_vm12, %v6498_v3, %v6499_v22  ;;  %v6166_v23 = vrot.slane %v6165_v42, 4  ;;  %v6794_v60 = vshrl.u32 %v15078_v54, 16 }
 0x3bc   : > { %v9894_v46 = vcombine.low %v6769_v14, %v6779_v50  ;;  %v9862_v5 = vcombine.low %v6497_v51, %v6500_v29  ;;  %v6783_v18 = vrot.slane %v6781_v36, 4  ;;  %v6786_v39 = vrot.slane %v6784_v26, 5  ;;  %v15113_v50 = vld [vmem:[#allocation2 + $0x78] sm:$0xf] }
 0x3bd   : > { %v6171_v45 = vsel %vm11878_vm10, %v6166_v23, %v6170_v44  ;;  %v6792_v33 = vrot.slane %v6790_v24, 5  ;;  %v6796_v56 = vrot.slane %v6794_v60, 4  ;;  %v6800_v22 = vshll.u32 %v15090_v62, 16  ;;  %v11468_v44 = vld [vmem:[#allocation2 + $0x64] sm:$0xf]  ;;  %v15115_v29 = vpop.f32.mrf.mxu0  ;;  %v15117_v23 = vpop.f32.mrf.mxu1 }
 0x3be   : > { %8942 = vmatprep.mubr.bf16.mxu0 %v9894_v46  ;;  %8781 = vmatprep.mubr.bf16.mxu1 %v9862_v5  ;;  %v9878_v59 = vcombine.low %v15042_v6, %v15044_v27  ;;  %v6161_v51 = vsel %vm11878_vm10, %v14621_v7, %v14615_v0  ;;  %v6787_v3 = vor.u32 %v6786_v39, %v6783_v18  ;;  %v6192_v42 = vshll.u32 %v5995_v19, 16  ;;  %v15120_v0 = vld [vmem:[#allocation2 + $0x7c] sm:$0xf] }
 0x3bf   : > { %v9846_v14 = vcombine.low %v6161_v51, %v6171_v45  ;;  %v6797_v36 = vor.u32 %v6796_v56, %v6792_v33  ;;  %v9751_v26 = vrot.slane %v6395_v47, 9  ;;  %v6503_v24 = vrot.slane %v11468_v44, 5  ;;  %v6604_v56 = vld [vmem:[#allocation2 + $0x80] sm:$0x1] }
 0x3c0   : > { %v6344_v6 = vshll.u32 %v14816_v11, 16  ;;  %8943 = vmatmul.mubr.bf16.gmra.mxu0 %v9878_v59  ;;  %v6788_v27 = vrot.slane %v6787_v3, 4  ;;  %v6802_v60 = vrot.slane %v6800_v22, 5  ;;  %v6194_v46 = vrot.slane %v6192_v42, 5 }
 0x3c1   : > { %8782 = vmatmul.mubr.bf16.gmra.mxu1 %v9846_v14  ;;  %v6798_v7 = vrot.slane %v6797_v36, 4  ;;  %v6504_v5 = vsel %vm11898_vm12, %v9751_v26, %v6503_v24  ;;  %v6505_v18 = vrot.slane %v6503_v24, 4  ;;  %v6506_v39 = vrot.slane %v5995_v19, 5  ;;  %v15136_v14 = vpop.f32.mrf.mxu0  ;;  %v5996_v24 = vld [vmem:[#allocation2 + $0x74] sm:$0x1] }
 0x3c2   : > { %v6793_v47 = vsel %vm11878_vm10, %v6788_v27, %v6792_v33  ;;  %v6189_v45 = vor.u32 %v14654_v48, %v14652_v35  ;;  %v6805_v59 = vshrl.u32 %v15113_v50, 16  ;;  %v6808_v22 = vshll.u32 %v15113_v50, 16  ;;  %v15138_v33 = vpop.f32.mrf.mxu1 }
 0x3c3   : > { %v6803_v51 = vsel %vm11878_vm10, %v6798_v7, %v6802_v60  ;;  %v6507_v3 = vsel %vm11898_vm12, %v6505_v18, %v6506_v39  ;;  %v6814_v42 = vshll.u32 %v15120_v0, 16  ;;  %v6818_v19 = vshrl.u32 %v15120_v0, 16  ;;  %v6396_v7 = vld [vmem:[#allocation2 + $0x6c] sm:$0xe] }
 0x3c4   : > { %v9895_v48 = vcombine.low %v6793_v47, %v6803_v51  ;;  %v9863_v36 = vcombine.low %v6504_v5, %v6507_v3  ;;  %v6190_v26 = vrot.slane %v6189_v45, 4  ;;  %v6807_v44 = vrot.slane %v6805_v59, 4  ;;  %v11469_v47 = vld [vmem:[#allocation2 + $0x70] sm:$0xf]  ;;  %v15148_v3 = vld [vmem:[#allocation2 + $0x84] sm:$0xf] }
 0x3c5   : > { %v6810_v27 = vrot.slane %v6808_v22, 5  ;;  %v6816_v12 = vrot.slane %v6814_v42, 5  ;;  %v6820_v21 = vrot.slane %v6818_v19, 4  ;;  %v6824_v60 = vshll.u32 %v6604_v56, 16  ;;  %v15150_v42 = vpop.f32.mrf.mxu0  ;;  %v15152_v19 = vpop.f32.mrf.mxu1 }
 0x3c6   : > { %8950 = vmatprep.mubr.bf16.mxu0 %v9895_v48  ;;  %8789 = vmatprep.mubr.bf16.mxu1 %v9863_v36  ;;  %v9879_v18 = vcombine.low %v15076_v61, %v15078_v54  ;;  %v6185_v39 = vsel %vm11878_vm10, %v14686_v2, %v14652_v35  ;;  %v6195_v5 = vsel %vm11878_vm10, %v6190_v26, %v6194_v46  ;;  %v6510_v45 = vrot.slane %v11469_v47, 5 }
 0x3c7   : > { %v9847_v59 = vcombine.low %v6185_v39, %v6195_v5  ;;  %v6811_v22 = vor.u32 %v6810_v27, %v6807_v44  ;;  %v6821_v51 = vor.u32 %v6820_v21, %v6816_v12  ;;  %v6216_v56 = vshll.u32 %v5996_v24, 16  ;;  %v15175_v39 = vpop.f32.mrf.mxu0  ;;  %v15177_v5 = vpop.f32.mrf.mxu1 }
 0x3c8   : > { %v15156_v61 = vrot.slane %v6341_v38, 4  ;;  %8951 = vmatmul.mubr.bf16.gmra.mxu0 %v9879_v18  ;;  %v9752_v35 = vrot.slane %v6396_v7, 9  ;;  %v6512_v2 = vrot.slane %v6510_v45, 4  ;;  %v6513_v54 = vrot.slane %v5996_v24, 5  ;;  %v15166_v38 = vld [vmem:[#allocation2 + $0x88] sm:$0xf] }
 0x3c9   : > { %v15158_v46 = vrot.slane %v6344_v6, 5  ;;  %8790 = vmatmul.mubr.bf16.gmra.mxu1 %v9847_v59  ;;  %v6812_v48 = vrot.slane %v6811_v22, 4  ;;  %v6822_v21 = vrot.slane %v6821_v51, 4  ;;  %v6826_v36 = vrot.slane %v6824_v60, 5  ;;  %16696 = vst [vmem:[#allocation41_spill] sm:$0xff] %v15166_v38 }
 0x3ca   : > { %v6511_v26 = vsel %vm11898_vm12, %v9752_v35, %v6510_v45  ;;  %v6514_v44 = vsel %vm11898_vm12, %v6512_v2, %v6513_v54  ;;  %v6213_v11 = vor.u32 %v14690_v15, %v14688_v31  ;;  %v6829_v27 = vshrl.u32 %v15148_v3, 16  ;;  %v15173_v18 = vld [vmem:[#allocation2 + $0x8c] sm:$0x1]  ;;  %v5997_v35 = vld [vmem:[#allocation2 + $0x80] sm:$0x1] }
 0x3cb   : > { %v6817_v6 = vsel %vm11878_vm10, %v6812_v48, %v6816_v12  ;;  %v6827_v24 = vsel %vm11878_vm10, %v6822_v21, %v6826_v36  ;;  %v6218_v60 = vrot.slane %v6216_v56, 5  ;;  %v9864_v7 = vcombine.low %v6511_v26, %v6514_v44  ;;  %v6397_v26 = vld [vmem:[#allocation2 + $0x78] sm:$0xe] }
 0x3cc   : > { %v9896_v47 = vcombine.low %v6817_v6, %v6827_v24  ;;  %v6214_v15 = vrot.slane %v6213_v11, 4  ;;  %v6831_v45 = vrot.slane %v6829_v27, 4  ;;  %v6832_v59 = vshll.u32 %v15148_v3, 16  ;;  %v15208_v24 = vld [vmem:[#allocation2 + $0xb8] sm:$0xf] }
 0x3cd   : > { %8797 = vmatprep.mubr.bf16.mxu1 %v9864_v7  ;;  %v9880_v12 = vcombine.low %v15113_v50, %v15120_v0  ;;  %v6209_v22 = vsel %vm11878_vm10, %v14694_v32, %v14688_v31  ;;  %v6838_v51 = vshll.u32 %v15166_v38, 16  ;;  %v6842_v56 = vshrl.u32 %v15166_v38, 16  ;;  %v15199_v44 = vpop.f32.mrf.mxu0  ;;  %v15201_v11 = vpop.f32.mrf.mxu1 }
 0x3ce   : > { %8958 = vmatprep.mubr.bf16.mxu0 %v9896_v47  ;;  %v6219_v2 = vsel %vm11878_vm10, %v6214_v15, %v6218_v60  ;;  %v6834_v54 = vrot.slane %v6832_v59, 5  ;;  %v6848_v48 = vshll.u32 %v15173_v18, 16  ;;  %v15193_v50 = vadd.f32 %v14990_v34, %v14974_v8  ;;  %v11471_v15 = vld [vmem:[#allocation2 + $0x7c] sm:$0xf] }
 0x3cf   : > { %v16698_v0 = vshrl.u32 %v14765_v4, 16  ;;  %v9848_v31 = vcombine.low %v6209_v22, %v6219_v2  ;;  %v6840_v32 = vrot.slane %v6838_v51, 5  ;;  %v6844_v36 = vrot.slane %v6842_v56, 4  ;;  %v15214_v22 = vld [vmem:[#allocation2 + $0x90] sm:$0xf] }
 0x3d0   : > { %16697 = vst [vmem:[#allocation35_spill] sm:$0xff] %v15193_v50  ;;  %v16699_v27 = vor.u32 %v14860_v57, %v14837_v28  ;;  %v6350_v8 = vshll.u32 %v15208_v24, 16  ;;  %8959 = vmatmul.mubr.bf16.gmra.mxu0 %v9880_v12  ;;  %v6835_v4 = vor.u32 %v6834_v54, %v6831_v45  ;;  %v6240_v34 = vshll.u32 %v5997_v35, 16  ;;  %v15216_v2 = vld [vmem:[#allocation2 + $0x94] sm:$0xf] }
 0x3d1   : > { %v15197_v21 = vrot.slane %v16698_v0, 4  ;;  %v6347_v60 = vor.u32 %v15158_v46, %v15156_v61  ;;  %v6354_v7 = vshrl.u32 %v15208_v24, 16  ;;  %8798 = vmatmul.mubr.bf16.gmra.mxu1 %v9848_v31  ;;  %v6845_v47 = vor.u32 %v6844_v36, %v6840_v32  ;;  %16700 = vst [vmem:[#allocation32_spill] sm:$0xff] %v15216_v2  ;;  %v15220_v46 = vpop.f32.mrf.mxu0  ;;  %v15222_v0 = vpop.f32.mrf.mxu1  ;;  %v16701_v36 = vld [vmem:[#allocation22_spill] sm:$0xff] }
 0x3d2   : > { %v15206_v6 = vrot.slane %v16699_v27, 4  ;;  %v6517_v59 = vrot.slane %v11471_v15, 5  ;;  %v6836_v28 = vrot.slane %v6835_v4, 4  ;;  %v6850_v57 = vrot.slane %v6848_v48, 5  ;;  %v5998_v15 = vld [vmem:[#allocation2 + $0x8c] sm:$0x1] }
 0x3d3   : > { %v9753_v51 = vrot.slane %v6397_v26, 9  ;;  %v6520_v56 = vrot.slane %v5997_v35, 5  ;;  %v6846_v12 = vrot.slane %v6845_v47, 4  ;;  %v6242_v45 = vrot.slane %v6240_v34, 5  ;;  %v16702_v35 = vld [vmem:[#allocation26_spill] sm:$0xff]  ;;  %v15246_v50 = vpop.f32.mrf.mxu1 }
 0x3d4   : > { %v6519_v54 = vrot.slane %v6517_v59, 4  ;;  %v9881_v61 = vcombine.low %v15148_v3, %v15166_v38  ;;  %v6841_v31 = vsel %vm11878_vm10, %v6836_v28, %v6840_v32  ;;  %v6237_v26 = vor.u32 %v16702_v35, %v16701_v36  ;;  %v15235_v34 = vld [vmem:[#allocation2 + $0x98] sm:$0x1] }
 0x3d5   : > { %v6518_v48 = vsel %vm11898_vm12, %v9753_v51, %v6517_v59  ;;  %v6853_v27 = vshrl.u32 %v15214_v22, 16  ;;  %v6851_v4 = vsel %vm11878_vm10, %v6846_v12, %v6850_v57  ;;  %16703 = vst [vmem:[#allocation18_spill] sm:$0xff] %v15235_v34  ;;  %v6856_v47 = vshll.u32 %v15214_v22, 16  ;;  %v16704_v35 = vld [vmem:[#allocation45_spill] sm:$0xff] }
 0x3d6   : > { %v6521_v3 = vsel %vm11898_vm12, %v6519_v54, %v6520_v56  ;;  %v6862_v32 = vshll.u32 %v15216_v2, 16  ;;  %v9897_v28 = vcombine.low %v6841_v31, %v6851_v4  ;;  %v6238_v51 = vrot.slane %v6237_v26, 4  ;;  %v15244_v54 = vpop.f32.mrf.mxu0 }
 0x3d7   : > { %v9865_v59 = vcombine.low %v6518_v48, %v6521_v3  ;;  %v6855_v58 = vrot.slane %v6853_v27, 4  ;;  %v6233_v1 = vsel %vm11878_vm10, %v16704_v35, %v16701_v36  ;;  %v6858_v57 = vrot.slane %v6856_v47, 5  ;;  %v6398_v27 = vld [vmem:[#allocation2 + $0x84] sm:$0xe] }
 0x3d8   : > { %v6864_v12 = vrot.slane %v6862_v32, 5  ;;  %v6866_v56 = vshrl.u32 %v15216_v2, 16  ;;  %8966 = vmatprep.mubr.bf16.mxu0 %v9897_v28  ;;  %v6243_v31 = vsel %vm11878_vm10, %v6238_v51, %v6242_v45  ;;  %v6872_v48 = vshll.u32 %v15235_v34, 16  ;;  %v16709_v34 = vld [vmem:[#allocation20_spill] sm:$0xff] }
 0x3d9   : > { %8805 = vmatprep.mubr.bf16.mxu1 %v9865_v59  ;;  %v15253_v26 = vadd.f32 %v15064_v16, %v15046_v10  ;;  %v6264_v36 = vshll.u32 %v5998_v15, 16  ;;  %v15255_v4 = vrot.slane %v6350_v8, 5  ;;  %8967 = vmatmul.mubr.bf16.gmra.mxu0 %v9881_v61  ;;  %v9849_v3 = vcombine.low %v6233_v1, %v6243_v31  ;;  %v11472_v59 = vld [vmem:[#allocation2 + $0x88] sm:$0xf]  ;;  %v15265_v10 = vld [vmem:[#allocation2 + $0xc0] sm:$0xf] }
 0x3da   : > { %v6859_v47 = vor.u32 %v6858_v57, %v6855_v58  ;;  %v6868_v32 = vrot.slane %v6866_v56, 4  ;;  %v15257_v35 = vrot.slane %v6347_v60, 4  ;;  %v15259_v28 = vrot.slane %v6354_v7, 4  ;;  %v15268_v58 = vld [vmem:[#allocation2 + $0x9c] sm:$0xf]  ;;  %v15270_v60 = vpop.f32.mrf.mxu0  ;;  %v15272_v7 = vpop.f32.mrf.mxu1 }
 0x3db   : > { %16705 = vst [vmem:[#allocation17_spill] sm:$0xff] %v15253_v26  ;;  %v6524_v45 = vrot.slane %v11472_v59, 5  ;;  %v15263_v51 = vadd.f32 %v15066_v13, %v15048_v25  ;;  %v6365_v16 = vshrl.u32 %v15265_v10, 16  ;;  %8806 = vmatmul.mubr.bf16.gmra.mxu1 %v9849_v3  ;;  %v9754_v1 = vrot.slane %v6398_v27, 9  ;;  %v15274_v25 = vld [vmem:[#allocation2 + $0xa0] sm:$0xf] }
 0x3dc   : > { %v6860_v8 = vrot.slane %v6859_v47, 4  ;;  %v6869_v61 = vor.u32 %v6868_v32, %v6864_v12  ;;  %v6874_v57 = vrot.slane %v6872_v48, 5  ;;  %v6266_v56 = vrot.slane %v6264_v36, 5  ;;  %16706 = vst [vmem:[#allocation13_spill] sm:$0xff] %v15274_v25  ;;  %v16707_v32 = vld [vmem:[#allocation50_spill] sm:$0xff]  ;;  %v16708_v48 = vld [vmem:[#allocation47_spill] sm:$0xff] }
 0x3dd   : > { %v6526_v31 = vrot.slane %v6524_v45, 4  ;;  %v6527_v59 = vrot.slane %v5998_v15, 5  ;;  %v6525_v3 = vsel %vm11898_vm12, %v9754_v1, %v6524_v45  ;;  %v9882_v27 = vcombine.low %v15214_v22, %v15216_v2  ;;  %v5999_v22 = vld [vmem:[#allocation2 + $0x98] sm:$0x1]  ;;  %v6399_v2 = vld [vmem:[#allocation2 + $0x90] sm:$0xe] }
 0x3de   : > { %v6865_v13 = vsel %vm11878_vm10, %v6860_v8, %v6864_v12  ;;  %v6870_v30 = vrot.slane %v6869_v61, 4  ;;  %v6261_v36 = vor.u32 %v16708_v48, %v16707_v32  ;;  %v6877_v15 = vshrl.u32 %v15268_v58, 16 }
 0x3df   : > { %v6528_v47 = vsel %vm11898_vm12, %v6526_v31, %v6527_v59  ;;  %v6880_v40 = vshll.u32 %v15268_v58, 16  ;;  %v6886_v45 = vshll.u32 %v15274_v25, 16  ;;  %v6890_v61 = vshrl.u32 %v15274_v25, 16  ;;  %v15292_v1 = vpop.f32.mrf.mxu0  ;;  %v15294_v31 = vpop.f32.mrf.mxu1 }
 0x3e0   : > { %v6875_v12 = vsel %vm11878_vm10, %v6870_v30, %v6874_v57  ;;  %v9866_v8 = vcombine.low %v6525_v3, %v6528_v47  ;;  %v6262_v48 = vrot.slane %v6261_v36, 4  ;;  %v6879_v41 = vrot.slane %v6877_v15, 4 }
 0x3e1   : > { %v9898_v59 = vcombine.low %v6865_v13, %v6875_v12  ;;  %v6882_v26 = vrot.slane %v6880_v40, 5  ;;  %v6257_v30 = vsel %vm11878_vm10, %v16709_v34, %v16707_v32  ;;  %v6888_v57 = vrot.slane %v6886_v45, 5  ;;  %v15300_v38 = vpop.f32.mrf.mxu0  ;;  %v15311_v12 = vpop.f32.mrf.mxu1 }
 0x3e2   : > { %8813 = vmatprep.mubr.bf16.mxu1 %v9866_v8  ;;  %v6892_v3 = vrot.slane %v6890_v61, 4  ;;  %v6896_v47 = vshll.u32 %v6607_v20, 16  ;;  %v6267_v53 = vsel %vm11878_vm10, %v6262_v48, %v6266_v56  ;;  %v15306_v40 = vadd.f32 %v15136_v14, %v15115_v29 }
 0x3e3   : > { %8974 = vmatprep.mubr.bf16.mxu0 %v9898_v59  ;;  %v6883_v13 = vor.u32 %v6882_v26, %v6879_v41  ;;  %v6288_v36 = vshll.u32 %v5999_v22, 16  ;;  %v15308_v15 = vrot.slane %v6365_v16, 4  ;;  %v6368_v34 = vshll.u32 %v15265_v10, 16  ;;  %v15313_v8 = vpop.f32.mrf.mxu0  ;;  %v11474_v41 = vld [vmem:[#allocation2 + $0x94] sm:$0xf] }
 0x3e4   : > { %16710 = vst [vmem:[#allocation33_spill] sm:$0xff] %v15306_v40  ;;  %8975 = vmatmul.mubr.bf16.gmra.mxu0 %v9882_v27  ;;  %v9850_v32 = vcombine.low %v6257_v30, %v6267_v53  ;;  %v6893_v20 = vor.u32 %v6892_v3, %v6888_v57  ;;  %v6898_v61 = vrot.slane %v6896_v47, 5  ;;  %v9755_v56 = vrot.slane %v6399_v2, 9  ;;  %v15327_v16 = vld [vmem:[#allocation2 + $0xa8] sm:$0xf] }
 0x3e5   : > { %v6884_v45 = vrot.slane %v6883_v13, 4  ;;  %v6531_v26 = vrot.slane %v11474_v41, 5  ;;  %v15317_v14 = vadd.f32 %v15138_v33, %v15117_v23  ;;  %v15321_v10 = vadd.f32 %v15175_v39, %v15150_v42  ;;  %v15329_v27 = vld [vmem:[#allocation2 + $0xc4] sm:$0xf]  ;;  %v15332_v3 = vld [vmem:[#allocation2 + $0xac] sm:$0xf]  ;;  %v15346_v47 = vpop.f32.mrf.mxu0 }
 0x3e6   : > { %8814 = vmatmul.mubr.bf16.gmra.mxu1 %v9850_v32  ;;  %v6894_v29 = vrot.slane %v6893_v20, 4  ;;  %v15325_v53 = vadd.f32 %v15177_v5, %v15152_v19  ;;  %v6374_v2 = vshll.u32 %v15329_v27, 16  ;;  %v6290_v59 = vrot.slane %v6288_v36, 5  ;;  %16713 = vst [vmem:[#allocation39_spill] sm:$0xff] %v15332_v3  ;;  %v15342_v39 = vld [vmem:[#allocation2 + $0xb0] sm:$0x1]  ;;  %v15344_v5 = vpop.f32.mrf.mxu1 }
 0x3e7   : > { %16711 = vst [vmem:[#allocation38_spill] sm:$0xff] %v15321_v10  ;;  %v6533_v48 = vrot.slane %v6531_v26, 4  ;;  %v6534_v30 = vrot.slane %v5999_v22, 5  ;;  %v6889_v23 = vsel %vm11878_vm10, %v6884_v45, %v6888_v57  ;;  %v6532_v42 = vsel %vm11898_vm12, %v9755_v56, %v6531_v26  ;;  %16714 = vst [vmem:[#allocation40_spill] sm:$0xff] %v15342_v39  ;;  %v16715_v57 = vld [vmem:[#allocation31_spill] sm:$0xff] }
 0x3e8   : > { %16712 = vst [vmem:[#allocation49_spill] sm:$0xff] %v15325_v53  ;;  %v6899_v33 = vsel %vm11878_vm10, %v6894_v29, %v6898_v61  ;;  %v9883_v19 = vcombine.low %v15268_v58, %v15274_v25  ;;  %v16716_v36 = vld [vmem:[#allocation23_spill] sm:$0xff]  ;;  %v6901_v20 = vshrl.u32 %v15327_v16, 16  ;;  %v6904_v61 = vshll.u32 %v15327_v16, 16  ;;  %v6000_v41 = vld [vmem:[#allocation2 + $0xa4] sm:$0x1]  ;;  %v15363_v25 = vpop.f32.mrf.mxu1 }
 0x3e9   : > { %v9899_v22 = vcombine.low %v6889_v23, %v6899_v33  ;;  %v6535_v13 = vsel %vm11898_vm12, %v6533_v48, %v6534_v30  ;;  %v6285_v32 = vor.u32 %v16716_v36, %v16715_v57  ;;  %v6910_v58 = vshll.u32 %v15332_v3, 16  ;;  %v6400_v36 = vld [vmem:[#allocation2 + $0x9c] sm:$0xe] }
 0x3ea   : > { %v9867_v45 = vcombine.low %v6532_v42, %v6535_v13  ;;  %v6914_v56 = vshrl.u32 %v15332_v3, 16  ;;  %v6903_v29 = vrot.slane %v6901_v20, 4  ;;  %v6920_v23 = vshll.u32 %v15342_v39, 16 }
 0x3eb   : > { %8982 = vmatprep.mubr.bf16.mxu0 %v9899_v22  ;;  %v6286_v26 = vrot.slane %v6285_v32, 4  ;;  %v15359_v48 = vadd.f32 %v15220_v46, %v15199_v44  ;;  %v15361_v30 = vrot.slane %v6368_v34, 5  ;;  %v6906_v33 = vrot.slane %v6904_v61, 5  ;;  %v16718_v22 = vld [vmem:[#allocation43_spill] sm:$0xff]  ;;  %v11476_v34 = vld [vmem:[#allocation2 + $0xa0] sm:$0xf] }
 0x3ec   : > { %8821 = vmatprep.mubr.bf16.mxu1 %v9867_v45  ;;  %8983 = vmatmul.mubr.bf16.gmra.mxu0 %v9883_v19  ;;  %v6912_v42 = vrot.slane %v6910_v58, 5  ;;  %v6916_v13 = vrot.slane %v6914_v56, 4  ;;  %v15365_v10 = vpop.f32.mrf.mxu0  ;;  %v6281_v32 = vsel %vm11878_vm10, %v16718_v22, %v16715_v57  ;;  %v6312_v46 = vshll.u32 %v6000_v41, 16 }
 0x3ed   : > { %16717 = vst [vmem:[#allocation29_spill] sm:$0xff] %v15359_v48  ;;  %v6291_v44 = vsel %vm11878_vm10, %v6286_v26, %v6290_v59  ;;  %v6538_v20 = vrot.slane %v11476_v34, 5  ;;  %v6907_v45 = vor.u32 %v6906_v33, %v6903_v29  ;;  %v6922_v58 = vrot.slane %v6920_v23, 5  ;;  %v15387_v29 = vld [vmem:[#allocation2 + $0xb4] sm:$0xf]  ;;  %v16723_v34 = vld [vmem:[#allocation25_spill] sm:$0xff] }
 0x3ee   : > { %v9851_v19 = vcombine.low %v6281_v32, %v6291_v44  ;;  %v6917_v61 = vor.u32 %v6916_v13, %v6912_v42  ;;  %v15373_v56 = vpop.f32.mrf.mxu0  ;;  %v9756_v48 = vrot.slane %v6400_v36, 9  ;;  %v6541_v39 = vrot.slane %v6000_v41, 5  ;;  %v16722_v44 = vld [vmem:[#allocation15_spill] sm:$0xff] }
 0x3ef   : > { %v6540_v40 = vrot.slane %v6538_v20, 4  ;;  %v15377_v53 = vadd.f32 %v15222_v0, %v15201_v11  ;;  %v6908_v57 = vrot.slane %v6907_v45, 4  ;;  %v15381_v59 = vadd.f32 %v15270_v60, %v15244_v54  ;;  %v15400_v60 = vld [vmem:[#allocation2 + $0xb8] sm:$0xf] }
 0x3f0   : > { %8822 = vmatmul.mubr.bf16.gmra.mxu1 %v9851_v19  ;;  %v6918_v22 = vrot.slane %v6917_v61, 4  ;;  %v15385_v26 = vadd.f32 %v15272_v7, %v15246_v50  ;;  %v15389_v23 = vpop.f32.mrf.mxu1  ;;  %v15391_v41 = vpop.f32.mrf.mxu0  ;;  %v15393_v33 = vrot.slane %v6374_v2, 5  ;;  %v6378_v11 = vshrl.u32 %v15329_v27, 16  ;;  %v6001_v61 = vld [vmem:[#allocation2 + $0xb0] sm:$0x1] }
 0x3f1   : > { %16719 = vst [vmem:[#allocation30_spill] sm:$0xff] %v15377_v53  ;;  %16720 = vst [vmem:[#allocation19_spill] sm:$0xff] %v15381_v59  ;;  %v6539_v0 = vsel %vm11898_vm12, %v9756_v48, %v6538_v20  ;;  %v6542_v54 = vsel %vm11898_vm12, %v6540_v40, %v6541_v39  ;;  %v6371_v50 = vor.u32 %v15361_v30, %v15308_v15  ;;  %v15414_v39 = vld [vmem:[#allocation2 + $0xbc] sm:$0x1]  ;;  %v6925_v20 = vshrl.u32 %v15387_v29, 16 }
 0x3f2   : > { %16721 = vst [vmem:[#allocation34_spill] sm:$0xff] %v15385_v26  ;;  %v6913_v7 = vsel %vm11878_vm10, %v6908_v57, %v6912_v42  ;;  %v6923_v2 = vsel %vm11878_vm10, %v6918_v22, %v6922_v58  ;;  %v9868_v13 = vcombine.low %v6539_v0, %v6542_v54  ;;  %v15408_v36 = vpop.f32.mrf.mxu1  ;;  %v15410_v32 = vpop.f32.mrf.mxu0  ;;  %v6309_v40 = vor.u32 %v16723_v34, %v16722_v44 }
 0x3f3   : > { %v9900_v48 = vcombine.low %v6913_v7, %v6923_v2  ;;  %16724 = vst [vmem:[#allocation14_spill] sm:$0xff] %v15414_v39  ;;  %v6928_v15 = vshll.u32 %v15387_v29, 16  ;;  %v6314_v30 = vrot.slane %v6312_v46, 5  ;;  %v9884_v42 = vcombine.low %v15327_v16, %v15332_v3  ;;  %v6401_v46 = vld [vmem:[#allocation2 + $0xa8] sm:$0xe]  ;;  %v16726_v7 = vld [vmem:[#allocation24_spill] sm:$0xff] }
 0x3f4   : > { %8829 = vmatprep.mubr.bf16.mxu1 %v9868_v13  ;;  %v6934_v19 = vshll.u32 %v15400_v60, 16  ;;  %v6938_v45 = vshrl.u32 %v15400_v60, 16  ;;  %v15422_v58 = vpop.f32.mrf.mxu1  ;;  %v6310_v57 = vrot.slane %v6309_v40, 4  ;;  %v6927_v22 = vrot.slane %v6925_v20, 4  ;;  %v11477_v20 = vld [vmem:[#allocation2 + $0xac] sm:$0xf] }
 0x3f5   : > { %8990 = vmatprep.mubr.bf16.mxu0 %v9900_v48  ;;  %v6930_v0 = vrot.slane %v6928_v15, 5  ;;  %v15426_v54 = vadd.f32 %v15300_v38, %v15292_v1  ;;  %v6305_v16 = vsel %vm11878_vm10, %v16726_v7, %v16722_v44  ;;  %v6944_v34 = vshll.u32 %v15414_v39, 16 }
 0x3f6   : > { %8991 = vmatmul.mubr.bf16.gmra.mxu0 %v9884_v42  ;;  %v6936_v2 = vrot.slane %v6934_v19, 5  ;;  %v6940_v13 = vrot.slane %v6938_v45, 4  ;;  %v15433_v59 = vpop.f32.mrf.mxu1  ;;  %v15435_v48 = vpop.f32.mrf.mxu0  ;;  %v6315_v40 = vsel %vm11878_vm10, %v6310_v57, %v6314_v30  ;;  %v6336_v1 = vshll.u32 %v6001_v61, 16 }
 0x3f7   : > { %16725 = vst [vmem:[#allocation16_spill] sm:$0xff] %v15426_v54  ;;  %v6931_v38 = vor.u32 %v6930_v0, %v6927_v22  ;;  %v6545_v15 = vrot.slane %v11477_v20, 5  ;;  %v15439_v42 = vrot.slane %v6378_v11, 4  ;;  %v9852_v54 = vcombine.low %v6305_v16, %v6315_v40  ;;  %v15457_v0 = vld [vmem:[#allocation2 + $0xc0] sm:$0xf]  ;;  %v16727_v16 = vld [vmem:[#allocation28_spill] sm:$0xff] }
 0x3f8   : > { %v6941_v3 = vor.u32 %v6940_v13, %v6936_v2  ;;  %v9757_v44 = vrot.slane %v6401_v46, 9  ;;  %v15441_v19 = vpop.f32.mrf.mxu0  ;;  %v6548_v39 = vrot.slane %v6001_v61, 5  ;;  %v15445_v26 = vadd.f32 %v15311_v12, %v15294_v31  ;;  %v15447_v53 = vpop.f32.mrf.mxu1  ;;  %v15459_v61 = vld [vmem:[#allocation2 + $0xc4] sm:$0xf]  ;;  %v15477_v13 = vld [vmem:[#allocation2 + $0xc8] sm:$0x1] }
 0x3f9   : > { %v6932_v45 = vrot.slane %v6931_v38, 4  ;;  %v6547_v7 = vrot.slane %v6545_v15, 4  ;;  %8830 = vmatmul.mubr.bf16.gmra.mxu1 %v9852_v54  ;;  %v6946_v57 = vrot.slane %v6944_v34, 5  ;;  %v15451_v11 = vadd.f32 %v15346_v47, %v15313_v8  ;;  %v6002_v20 = vld [vmem:[#allocation2 + $0xbc] sm:$0x1] }
 0x3fa   : > { %v6942_v30 = vrot.slane %v6941_v3, 4  ;;  %v15455_v22 = vadd.f32 %v15363_v25, %v15344_v5  ;;  %v15461_v46 = vpop.f32.mrf.mxu0  ;;  %v15463_v31 = vrot.slane %v6371_v50, 4  ;;  %v6338_v12 = vrot.slane %v6336_v1, 5  ;;  %v15469_v47 = vpop.f32.mrf.mxu1 }
 0x3fb   : > { %v6546_v3 = vsel %vm11898_vm12, %v9757_v44, %v6545_v15  ;;  %v6549_v8 = vsel %vm11898_vm12, %v6547_v7, %v6548_v39  ;;  %v6937_v25 = vsel %vm11878_vm10, %v6932_v45, %v6936_v2  ;;  %v6333_v50 = vor.u32 %v15197_v21, %v16727_v16 }
 0x3fc   : > { %v6947_v5 = vsel %vm11878_vm10, %v6942_v30, %v6946_v57  ;;  %v9869_v54 = vcombine.low %v6546_v3, %v6549_v8  ;;  %v15479_v34 = vpop.f32.mrf.mxu0  ;;  %v6949_v38 = vshrl.u32 %v15457_v0, 16  ;;  %v6952_v39 = vshll.u32 %v15457_v0, 16  ;;  %v15484_v2 = vpop.f32.mrf.mxu1  ;;  %v6402_v8 = vld [vmem:[#allocation2 + $0xb4] sm:$0xe] }
 0x3fd   : > { %v9901_v40 = vcombine.low %v6937_v25, %v6947_v5  ;;  %v6958_v1 = vshll.u32 %v15459_v61, 16  ;;  %v9885_v15 = vcombine.low %v15387_v29, %v15400_v60  ;;  %v6334_v44 = vrot.slane %v6333_v50, 4  ;;  %v15502_v50 = vld [vmem:[#allocation2 + $0x44] sm:$0x1] }
 0x3fe   : > { %8837 = vmatprep.mubr.bf16.mxu1 %v9869_v54  ;;  %v6962_v21 = vshrl.u32 %v15459_v61, 16  ;;  %v15491_v45 = vadd.f32 %v15373_v56, %v15365_v10  ;;  %v6329_v7 = vsel %vm11878_vm10, %v15206_v6, %v16727_v16  ;;  %v6951_v30 = vrot.slane %v6949_v38, 4  ;;  %v10592_v25 = vpop.f32.mrf.mxu1 }
 0x3ff   : > { %8998 = vmatprep.mubr.bf16.mxu0 %v9901_v40  ;;  %v6954_v57 = vrot.slane %v6952_v39, 5  ;;  %v6960_v3 = vrot.slane %v6958_v1, 5  ;;  %v6339_v29 = vsel %vm11878_vm10, %v6334_v44, %v6338_v12  ;;  %v6968_v54 = vshll.u32 %v15477_v13, 16  ;;  %v15500_v56 = vpop.f32.mrf.mxu0 }
 0x400   : > { %16728 = vst [vmem:[#allocation21_spill] sm:$0xff] %v15491_v45  ;;  %8999 = vmatmul.mubr.bf16.gmra.mxu0 %v9885_v15  ;;  %v6964_v5 = vrot.slane %v6962_v21, 4  ;;  %v6360_v10 = vshll.u32 %v6002_v20, 16  ;;  %v9853_v6 = vcombine.low %v6329_v7, %v6339_v29  ;;  %v6552_v38 = vrot.slane %v15208_v24, 5 }
 0x401   : > { %v6955_v16 = vor.u32 %v6954_v57, %v6951_v30  ;;  %v9758_v1 = vrot.slane %v6402_v8, 9  ;;  %v15508_v15 = vadd.f32 %v15408_v36, %v15389_v23  ;;  %v15512_v12 = vadd.f32 %v15410_v32, %v15391_v41  ;;  %v10707_v21 = vpop.f32.mrf.mxu0 }
 0x402   : > { %v6965_v39 = vor.u32 %v6964_v5, %v6960_v3  ;;  %v15514_v44 = vpop.f32.mrf.mxu1  ;;  %8838 = vmatmul.mubr.bf16.gmra.mxu1 %v9853_v6  ;;  %v6554_v40 = vrot.slane %v6552_v38, 4  ;;  %v6555_v7 = vrot.slane %v6002_v20, 5  ;;  %v15518_v24 = vadd.f32 %v15433_v59, %v15422_v58  ;;  %v6003_v58 = vld [vmem:[#allocation2 + $0xc8] sm:$0x1]  ;;  %v6403_v5 = vld [vmem:[#allocation2 + $0xc0] sm:$0xe] }
 0x403   : > { %v6956_v45 = vrot.slane %v6955_v16, 4  ;;  %v6970_v23 = vrot.slane %v6968_v54, 5  ;;  %v6362_v36 = vrot.slane %v6360_v10, 5  ;;  %v15523_v41 = vpop.f32.mrf.mxu0  ;;  %v6553_v32 = vsel %vm11898_vm12, %v9758_v1, %v6552_v38 }
 0x404   : > { %v6966_v57 = vrot.slane %v6965_v39, 4  ;;  %v15521_v8 = vpop.f32.mrf.mxu1  ;;  %v6556_v29 = vsel %vm11898_vm12, %v6554_v40, %v6555_v7  ;;  %v9886_v20 = vcombine.low %v15457_v0, %v15459_v61  ;;  %v6357_v59 = vor.u32 %v15259_v28, %v15255_v4  ;;  %v15558_v7 = vld [vmem:[#allocation2 + $0xcc] sm:$0xf] }
 0x405   : > { %v6961_v54 = vsel %vm11878_vm10, %v6956_v45, %v6960_v3  ;;  %v9870_v6 = vcombine.low %v6553_v32, %v6556_v29  ;;  %v15539_v16 = vadd.f32 %v15441_v19, %v15435_v48  ;;  %v15543_v38 = vpop.f32.mrf.mxu0  ;;  %v6353_v28 = vsel %vm11878_vm10, %v15257_v35, %v15255_v4 }
 0x406   : > { %v6971_v10 = vsel %vm11878_vm10, %v6966_v57, %v6970_v23  ;;  %v15541_v40 = vpop.f32.mrf.mxu1  ;;  %v6358_v39 = vrot.slane %v6357_v59, 4  ;;  %v6559_v45 = vrot.slane %v15329_v27, 5  ;;  %v6384_v3 = vshll.u32 %v6003_v58, 16  ;;  %v15573_v59 = vld [vmem:[#allocation2 + $0xd4] sm:$0x1] }
 0x407   : > { %v9902_v0 = vcombine.low %v6961_v54, %v6971_v10  ;;  %8845 = vmatprep.mubr.bf16.mxu1 %v9870_v6  ;;  %v9759_v1 = vrot.slane %v6403_v5, 9  ;;  %v15552_v48 = vadd.f32 %v15469_v47, %v15447_v53  ;;  %v15556_v19 = vadd.f32 %v15479_v34, %v15461_v46  ;;  %v15567_v53 = vld [vmem:[#allocation2 + $0xd0] sm:$0xf]  ;;  %16730 = vst [vmem:[#allocation26_spill] sm:$0xff] %v15573_v59 }
 0x408   : > { %v10598_v57 = vpop.f32.mrf.mxu1  ;;  %v15560_v23 = vpop.f32.mrf.mxu0  ;;  %v6363_v4 = vsel %vm11878_vm10, %v6358_v39, %v6362_v36  ;;  %v6561_v35 = vrot.slane %v6559_v45, 4  ;;  %v6562_v27 = vrot.slane %v6003_v58, 5  ;;  %v15565_v32 = vadd.f32 %v10592_v25, %v15484_v2  ;;  %16729 = vst [vmem:[#allocation22_spill] sm:$0xff] %v15567_v53 }
 0x409   : > { %9006 = vmatprep.mubr.bf16.mxu0 %v9902_v0  ;;  %v9854_v34 = vcombine.low %v6353_v28, %v6363_v4  ;;  %v6381_v29 = vor.u32 %v15439_v42, %v15393_v33  ;;  %v6560_v36 = vsel %vm11898_vm12, %v9759_v1, %v6559_v45  ;;  %v15580_v25 = vadd.f32 %v10707_v21, %v15500_v56  ;;  %v6996_v4 = vld [vmem:[#allocation2 + $0x18] sm:$0xe] }
 0x40a   : > { %9007 = vmatmul.mubr.bf16.gmra.mxu0 %v9886_v20  ;;  %v10713_v5 = vpop.f32.mrf.mxu0  ;;  %v6563_v2 = vsel %vm11898_vm12, %v6561_v35, %v6562_v27  ;;  %v6973_v58 = vshrl.u32 %v15558_v7, 16  ;;  %v10600_v54 = vpop.f32.mrf.mxu1  ;;  %v6976_v42 = vshll.u32 %v15558_v7, 16  ;;  %v6982_v6 = vshll.u32 %v15567_v53, 16 }
 0x40b   : > { %8846 = vmatmul.mubr.bf16.gmra.mxu1 %v9854_v34  ;;  %v9871_v20 = vcombine.low %v6560_v36, %v6563_v2  ;;  %v6382_v10 = vrot.slane %v6381_v29, 4  ;;  %v6386_v28 = vrot.slane %v6384_v3, 5  ;;  %v6986_v45 = vshrl.u32 %v15567_v53, 16 }
 0x40c   : > { %v10715_v0 = vpop.f32.mrf.mxu0  ;;  %v6975_v39 = vrot.slane %v6973_v58, 4  ;;  %v6992_v1 = vshll.u32 %v15573_v59, 16  ;;  %v10601_v56 = vpop.f32.mrf.mxu1  ;;  %v15589_v21 = vadd.f32 %v15100_v49, %v15080_v37  ;;  %v10563_v35 = vadd.f32 %v15102_v63, %v15082_v9  ;;  %v11479_v58 = vld [vmem:[#allocation2 + $0x1c] sm:$0xf]  ;;  %v6997_v37 = vld [vmem:[#allocation2 + $0x24] sm:$0xe] }
 0x40d   : > { %8853 = vmatprep.mubr.bf16.mxu1 %v9871_v20  ;;  %v6978_v27 = vrot.slane %v6976_v42, 5  ;;  %v6984_v34 = vrot.slane %v6982_v6, 5  ;;  %v6377_v3 = vsel %vm11878_vm10, %v15463_v31, %v15393_v33  ;;  %v6387_v36 = vsel %vm11878_vm10, %v6382_v10, %v6386_v28  ;;  %v11480_v6 = vld [vmem:[#allocation2 + $0x20] sm:$0x1] }
 0x40e   : > { %v10716_v29 = vpop.f32.mrf.mxu0  ;;  %v6988_v2 = vrot.slane %v6986_v45, 4  ;;  %v7062_v46 = vrot.slane %v11479_v58, 5  ;;  %v10603_v49 = vpop.f32.mrf.mxu1  ;;  %v6994_v30 = vrot.slane %v6992_v1, 5  ;;  %v9760_v9 = vrot.slane %v6996_v4, 9  ;;  %v11481_v58 = vld [vmem:[#allocation2 + $0x34] sm:$0xf] }
 0x40f   : > { %v6979_v47 = vor.u32 %v6978_v27, %v6975_v39  ;;  %v15601_v63 = vadd.f32 %v15521_v8, %v15514_v44  ;;  %v7065_v59 = vrot.slane %v11480_v6, 5  ;;  %v15605_v33 = vadd.f32 %v15543_v38, %v15523_v41  ;;  %v15613_v44 = vld [vmem:[%s16406_s4] ss:$0 sm:$0xff] }
 0x410   : > { %v6989_v20 = vor.u32 %v6988_v2, %v6984_v34  ;;  %v7064_v42 = vrot.slane %v7062_v46, 4  ;;  %v10604_v31 = vpop.f32.mrf.mxu1  ;;  %v9855_v10 = vcombine.low %v6377_v3, %v6387_v36  ;;  %v15608_v45 = vadd.f32 %v10598_v57, %v15541_v40  ;;  %v6998_v2 = vld [vmem:[#allocation2 + $0x30] sm:$0xe] }
 0x411   : > { %v6980_v28 = vrot.slane %v6979_v47, 4  ;;  %v9761_v39 = vrot.slane %v6997_v37, 9  ;;  %v10718_v1 = vpop.f32.mrf.mxu0  ;;  %v7063_v4 = vsel %vm11898_vm12, %v9760_v9, %v7062_v46  ;;  %v15620_v38 = vadd.f32 %v10713_v5, %v15560_v23 }
 0x412   : > { %v6990_v8 = vrot.slane %v6989_v20, 4  ;;  %v7066_v41 = vsel %vm11898_vm12, %v7064_v42, %v7065_v59  ;;  %v15624_v40 = vadd.f32 %v15263_v51, %v15613_v44  ;;  %v16731_v27 = vrot.slane %v14883_v52, 5  ;;  %v16732_v51 = vld [vmem:[#allocation36_spill] sm:$0xff] }
 0x413   : > { %8854 = vmatmul.mubr.bf16.gmra.mxu1 %v9855_v10  ;;  %v6985_v57 = vsel %vm11878_vm10, %v6980_v28, %v6984_v34  ;;  %v9904_v47 = vcombine.low %v7063_v4, %v7066_v41  ;;  %v10719_v36 = vpop.f32.mrf.mxu0  ;;  %v9887_v59 = vcombine.low %v15558_v7, %v15567_v53  ;;  %v7076_v37 = vrot.slane %v11481_v58, 5  ;;  %v11482_v10 = vld [vmem:[#allocation2 + $0x38] sm:$0x1]  ;;  %v11483_v28 = vld [vmem:[#allocation2 + $0x40] sm:$0xf] }
 0x414   : > { %v7070_v46 = vsel %vm11898_vm12, %v9761_v39, %v16731_v27  ;;  %v10606_v3 = vpop.f32.mrf.mxu1  ;;  %v6995_v23 = vsel %vm11878_vm10, %v6990_v8, %v6994_v30  ;;  %v10602_v9 = vadd.f32 %v10601_v56, %v10600_v54  ;;  %v15637_v52 = vadd.f32 %v10716_v29, %v10715_v0  ;;  %v16733_v54 = vld [vmem:[#allocation49_spill] sm:$0xff]  ;;  %v16736_v41 = vld [vmem:[#allocation34_spill] sm:$0xff] }
 0x415   : > { %v9905_v5 = vcombine.low %v7070_v46, %v16732_v51  ;;  %v9903_v34 = vcombine.low %v6985_v57, %v6995_v23  ;;  %11072 = vmatprep.mubr.bf16.mxu1 %v9904_v47  ;;  %v15639_v20 = vadd.f32 %v10604_v31, %v10603_v49  ;;  %v10721_v6 = vpop.f32.mrf.mxu0  ;;  %v15642_v17 = vadd.f32 %v10563_v35, %v15613_v44  ;;  %v16735_v31 = vld [vmem:[#allocation30_spill] sm:$0xff]  ;;  %v11484_v47 = vld [vmem:[#allocation2 + $0x4c] sm:$0xf] }
 0x416   : > { %v10607_v42 = vpop.f32.mrf.mxu1  ;;  %v7078_v30 = vrot.slane %v7076_v37, 4  ;;  %v7079_v7 = vrot.slane %v11482_v10, 5  ;;  %v7083_v39 = vrot.slane %v11483_v28, 5  ;;  %v15646_v8 = vadd.f32 %v15317_v14, %v15613_v44  ;;  %v16737_v46 = vld [vmem:[#allocation14_spill] sm:$0xff] }
 0x417   : > { %v15650_v0 = vadd.f32 %v16733_v54, %v15613_v44  ;;  %9014 = vmatprep.mubr.bf16.mxu0 %v9903_v34  ;;  %v9762_v56 = vrot.slane %v6998_v2, 9  ;;  %v15652_v29 = vadd.f32 %v10719_v36, %v10718_v1  ;;  %v10722_v35 = vpop.f32.mrf.mxu0  ;;  %v15656_v4 = vadd.f32 %v16735_v31, %v15613_v44  ;;  %v11486_v31 = vld [vmem:[#allocation2 + $0x50] sm:$0x1] }
 0x418   : > { %v10609_v49 = vpop.f32.mrf.mxu1  ;;  %v15660_v57 = vadd.f32 %v16736_v41, %v15613_v44  ;;  %9015 = vmatmul.mubr.bf16.gmra.mxu0 %v9887_v59  ;;  %v7080_v14 = vsel %vm11898_vm12, %v7078_v30, %v7079_v7  ;;  %v7090_v27 = vrot.slane %v11484_v47, 5  ;;  %v10608_v36 = vadd.f32 %v10607_v42, %v10606_v3  ;;  %v6999_v3 = vld [vmem:[#allocation2 + $0x3c] sm:$0xe]  ;;  %v11485_v42 = vld [vmem:[#allocation2 + $0x58] sm:$0xf] }
 0x419   : > { %16734 = vst [vmem:[#allocation45_spill] sm:$0xff] %v15652_v29  ;;  %v7077_v1 = vsel %vm11898_vm12, %v9762_v56, %v7076_v37  ;;  %v15667_v51 = vadd.f32 %v10722_v35, %v10721_v6  ;;  %v15671_v34 = vadd.f32 %v15445_v26, %v15613_v44  ;;  %v7085_v10 = vrot.slane %v7083_v39, 4  ;;  %v11487_v41 = vld [vmem:[#allocation2 + $0x64] sm:$0xf]  ;;  %v11490_v29 = vld [vmem:[#allocation2 + $0x68] sm:$0x1] }
 0x41a   : > { %v10610_v2 = vpop.f32.mrf.mxu1  ;;  %v10724_v58 = vpop.f32.mrf.mxu0  ;;  %v9906_v59 = vcombine.low %v7077_v1, %v7080_v14  ;;  %v15675_v30 = vadd.f32 %v15455_v22, %v15613_v44  ;;  %v15679_v7 = vadd.f32 %v15508_v15, %v15613_v44  ;;  %v7092_v37 = vrot.slane %v7090_v27, 4  ;;  %v7000_v15 = vld [vmem:[#allocation2 + $0x48] sm:$0xe] }
 0x41b   : > { %16738 = vst [vmem:[#allocation50_spill] sm:$0xff] %v15667_v51  ;;  %v10611_v28 = vadd.f32 %v10610_v2, %v10609_v49  ;;  %11073 = vmatmul.mubr.bf16.vlgmr.msra.gmra.mxu1 %v9905_v5  ;;  %v7097_v6 = vrot.slane %v11485_v42, 5  ;;  %v15683_v26 = vadd.f32 %v15518_v24, %v15613_v44  ;;  %v15687_v56 = vadd.f32 %v15552_v48, %v15613_v44 }
 0x41c   : > { %v10725_v54 = vpop.f32.mrf.mxu0  ;;  %v15691_v22 = vadd.f32 %v15565_v32, %v15613_v44  ;;  %11076 = vmatprep.mubr.bf16.mxu1 %v9906_v59  ;;  %v10612_v5 = vpop.f32.mrf.mxu1  ;;  %v15697_v35 = vadd.f32 %v15601_v63, %v15613_v44  ;;  %v15701_v24 = vadd.f32 %v15608_v45, %v15613_v44  ;;  %v7093_v48 = vrot.slane %v11486_v31, 5  ;;  %v11488_v59 = vld [vmem:[#allocation2 + $0x70] sm:$0xf]  ;;  %v7001_v31 = vld [vmem:[#allocation2 + $0x54] sm:$0xe] }
 0x41d   : > { %v15693_v49 = vadd.f32 %v10725_v54, %v10724_v58  ;;  %v7104_v14 = vrot.slane %v11487_v41, 5  ;;  %v15704_v32 = vadd.f32 %v10602_v9, %v15613_v44  ;;  %v9763_v1 = vrot.slane %v6999_v3, 9  ;;  %v7002_v3 = vld [vmem:[#allocation2 + $0x60] sm:$0xe] }
 0x41e   : > { %v10727_v47 = vpop.f32.mrf.mxu0  ;;  %v16740_v2 = vrot.slane %v15502_v50, 5  ;;  %v10613_v63 = vpop.f32.mrf.mxu1  ;;  %v7111_v42 = vrot.slane %v11488_v59, 5  ;;  %v9764_v54 = vrot.slane %v7000_v15, 9  ;;  %v7094_v45 = vsel %vm11898_vm12, %v7092_v37, %v7093_v48  ;;  %v7003_v48 = vld [vmem:[#allocation2 + $0x6c] sm:$0xe] }
 0x41f   : > { %16739 = vst [vmem:[#allocation47_spill] sm:$0xff] %v15693_v49  ;;  %v7099_v23 = vrot.slane %v7097_v6, 4  ;;  %v10614_v41 = vadd.f32 %v10613_v63, %v10612_v5  ;;  %v7084_v9 = vsel %vm11898_vm12, %v9763_v1, %v7083_v39  ;;  %v7106_v49 = vrot.slane %v7104_v14, 4  ;;  %v11489_v5 = vld [vmem:[#allocation2 + $0x7c] sm:$0xf] }
 0x420   : > { %v7087_v58 = vsel %vm11898_vm12, %v7085_v10, %v16740_v2  ;;  %v10728_v53 = vpop.f32.mrf.mxu0  ;;  %v10615_v50 = vpop.f32.mrf.mxu1  ;;  %v7113_v10 = vrot.slane %v7111_v42, 4  ;;  %v15718_v2 = vadd.f32 %v15639_v20, %v15613_v44  ;;  %v7091_v37 = vsel %vm11898_vm12, %v9764_v54, %v7090_v27 }
 0x421   : > { %v15714_v51 = vadd.f32 %v10728_v53, %v10727_v47  ;;  %v9907_v15 = vcombine.low %v7084_v9, %v7087_v58  ;;  %v7118_v63 = vrot.slane %v11489_v5, 5  ;;  %v9908_v59 = vcombine.low %v7091_v37, %v7094_v45 }
 0x422   : > { %v15723_v39 = vadd.f32 %v10608_v36, %v15613_v44  ;;  %v9765_v1 = vrot.slane %v7001_v31, 9  ;;  %v7107_v53 = vrot.slane %v11490_v29, 5  ;;  %v10616_v47 = vpop.f32.mrf.mxu1  ;;  %v15726_v20 = vadd.f32 %v10611_v28, %v15613_v44  ;;  %v15740_v28 = vld [vmem:[#allocation2 + $0x84] sm:$0xe] }
 0x423   : > { %16741 = vst [vmem:[#allocation20_spill] sm:$0xff] %v15714_v51  ;;  %v7004_v51 = vld [vmem:[#allocation2 + $0x78] sm:$0xe]  ;;  %11077 = vmatmul.mubr.bf16.gmra.mxu1 %v9907_v15  ;;  %v16743_v58 = vrot.slane %v15020_v43, 5  ;;  %v9766_v54 = vrot.slane %v7002_v3, 9  ;;  %v10617_v9 = vadd.f32 %v10616_v47, %v10615_v50  ;;  %v10730_v45 = vpop.f32.mrf.mxu0  ;;  %v9767_v31 = vrot.slane %v7003_v48, 9 }
 0x424   : > { %16742 = vst [vmem:[#allocation31_spill] sm:$0xff] %v15726_v20  ;;  %11080 = vmatprep.mubr.bf16.mxu1 %v9908_v59  ;;  %v7108_v36 = vsel %vm11898_vm12, %v7106_v49, %v7107_v53  ;;  %v16744_v29 = vrot.slane %v15090_v62, 5  ;;  %16745 = vst [vmem:[#allocation23_spill] sm:$0xff] %v15740_v28  ;;  %v16746_v43 = vld [vmem:[#allocation41_spill] sm:$0xff]  ;;  %v9768_v49 = vrot.slane %v7004_v51, 9  ;;  %v7120_v48 = vrot.slane %v7118_v63, 4 }
 0x425   : > { %v7101_v27 = vsel %vm11898_vm12, %v7099_v23, %v16743_v58  ;;  %v16454_v37 = vrot.slane %v16746_v43, 5  ;;  %v7098_v23 = vsel %vm11898_vm12, %v9765_v1, %v7097_v6  ;;  %v7105_v3 = vsel %vm11898_vm12, %v9766_v54, %v7104_v14  ;;  %v10731_v5 = vpop.f32.mrf.mxu0  ;;  %v15756_v47 = vld [vmem:[#allocation2 + $0x90] sm:$0xe]  ;;  %v11491_v1 = vld [vmem:[#allocation2 + $0x80] sm:$0x1] }
 0x426   : > { %v15738_v15 = vsel %vm11898_vm12, %v7113_v10, %v16744_v29  ;;  %v10618_v50 = vpop.f32.mrf.mxu1  ;;  %v9909_v59 = vcombine.low %v7098_v23, %v7101_v27  ;;  %v15748_v62 = vadd.f32 %v10614_v41, %v15613_v44  ;;  %v15752_v10 = vsel %vm11898_vm12, %v9767_v31, %v7111_v42  ;;  %v7008_v41 = vld [vmem:[#allocation2 + $0xa8] sm:$0xe]  ;;  %v7009_v23 = vld [vmem:[#allocation2 + $0xb4] sm:$0xe] }
 0x427   : > { %v15754_v53 = vadd.f32 %v10731_v5, %v10730_v45  ;;  %v9910_v6 = vcombine.low %v7105_v3, %v7108_v36  ;;  %v7121_v58 = vrot.slane %v11491_v1, 5  ;;  %v10733_v54 = vpop.f32.mrf.mxu0  ;;  %v15763_v29 = vsel %vm11898_vm12, %v9768_v49, %v7118_v63  ;;  %v16749_v31 = vld [vmem:[#allocation39_spill] sm:$0xff]  ;;  %v16750_v27 = vld [vmem:[#allocation32_spill] sm:$0xff]  ;;  %v16751_v49 = vld [vmem:[#allocation18_spill] sm:$0xff] }
 0x428   : > { %16747 = vst [vmem:[#allocation43_spill] sm:$0xff] %v15748_v62  ;;  %v10619_v51 = vpop.f32.mrf.mxu1  ;;  %v7127_v45 = vrot.slane %v16454_v37, 4  ;;  %v7146_v36 = vrot.slane %v16749_v31, 5  ;;  %v15774_v63 = vadd.f32 %v10617_v9, %v15613_v44  ;;  %v9772_v31 = vrot.slane %v7008_v41, 9 }
 0x429   : > { %16748 = vst [vmem:[#allocation15_spill] sm:$0xff] %v15754_v53  ;;  %v10620_v42 = vadd.f32 %v10619_v51, %v10618_v50  ;;  %v7122_v3 = vsel %vm11898_vm12, %v7120_v48, %v7121_v58  ;;  %v10734_v1 = vpop.f32.mrf.mxu0  ;;  %v7153_v53 = vrot.slane %v15400_v60, 5  ;;  %v16752_v58 = vld [vmem:[#allocation40_spill] sm:$0xff]  ;;  %v9773_v20 = vrot.slane %v7009_v23, 9 }
 0x42a   : > { %v10621_v5 = vpop.f32.mrf.mxu1  ;;  %v15776_v50 = vadd.f32 %v10734_v1, %v10733_v54  ;;  %v7148_v48 = vrot.slane %v7146_v36, 4  ;;  %v7149_v62 = vrot.slane %v16752_v58, 5  ;;  %v9912_v28 = vcombine.low %v15763_v29, %v7122_v3  ;;  %v7010_v1 = vld [vmem:[#allocation2 + $0xc0] sm:$0xe]  ;;  %v16757_v58 = vld [vmem:[#allocation33_spill] sm:$0xff] }
 0x42b   : > { %11081 = vmatmul.mubr.bf16.gmra.mxu1 %v9909_v59  ;;  %v7155_v14 = vrot.slane %v7153_v53, 4  ;;  %v16753_v9 = vrot.slane %v15173_v18, 5  ;;  %v7160_v59 = vrot.slane %v15459_v61, 5  ;;  %v15790_v51 = vsel %vm11898_vm12, %v9772_v31, %v7146_v36  ;;  %v16756_v31 = vld [vmem:[#allocation17_spill] sm:$0xff] }
 0x42c   : > { %v10622_v37 = vpop.f32.mrf.mxu1  ;;  %v10736_v43 = vpop.f32.mrf.mxu0  ;;  %11084 = vmatprep.mubr.bf16.mxu1 %v9910_v6  ;;  %v15794_v6 = vsel %vm11898_vm12, %v7148_v48, %v7149_v62  ;;  %v16754_v18 = vrot.slane %v16737_v46, 5  ;;  %v16755_v23 = vrot.slane %v16750_v27, 5  ;;  %v7163_v46 = vrot.slane %v15477_v13, 5 }
 0x42d   : > { %v10623_v60 = vadd.f32 %v10622_v37, %v10621_v5  ;;  %v15785_v54 = vsel %vm11898_vm12, %v7127_v45, %v16753_v9  ;;  %v15798_v37 = vsel %vm11898_vm12, %v9773_v20, %v7153_v53  ;;  %v9916_v3 = vcombine.low %v15790_v51, %v15794_v6  ;;  %v16781_v6 = vld [vmem:[#allocation27_spill] sm:$0xff] }
 0x42e   : > { %v10737_v41 = vpop.f32.mrf.mxu0  ;;  %v15804_v29 = vsel %vm11898_vm12, %v7155_v14, %v16754_v18  ;;  %v10624_v61 = vpop.f32.mrf.mxu1  ;;  %v7134_v36 = vrot.slane %v16755_v23, 4  ;;  %v9774_v20 = vrot.slane %v7010_v1, 9  ;;  %v7162_v53 = vrot.slane %v7160_v59, 4  ;;  %v16759_v1 = vld [vmem:[#allocation29_spill] sm:$0xff] }
 0x42f   : > { %v10738_v45 = vadd.f32 %v10737_v41, %v10736_v43  ;;  %v15815_v14 = vadd.f32 %v16756_v31, %v15624_v40  ;;  %v15819_v43 = vadd.f32 %v15589_v21, %v15642_v17  ;;  %v15823_v9 = vadd.f32 %v16757_v58, %v15646_v8  ;;  %v16758_v41 = vld [vmem:[#allocation38_spill] sm:$0xff]  ;;  %v16760_v31 = vld [vmem:[#allocation13_spill] sm:$0xff] }
 0x430   : > { %v10739_v5 = vpop.f32.mrf.mxu0  ;;  %v10625_v48 = vpop.f32.mrf.mxu1  ;;  %v15827_v18 = vadd.f32 %v16758_v41, %v15650_v0  ;;  %v15831_v13 = vadd.f32 %v16759_v1, %v15656_v4  ;;  %v7139_v62 = vrot.slane %v16760_v31, 5  ;;  %v15836_v21 = vsel %vm11898_vm12, %v9774_v20, %v7160_v59  ;;  %v16761_v4 = vld [vmem:[#allocation19_spill] sm:$0xff] }
 0x431   : > { %v10626_v23 = vadd.f32 %v10625_v48, %v10624_v61  ;;  %v15840_v17 = vsel %vm11898_vm12, %v7162_v53, %v7163_v46  ;;  %v15846_v41 = vadd.f32 %v16761_v4, %v15660_v57  ;;  %v16762_v61 = vld [vmem:[#allocation16_spill] sm:$0xff]  ;;  %v16763_v59 = vcombine.low %v15752_v10, %v15738_v15  ;;  %v16764_v46 = vld [vmem:[#allocation21_spill] sm:$0xff] }
 0x432   : > { %v10740_v40 = vpop.f32.mrf.mxu0  ;;  %v10627_v8 = vpop.f32.mrf.mxu1  ;;  %v9918_v0 = vcombine.low %v15836_v21, %v15840_v17  ;;  %v15850_v48 = vadd.f32 %v16762_v61, %v15671_v34  ;;  %v8502_v20 = vadd.f32 %v10620_v42, %v15613_v44  ;;  %v8505_v53 = vadd.f32 %v10623_v60, %v15613_v44  ;;  %v16769_v60 = vld [vmem:[#allocation47_spill] sm:$0xff] }
 0x433   : > { %v10741_v58 = vadd.f32 %v10740_v40, %v10739_v5  ;;  %11085 = vmatmul.mubr.bf16.gmra.mxu1 %v16763_v59  ;;  %v15859_v5 = vadd.f32 %v15451_v11, %v15675_v30  ;;  %v15863_v57 = vadd.f32 %v16764_v46, %v15679_v7  ;;  %v8510_v34 = vadd.f32 %v10626_v23, %v15613_v44  ;;  %v16775_v61 = vld [vmem:[#allocation23_spill] sm:$0xff] }
 0x434   : > { %11088 = vmatprep.mubr.bf16.mxu1 %v9912_v28  ;;  %v10628_v1 = vpop.f32.mrf.mxu1  ;;  %v15868_v15 = vadd.f32 %v15512_v12, %v15683_v26  ;;  %v15872_v10 = vadd.f32 %v15539_v16, %v15687_v56  ;;  %v15876_v11 = vadd.f32 %v15556_v19, %v15691_v22  ;;  %v15880_v7 = vadd.f32 %v15580_v25, %v15697_v35  ;;  %v16765_v19 = vld [vmem:[#allocation45_spill] sm:$0xff]  ;;  %v16766_v56 = vld [vmem:[#allocation31_spill] sm:$0xff]  ;;  %v16767_v22 = vld [vmem:[#allocation50_spill] sm:$0xff] }
 0x435   : > { %v10629_v30 = vadd.f32 %v10628_v1, %v10627_v8  ;;  %v10742_v42 = vpop.f32.mrf.mxu0  ;;  %v15884_v28 = vadd.f32 %v15605_v33, %v15701_v24  ;;  %v15888_v12 = vadd.f32 %v15620_v38, %v15704_v32  ;;  %v15892_v16 = vadd.f32 %v15637_v52, %v15718_v2  ;;  %v16768_v35 = vld [vmem:[#allocation43_spill] sm:$0xff]  ;;  %v16771_v2 = vld [vmem:[#allocation20_spill] sm:$0xff]  ;;  %v16773_v8 = vld [vmem:[#allocation41_spill] sm:$0xff] }
 0x436   : > { %v15896_v26 = vadd.f32 %v16765_v19, %v15723_v39  ;;  %v15900_v25 = vadd.f32 %v16767_v22, %v16766_v56  ;;  %v15904_v33 = vadd.f32 %v16769_v60, %v16768_v35  ;;  %v16770_v24 = vrot.slane %v16751_v49, 5  ;;  %v16772_v39 = vld [vmem:[#allocation15_spill] sm:$0xff]  ;;  %v7007_v35 = vld [vmem:[#allocation2 + $0x9c] sm:$0xe] }
 0x437   : > { %v10743_v52 = vpop.f32.mrf.mxu0  ;;  %v15912_v23 = vadd.f32 %v16771_v2, %v15774_v63  ;;  %v15915_v40 = vadd.f32 %v16772_v39, %v8502_v20  ;;  %v15918_v31 = vadd.f32 %v15776_v50, %v8505_v53  ;;  %v16774_v4 = vrot.slane %v16773_v8, 5 }
 0x438   : > { %v7136_v38 = vsel %vm11898_vm12, %v7134_v36, %v16770_v24  ;;  %v10630_v32 = vpop.f32.mrf.mxu1  ;;  %v16776_v59 = vrot.slane %v16775_v61, 9  ;;  %v10744_v36 = vadd.f32 %v10743_v52, %v10742_v42  ;;  %v16777_v1 = vrot.slane %v16750_v27, 5  ;;  %v11492_v52 = vld [vmem:[#allocation2 + $0xa4] sm:$0x1] }
 0x439   : > { %v16778_v63 = vrot.slane %v15756_v47, 9  ;;  %v10745_v50 = vpop.f32.mrf.mxu0  ;;  %v15933_v53 = vadd.f32 %v10738_v45, %v8510_v34  ;;  %v8513_v22 = vadd.f32 %v10629_v30, %v15613_v44  ;;  %v7141_v60 = vrot.slane %v7139_v62, 4 }
 0x43a   : > { %v7126_v49 = vsel %vm11898_vm12, %v16776_v59, %v16774_v4  ;;  %v10631_v19 = vpop.f32.mrf.mxu1  ;;  %v7142_v27 = vrot.slane %v11492_v52, 5  ;;  %v9771_v2 = vrot.slane %v7007_v35, 9  ;;  %v16780_v52 = vld [vmem:[#allocation26_spill] sm:$0xff] }
 0x43b   : > { %v9913_v46 = vcombine.low %v7126_v49, %v15785_v54  ;;  %v7133_v20 = vsel %vm11898_vm12, %v16778_v63, %v16777_v1  ;;  %v10632_v24 = vadd.f32 %v10631_v19, %v10630_v32  ;;  %v10746_v54 = vpop.f32.mrf.mxu0  ;;  %v15939_v30 = vadd.f32 %v10741_v58, %v8513_v22  ;;  %v7011_v22 = vld [vmem:[#allocation2 + $0xcc] sm:$0xe] }
 0x43c   : > { %v9914_v56 = vcombine.low %v7133_v20, %v7136_v38  ;;  %v10633_v42 = vpop.f32.mrf.mxu1  ;;  %v10747_v47 = vadd.f32 %v10746_v54, %v10745_v50  ;;  %v7143_v45 = vsel %vm11898_vm12, %v7141_v60, %v7142_v27  ;;  %v7140_v32 = vsel %vm11898_vm12, %v9771_v2, %v7139_v62  ;;  %v16779_v62 = vld [vmem:[#allocation22_spill] sm:$0xff] }
 0x43d   : > { %11089 = vmatmul.mubr.bf16.gmra.mxu1 %v9913_v46  ;;  %v8518_v34 = vadd.f32 %v10632_v24, %v15613_v44  ;;  %v9915_v49 = vcombine.low %v7140_v32, %v7143_v45  ;;  %v7167_v35 = vrot.slane %v16779_v62, 5  ;;  %v9775_v54 = vrot.slane %v7011_v22, 9 }
 0x43e   : > { %11092 = vmatprep.mubr.bf16.mxu1 %v9914_v56  ;;  %v10634_v39 = vpop.f32.mrf.mxu1  ;;  %v10748_v8 = vpop.f32.mrf.mxu0  ;;  %v7170_v27 = vrot.slane %v16780_v52, 5  ;;  %v16786_v52 = vld [vmem:[#allocation35_spill] sm:$0xff] }
 0x43f   : > { %v10635_v38 = vadd.f32 %v10634_v39, %v10633_v42  ;;  %v15943_v63 = vadd.f32 %v10744_v36, %v8518_v34  ;;  %v7169_v39 = vrot.slane %v7167_v35, 4 }
 0x440   : > { %v10749_v4 = vpop.f32.mrf.mxu0  ;;  %v10636_v61 = vpop.f32.mrf.mxu1 }
 0x441   : > { %v10750_v59 = vadd.f32 %v10749_v4, %v10748_v8  ;;  %v8521_v20 = vadd.f32 %v10635_v38, %v15613_v44  ;;  %v16783_v38 = vcombine.low %v15798_v37, %v15804_v29  ;;  %v7168_v4 = vsel %vm11898_vm12, %v9775_v54, %v7167_v35 }
 0x442   : > { %v10751_v46 = vpop.f32.mrf.mxu0  ;;  %v10637_v1 = vpop.f32.mrf.mxu1 }
 0x443   : > { %v10638_v19 = vadd.f32 %v10637_v1, %v10636_v61  ;;  %v15950_v36 = vadd.f32 %v10747_v47, %v8521_v20 }
 0x444   : > { %v10752_v50 = vpop.f32.mrf.mxu0  ;;  %v10639_v58 = vpop.f32.mrf.mxu1 }
 0x445   : > { %11093 = vmatmul.mubr.bf16.gmra.mxu1 %v9915_v49  ;;  %v10753_v56 = vadd.f32 %v10752_v50, %v10751_v46  ;;  %v8526_v2 = vadd.f32 %v10638_v19, %v15613_v44  ;;  %v7171_v49 = vsel %vm11898_vm12, %v7169_v39, %v7170_v27  ;;  %v16788_v39 = vld [vmem:[#allocation44_spill] sm:$0xff] }
 0x446   : > { %11096 = vmatprep.mubr.bf16.mxu1 %v9916_v3  ;;  %v10640_v60 = vpop.f32.mrf.mxu1  ;;  %v16782_v3 = vld [vmem:[#allocation42_spill] sm:$0xff]  ;;  %v9919_v19 = vcombine.low %v7168_v4, %v7171_v49 }
 0x447   : > { %v10641_v24 = vadd.f32 %v10640_v60, %v10639_v58  ;;  %v10754_v42 = vpop.f32.mrf.mxu0  ;;  %v10554_v34 = vadd.f32 %v16782_v3, %v16781_v6  ;;  %v15967_v1 = vadd.f32 %v10750_v59, %v8526_v2  ;;  %v16785_v60 = vld [vmem:[#allocation48_spill] sm:$0xff]  ;;  %v16787_v2 = vld [vmem:[#allocation37_spill] sm:$0xff] }
 0x449   : > { %v10642_v8 = vpop.f32.mrf.mxu1  ;;  %v10755_v45 = vpop.f32.mrf.mxu0  ;;  %v8529_v61 = vadd.f32 %v10641_v24, %v15613_v44  ;;  %v8414_v22 = vadd.f32 %v10554_v34, %v15613_v44  ;;  %v10557_v24 = vadd.f32 %v16785_v60, %v16784_v55 }
 0x44a   : > { %v10756_v51 = vadd.f32 %v10755_v45, %v10754_v42 }
 0x44b   : > { %v10643_v47 = vpop.f32.mrf.mxu1  ;;  %v10757_v32 = vpop.f32.mrf.mxu0  ;;  %v15971_v17 = vadd.f32 %v10753_v56, %v8529_v61  ;;  %v8575_v27 = vadd.f32 %v16786_v52, %v8414_v22  ;;  %v8417_v34 = vadd.f32 %v10557_v24, %v15613_v44 }
 0x44c   : > { %v10644_v46 = vadd.f32 %v10643_v47, %v10642_v8  ;;  %v10669_v8 = vadd.f32 %v16788_v39, %v16787_v2 }
 0x44d   : > { %11097 = vmatmul.mubr.bf16.gmra.mxu1 %v16783_v38  ;;  %v10645_v20 = vpop.f32.mrf.mxu1  ;;  %v10758_v37 = vpop.f32.mrf.mxu0 }
 0x44e   : > { %11100 = vmatprep.mubr.bf16.mxu1 %v9918_v0  ;;  %v10759_v29 = vadd.f32 %v10758_v37, %v10757_v32  ;;  %v8534_v62 = vadd.f32 %v10644_v46, %v15613_v44  ;;  %v8578_v49 = vadd.f32 %v10669_v8, %v8417_v34 }
 0x44f   : > { %v10646_v50 = vpop.f32.mrf.mxu1  ;;  %v10888_v58 = vpop.f32.mrf.mxu0 }
 0x450   : > { %v10647_v21 = vadd.f32 %v10646_v50, %v10645_v20  ;;  %v15978_v6 = vadd.f32 %v10756_v51, %v8534_v62 }
 0x451   : > { %v10776_v0 = vpop.f32.mrf.mxu1  ;;  %v10889_v35 = vpop.f32.mrf.mxu0 }
 0x452   : > { %v10890_v59 = vadd.f32 %v10889_v35, %v10888_v58  ;;  %16789 = vst [vmem:[#allocation25_spill] sm:$0xff] %v15978_v6  ;;  %v8537_v47 = vadd.f32 %v10647_v21, %v15613_v44 }
 0x453   : > { %v10777_v42 = vpop.f32.mrf.mxu1  ;;  %v10891_v54 = vpop.f32.mrf.mxu0 }
 0x454   : > { %v10778_v45 = vadd.f32 %v10777_v42, %v10776_v0  ;;  %v15988_v58 = vadd.f32 %v10759_v29, %v8537_v47 }
 0x455   : > { %11101 = vmatmul.mubr.bf16.gmra.mxu1 %v9919_v19  ;;  %v10779_v3 = vpop.f32.mrf.mxu1  ;;  %v10892_v56 = vpop.f32.mrf.mxu0 }
 0x456   : > { %v8736_v38 = vadd.f32 %v10778_v45, %v8575_v27  ;;  %v10893_v4 = vadd.f32 %v10892_v56, %v10891_v54  ;;  %16790 = vst [vmem:[#allocation24_spill] sm:$0xff] %v15988_v58 }
 0x457   : > { %v10780_v32 = vpop.f32.mrf.mxu1  ;;  %v15982_v61 = vpop.f32.mrf.mxu0 }
 0x458   : > { %v10781_v46 = vadd.f32 %v10780_v32, %v10779_v3  ;;  %v16002_v54 = vadd.f32 %v10890_v59, %v8736_v38 }
 0x459   : > { %v10782_v20 = vpop.f32.mrf.mxu1  ;;  %v15984_v37 = vpop.f32.mrf.mxu0 }
 0x45a   : > { %v8739_v19 = vadd.f32 %v10781_v46, %v8578_v49 }
 0x45b   : > { %v10783_v50 = vpop.f32.mrf.mxu1  ;;  %v15986_v51 = vpop.f32.mrf.mxu0 }
 0x45c   : > { %v10784_v22 = vadd.f32 %v10783_v50, %v10782_v20  ;;  %v16011_v8 = vadd.f32 %v10893_v4, %v8739_v19 }
 0x45d   : > { %v10785_v62 = vpop.f32.mrf.mxu1  ;;  %v15990_v0 = vpop.f32.mrf.mxu0 }
 0x45e   : > { %v15993_v44 = vadd.f32 %v10784_v22, %v15815_v14 }
 0x45f   : > { %v10786_v21 = vpop.f32.mrf.mxu1  ;;  %v15995_v35 = vpop.f32.mrf.mxu0 }
 0x460   : > { %v10787_v55 = vadd.f32 %v10786_v21, %v10785_v62 }
 0x461   : > { %v10788_v60 = vpop.f32.mrf.mxu1  ;;  %v15997_v24 = vpop.f32.mrf.mxu0 }
 0x462   : > { %v16000_v42 = vadd.f32 %v10787_v55, %v15819_v43 }
 0x463   : > { %v10789_v29 = vpop.f32.mrf.mxu1  ;;  %v16004_v52 = vpop.f32.mrf.mxu0 }
 0x464   : > { %v10790_v27 = vadd.f32 %v10789_v29, %v10788_v60 }
 0x465   : > { %v10791_v2 = vpop.f32.mrf.mxu1  ;;  %v16006_v39 = vpop.f32.mrf.mxu0 }
 0x466   : > { %v16009_v14 = vadd.f32 %v10790_v27, %v15823_v9 }
 0x467   : > { %v10792_v45 = vpop.f32.mrf.mxu1 }
 0x468   : > { %v10793_v3 = vadd.f32 %v10792_v45, %v10791_v2  ;;  %v16013_v56 = vpop.f32.mrf.mxu0 }
 0x469   : > { %v10794_v43 = vpop.f32.mrf.mxu1 }
 0x46a   : > { %v16016_v59 = vadd.f32 %v10793_v3, %v15827_v18  ;;  %v16018_v34 = vpop.f32.mrf.mxu0 }
 0x46b   : > { %v10795_v38 = vpop.f32.mrf.mxu1 }
 0x46c   : > { %v10796_v47 = vadd.f32 %v10795_v38, %v10794_v43  ;;  %v16020_v32 = vpop.f32.mrf.mxu0 }
 0x46d   : > { %v10797_v49 = vpop.f32.mrf.mxu1 }
 0x46e   : > { %v16023_v9 = vadd.f32 %v10796_v47, %v15831_v13  ;;  %v16025_v4 = vpop.f32.mrf.mxu0 }
 0x46f   : > { %v10798_v46 = vpop.f32.mrf.mxu1 }
 0x470   : > { %v10799_v20 = vadd.f32 %v10798_v46, %v10797_v49  ;;  %v16027_v19 = vpop.f32.mrf.mxu0 }
 0x471   : > { %v10800_v50 = vpop.f32.mrf.mxu1 }
 0x472   : > { %v16030_v18 = vadd.f32 %v10799_v20, %v15846_v41  ;;  %v16032_v22 = vpop.f32.mrf.mxu0 }
 0x473   : > { %v10801_v62 = vpop.f32.mrf.mxu1 }
 0x474   : > { %v10802_v21 = vadd.f32 %v10801_v62, %v10800_v50  ;;  %v16034_v55 = vpop.f32.mrf.mxu0 }
 0x475   : > { %v10803_v60 = vpop.f32.mrf.mxu1 }
 0x476   : > { %v16037_v13 = vadd.f32 %v10802_v21, %v15850_v48  ;;  %v16039_v29 = vpop.f32.mrf.mxu0 }
 0x477   : > { %v10804_v27 = vpop.f32.mrf.mxu1 }
 0x478   : > { %v10805_v2 = vadd.f32 %v10804_v27, %v10803_v60  ;;  %v16041_v45 = vpop.f32.mrf.mxu0 }
 0x479   : > { %v10806_v3 = vpop.f32.mrf.mxu1 }
 0x47a   : > { %v16044_v41 = vadd.f32 %v10805_v2, %v15859_v5  ;;  %v16046_v43 = vpop.f32.mrf.mxu0 }
 0x47b   : > { %v10807_v38 = vpop.f32.mrf.mxu1 }
 0x47c   : > { %v10808_v47 = vadd.f32 %v10807_v38, %v10806_v3  ;;  %v16048_v49 = vpop.f32.mrf.mxu0 }
 0x47d   : > { %v10809_v46 = vpop.f32.mrf.mxu1 }
 0x47e   : > { %v16051_v48 = vadd.f32 %v10808_v47, %v15863_v57  ;;  %v16053_v20 = vpop.f32.mrf.mxu0 }
 0x47f   : > { %v10810_v50 = vpop.f32.mrf.mxu1 }
 0x480   : > { %v10811_v62 = vadd.f32 %v10810_v50, %v10809_v46  ;;  %v16055_v21 = vpop.f32.mrf.mxu0 }
 0x481   : > { %16791 = vst [vmem:[#allocation28_spill] sm:$0xff] %v16055_v21  ;;  %v10812_v60 = vpop.f32.mrf.mxu1 }
 0x482   : > { %v16058_v5 = vadd.f32 %v10811_v62, %v15868_v15  ;;  %v16060_v27 = vpop.f32.mrf.mxu0 }
 0x483   : > { %16792 = vst [vmem:[#allocation36_spill] sm:$0xff] %v16060_v27  ;;  %v10813_v2 = vpop.f32.mrf.mxu1 }
 0x484   : > { %v10814_v3 = vadd.f32 %v10813_v2, %v10812_v60  ;;  %v16062_v38 = vpop.f32.mrf.mxu0 }
 0x485   : > { %16793 = vst [vmem:[#allocation49_spill] sm:$0xff] %v16062_v38  ;;  %v10815_v58 = vpop.f32.mrf.mxu1 }
 0x486   : > { %v16065_v57 = vadd.f32 %v10814_v3, %v15872_v10  ;;  %v16067_v47 = vpop.f32.mrf.mxu0 }
 0x487   : > { %16795 = vst [vmem:[#allocation34_spill] sm:$0xff] %v16067_v47  ;;  %v10816_v6 = vpop.f32.mrf.mxu1 }
 0x488   : > { %16794 = vst [vmem:[#allocation30_spill] sm:$0xff] %v16065_v57  ;;  %v10817_v46 = vadd.f32 %v10816_v6, %v10815_v58  ;;  %v16069_v50 = vpop.f32.mrf.mxu0 }
 0x489   : > { %v10818_v21 = vpop.f32.mrf.mxu1 }
 0x48a   : > { %v16072_v15 = vadd.f32 %v10817_v46, %v15876_v11  ;;  %v16074_v62 = vpop.f32.mrf.mxu0 }
 0x48b   : > { %16797 = vst [vmem:[#allocation39_spill] sm:$0xff] %v16074_v62  ;;  %v10819_v27 = vpop.f32.mrf.mxu1 }
 0x48c   : > { %16796 = vst [vmem:[#allocation14_spill] sm:$0xff] %v16072_v15  ;;  %v10820_v60 = vadd.f32 %v10819_v27, %v10818_v21  ;;  %v16076_v2 = vpop.f32.mrf.mxu0 }
 0x48d   : > { %16798 = vst [vmem:[#allocation32_spill] sm:$0xff] %v16076_v2  ;;  %v10821_v38 = vpop.f32.mrf.mxu1 }
 0x48e   : > { %v16079_v10 = vadd.f32 %v10820_v60, %v15880_v7  ;;  %v16081_v57 = vpop.f32.mrf.mxu0 }
 0x48f   : > { %v10822_v3 = vpop.f32.mrf.mxu1 }
 0x490   : > { %v10823_v47 = vadd.f32 %v10822_v3, %v10821_v38  ;;  %v16086_v15 = vpop.f32.mrf.mxu0 }
 0x491   : > { %v10824_v6 = vpop.f32.mrf.mxu1 }
 0x492   : > { %v16084_v58 = vadd.f32 %v10823_v47, %v15884_v28  ;;  %v16091_v7 = vpop.f32.mrf.mxu0 }
 0x493   : > { %v10825_v11 = vpop.f32.mrf.mxu1 }
 0x494   : > { %16799 = vst [vmem:[#allocation18_spill] sm:$0xff] %v16084_v58  ;;  %v10826_v46 = vadd.f32 %v10825_v11, %v10824_v6  ;;  %v16096_v3 = vpop.f32.mrf.mxu0 }
 0x495   : > { %v10827_v62 = vpop.f32.mrf.mxu1  ;;  %16802 = vst [vmem:[#allocation33_spill] sm:$0xff] %v16096_v3 }
 0x496   : > { %v16089_v21 = vadd.f32 %v10826_v46, %v15888_v12  ;;  %v16101_v11 = vpop.f32.mrf.mxu0 }
 0x497   : > { %v10828_v27 = vpop.f32.mrf.mxu1  ;;  %16803 = vst [vmem:[#allocation38_spill] sm:$0xff] %v16101_v11 }
 0x498   : > { %16800 = vst [vmem:[#allocation40_spill] sm:$0xff] %v16089_v21  ;;  %v10829_v2 = vadd.f32 %v10828_v27, %v10827_v62 }
 0x499   : > { %v16106_v27 = vpop.f32.mrf.mxu0 }
 0x49a   : > { %v16094_v38 = vadd.f32 %v10829_v2, %v15892_v16 }
 0x49b   : > { %v10830_v60 = vpop.f32.mrf.mxu1  ;;  %v16108_v21 = vpop.f32.mrf.mxu0 }
 0x49c   : > { %16801 = vst [vmem:[#allocation17_spill] sm:$0xff] %v16094_v38 }
 0x49d   : > { %v10831_v28 = vpop.f32.mrf.mxu1 }
 0x49e   : > { %v10832_v47 = vadd.f32 %v10831_v28, %v10830_v60 }
 0x49f   : > { %v10833_v58 = vpop.f32.mrf.mxu1 }
 0x4a0   : > { %v16099_v6 = vadd.f32 %v10832_v47, %v15896_v26  ;;  %v16113_v47 = vpop.f32.mrf.mxu0 }
 0x4a1   : > { %v10834_v12 = vpop.f32.mrf.mxu1 }
 0x4a2   : > { %v10835_v46 = vadd.f32 %v10834_v12, %v10833_v58  ;;  %v16118_v12 = vpop.f32.mrf.mxu0 }
 0x4a3   : > { %16807 = vst [vmem:[#allocation16_spill] sm:$0xff] %v16118_v12 }
 0x4a4   : > { %v16104_v62 = vadd.f32 %v10835_v46, %v15900_v25 }
 0x4a6   : > { %16804 = vst [vmem:[#allocation29_spill] sm:$0xff] %v16104_v62  ;;  %v10836_v16 = vpop.f32.mrf.mxu1 }
 0x4a8   : > { %v10837_v2 = vpop.f32.mrf.mxu1 }
 0x4a9   : > { %v10838_v38 = vadd.f32 %v10837_v2, %v10836_v16  ;;  %v16123_v2 = vpop.f32.mrf.mxu0 }
 0x4aa   : > { %v10839_v3 = vpop.f32.mrf.mxu1 }
 0x4ab   : > { %v16111_v60 = vadd.f32 %v10838_v38, %v15904_v33 }
 0x4ac   : > { %v10840_v26 = vpop.f32.mrf.mxu1 }
 0x4ad   : > { %16805 = vst [vmem:[#allocation13_spill] sm:$0xff] %v16111_v60  ;;  %v10841_v28 = vadd.f32 %v10840_v26, %v10839_v3  ;;  %v16128_v26 = vpop.f32.mrf.mxu0 }
 0x4af   : > { %v16116_v58 = vadd.f32 %v10841_v28, %v15912_v23  ;;  %v16130_v60 = vpop.f32.mrf.mxu0 }
 0x4b0   : > { %v10842_v25 = vpop.f32.mrf.mxu1  ;;  %16810 = vst [vmem:[#allocation31_spill] sm:$0xff] %v16130_v60 }
 0x4b1   : > { %16806 = vst [vmem:[#allocation19_spill] sm:$0xff] %v16116_v58 }
 0x4b2   : > { %v10843_v46 = vpop.f32.mrf.mxu1 }
 0x4b3   : > { %v10844_v62 = vadd.f32 %v10843_v46, %v10842_v25  ;;  %v16135_v46 = vpop.f32.mrf.mxu0 }
 0x4b4   : > { %v10845_v11 = vpop.f32.mrf.mxu1 }
 0x4b5   : > { %v16121_v16 = vadd.f32 %v10844_v62, %v15915_v40 }
 0x4b6   : > { %v10846_v33 = vpop.f32.mrf.mxu1 }
 0x4b7   : > { %16808 = vst [vmem:[#allocation21_spill] sm:$0xff] %v16121_v16  ;;  %v10847_v38 = vadd.f32 %v10846_v33, %v10845_v11 }
 0x4b9   : > { %v16126_v3 = vadd.f32 %v10847_v38, %v15918_v31  ;;  %v10848_v23 = vpop.f32.mrf.mxu1  ;;  %v16140_v38 = vpop.f32.mrf.mxu0 }
 0x4bb   : > { %16809 = vst [vmem:[#allocation45_spill] sm:$0xff] %v16126_v3  ;;  %v10849_v28 = vpop.f32.mrf.mxu1  ;;  %v16145_v60 = vpop.f32.mrf.mxu0 }
 0x4bc   : > { %v10850_v58 = vadd.f32 %v10849_v28, %v10848_v23 }
 0x4bd   : > { %v10851_v12 = vpop.f32.mrf.mxu1 }
 0x4be   : > { %v16133_v25 = vadd.f32 %v10850_v58, %v15933_v53 }
 0x4bf   : > { %v10852_v40 = vpop.f32.mrf.mxu1 }
 0x4c0   : > { %16811 = vst [vmem:[#allocation50_spill] sm:$0xff] %v16133_v25  ;;  %v10853_v62 = vadd.f32 %v10852_v40, %v10851_v12  ;;  %v16150_v40 = vpop.f32.mrf.mxu0 }
 0x4c2   : > { %v16138_v11 = vadd.f32 %v10853_v62, %v15939_v30  ;;  %v10854_v31 = vpop.f32.mrf.mxu1 }
 0x4c4   : > { %16812 = vst [vmem:[#allocation43_spill] sm:$0xff] %v16138_v11  ;;  %v10855_v33 = vpop.f32.mrf.mxu1 }
 0x4c5   : > { %v10856_v3 = vadd.f32 %v10855_v33, %v10854_v31  ;;  %v16155_v31 = vpop.f32.mrf.mxu0 }
 0x4c6   : > { %v10857_v16 = vpop.f32.mrf.mxu1 }
 0x4c7   : > { %v16143_v23 = vadd.f32 %v10856_v3, %v15943_v63 }
 0x4c8   : > { %v10858_v28 = vpop.f32.mrf.mxu1 }
 0x4c9   : > { %16813 = vst [vmem:[#allocation47_spill] sm:$0xff] %v16143_v23  ;;  %v10859_v53 = vadd.f32 %v10858_v28, %v10857_v16 }
 0x4cb   : > { %v16148_v58 = vadd.f32 %v10859_v53, %v15950_v36  ;;  %v10860_v12 = vpop.f32.mrf.mxu1  ;;  %v16162_v36 = vpop.f32.mrf.mxu0 }
 0x4cd   : > { %16814 = vst [vmem:[#allocation20_spill] sm:$0xff] %v16148_v58  ;;  %v10861_v30 = vpop.f32.mrf.mxu1 }
 0x4ce   : > { %v10862_v62 = vadd.f32 %v10861_v30, %v10860_v12  ;;  %v16170_v12 = vpop.f32.mrf.mxu0 }
 0x4cf   : > { %v10863_v11 = vpop.f32.mrf.mxu1 }
 0x4d0   : > { %v16153_v25 = vadd.f32 %v10862_v62, %v15967_v1  ;;  %v10896_v1 = vadd.f32 %v15984_v37, %v15982_v61 }
 0x4d1   : > { %v10864_v63 = vpop.f32.mrf.mxu1 }
 0x4d2   : > { %16815 = vst [vmem:[#allocation15_spill] sm:$0xff] %v16153_v25  ;;  %v10865_v3 = vadd.f32 %v10864_v63, %v10863_v11  ;;  %v8905_v11 = vadd.f32 %v10896_v1, %v15993_v44  ;;  %v11493_v25 = vld [vmem:[%s11849_s30 + $0x10] sm:$0xff]  ;;  %v10908_v44 = vadd.f32 %v16018_v34, %v16013_v56 }
 0x4d3   : > { %v16157_v33 = vpop.f32.mrf.mxu1 }
 0x4d4   : > { %v16160_v16 = vadd.f32 %v10865_v3, %v15971_v17  ;;  %v10899_v17 = vadd.f32 %v15990_v0, %v15986_v51  ;;  %v16177_v3 = vpop.f32.mrf.mxu0  ;;  %v10902_v0 = vadd.f32 %v15997_v24, %v15995_v35  ;;  %v10911_v24 = vadd.f32 %v16025_v4, %v16020_v32 }
 0x4d5   : > { %v16164_v28 = vpop.f32.mrf.mxu1 }
 0x4d6   : > { %16816 = vst [vmem:[#allocation41_spill] sm:$0xff] %v16160_v16  ;;  %v8908_v37 = vadd.f32 %v10899_v17, %v16000_v42  ;;  %v8913_v35 = vadd.f32 %v10902_v0, %v16009_v14  ;;  %v10905_v17 = vadd.f32 %v16006_v39, %v16004_v52  ;;  %v11497_v14 = vld [vmem:[%s11849_s30 + $0x30] sm:$0xff]  ;;  %v8924_v4 = vadd.f32 %v10911_v24, %v16030_v18  ;;  %v11498_v39 = vld [vmem:[%s11849_s30 + $0x20] sm:$0xff] }
 0x4d7   : > { %v16166_v53 = vpop.f32.mrf.mxu1 }
 0x4d8   : > { %16817 = vst [vmem:[#allocation23_spill] sm:$0xff] %v16166_v53 }
 0x4d9   : > { %v16172_v30 = vpop.f32.mrf.mxu1 }
 0x4da   : > { %16818 = vst [vmem:[#allocation22_spill] sm:$0xff] %v16172_v30  ;;  %v11494_v30 = vld [vmem:[%s11849_s30] sm:$0xff] }
 0x4db   : > { %v11074_v62 = vpop.f32.mrf.mxu1 }
 0x4dc   : > { %v9066_v63 = vadd.f32 %v11074_v62, %v8905_v11  ;;  %v16187_v11 = vpop.f32.mrf.mxu0 }
 0x4dd   : > { %v9057_v16 = vpop.f32.mrf.mxu1 }
 0x4de   : > { %v9186_v58 = vadd.f32 %v11493_v25, %v9066_v63  ;;  %v9058_v61 = vadd.f32 %v9057_v16, %v16002_v54  ;;  %v11495_v54 = vld [vmem:[%s11849_s30 + $0x18] sm:$0xff]  ;;  %v8921_v25 = vadd.f32 %v10908_v44, %v16023_v9  ;;  %v16204_v63 = vpop.f32.mrf.mxu0  ;;  %v8916_v44 = vadd.f32 %v10905_v17, %v16016_v59 }
 0x4df   : > { %v11075_v53 = vpop.f32.mrf.mxu1  ;;  %v11499_v59 = vld [vmem:[%s11849_s30 + $0x38] sm:$0xff] }
 0x4e0   : > { %v9218_v1 = vmax.f32 %v9186_v58, 0.0  ;;  %v9184_v23 = vadd.f32 %v11494_v30, %v9058_v61  ;;  %v9069_v51 = vadd.f32 %v11075_v53, %v8908_v37  ;;  %v11496_v53 = vld [vmem:[%s11849_s30 + $0x8] sm:$0xff] }
 0x4e1   : > { %v9060_v62 = vpop.f32.mrf.mxu1 }
 0x4e2   : > { %9250 = vst [vmem:[%s16191_s28 + $0x10] sm:$0xff] %v9218_v1  ;;  %v9216_v42 = vmax.f32 %v9184_v23, 0.0  ;;  %v9187_v56 = vadd.f32 %v11495_v54, %v9069_v51  ;;  %v9061_v34 = vadd.f32 %v9060_v62, %v16011_v8  ;;  %v10920_v1 = vadd.f32 %v16046_v43, %v16041_v45 }
 0x4e3   : > { %v11078_v58 = vpop.f32.mrf.mxu1  ;;  %v10914_v62 = vadd.f32 %v16032_v22, %v16027_v19  ;;  %v11500_v22 = vld [vmem:[%s11849_s30 + $0x28] sm:$0xff] }
 0x4e4   : > { %9248 = vst [vmem:[%s16191_s28] sm:$0xff] %v9216_v42  ;;  %v9219_v16 = vmax.f32 %v9187_v56, 0.0  ;;  %v9185_v30 = vadd.f32 %v11496_v53, %v9061_v34  ;;  %v9082_v23 = vadd.f32 %v11078_v58, %v8921_v25  ;;  %v16216_v42 = vpop.f32.mrf.mxu0  ;;  %v8937_v43 = vadd.f32 %v10920_v1, %v16051_v48 }
 0x4e5   : > { %v9073_v8 = vpop.f32.mrf.mxu1  ;;  %v8929_v25 = vadd.f32 %v10914_v62, %v16037_v13  ;;  %v10923_v58 = vadd.f32 %v16053_v20, %v16048_v49  ;;  %v11501_v13 = vld [vmem:[%s11849_s30 + $0x50] sm:$0xff]  ;;  %v16822_v62 = vld [vmem:[#allocation30_spill] sm:$0xff] }
 0x4e6   : > { %9251 = vst [vmem:[%s16191_s28 + $0x18] sm:$0xff] %v9219_v16  ;;  %v9217_v9 = vmax.f32 %v9185_v30, 0.0  ;;  %v9190_v61 = vadd.f32 %v11497_v14, %v9082_v23  ;;  %v9074_v32 = vadd.f32 %v9073_v8, %v8913_v35  ;;  %v10917_v16 = vadd.f32 %v16039_v29, %v16034_v55  ;;  %v16228_v53 = vpop.f32.mrf.mxu0  ;;  %v11502_v29 = vld [vmem:[%s11849_s30 + $0x40] sm:$0xff] }
 0x4e7   : > { %v11079_v37 = vpop.f32.mrf.mxu1  ;;  %v8940_v20 = vadd.f32 %v10923_v58, %v16058_v5  ;;  %v16825_v58 = vld [vmem:[#allocation34_spill] sm:$0xff] }
 0x4e8   : > { %9249 = vst [vmem:[%s16191_s28 + $0x8] sm:$0xff] %v9217_v9  ;;  %v9222_v52 = vmax.f32 %v9190_v61, 0.0  ;;  %v9188_v51 = vadd.f32 %v11498_v39, %v9074_v32  ;;  %v9085_v0 = vadd.f32 %v11079_v37, %v8924_v4  ;;  %v8932_v8 = vadd.f32 %v10917_v16, %v16044_v41  ;;  %v16819_v9 = vld [vmem:[#allocation39_spill] sm:$0xff]  ;;  %v16820_v4 = vld [vmem:[#allocation28_spill] sm:$0xff]  ;;  %v16240_v1 = vpop.f32.mrf.mxu0 }
 0x4e9   : > { %v9076_v54 = vpop.f32.mrf.mxu1  ;;  %v10932_v14 = vadd.f32 %v16819_v9, %v16069_v50  ;;  %v16821_v37 = vld [vmem:[#allocation36_spill] sm:$0xff] }
 0x4ea   : > { %9254 = vst [vmem:[%s16191_s28 + $0x30] sm:$0xff] %v9222_v52  ;;  %v9220_v18 = vmax.f32 %v9188_v51, 0.0  ;;  %v9191_v56 = vadd.f32 %v11499_v59, %v9085_v0  ;;  %v9077_v45 = vadd.f32 %v9076_v54, %v8916_v44  ;;  %v10926_v44 = vadd.f32 %v16821_v37, %v16820_v4  ;;  %v11503_v41 = vld [vmem:[%s11849_s30 + $0x58] sm:$0xff] }
 0x4eb   : > { %v11082_v34 = vpop.f32.mrf.mxu1  ;;  %v8953_v51 = vadd.f32 %v10932_v14, %v16079_v10  ;;  %v11507_v4 = vld [vmem:[%s11849_s30 + $0x78] sm:$0xff] }
 0x4ec   : > { %9252 = vst [vmem:[%s16191_s28 + $0x20] sm:$0xff] %v9220_v18  ;;  %v9223_v19 = vmax.f32 %v9191_v56, 0.0  ;;  %v9189_v35 = vadd.f32 %v11500_v22, %v9077_v45  ;;  %v9098_v24 = vadd.f32 %v11082_v34, %v8937_v43  ;;  %v8945_v54 = vadd.f32 %v10926_v44, %v16822_v62  ;;  %v16823_v18 = vld [vmem:[#allocation32_spill] sm:$0xff]  ;;  %v11504_v45 = vld [vmem:[%s11849_s30 + $0x48] sm:$0xff]  ;;  %v16252_v22 = vpop.f32.mrf.mxu0 }
 0x4ed   : > { %v9089_v30 = vpop.f32.mrf.mxu1  ;;  %v10935_v59 = vadd.f32 %v16081_v57, %v16823_v18  ;;  %v16831_v62 = vld [vmem:[#allocation38_spill] sm:$0xff] }
 0x4ee   : > { %9255 = vst [vmem:[%s16191_s28 + $0x38] sm:$0xff] %v9223_v19  ;;  %v9221_v48 = vmax.f32 %v9189_v35, 0.0  ;;  %v9194_v23 = vadd.f32 %v11501_v13, %v9098_v24  ;;  %v9090_v49 = vadd.f32 %v9089_v30, %v8929_v25  ;;  %v16824_v25 = vld [vmem:[#allocation49_spill] sm:$0xff]  ;;  %v11505_v24 = vld [vmem:[%s11849_s30 + $0x70] sm:$0xff]  ;;  %v16826_v30 = vld [vmem:[#allocation18_spill] sm:$0xff] }
 0x4ef   : > { %v11083_v17 = vpop.f32.mrf.mxu1  ;;  %v10929_v19 = vadd.f32 %v16825_v58, %v16824_v25  ;;  %v16833_v58 = vld [vmem:[#allocation17_spill] sm:$0xff] }
 0x4f0   : > { %9253 = vst [vmem:[%s16191_s28 + $0x28] sm:$0xff] %v9221_v48  ;;  %v9226_v55 = vmax.f32 %v9194_v23, 0.0  ;;  %v9192_v61 = vadd.f32 %v11502_v29, %v9090_v49  ;;  %v9101_v32 = vadd.f32 %v11083_v17, %v8940_v20  ;;  %v8956_v48 = vadd.f32 %v10935_v59, %v16826_v30  ;;  %v16827_v23 = vld [vmem:[#allocation14_spill] sm:$0xff]  ;;  %v16264_v29 = vpop.f32.mrf.mxu0 }
 0x4f1   : > { %v9092_v52 = vpop.f32.mrf.mxu1  ;;  %v8948_v49 = vadd.f32 %v10929_v19, %v16827_v23  ;;  %v10944_v20 = vadd.f32 %v16108_v21, %v16106_v27  ;;  %v10950_v30 = vadd.f32 %v16128_v26, %v16123_v2  ;;  %v11512_v26 = vld [vmem:[%s11849_s30 + $0x88] sm:$0xff] }
 0x4f2   : > { %9258 = vst [vmem:[%s16191_s28 + $0x50] sm:$0xff] %v9226_v55  ;;  %v9224_v5 = vmax.f32 %v9192_v61, 0.0  ;;  %v9195_v39 = vadd.f32 %v11503_v41, %v9101_v32  ;;  %v9093_v50 = vadd.f32 %v9092_v52, %v8932_v8  ;;  %v11506_v8 = vld [vmem:[%s11849_s30 + $0x60] sm:$0xff]  ;;  %v10938_v55 = vadd.f32 %v16091_v7, %v16086_v15  ;;  %v16828_v52 = vld [vmem:[#allocation40_spill] sm:$0xff]  ;;  %v11508_v7 = vld [vmem:[%s11849_s30 + $0x68] sm:$0xff]  ;;  %v16276_v18 = vpop.f32.mrf.mxu0 }
 0x4f3   : > { %v11086_v0 = vpop.f32.mrf.mxu1  ;;  %v8969_v27 = vadd.f32 %v10944_v20, %v16099_v6  ;;  %v16829_v41 = vld [vmem:[#allocation16_spill] sm:$0xff] }
 0x4f4   : > { %9256 = vst [vmem:[%s16191_s28 + $0x40] sm:$0xff] %v9224_v5  ;;  %v9227_v56 = vmax.f32 %v9195_v39, 0.0  ;;  %v9193_v43 = vadd.f32 %v11504_v45, %v9093_v50  ;;  %v9114_v34 = vadd.f32 %v11086_v0, %v8953_v51  ;;  %v8961_v5 = vadd.f32 %v10938_v55, %v16828_v52  ;;  %v16830_v0 = vld [vmem:[#allocation33_spill] sm:$0xff]  ;;  %v11513_v52 = vld [vmem:[%s11849_s30 + $0xb0] sm:$0xff] }
 0x4f5   : > { %v9105_v35 = vpop.f32.mrf.mxu1  ;;  %v10947_v39 = vadd.f32 %v16829_v41, %v16113_v47 }
 0x4f6   : > { %9259 = vst [vmem:[%s16191_s28 + $0x58] sm:$0xff] %v9227_v56  ;;  %v9225_v10 = vmax.f32 %v9193_v43, 0.0  ;;  %v9198_v16 = vadd.f32 %v11505_v24, %v9114_v34  ;;  %v9106_v57 = vadd.f32 %v9105_v35, %v8945_v54  ;;  %v10941_v54 = vadd.f32 %v16831_v62, %v16830_v0  ;;  %v11509_v56 = vld [vmem:[%s11849_s30 + $0x90] sm:$0xff]  ;;  %v16832_v43 = vld [vmem:[#allocation29_spill] sm:$0xff] }
 0x4f7   : > { %v11087_v13 = vpop.f32.mrf.mxu1  ;;  %v8972_v34 = vadd.f32 %v10947_v39, %v16832_v43  ;;  %v10956_v35 = vadd.f32 %v16145_v60, %v16140_v38  ;;  %v11510_v24 = vld [vmem:[%s11849_s30 + $0x80] sm:$0xff] }
 0x4f8   : > { %9257 = vst [vmem:[%s16191_s28 + $0x48] sm:$0xff] %v9225_v10  ;;  %v9230_v17 = vmax.f32 %v9198_v16, 0.0  ;;  %v9196_v9 = vadd.f32 %v11506_v8, %v9106_v57  ;;  %v9117_v14 = vadd.f32 %v11087_v13, %v8956_v48  ;;  %v8964_v19 = vadd.f32 %v10941_v54, %v16833_v58  ;;  %v16288_v48 = vpop.f32.mrf.mxu0  ;;  %v16834_v38 = vld [vmem:[#allocation21_spill] sm:$0xff] }
 0x4f9   : > { %v9108_v61 = vpop.f32.mrf.mxu1  ;;  %v16837_v39 = vld [vmem:[#allocation45_spill] sm:$0xff] }
 0x4fa   : > { %9262 = vst [vmem:[%s16191_s28 + $0x70] sm:$0xff] %v9230_v17  ;;  %v9228_v32 = vmax.f32 %v9196_v9, 0.0  ;;  %v9199_v37 = vadd.f32 %v11507_v4, %v9117_v14  ;;  %v9109_v21 = vadd.f32 %v9108_v61, %v8948_v49  ;;  %v11511_v49 = vld [vmem:[%s11849_s30 + $0x98] sm:$0xff]  ;;  %v8985_v17 = vadd.f32 %v10956_v35, %v16834_v38  ;;  %v10978_v8 = vpop.f32.mrf.mxu0  ;;  %v16835_v14 = vld [vmem:[#allocation13_spill] sm:$0xff] }
 0x4fb   : > { %v8977_v55 = vadd.f32 %v10950_v30, %v16835_v14  ;;  %v10959_v61 = vadd.f32 %v16155_v31, %v16150_v40 }
 0x4fc   : > { %9260 = vst [vmem:[%s16191_s28 + $0x60] sm:$0xff] %v9228_v32  ;;  %v9231_v15 = vmax.f32 %v9199_v37, 0.0  ;;  %v9197_v50 = vadd.f32 %v11508_v7, %v9109_v21  ;;  %v16836_v37 = vld [vmem:[#allocation31_spill] sm:$0xff]  ;;  %v10979_v31 = vpop.f32.mrf.mxu0 }
 0x4fd   : > { %v11090_v44 = vpop.f32.mrf.mxu1  ;;  %v10953_v21 = vadd.f32 %v16135_v46, %v16836_v37  ;;  %v8988_v40 = vadd.f32 %v10959_v61, %v16837_v39  ;;  %v16838_v7 = vld [vmem:[#allocation19_spill] sm:$0xff]  ;;  %v11514_v46 = vld [vmem:[%s11849_s30 + $0xa0] sm:$0xff]  ;;  %v10980_v30 = vadd.f32 %v10979_v31, %v10978_v8 }
 0x4fe   : > { %v9130_v51 = vadd.f32 %v11090_v44, %v8969_v27  ;;  %9263 = vst [vmem:[%s16191_s28 + $0x78] sm:$0xff] %v9231_v15  ;;  %v9229_v6 = vmax.f32 %v9197_v50, 0.0 }
 0x4ff   : > { %v9121_v59 = vpop.f32.mrf.mxu1  ;;  %v8980_v50 = vadd.f32 %v10953_v21, %v16838_v7 }
 0x500   : > { %v9202_v45 = vadd.f32 %v11509_v56, %v9130_v51  ;;  %v9122_v47 = vadd.f32 %v9121_v59, %v8961_v5  ;;  %9261 = vst [vmem:[%s16191_s28 + $0x68] sm:$0xff] %v9229_v6  ;;  %v10968_v51 = vadd.f32 %v16216_v42, %v16204_v63  ;;  %v10962_v59 = vadd.f32 %v16170_v12, %v16162_v36  ;;  %v16839_v63 = vld [vmem:[#allocation47_spill] sm:$0xff] }
 0x501   : > { %v11091_v25 = vpop.f32.mrf.mxu1  ;;  %v10868_v6 = vadd.f32 %v16164_v28, %v16157_v33  ;;  %v10971_v36 = vadd.f32 %v16240_v1, %v16228_v53  ;;  %v11516_v33 = vld [vmem:[%s11849_s30 + $0xa8] sm:$0xff]  ;;  %v11517_v53 = vld [vmem:[%s11849_s30 + $0xd0] sm:$0xff] }
 0x502   : > { %v9234_v10 = vmax.f32 %v9202_v45, 0.0  ;;  %v9200_v16 = vadd.f32 %v11510_v24, %v9122_v47  ;;  %v9133_v57 = vadd.f32 %v11091_v25, %v8972_v34  ;;  %v11515_v47 = vld [vmem:[%s11849_s30 + $0xb8] sm:$0xff]  ;;  %v9001_v42 = vadd.f32 %v10968_v51, %v16839_v63  ;;  %v10981_v25 = vpop.f32.mrf.mxu0 }
 0x503   : > { %v9124_v13 = vpop.f32.mrf.mxu1  ;;  %v10965_v24 = vadd.f32 %v16187_v11, %v16177_v3  ;;  %v11518_v11 = vld [vmem:[%s11849_s30 + $0xc0] sm:$0xff]  ;;  %v10977_v51 = vadd.f32 %v16288_v48, %v16276_v18 }
 0x504   : > { %9266 = vst [vmem:[%s16191_s28 + $0x90] sm:$0xff] %v9234_v10  ;;  %v9232_v23 = vmax.f32 %v9200_v16, 0.0  ;;  %v9203_v20 = vadd.f32 %v11511_v49, %v9133_v57  ;;  %v9125_v60 = vadd.f32 %v9124_v13, %v8964_v19  ;;  %v16840_v19 = vld [vmem:[#allocation50_spill] sm:$0xff]  ;;  %v16841_v16 = vld [vmem:[#allocation25_spill] sm:$0xff]  ;;  %v16842_v13 = vld [vmem:[#allocation23_spill] sm:$0xff]  ;;  %v10982_v14 = vpop.f32.mrf.mxu0 }
 0x505   : > { %v11094_v9 = vpop.f32.mrf.mxu1  ;;  %v8993_v35 = vadd.f32 %v10962_v59, %v16840_v19  ;;  %v8856_v57 = vadd.f32 %v10868_v6, %v16841_v16  ;;  %v16848_v18 = vld [vmem:[#allocation41_spill] sm:$0xff] }
 0x506   : > { %9264 = vst [vmem:[%s16191_s28 + $0x80] sm:$0xff] %v9232_v23  ;;  %v9235_v2 = vmax.f32 %v9203_v20, 0.0  ;;  %v9201_v32 = vadd.f32 %v11512_v26, %v9125_v60  ;;  %v9146_v4 = vadd.f32 %v11094_v9, %v8985_v17  ;;  %v16843_v23 = vld [vmem:[#allocation22_spill] sm:$0xff]  ;;  %v16844_v17 = vld [vmem:[#allocation20_spill] sm:$0xff]  ;;  %v9012_v48 = vadd.f32 %v10977_v51, %v16848_v18 }
 0x507   : > { %v9137_v27 = vpop.f32.mrf.mxu1  ;;  %v10871_v49 = vadd.f32 %v16843_v23, %v16842_v13  ;;  %v9004_v9 = vadd.f32 %v10971_v36, %v16844_v17  ;;  %v11524_v36 = vld [vmem:[%s11849_s30 + $0xe8] sm:$0xff] }
 0x508   : > { %9267 = vst [vmem:[%s16191_s28 + $0x98] sm:$0xff] %v9235_v2  ;;  %v9233_v44 = vmax.f32 %v9201_v32, 0.0  ;;  %v9206_v5 = vadd.f32 %v11513_v52, %v9146_v4  ;;  %v9138_v41 = vadd.f32 %v9137_v27, %v8977_v55  ;;  %v16845_v2 = vld [vmem:[#allocation43_spill] sm:$0xff]  ;;  %v10974_v32 = vadd.f32 %v16264_v29, %v16252_v22  ;;  %v16846_v4 = vld [vmem:[#allocation24_spill] sm:$0xff] }
 0x509   : > { %v11095_v15 = vpop.f32.mrf.mxu1  ;;  %v8996_v26 = vadd.f32 %v10965_v24, %v16845_v2  ;;  %v8859_v37 = vadd.f32 %v10871_v49, %v16846_v4  ;;  %v9017_v27 = vadd.f32 %v10980_v30, %v8856_v57  ;;  %v16847_v29 = vld [vmem:[#allocation15_spill] sm:$0xff] }
 0x50a   : > { %9265 = vst [vmem:[%s16191_s28 + $0x88] sm:$0xff] %v9233_v44  ;;  %v9238_v0 = vmax.f32 %v9206_v5, 0.0  ;;  %v9204_v62 = vadd.f32 %v11514_v46, %v9138_v41  ;;  %v9149_v54 = vadd.f32 %v11095_v15, %v8988_v40  ;;  %v10983_v44 = vadd.f32 %v10982_v14, %v10981_v25  ;;  %v11519_v5 = vld [vmem:[%s11849_s30 + $0xd8] sm:$0xff]  ;;  %v11520_v15 = vld [vmem:[%s11849_s30 + $0xc8] sm:$0xff] }
 0x50b   : > { %v9140_v56 = vpop.f32.mrf.mxu1  ;;  %v11523_v25 = vld [vmem:[%s11849_s30 + $0xf8] sm:$0xff] }
 0x50c   : > { %9270 = vst [vmem:[%s16191_s28 + $0xb0] sm:$0xff] %v9238_v0  ;;  %v9236_v45 = vmax.f32 %v9204_v62, 0.0  ;;  %v9207_v43 = vadd.f32 %v11515_v47, %v9149_v54  ;;  %v9141_v34 = vadd.f32 %v9140_v56, %v8980_v50  ;;  %v9009_v50 = vadd.f32 %v10974_v32, %v16847_v29  ;;  %v11521_v62 = vld [vmem:[%s11849_s30 + $0xf0] sm:$0xff]  ;;  %v11522_v47 = vld [vmem:[%s11849_s30 + $0xe0] sm:$0xff]  ;;  %s11609_s30 = sshll.u32 %s11683_s29, 4  ;;  %s11610_s30 = int_to_ptr.vmem [resolvable:$false] %s11609_s30 }
 0x50d   : > { %v11098_v58 = vpop.f32.mrf.mxu1  ;;  %v9020_v6 = vadd.f32 %v10983_v44, %v8859_v37  ;;  %s11611_s24 = scalar_lea.vmem %s11610_s30, 8192  ;;  %p11612_p6 = scmp.lt.s32.totalorder %s16357_s7, %s11610_s30 }
 0x50e   : > { %9268 = vst [vmem:[%s16191_s28 + $0xa0] sm:$0xff] %v9236_v45  ;;  %v9239_v12 = vmax.f32 %v9207_v43, 0.0  ;;  %v9205_v28 = vadd.f32 %v11516_v33, %v9141_v34  ;;  %v9162_v10 = vadd.f32 %v11098_v58, %v9001_v42  ;;  %p11613_p12 = scmp.lt.s32.totalorder %s11611_s24, %s11605_s22 }
 0x50f   : > { %v9153_v20 = vpop.f32.mrf.mxu1 }
 0x510   : > { %9271 = vst [vmem:[%s16191_s28 + $0xb8] sm:$0xff] %v9239_v12  ;;  %v9237_v60 = vmax.f32 %v9205_v28, 0.0  ;;  %v9210_v1 = vadd.f32 %v11517_v53, %v9162_v10  ;;  %v9154_v38 = vadd.f32 %v9153_v20, %v8993_v35  ;;  %p11614_p7 = por %p11613_p12, %p11612_p6 }
 0x511   : > { %v11099_v55 = vpop.f32.mrf.mxu1 }
 0x512   : > { %9269 = vst [vmem:[%s16191_s28 + $0xa8] sm:$0xff] %v9237_v60  ;;  %v9242_v3 = vmax.f32 %v9210_v1, 0.0  ;;  %v9208_v8 = vadd.f32 %v11518_v11, %v9154_v38  ;;  %v9165_v61 = vadd.f32 %v11099_v55, %v9004_v9  ;;  %p11615_p9 = pnand %p11614_p7, %p11608_p2 }
 0x513   : > { %v9156_v21 = vpop.f32.mrf.mxu1 }
 0x514   : > { %9274 = vst [vmem:[%s16191_s28 + $0xd0] sm:$0xff] %v9242_v3  ;;  %v9240_v52 = vmax.f32 %v9208_v8, 0.0  ;;  %v9211_v41 = vadd.f32 %v11519_v5, %v9165_v61  ;;  %v9157_v39 = vadd.f32 %v9156_v21, %v8996_v26 }
 0x515   : > { %v11102_v40 = vpop.f32.mrf.mxu1 }
 0x516   : > { %9272 = vst [vmem:[%s16191_s28 + $0xc0] sm:$0xff] %v9240_v52  ;;  %v9243_v31 = vmax.f32 %v9211_v41, 0.0  ;;  %v9209_v7 = vadd.f32 %v11520_v15, %v9157_v39  ;;  %v9178_v22 = vadd.f32 %v11102_v40, %v9017_v27 }
 0x517   : > { %v9169_v0 = vpop.f32.mrf.mxu1 }
 0x518   : > { %9275 = vst [vmem:[%s16191_s28 + $0xd8] sm:$0xff] %v9243_v31  ;;  %v9241_v46 = vmax.f32 %v9209_v7, 0.0  ;;  %v9214_v54 = vadd.f32 %v11521_v62, %v9178_v22  ;;  %v9170_v59 = vadd.f32 %v9169_v0, %v9009_v50 }
 0x519   : > { %v11103_v56 = vpop.f32.mrf.mxu1 }
 0x51a   : > { %9273 = vst [vmem:[%s16191_s28 + $0xc8] sm:$0xff] %v9241_v46  ;;  %v9246_v45 = vmax.f32 %v9214_v54, 0.0  ;;  %v9212_v43 = vadd.f32 %v11522_v47, %v9170_v59  ;;  %v9181_v34 = vadd.f32 %v11103_v56, %v9020_v6 }
 0x51b   : > { %v9172_v63 = vpop.f32.mrf.mxu1 }
 0x51c   : > { %9278 = vst [vmem:[%s16191_s28 + $0xf0] sm:$0xff] %v9246_v45  ;;  %v9244_v42 = vmax.f32 %v9212_v43, 0.0  ;;  %v9215_v58 = vadd.f32 %v11523_v25, %v9181_v34  ;;  %v9173_v19 = vadd.f32 %v9172_v63, %v9012_v48 }
 0x51e   : > { %9276 = vst [vmem:[%s16191_s28 + $0xe0] sm:$0xff] %v9244_v42  ;;  %v9247_v35 = vmax.f32 %v9215_v58, 0.0  ;;  %v9213_v12 = vadd.f32 %v11524_v36, %v9173_v19 }
 0x520   : > { %9279 = vst [vmem:[%s16191_s28 + $0xf8] sm:$0xff] %v9247_v35  ;;  %v9245_v33 = vmax.f32 %v9213_v12, 0.0 }
 0x522   : > { %9277 = vst [vmem:[%s16191_s28 + $0xe8] sm:$0xff] %v9245_v33 }
 0x523   : > { %11618 = shalt.err (!%p11615_p9)
}
 0x524   : > { %s11619_s26 = scalar_lea.hbm %s16355_s14, 4096  ;;  %s11623_s11 = scalar_lea.hbm %s16407_s5, 8192 }
 0x525   : > { %p11620_p13 = scmp.ne.s32.totalorder %s16355_s14, %s11619_s26  ;;  %p11624_p4 = scmp.lt.s32.totalorder %s16355_s14, %s16407_s5 }
 0x526   : > { %p11625_p8 = scmp.lt.s32.totalorder %s11623_s11, %s11619_s26 }
 0x527   : > { %p11621_p5 = pnand %p11620_p13, %p16849_p10 }
 0x528   : > { %p11626_p3 = por %p11625_p8, %p11624_p4 }
 0x529   : > { %p11622_p0 = pneg %p11621_p5 }
 0x52b   : > { %p11627_p11 = pnand %p11626_p3, %p11622_p0 }
 0x52d   : > { %11630 = shalt.err (!%p11627_p11)
}
 0x52e   : > { %s11684_s6 = smov 128   ;;  %s11685_s9 = smov 8  }
 0x52f   : > { %11114 = dma.vmem_to_hbm [thread:$0]  (%p16849_p10), %s16357_s7, 4096, %s16355_s14, %s9281_s17, %s11684_s6, %s11684_s6, %s11685_s9  }
 0x530 PF: > { %s9309_s13 = sand.u32 1, %s11661_s18   ;;  %p16850_p1 = scmp.ne.s32.totalorder %s16457_s25, 0 }
 0x531   : > { %p16851_p2 = scmp.ge.s32.totalorder %s11673_s21, 2  ;;  %s9310_s22 = scalar_lea.sflag [#allocation5], %s9309_s13 }
 0x533   : > { %p11128_p6 = pnand %p16851_p2, %p16850_p1 }
 0x535   : > { %p11129_p12 = pneg %p11128_p6 }
 0x537   : > { %11656 = dma.done.wait (%p11129_p12), %s9310_s22, 4096  }
 0x538   : > { %11658 = vsyncadd (%p11129_p12), %s9310_s22, 4294963200  ;;  %p19_p7 = scmp.ge.s32.totalorder %s11788_s15, 4   ;;  %s16852_s18 = smov %s11665_s19 }
 0x539   : > { %s16853_s19 = smov %s11669_s20  ;;  %s16854_s20 = smov %s11804_s27 }
 0x53a   : > { %s16855_s21 = smov %s11788_s15  ;;  %21 = sbr.rel (!%p19_p7) target bundleno = 6 (0x6), region = 96 }
 0x53f   :  { %9315 = vsyncpa [#allocation4], 1 }
 0x540   :  { %9317 = vsyncpa [#allocation4 + $0x1], 1 }
 0x541   :  { %9318 = vsyncpa [#allocation7], 1 }
 0x542   :  { %9319 = vsyncpa [#allocation5], 1 }
 0x543   :  { %9321 = vsyncpa [#allocation5 + $0x1], 1 }

</bundles_post_ra>
